<compile_context>
chip_gen: v6e
topology: v6e:2x2x1
jax: 0.10.0
libtpu: 0.0.40
codegen_flags: <defaults>
</compile_context>

<pallas_src>
import functools

import numpy as np
import jax
import jax.numpy as jnp
from jax import lax
from jax.experimental import pallas as pl
from jax.experimental.pallas import tpu as pltpu

LRELU_ALPHA = 0.2                        # leaky_relu slope used by bias_act('lrelu')
LRELU_GAIN = float(np.sqrt(2.0))         # bias_act def_gain for 'lrelu'
# setup_filter([1,3,3,1]) (2D outer product, sum 1) with upfirdn gain=up^2=4 folded in,
# separably => per-dimension taps [1,3,3,1]/4.
F1D = tuple(float(v) for v in (np.array([1.0, 3.0, 3.0, 1.0], np.float64) / 4.0))

try:
    _VMEM_CAP = int(pltpu.get_tpu_info().vmem_capacity_bytes)
except Exception:                         # pragma: no cover - fallback if query unavailable
    _VMEM_CAP = 128 * 1024 * 1024
_VMEM_LIMIT = int(min(100 * 1024 * 1024, (_VMEM_CAP * 3) // 4))


def _compiler():
    return pltpu.CompilerParams(dimension_semantics=("parallel",),
                                vmem_limit_bytes=_VMEM_LIMIT)


# ---------------------------------------------------------------------------
# Single-buffering of grid-invariant operands (halves their VMEM) - probed once.
# ---------------------------------------------------------------------------
_SINGLE_BUF_OK = None


def _single_buffer_ok():
    global _SINGLE_BUF_OK
    if _SINGLE_BUF_OK is not None:
        return _SINGLE_BUF_OK
    try:
        const_spec = pl.BlockSpec((8, 128), lambda n: (0, 0),
                                  pipeline_mode=pl.Buffered(1))

        def _k(a_ref, b_ref, o_ref):
            o_ref[...] = a_ref[...] + b_ref[...]

        a = jnp.full((8, 128), 2.0, jnp.float32)
        b = jnp.arange(16 * 128, dtype=jnp.float32).reshape(16, 128)
        o = pl.pallas_call(
            _k, grid=(2,),
            in_specs=[const_spec, pl.BlockSpec((8, 128), lambda n: (n, 0))],
            out_specs=pl.BlockSpec((8, 128), lambda n: (n, 0)),
            out_shape=jax.ShapeDtypeStruct((16, 128), jnp.float32),
        )(a, b)
        _SINGLE_BUF_OK = bool(jnp.allclose(o, b + 2.0))
    except Exception:
        _SINGLE_BUF_OK = False
    return _SINGLE_BUF_OK


def _bspec(shape, index_map, *, single=False):
    """BlockSpec; grid-invariant operands get single buffering when supported."""
    if single and _single_buffer_ok():
        return pl.BlockSpec(shape, index_map, pipeline_mode=pl.Buffered(1))
    return pl.BlockSpec(shape, index_map)


def _chunks(total, chunk):
    i, out = 0, []
    while i < total:
        out.append((i, min(chunk, total - i)))
        i += chunk
    return out


def _chunk_rows(cout):
    # Keep the per-chunk f32 accumulator small enough that the 9-tap sum mostly stays in
    # vregs and each flat-row chunk is stored exactly once (avoids the per-tap full-slab
    # read-modify-write that saturates the vst slot, esp. on v5e).
    return 256 if cout > 256 else 512


# ---------------------------------------------------------------------------
# Kernel bodies
# ---------------------------------------------------------------------------
def _conv0_kernel(xd_ref, cw_ref, dcoef_ref, style1_ref, noise_ref, bias_ref,
                  out_ref, t_ref, *, R, W):
    """Fused conv0 (SynthesisLayer, up=2), producing conv1's pre-modulated, zero-padded
    bf16 input slab.

      stage 1: 9-tap correlation of the zero-dilated, pre-modulated input with the flipped
               3x3 weight -> t scratch (carries the FIR halo; halo rows/cols come out as
               exact zeros from the dilation margins).
      stage 2: fused 16-tap separable upfirdn2d FIR + demod + noise + bias + lrelu*sqrt(2),
               pre-multiplied by conv1's style, junk columns zeroed, stored at a +2-row
               offset inside conv1's zero halo.

    xd_ref   : (1, (R+7)*W, Cin) bf16   flat dilated input (x*style0 at rows/cols 3+2i)
    cw_ref   : (9, Cin, C0)      bf16   flipped 3x3 taps, row-major (ky, kx)
    dcoef_ref/style1_ref: (1, 1, C0) f32;  noise_ref: (R*W, 1) f32;  bias_ref: (1, C0) f32
    out_ref  : (1, (R+4)*W, C0)  bf16
    t_ref    : ((R+4)*W, C0)     f32 scratch
    """
    C0 = out_ref.shape[2]
    LT = (R + 4) * W                 # rows of t needed by the FIR (includes halo)
    LO = R * W                       # valid output rows (x W row pitch)
    CH = _chunk_rows(C0)

    # ---- stage 1: per-chunk register accumulation of the 9 MXU taps, one store each ----
    for i, c in _chunks(LT, CH):
        acc = None
        for tap in range(9):
            ky, kx = divmod(tap, 3)
            lhs = xd_ref[0, pl.ds(i + ky * W + kx, c), :]
            d = jnp.dot(lhs, cw_ref[tap], preferred_element_type=jnp.float32)
            acc = d if acc is None else acc + d
        t_ref[pl.ds(i, c), :] = acc

    # ---- stage 2: fused 16-tap separable FIR + epilogue, per chunk -----------------------
    for i, c in _chunks(LO, CH):
        fir = None
        for qy in range(4):
            for qx in range(4):
                v = (F1D[qy] * F1D[qx]) * t_ref[pl.ds(i + qy * W + qx, c), :]
                fir = v if fir is None else fir + v
        y = fir * dcoef_ref[0] + noise_ref[pl.ds(i, c), :] + bias_ref[...]
        y = jnp.where(y >= 0.0, y, LRELU_ALPHA * y) * LRELU_GAIN
        y = y * style1_ref[0]
        # Zero the W-R junk columns: conv1's kx=+-1 taps wrap across row boundaries and must
        # read exact zeros there.  Mask is generated in-kernel (no (R*W,1) mask DMA).
        col = (lax.broadcasted_iota(jnp.int32, (c, 1), 0) + i) % W
        y = jnp.where(col < R, y, 0.0)
        out_ref[0, pl.ds(2 * W + i, c), :] = y.astype(out_ref.dtype)

    # conv1's zero halo rows (2 top, 2 bottom).
    zeros2 = jnp.zeros((2 * W, C0), out_ref.dtype)
    out_ref[0, pl.ds(0, 2 * W), :] = zeros2
    out_ref[0, pl.ds((R + 2) * W, 2 * W), :] = zeros2


def _conv1_torgb_kernel(xp_ref, cw_ref, dcoef_ref, noise_ref, bias_ref,
                        srgb_ref, cwr_ref, brgb_ref, x_ref, rgb_ref, *, R, W):
    """conv1 (modulated 3x3, up=1) with ToRGB's 1x1 modulated conv (no demod) fused into its
    epilogue so x2 never makes an HBM round trip.  The input slab already carries conv1's
    style modulation, zero halo rows and zeroed junk columns.

    xp_ref : (1, (R+4)*W, C0) bf16;  cw_ref: (9, C0, C1) bf16 (taps row-major, NOT flipped)
    dcoef_ref/srgb_ref: (1,1,C1) f32;  noise_ref: (R*W,1) f32;  bias_ref: (1,C1) f32
    cwr_ref: (C1, Cimg) bf16;  brgb_ref: (1, Cimg) f32
    x_ref  : (1, R*W, C1) f32 (module's x output);  rgb_ref: (1, R*W, Cimg) f32
    """
    C1 = x_ref.shape[2]
    LO = R * W
    CH = _chunk_rows(C1)
    for i, c in _chunks(LO, CH):
        acc = None
        for tap in range(9):
            ky, kx = divmod(tap, 3)
            lhs = xp_ref[0, pl.ds(i + (ky + 1) * W + (kx - 1), c), :]
            d = jnp.dot(lhs, cw_ref[tap], preferred_element_type=jnp.float32)
            acc = d if acc is None else acc + d
        y = acc * dcoef_ref[0] + noise_ref[pl.ds(i, c), :] + bias_ref[...]
        y = jnp.where(y >= 0.0, y, LRELU_ALPHA * y) * LRELU_GAIN
        x_ref[0, pl.ds(i, c), :] = y
        # ToRGB: modulate with the rgb style, bf16 MXU operands, f32 accumulation, + bias.
        xm = (y * srgb_ref[0]).astype(jnp.bfloat16)
        rgb = jnp.dot(xm, cwr_ref[...], preferred_element_type=jnp.float32) + brgb_ref[...]
        rgb_ref[0, pl.ds(i, c), :] = rgb


# ---------------------------------------------------------------------------
# pallas_call wrappers
# ---------------------------------------------------------------------------
def _conv0(xd, cw, dcoef, style1, noise, bias, *, R, W):
    N, _, Cin = xd.shape
    C0 = cw.shape[2]
    kern = functools.partial(_conv0_kernel, R=R, W=W)
    return pl.pallas_call(
        kern, grid=(N,),
        in_specs=[
            pl.BlockSpec((1, (R + 7) * W, Cin), lambda n: (n, 0, 0)),
            _bspec((9, Cin, C0), lambda n: (0, 0, 0), single=True),
            pl.BlockSpec((1, 1, C0), lambda n: (n, 0, 0)),
            pl.BlockSpec((1, 1, C0), lambda n: (n, 0, 0)),
            _bspec((R * W, 1), lambda n: (0, 0), single=True),
            _bspec((1, C0), lambda n: (0, 0), single=True),
        ],
        out_specs=pl.BlockSpec((1, (R + 4) * W, C0), lambda n: (n, 0, 0)),
        out_shape=jax.ShapeDtypeStruct((N, (R + 4) * W, C0), jnp.bfloat16),
        scratch_shapes=[pltpu.VMEM(((R + 4) * W, C0), jnp.float32)],
        compiler_params=_compiler(),
    )(xd, cw, dcoef, style1, noise, bias)


def _conv1_torgb(xp, cw, dcoef, noise, bias, srgb, cwr, brgb, *, R, W):
    N, _, C0 = xp.shape
    C1 = cw.shape[2]
    Cimg = cwr.shape[1]
    kern = functools.partial(_conv1_torgb_kernel, R=R, W=W)
    return pl.pallas_call(
        kern, grid=(N,),
        in_specs=[
            pl.BlockSpec((1, (R + 4) * W, C0), lambda n: (n, 0, 0)),
            _bspec((9, C0, C1), lambda n: (0, 0, 0), single=True),
            pl.BlockSpec((1, 1, C1), lambda n: (n, 0, 0)),
            _bspec((R * W, 1), lambda n: (0, 0), single=True),
            _bspec((1, C1), lambda n: (0, 0), single=True),
            pl.BlockSpec((1, 1, C1), lambda n: (n, 0, 0)),
            _bspec((C1, Cimg), lambda n: (0, 0), single=True),
            _bspec((1, Cimg), lambda n: (0, 0), single=True),
        ],
        out_specs=(
            pl.BlockSpec((1, R * W, C1), lambda n: (n, 0, 0)),
            pl.BlockSpec((1, R * W, Cimg), lambda n: (n, 0, 0)),
        ),
        out_shape=(jax.ShapeDtypeStruct((N, R * W, C1), jnp.float32),
                   jax.ShapeDtypeStruct((N, R * W, Cimg), jnp.float32)),
        compiler_params=_compiler(),
    )(xp, cw, dcoef, noise, bias, srgb, cwr, brgb)


# ---------------------------------------------------------------------------
# Parameters (matches SynthesisBlock.__init__ shapes), styles/demod, forward glue
# ---------------------------------------------------------------------------
def init_synthesis_block_params(key, in_channels, out_channels, w_dim,
                                resolution, img_channels):
    ks = jax.random.split(key, 8)
    conv0 = dict(
        aff_w=jax.random.normal(ks[0], (in_channels, w_dim), jnp.float32),
        aff_b=jnp.ones((in_channels,), jnp.float32),                 # bias_init=1
        weight=jax.random.normal(ks[1], (out_channels, in_channels, 3, 3), jnp.float32),
        noise_const=jax.random.normal(ks[2], (resolution, resolution), jnp.float32),
        noise_strength=jnp.zeros((), jnp.float32),
        bias=jnp.zeros((out_channels,), jnp.float32),
    )
    conv1 = dict(
        aff_w=jax.random.normal(ks[3], (out_channels, w_dim), jnp.float32),
        aff_b=jnp.ones((out_channels,), jnp.float32),
        weight=jax.random.normal(ks[4], (out_channels, out_channels, 3, 3), jnp.float32),
        noise_const=jax.random.normal(ks[5], (resolution, resolution), jnp.float32),
        noise_strength=jnp.zeros((), jnp.float32),
        bias=jnp.zeros((out_channels,), jnp.float32),
    )
    torgb = dict(
        aff_w=jax.random.normal(ks[6], (out_channels, w_dim), jnp.float32),
        aff_b=jnp.ones((out_channels,), jnp.float32),
        weight=jax.random.normal(ks[7], (img_channels, out_channels, 1, 1), jnp.float32),
        bias=jnp.zeros((img_channels,), jnp.float32),
    )
    return dict(conv0=conv0, conv1=conv1, torgb=torgb)


def _styles_and_demod(params, ws):
    """Affines (FullyConnectedLayer with 1/sqrt(w_dim) weight gain, bias=1) and demod
    coefficients; shared by the Pallas forward and the golden reference."""
    c0, c1, tr = params["conv0"], params["conv1"], params["torgb"]
    wdim = ws.shape[2]
    g = 1.0 / float(np.sqrt(wdim))
    C0 = c0["weight"].shape[0]
    s0 = ws[:, 0, :] @ (c0["aff_w"].T * g) + c0["aff_b"][None, :]         # (N, Cin)
    s1 = ws[:, 1, :] @ (c1["aff_w"].T * g) + c1["aff_b"][None, :]         # (N, C0)
    srgb = (ws[:, 2, :] @ (tr["aff_w"].T * g) + tr["aff_b"][None, :]) \
        * (1.0 / float(np.sqrt(C0)))                                      # ToRGB weight_gain
    wsq0 = jnp.sum(jnp.square(c0["weight"].astype(jnp.float32)), axis=(2, 3)).T  # (Cin, C0)
    wsq1 = jnp.sum(jnp.square(c1["weight"].astype(jnp.float32)), axis=(2, 3)).T  # (C0, C0)
    d0 = lax.rsqrt((s0 * s0) @ wsq0 + 1e-8)                               # (N, C0)
    d1 = lax.rsqrt((s1 * s1) @ wsq1 + 1e-8)                               # (N, C0)
    return s0, s1, srgb, d0, d1


def _upsample2d_img(img, Cimg):
    """upfirdn2d.upsample2d(img, [1,3,3,1]) for the 3-channel skip image (pure XLA)."""
    f2d = jnp.asarray(np.outer(np.array(F1D), np.array(F1D)), jnp.float32)
    fir = jnp.broadcast_to(f2d, (Cimg, 1, 4, 4))
    return lax.conv_general_dilated(
        img.astype(jnp.float32), fir, (1, 1), ((2, 2), (2, 2)), lhs_dilation=(2, 2),
        dimension_numbers=('NCHW', 'OIHW', 'NCHW'), feature_group_count=Cimg,
        precision=lax.Precision.HIGHEST)


def synthesis_block_forward(params, x, img, ws, resolution):
    """SynthesisBlock.forward for architecture='skip', in_channels != 0, short_cut_=None,
    mixes_=None, noise == noise_const*noise_strength (== 0 at init), conv_clamp=None.

    x: (N, Cin, R/2, R/2) NCHW; img: (N, Cimg, R/2, R/2) or None; ws: (N, 3, w_dim).
    Returns (x_out (N, Cout, R, R), img_out (N, Cimg, R, R)), both NCHW float32."""
    N, Cin, Hin, _ = x.shape
    R = resolution
    r = R // 2
    assert Hin == r
    W = R + 8                                  # common flat-row pitch for both kernels

    c0, c1, tr = params["conv0"], params["conv1"], params["torgb"]
    C0 = c0["weight"].shape[0]
    Cimg = tr["weight"].shape[0]

    s0, s1, srgb, d0, d1 = _styles_and_demod(params, ws)

    # ---------------- conv0 (fused: modulate, up=2 conv, FIR, epilogue) ----------------
    x_nhwc = jnp.transpose(x.astype(jnp.float32), (0, 2, 3, 1))
    xmod = x_nhwc * s0[:, None, None, :]
    xd = jnp.zeros((N, R + 7, W, Cin), jnp.float32)
    xd = xd.at[:, 3:R + 2:2, 3:R + 2:2, :].set(xmod)              # zero-dilated input
    xd = xd.astype(jnp.bfloat16).reshape(N, (R + 7) * W, Cin)
    cw0 = jnp.transpose(c0["weight"][:, :, ::-1, ::-1], (2, 3, 1, 0))   # flipped taps
    cw0 = cw0.reshape(9, Cin, C0).astype(jnp.bfloat16)
    noise0 = (c0["noise_const"] * c0["noise_strength"]).astype(jnp.float32)
    noise0 = jnp.pad(noise0, ((0, 0), (0, W - R))).reshape(R * W, 1)
    x1buf = _conv0(xd, cw0, d0[:, None, :], s1[:, None, :], noise0,
                   c0["bias"][None, :], R=R, W=W)                 # (N,(R+4)W,C0) bf16

    # ---------------- conv1 + ToRGB (fused) ----------------------------------------------
    cw1 = jnp.transpose(c1["weight"], (2, 3, 1, 0)).reshape(9, C0, C0).astype(jnp.bfloat16)
    noise1 = (c1["noise_const"] * c1["noise_strength"]).astype(jnp.float32)
    noise1 = jnp.pad(noise1, ((0, 0), (0, W - R))).reshape(R * W, 1)
    cwr = tr["weight"][:, :, 0, 0].T.astype(jnp.bfloat16)         # (C0, Cimg)
    x2flat, yflat = _conv1_torgb(x1buf, cw1, d1[:, None, :], noise1, c1["bias"][None, :],
                                 srgb[:, None, :], cwr, tr["bias"][None, :], R=R, W=W)

    # ---------------- back to NCHW (drop junk columns) + skip image in XLA ----------------
    x_out = jnp.transpose(x2flat.reshape(N, R, W, C0)[:, :, :R, :], (0, 3, 1, 2))
    y_rgb = jnp.transpose(yflat.reshape(N, R, W, Cimg)[:, :, :R, :], (0, 3, 1, 2))
    if img is not None:
        img_out = _upsample2d_img(img, Cimg) + y_rgb
    else:
        img_out = y_rgb
    return x_out, img_out


# ---------------------------------------------------------------------------
# Pure-XLA f32 golden reference (lax convs) of the same forward.
# ---------------------------------------------------------------------------
def synthesis_block_reference(params, x, img, ws, resolution):
    R = resolution
    c0, c1, tr = params["conv0"], params["conv1"], params["torgb"]
    C0 = c0["weight"].shape[0]
    Cimg = tr["weight"].shape[0]
    s0, s1, srgb, d0, d1 = _styles_and_demod(params, ws)
    f2d = jnp.asarray(np.outer(np.array(F1D), np.array(F1D)), jnp.float32)
    hi = lax.Precision.HIGHEST
    dn = ('NCHW', 'OIHW', 'NCHW')

    # conv0: modulate, transposed conv stride 2 (== dilated corr. with flipped weight), FIR.
    xm = x.astype(jnp.float32) * s0[:, :, None, None]
    wf0 = c0["weight"][:, :, ::-1, ::-1].astype(jnp.float32)
    a = lax.conv_general_dilated(xm, wf0, (1, 1), ((2, 2), (2, 2)), lhs_dilation=(2, 2),
                                 dimension_numbers=dn, precision=hi)        # (N,C0,R+1,R+1)
    fir = jnp.broadcast_to(f2d, (C0, 1, 4, 4))
    a = lax.conv_general_dilated(a, fir, (1, 1), ((1, 1), (1, 1)),
                                 dimension_numbers=dn, feature_group_count=C0,
                                 precision=hi)                               # (N,C0,R,R)
    noise0 = c0["noise_const"] * c0["noise_strength"]
    a = a * d0[:, :, None, None] + noise0[None, None] + c0["bias"][None, :, None, None]
    x1 = jnp.where(a >= 0, a, LRELU_ALPHA * a) * LRELU_GAIN

    # conv1: modulate, 3x3 correlation (padding 1), demod, noise, bias, lrelu.
    xm1 = x1 * s1[:, :, None, None]
    b = lax.conv_general_dilated(xm1, c1["weight"].astype(jnp.float32), (1, 1),
                                 ((1, 1), (1, 1)), dimension_numbers=dn, precision=hi)
    noise1 = c1["noise_const"] * c1["noise_strength"]
    b = b * d1[:, :, None, None] + noise1[None, None] + c1["bias"][None, :, None, None]
    x2 = jnp.where(b >= 0, b, LRELU_ALPHA * b) * LRELU_GAIN

    # torgb (no demod) + skip-image upsample.
    y = jnp.einsum('nchw,kc,nc->nkhw', x2, tr["weight"][:, :, 0, 0].astype(jnp.float32),
                   srgb, precision=hi) + tr["bias"][None, :, None, None]
    if img is not None:
        img_out = _upsample2d_img(img, Cimg) + y
    else:
        img_out = y
    return x2, img_out


if __name__ == "__main__":
    key = jax.random.PRNGKey(0)
    N, Cin, Cout, wdim, R, Cimg = 2, 4, 8, 32, 16, 3
    kp, kx, kw, ki = jax.random.split(key, 4)
    params = init_synthesis_block_params(kp, Cin, Cout, wdim, R, Cimg)
    x = jax.random.normal(kx, (N, Cin, R // 2, R // 2), jnp.float32)
    ws = jax.random.normal(kw, (N, 3, wdim), jnp.float32)   # num_conv + num_torgb = 3
    img = jax.random.normal(ki, (N, Cimg, R // 2, R // 2), jnp.float32)

    x_out, img_out = synthesis_block_forward(params, x, img, ws, resolution=R)
    jax.block_until_ready((x_out, img_out))

    assert x_out.shape == (N, Cout, R, R) and x_out.dtype == jnp.float32
    assert img_out.shape == (N, Cimg, R, R) and img_out.dtype == jnp.float32
    assert bool(jnp.all(jnp.isfinite(x_out))) and bool(jnp.all(jnp.isfinite(img_out)))

    # Golden check vs the pure-XLA f32 reference (kernels use bf16 MXU operands).
    x_ref, img_ref = synthesis_block_reference(params, x, img, ws, resolution=R)
    jax.block_until_ready((x_ref, img_ref))
    np.testing.assert_allclose(np.asarray(x_out), np.asarray(x_ref), rtol=5e-2, atol=1.5e-1)
    np.testing.assert_allclose(np.asarray(img_out), np.asarray(img_ref), rtol=5e-2, atol=1.5e-1)

    print("KERNEL_OK")
</pallas_src>

<mosaic_0001>
module attributes {stable_mosaic.version = 11 : i64} {
  func.func @_k(%arg0: i32, %arg1: memref<8x128xf32, #tpu.memory_space<vmem>>, %arg2: memref<8x128xf32, #tpu.memory_space<vmem>>, %arg3: memref<8x128xf32, #tpu.memory_space<vmem>>) attributes {dimension_semantics = [#tpu.dimension_semantics<arbitrary>], iteration_bounds = array<i64: 2>, scalar_prefetch = 0 : i64, scratch_operands = 0 : i64, tpu.core_type = #tpu.core_type<tc>, window_params = [{pipeline_mode = #tpu.pipeline_mode<synchronous>, transform_indices = @transform_0, window_bounds = array<i64: 8, 128>}, {transform_indices = @transform_1, window_bounds = array<i64: 8, 128>}, {transform_indices = @transform_2, window_bounds = array<i64: 8, 128>}]} {
    %c0 = arith.constant 0 : index
    %c0_0 = arith.constant 0 : index
    %0 = vector.load %arg1[%c0, %c0_0] : memref<8x128xf32, #tpu.memory_space<vmem>>, vector<8x128xf32>
    %c0_1 = arith.constant 0 : index
    %c0_2 = arith.constant 0 : index
    %1 = vector.load %arg2[%c0_1, %c0_2] : memref<8x128xf32, #tpu.memory_space<vmem>>, vector<8x128xf32>
    %2 = arith.addf %0, %1 : vector<8x128xf32>
    %c0_3 = arith.constant 0 : index
    %c0_4 = arith.constant 0 : index
    %3 = vector.load %arg3[%c0_3, %c0_4] : memref<8x128xf32, #tpu.memory_space<vmem>>, vector<8x128xf32>
    tpu.vector_store %arg3[%c0_3, %c0_4], %2 {strides = array<i32>} : memref<8x128xf32, #tpu.memory_space<vmem>>, vector<8x128xf32>,
    return
  }
  func.func @transform_0(%arg0: i32) -> (i32, i32) {
    %c0_i32 = arith.constant 0 : i32
    %c0_i32_0 = arith.constant 0 : i32
    %c0_i32_1 = arith.constant 0 : i32
    return %c0_i32, %c0_i32_0 : i32, i32
  }
  func.func @transform_1(%arg0: i32) -> (i32, i32) {
    %c0_i32 = arith.constant 0 : i32
    %c0_i32_0 = arith.constant 0 : i32
    return %arg0, %c0_i32 : i32, i32
  }
  func.func @transform_2(%arg0: i32) -> (i32, i32) {
    %c0_i32 = arith.constant 0 : i32
    %c0_i32_0 = arith.constant 0 : i32
    return %arg0, %c0_i32 : i32, i32
  }
}

module attributes {stable_mosaic.version = 11 : i64} {
  func.func @_conv0_kernel(%arg0: i32, %arg1: memref<1x552x4xbf16, #tpu.memory_space<vmem>>, %arg2: memref<9x4x8xbf16, #tpu.memory_space<vmem>>, %arg3: memref<1x1x8xf32, #tpu.memory_space<vmem>>, %arg4: memref<1x1x8xf32, #tpu.memory_space<vmem>>, %arg5: memref<384x1xf32, #tpu.memory_space<vmem>>, %arg6: memref<1x8xf32, #tpu.memory_space<vmem>>, %arg7: memref<1x480x8xbf16, #tpu.memory_space<vmem>>, %arg8: memref<480x8xf32, #tpu.memory_space<vmem>>) attributes {dimension_semantics = [#tpu.dimension_semantics<parallel>], iteration_bounds = array<i64: 2>, scalar_prefetch = 0 : i64, scratch_operands = 1 : i64, tpu.core_type = #tpu.core_type<tc>, window_params = [{transform_indices = @transform_0, window_bounds = array<i64: 1, 552, 4>}, {pipeline_mode = #tpu.pipeline_mode<synchronous>, transform_indices = @transform_1, window_bounds = array<i64: 9, 4, 8>}, {transform_indices = @transform_2, window_bounds = array<i64: 1, 1, 8>}, {transform_indices = @transform_3, window_bounds = array<i64: 1, 1, 8>}, {pipeline_mode = #tpu.pipeline_mode<synchronous>, transform_indices = @transform_4, window_bounds = array<i64: 384, 1>}, {pipeline_mode = #tpu.pipeline_mode<synchronous>, transform_indices = @transform_5, window_bounds = array<i64: 1, 8>}, {transform_indices = @transform_6, window_bounds = array<i64: 1, 480, 8>}]} {
    %c0 = arith.constant 0 : index
    %c0_0 = arith.constant 0 : index
    %c0_1 = arith.constant 0 : index
    %0 = vector.load %arg1[%c0, %c0_0, %c0_1] : memref<1x552x4xbf16, #tpu.memory_space<vmem>>, vector<1x480x4xbf16>
    %1 = vector.shape_cast %0 : vector<1x480x4xbf16> to vector<480x4xbf16>
    %c0_2 = arith.constant 0 : index
    %c0_3 = arith.constant 0 : index
    %c0_4 = arith.constant 0 : index
    %2 = vector.load %arg2[%c0_2, %c0_3, %c0_4] : memref<9x4x8xbf16, #tpu.memory_space<vmem>>, vector<1x4x8xbf16>
    %3 = vector.shape_cast %2 : vector<1x4x8xbf16> to vector<4x8xbf16>
    %cst = arith.constant dense<0.000000e+00> : vector<480x8xf32>
    %4 = tpu.matmul %1, %3, %cst {dimension_numbers = #tpu.dot_dimension_numbers<[1], [0], [0], [1], [0, 0, 1, 1], [], []>} : vector<480x4xbf16>, vector<4x8xbf16>, vector<480x8xf32> -> vector<480x8xf32>
    %c0_5 = arith.constant 0 : index
    %c1 = arith.constant 1 : index
    %c0_6 = arith.constant 0 : index
    %5 = vector.load %arg1[%c0_5, %c1, %c0_6] : memref<1x552x4xbf16, #tpu.memory_space<vmem>>, vector<1x480x4xbf16>
    %6 = vector.shape_cast %5 : vector<1x480x4xbf16> to vector<480x4xbf16>
    %c1_7 = arith.constant 1 : index
    %c0_8 = arith.constant 0 : index
    %c0_9 = arith.constant 0 : index
    %7 = vector.load %arg2[%c1_7, %c0_8, %c0_9] : memref<9x4x8xbf16, #tpu.memory_space<vmem>>, vector<1x4x8xbf16>
    %8 = vector.shape_cast %7 : vector<1x4x8xbf16> to vector<4x8xbf16>
    %cst_10 = arith.constant dense<0.000000e+00> : vector<480x8xf32>
    %9 = tpu.matmul %6, %8, %cst_10 {dimension_numbers = #tpu.dot_dimension_numbers<[1], [0], [0], [1], [0, 0, 1, 1], [], []>} : vector<480x4xbf16>, vector<4x8xbf16>, vector<480x8xf32> -> vector<480x8xf32>
    %10 = arith.addf %4, %9 : vector<480x8xf32>
    %c0_11 = arith.constant 0 : index
    %c2 = arith.constant 2 : index
    %c0_12 = arith.constant 0 : index
    %11 = vector.load %arg1[%c0_11, %c2, %c0_12] : memref<1x552x4xbf16, #tpu.memory_space<vmem>>, vector<1x480x4xbf16>
    %12 = vector.shape_cast %11 : vector<1x480x4xbf16> to vector<480x4xbf16>
    %c2_13 = arith.constant 2 : index
    %c0_14 = arith.constant 0 : index
    %c0_15 = arith.constant 0 : index
    %13 = vector.load %arg2[%c2_13, %c0_14, %c0_15] : memref<9x4x8xbf16, #tpu.memory_space<vmem>>, vector<1x4x8xbf16>
    %14 = vector.shape_cast %13 : vector<1x4x8xbf16> to vector<4x8xbf16>
    %cst_16 = arith.constant dense<0.000000e+00> : vector<480x8xf32>
    %15 = tpu.matmul %12, %14, %cst_16 {dimension_numbers = #tpu.dot_dimension_numbers<[1], [0], [0], [1], [0, 0, 1, 1], [], []>} : vector<480x4xbf16>, vector<4x8xbf16>, vector<480x8xf32> -> vector<480x8xf32>
    %16 = arith.addf %10, %15 : vector<480x8xf32>
    %c0_17 = arith.constant 0 : index
    %c24 = arith.constant 24 : index
    %c0_18 = arith.constant 0 : index
    %17 = vector.load %arg1[%c0_17, %c24, %c0_18] : memref<1x552x4xbf16, #tpu.memory_space<vmem>>, vector<1x480x4xbf16>
    %18 = vector.shape_cast %17 : vector<1x480x4xbf16> to vector<480x4xbf16>
    %c3 = arith.constant 3 : index
    %c0_19 = arith.constant 0 : index
    %c0_20 = arith.constant 0 : index
    %19 = vector.load %arg2[%c3, %c0_19, %c0_20] : memref<9x4x8xbf16, #tpu.memory_space<vmem>>, vector<1x4x8xbf16>
    %20 = vector.shape_cast %19 : vector<1x4x8xbf16> to vector<4x8xbf16>
    %cst_21 = arith.constant dense<0.000000e+00> : vector<480x8xf32>
    %21 = tpu.matmul %18, %20, %cst_21 {dimension_numbers = #tpu.dot_dimension_numbers<[1], [0], [0], [1], [0, 0, 1, 1], [], []>} : vector<480x4xbf16>, vector<4x8xbf16>, vector<480x8xf32> -> vector<480x8xf32>
    %22 = arith.addf %16, %21 : vector<480x8xf32>
    %c0_22 = arith.constant 0 : index
    %c25 = arith.constant 25 : index
    %c0_23 = arith.constant 0 : index
    %23 = vector.load %arg1[%c0_22, %c25, %c0_23] : memref<1x552x4xbf16, #tpu.memory_space<vmem>>, vector<1x480x4xbf16>
    %24 = vector.shape_cast %23 : vector<1x480x4xbf16> to vector<480x4xbf16>
    %c4 = arith.constant 4 : index
    %c0_24 = arith.constant 0 : index
    %c0_25 = arith.constant 0 : index
    %25 = vector.load %arg2[%c4, %c0_24, %c0_25] : memref<9x4x8xbf16, #tpu.memory_space<vmem>>, vector<1x4x8xbf16>
    %26 = vector.shape_cast %25 : vector<1x4x8xbf16> to vector<4x8xbf16>
    %cst_26 = arith.constant dense<0.000000e+00> : vector<480x8xf32>
    %27 = tpu.matmul %24, %26, %cst_26 {dimension_numbers = #tpu.dot_dimension_numbers<[1], [0], [0], [1], [0, 0, 1, 1], [], []>} : vector<480x4xbf16>, vector<4x8xbf16>, vector<480x8xf32> -> vector<480x8xf32>
    %28 = arith.addf %22, %27 : vector<480x8xf32>
    %c0_27 = arith.constant 0 : index
    %c26 = arith.constant 26 : index
    %c0_28 = arith.constant 0 : index
    %29 = vector.load %arg1[%c0_27, %c26, %c0_28] : memref<1x552x4xbf16, #tpu.memory_space<vmem>>, vector<1x480x4xbf16>
    %30 = vector.shape_cast %29 : vector<1x480x4xbf16> to vector<480x4xbf16>
    %c5 = arith.constant 5 : index
    %c0_29 = arith.constant 0 : index
    %c0_30 = arith.constant 0 : index
    %31 = vector.load %arg2[%c5, %c0_29, %c0_30] : memref<9x4x8xbf16, #tpu.memory_space<vmem>>, vector<1x4x8xbf16>
    %32 = vector.shape_cast %31 : vector<1x4x8xbf16> to vector<4x8xbf16>
    %cst_31 = arith.constant dense<0.000000e+00> : vector<480x8xf32>
    %33 = tpu.matmul %30, %32, %cst_31 {dimension_numbers = #tpu.dot_dimension_numbers<[1], [0], [0], [1], [0, 0, 1, 1], [], []>} : vector<480x4xbf16>, vector<4x8xbf16>, vector<480x8xf32> -> vector<480x8xf32>
    %34 = arith.addf %28, %33 : vector<480x8xf32>
    %c0_32 = arith.constant 0 : index
    %c48 = arith.constant 48 : index
    %c0_33 = arith.constant 0 : index
    %35 = vector.load %arg1[%c0_32, %c48, %c0_33] : memref<1x552x4xbf16, #tpu.memory_space<vmem>>, vector<1x480x4xbf16>
    %36 = vector.shape_cast %35 : vector<1x480x4xbf16> to vector<480x4xbf16>
    %c6 = arith.constant 6 : index
    %c0_34 = arith.constant 0 : index
    %c0_35 = arith.constant 0 : index
    %37 = vector.load %arg2[%c6, %c0_34, %c0_35] : memref<9x4x8xbf16, #tpu.memory_space<vmem>>, vector<1x4x8xbf16>
    %38 = vector.shape_cast %37 : vector<1x4x8xbf16> to vector<4x8xbf16>
    %cst_36 = arith.constant dense<0.000000e+00> : vector<480x8xf32>
    %39 = tpu.matmul %36, %38, %cst_36 {dimension_numbers = #tpu.dot_dimension_numbers<[1], [0], [0], [1], [0, 0, 1, 1], [], []>} : vector<480x4xbf16>, vector<4x8xbf16>, vector<480x8xf32> -> vector<480x8xf32>
    %40 = arith.addf %34, %39 : vector<480x8xf32>
    %c0_37 = arith.constant 0 : index
    %c49 = arith.constant 49 : index
    %c0_38 = arith.constant 0 : index
    %41 = vector.load %arg1[%c0_37, %c49, %c0_38] : memref<1x552x4xbf16, #tpu.memory_space<vmem>>, vector<1x480x4xbf16>
    %42 = vector.shape_cast %41 : vector<1x480x4xbf16> to vector<480x4xbf16>
    %c7 = arith.constant 7 : index
    %c0_39 = arith.constant 0 : index
    %c0_40 = arith.constant 0 : index
    %43 = vector.load %arg2[%c7, %c0_39, %c0_40] : memref<9x4x8xbf16, #tpu.memory_space<vmem>>, vector<1x4x8xbf16>
    %44 = vector.shape_cast %43 : vector<1x4x8xbf16> to vector<4x8xbf16>
    %cst_41 = arith.constant dense<0.000000e+00> : vector<480x8xf32>
    %45 = tpu.matmul %42, %44, %cst_41 {dimension_numbers = #tpu.dot_dimension_numbers<[1], [0], [0], [1], [0, 0, 1, 1], [], []>} : vector<480x4xbf16>, vector<4x8xbf16>, vector<480x8xf32> -> vector<480x8xf32>
    %46 = arith.addf %40, %45 : vector<480x8xf32>
    %c0_42 = arith.constant 0 : index
    %c50 = arith.constant 50 : index
    %c0_43 = arith.constant 0 : index
    %47 = vector.load %arg1[%c0_42, %c50, %c0_43] : memref<1x552x4xbf16, #tpu.memory_space<vmem>>, vector<1x480x4xbf16>
    %48 = vector.shape_cast %47 : vector<1x480x4xbf16> to vector<480x4xbf16>
    %c8 = arith.constant 8 : index
    %c0_44 = arith.constant 0 : index
    %c0_45 = arith.constant 0 : index
    %49 = vector.load %arg2[%c8, %c0_44, %c0_45] : memref<9x4x8xbf16, #tpu.memory_space<vmem>>, vector<1x4x8xbf16>
    %50 = vector.shape_cast %49 : vector<1x4x8xbf16> to vector<4x8xbf16>
    %cst_46 = arith.constant dense<0.000000e+00> : vector<480x8xf32>
    %51 = tpu.matmul %48, %50, %cst_46 {dimension_numbers = #tpu.dot_dimension_numbers<[1], [0], [0], [1], [0, 0, 1, 1], [], []>} : vector<480x4xbf16>, vector<4x8xbf16>, vector<480x8xf32> -> vector<480x8xf32>
    %52 = arith.addf %46, %51 : vector<480x8xf32>
    %c0_47 = arith.constant 0 : index
    %c0_48 = arith.constant 0 : index
    %53 = vector.load %arg8[%c0_47, %c0_48] : memref<480x8xf32, #tpu.memory_space<vmem>>, vector<480x8xf32>
    tpu.vector_store %arg8[%c0_47, %c0_48], %52 {strides = array<i32>} : memref<480x8xf32, #tpu.memory_space<vmem>>, vector<480x8xf32>,
    %c0_49 = arith.constant 0 : index
    %c0_50 = arith.constant 0 : index
    %54 = vector.load %arg8[%c0_49, %c0_50] : memref<480x8xf32, #tpu.memory_space<vmem>>, vector<384x8xf32>
    %cst_51 = arith.constant 6.250000e-02 : f32
    %55 = vector.broadcast %cst_51 : f32 to vector<384x8xf32>
    %56 = arith.mulf %55, %54 : vector<384x8xf32>
    %c1_52 = arith.constant 1 : index
    %c0_53 = arith.constant 0 : index
    %57 = vector.load %arg8[%c1_52, %c0_53] : memref<480x8xf32, #tpu.memory_space<vmem>>, vector<384x8xf32>
    %cst_54 = arith.constant 1.875000e-01 : f32
    %58 = vector.broadcast %cst_54 : f32 to vector<384x8xf32>
    %59 = arith.mulf %58, %57 : vector<384x8xf32>
    %60 = arith.addf %56, %59 : vector<384x8xf32>
    %c2_55 = arith.constant 2 : index
    %c0_56 = arith.constant 0 : index
    %61 = vector.load %arg8[%c2_55, %c0_56] : memref<480x8xf32, #tpu.memory_space<vmem>>, vector<384x8xf32>
    %cst_57 = arith.constant 1.875000e-01 : f32
    %62 = vector.broadcast %cst_57 : f32 to vector<384x8xf32>
    %63 = arith.mulf %62, %61 : vector<384x8xf32>
    %64 = arith.addf %60, %63 : vector<384x8xf32>
    %c3_58 = arith.constant 3 : index
    %c0_59 = arith.constant 0 : index
    %65 = vector.load %arg8[%c3_58, %c0_59] : memref<480x8xf32, #tpu.memory_space<vmem>>, vector<384x8xf32>
    %cst_60 = arith.constant 6.250000e-02 : f32
    %66 = vector.broadcast %cst_60 : f32 to vector<384x8xf32>
    %67 = arith.mulf %66, %65 : vector<384x8xf32>
    %68 = arith.addf %64, %67 : vector<384x8xf32>
    %c24_61 = arith.constant 24 : index
    %c0_62 = arith.constant 0 : index
    %69 = vector.load %arg8[%c24_61, %c0_62] : memref<480x8xf32, #tpu.memory_space<vmem>>, vector<384x8xf32>
    %cst_63 = arith.constant 1.875000e-01 : f32
    %70 = vector.broadcast %cst_63 : f32 to vector<384x8xf32>
    %71 = arith.mulf %70, %69 : vector<384x8xf32>
    %72 = arith.addf %68, %71 : vector<384x8xf32>
    %c25_64 = arith.constant 25 : index
    %c0_65 = arith.constant 0 : index
    %73 = vector.load %arg8[%c25_64, %c0_65] : memref<480x8xf32, #tpu.memory_space<vmem>>, vector<384x8xf32>
    %cst_66 = arith.constant 5.625000e-01 : f32
    %74 = vector.broadcast %cst_66 : f32 to vector<384x8xf32>
    %75 = arith.mulf %74, %73 : vector<384x8xf32>
    %76 = arith.addf %72, %75 : vector<384x8xf32>
    %c26_67 = arith.constant 26 : index
    %c0_68 = arith.constant 0 : index
    %77 = vector.load %arg8[%c26_67, %c0_68] : memref<480x8xf32, #tpu.memory_space<vmem>>, vector<384x8xf32>
    %cst_69 = arith.constant 5.625000e-01 : f32
    %78 = vector.broadcast %cst_69 : f32 to vector<384x8xf32>
    %79 = arith.mulf %78, %77 : vector<384x8xf32>
    %80 = arith.addf %76, %79 : vector<384x8xf32>
    %c27 = arith.constant 27 : index
    %c0_70 = arith.constant 0 : index
    %81 = vector.load %arg8[%c27, %c0_70] : memref<480x8xf32, #tpu.memory_space<vmem>>, vector<384x8xf32>
    %cst_71 = arith.constant 1.875000e-01 : f32
    %82 = vector.broadcast %cst_71 : f32 to vector<384x8xf32>
    %83 = arith.mulf %82, %81 : vector<384x8xf32>
    %84 = arith.addf %80, %83 : vector<384x8xf32>
    %c48_72 = arith.constant 48 : index
    %c0_73 = arith.constant 0 : index
    %85 = vector.load %arg8[%c48_72, %c0_73] : memref<480x8xf32, #tpu.memory_space<vmem>>, vector<384x8xf32>
    %cst_74 = arith.constant 1.875000e-01 : f32
    %86 = vector.broadcast %cst_74 : f32 to vector<384x8xf32>
    %87 = arith.mulf %86, %85 : vector<384x8xf32>
    %88 = arith.addf %84, %87 : vector<384x8xf32>
    %c49_75 = arith.constant 49 : index
    %c0_76 = arith.constant 0 : index
    %89 = vector.load %arg8[%c49_75, %c0_76] : memref<480x8xf32, #tpu.memory_space<vmem>>, vector<384x8xf32>
    %cst_77 = arith.constant 5.625000e-01 : f32
    %90 = vector.broadcast %cst_77 : f32 to vector<384x8xf32>
    %91 = arith.mulf %90, %89 : vector<384x8xf32>
    %92 = arith.addf %88, %91 : vector<384x8xf32>
    %c50_78 = arith.constant 50 : index
    %c0_79 = arith.constant 0 : index
    %93 = vector.load %arg8[%c50_78, %c0_79] : memref<480x8xf32, #tpu.memory_space<vmem>>, vector<384x8xf32>
    %cst_80 = arith.constant 5.625000e-01 : f32
    %94 = vector.broadcast %cst_80 : f32 to vector<384x8xf32>
    %95 = arith.mulf %94, %93 : vector<384x8xf32>
    %96 = arith.addf %92, %95 : vector<384x8xf32>
    %c51 = arith.constant 51 : index
    %c0_81 = arith.constant 0 : index
    %97 = vector.load %arg8[%c51, %c0_81] : memref<480x8xf32, #tpu.memory_space<vmem>>, vector<384x8xf32>
    %cst_82 = arith.constant 1.875000e-01 : f32
    %98 = vector.broadcast %cst_82 : f32 to vector<384x8xf32>
    %99 = arith.mulf %98, %97 : vector<384x8xf32>
    %100 = arith.addf %96, %99 : vector<384x8xf32>
    %c72 = arith.constant 72 : index
    %c0_83 = arith.constant 0 : index
    %101 = vector.load %arg8[%c72, %c0_83] : memref<480x8xf32, #tpu.memory_space<vmem>>, vector<384x8xf32>
    %cst_84 = arith.constant 6.250000e-02 : f32
    %102 = vector.broadcast %cst_84 : f32 to vector<384x8xf32>
    %103 = arith.mulf %102, %101 : vector<384x8xf32>
    %104 = arith.addf %100, %103 : vector<384x8xf32>
    %c73 = arith.constant 73 : index
    %c0_85 = arith.constant 0 : index
    %105 = vector.load %arg8[%c73, %c0_85] : memref<480x8xf32, #tpu.memory_space<vmem>>, vector<384x8xf32>
    %cst_86 = arith.constant 1.875000e-01 : f32
    %106 = vector.broadcast %cst_86 : f32 to vector<384x8xf32>
    %107 = arith.mulf %106, %105 : vector<384x8xf32>
    %108 = arith.addf %104, %107 : vector<384x8xf32>
    %c74 = arith.constant 74 : index
    %c0_87 = arith.constant 0 : index
    %109 = vector.load %arg8[%c74, %c0_87] : memref<480x8xf32, #tpu.memory_space<vmem>>, vector<384x8xf32>
    %cst_88 = arith.constant 1.875000e-01 : f32
    %110 = vector.broadcast %cst_88 : f32 to vector<384x8xf32>
    %111 = arith.mulf %110, %109 : vector<384x8xf32>
    %112 = arith.addf %108, %111 : vector<384x8xf32>
    %c75 = arith.constant 75 : index
    %c0_89 = arith.constant 0 : index
    %113 = vector.load %arg8[%c75, %c0_89] : memref<480x8xf32, #tpu.memory_space<vmem>>, vector<384x8xf32>
    %cst_90 = arith.constant 6.250000e-02 : f32
    %114 = vector.broadcast %cst_90 : f32 to vector<384x8xf32>
    %115 = arith.mulf %114, %113 : vector<384x8xf32>
    %116 = arith.addf %112, %115 : vector<384x8xf32>
    %c0_91 = arith.constant 0 : index
    %c0_92 = arith.constant 0 : index
    %c0_93 = arith.constant 0 : index
    %117 = vector.load %arg3[%c0_91, %c0_92, %c0_93] : memref<1x1x8xf32, #tpu.memory_space<vmem>>, vector<1x1x8xf32>
    %118 = vector.shape_cast %117 : vector<1x1x8xf32> to vector<1x8xf32>
    %119 = vector.broadcast %118 : vector<1x8xf32> to vector<384x8xf32>
    %120 = arith.mulf %116, %119 : vector<384x8xf32>
    %c0_94 = arith.constant 0 : index
    %c0_95 = arith.constant 0 : index
    %121 = vector.load %arg5[%c0_94, %c0_95] : memref<384x1xf32, #tpu.memory_space<vmem>>, vector<384x1xf32>
    %122 = vector.broadcast %121 : vector<384x1xf32> to vector<384x8xf32>
    %123 = arith.addf %120, %122 : vector<384x8xf32>
    %c0_96 = arith.constant 0 : index
    %c0_97 = arith.constant 0 : index
    %124 = vector.load %arg6[%c0_96, %c0_97] : memref<1x8xf32, #tpu.memory_space<vmem>>, vector<1x8xf32>
    %125 = vector.broadcast %124 : vector<1x8xf32> to vector<384x8xf32>
    %126 = arith.addf %123, %125 : vector<384x8xf32>
    %cst_98 = arith.constant 0.000000e+00 : f32
    %127 = vector.broadcast %cst_98 : f32 to vector<384x8xf32>
    %128 = arith.cmpf oge, %126, %127 : vector<384x8xf32>
    %cst_99 = arith.constant 2.000000e-01 : f32
    %129 = vector.broadcast %cst_99 : f32 to vector<384x8xf32>
    %130 = arith.mulf %129, %126 : vector<384x8xf32>
    %131 = arith.select %128, %126, %130 : vector<384x8xi1>, vector<384x8xf32>
    %cst_100 = arith.constant 1.41421354 : f32
    %132 = vector.broadcast %cst_100 : f32 to vector<384x8xf32>
    %133 = arith.mulf %131, %132 : vector<384x8xf32>
    %c0_101 = arith.constant 0 : index
    %c0_102 = arith.constant 0 : index
    %c0_103 = arith.constant 0 : index
    %134 = vector.load %arg4[%c0_101, %c0_102, %c0_103] : memref<1x1x8xf32, #tpu.memory_space<vmem>>, vector<1x1x8xf32>
    %135 = vector.shape_cast %134 : vector<1x1x8xf32> to vector<1x8xf32>
    %136 = vector.broadcast %135 : vector<1x8xf32> to vector<384x8xf32>
    %137 = arith.mulf %133, %136 : vector<384x8xf32>
    %138 = tpu.iota {dimensions = array<i32: 0>} : vector<384x1xi32>
    %c0_i32 = arith.constant 0 : i32
    %139 = vector.broadcast %c0_i32 : i32 to vector<384x1xi32>
    %140 = arith.addi %138, %139 : vector<384x1xi32>
    %c24_i32 = arith.constant 24 : i32
    %c0_i32_104 = arith.constant 0 : i32
    %141 = arith.cmpi eq, %c24_i32, %c0_i32_104 : i32
    %c1_i32 = arith.constant 1 : i32
    %142 = arith.select %141, %c1_i32, %c24_i32 : i32
    %143 = vector.broadcast %142 : i32 to vector<384x1xi32>
    %144 = arith.remsi %140, %143 : vector<384x1xi32>
    %c0_i32_105 = arith.constant 0 : i32
    %145 = vector.broadcast %c0_i32_105 : i32 to vector<384x1xi32>
    %146 = arith.cmpi ne, %144, %145 : vector<384x1xi32>
    %c0_i32_106 = arith.constant 0 : i32
    %147 = vector.broadcast %c0_i32_106 : i32 to vector<384x1xi32>
    %148 = arith.cmpi slt, %144, %147 : vector<384x1xi32>
    %c0_i32_107 = arith.constant 0 : i32
    %149 = arith.cmpi slt, %142, %c0_i32_107 : i32
    %150 = vector.broadcast %149 : i1 to vector<384x1xi1>
    %151 = vector.broadcast %150 : vector<384x1xi1> to vector<384x1xi1>
    %152 = arith.xori %148, %151 : vector<384x1xi1>
    %153 = arith.andi %152, %146 : vector<384x1xi1>
    %154 = vector.broadcast %142 : i32 to vector<384x1xi32>
    %155 = arith.addi %144, %154 : vector<384x1xi32>
    %156 = arith.select %153, %155, %144 : vector<384x1xi1>, vector<384x1xi32>
    %c16_i32 = arith.constant 16 : i32
    %157 = vector.broadcast %c16_i32 : i32 to vector<384x1xi32>
    %158 = arith.cmpi slt, %156, %157 : vector<384x1xi32>
    %cst_108 = arith.constant 0.000000e+00 : f32
    %159 = vector.shape_cast %158 : vector<384x1xi1> to vector<384x1xi1>
    %160 = vector.broadcast %159 : vector<384x1xi1> to vector<384x8xi1>
    %161 = vector.broadcast %cst_108 : f32 to vector<384x8xf32>
    %162 = arith.select %160, %137, %161 : vector<384x8xi1>, vector<384x8xf32>
    %163 = arith.truncf %162 : vector<384x8xf32> to vector<384x8xbf16>
    %c0_109 = arith.constant 0 : index
    %c48_110 = arith.constant 48 : index
    %c0_111 = arith.constant 0 : index
    %164 = vector.load %arg7[%c0_109, %c48_110, %c0_111] : memref<1x480x8xbf16, #tpu.memory_space<vmem>>, vector<1x384x8xbf16>
    %165 = vector.shape_cast %164 : vector<1x384x8xbf16> to vector<384x8xbf16>
    %166 = vector.shape_cast %163 : vector<384x8xbf16> to vector<1x384x8xbf16>
    tpu.vector_store %arg7[%c0_109, %c48_110, %c0_111], %166 {strides = array<i32>} : memref<1x480x8xbf16, #tpu.memory_space<vmem>>, vector<1x384x8xbf16>,
    %cst_112 = arith.constant 0.000000e+00 : bf16
    %167 = vector.broadcast %cst_112 : bf16 to vector<48x8xbf16>
    %c0_113 = arith.constant 0 : index
    %c0_114 = arith.constant 0 : index
    %c0_115 = arith.constant 0 : index
    %168 = vector.load %arg7[%c0_113, %c0_114, %c0_115] : memref<1x480x8xbf16, #tpu.memory_space<vmem>>, vector<1x48x8xbf16>
    %169 = vector.shape_cast %168 : vector<1x48x8xbf16> to vector<48x8xbf16>
    %170 = vector.shape_cast %167 : vector<48x8xbf16> to vector<1x48x8xbf16>
    tpu.vector_store %arg7[%c0_113, %c0_114, %c0_115], %170 {strides = array<i32>} : memref<1x480x8xbf16, #tpu.memory_space<vmem>>, vector<1x48x8xbf16>,
    %c0_116 = arith.constant 0 : index
    %c432 = arith.constant 432 : index
    %c0_117 = arith.constant 0 : index
    %171 = vector.load %arg7[%c0_116, %c432, %c0_117] : memref<1x480x8xbf16, #tpu.memory_space<vmem>>, vector<1x48x8xbf16>
    %172 = vector.shape_cast %171 : vector<1x48x8xbf16> to vector<48x8xbf16>
    %173 = vector.shape_cast %167 : vector<48x8xbf16> to vector<1x48x8xbf16>
    tpu.vector_store %arg7[%c0_116, %c432, %c0_117], %173 {strides = array<i32>} : memref<1x480x8xbf16, #tpu.memory_space<vmem>>, vector<1x48x8xbf16>,
    return
  }
  func.func @transform_0(%arg0: i32) -> (i32, i32, i32) {
    %c0_i32 = arith.constant 0 : i32
    %c0_i32_0 = arith.constant 0 : i32
    %c0_i32_1 = arith.constant 0 : i32
    return %arg0, %c0_i32, %c0_i32_0 : i32, i32, i32
  }
  func.func @transform_1(%arg0: i32) -> (i32, i32, i32) {
    %c0_i32 = arith.constant 0 : i32
    %c0_i32_0 = arith.constant 0 : i32
    %c0_i32_1 = arith.constant 0 : i32
    %c0_i32_2 = arith.constant 0 : i32
    return %c0_i32, %c0_i32_0, %c0_i32_1 : i32, i32, i32
  }
  func.func @transform_2(%arg0: i32) -> (i32, i32, i32) {
    %c0_i32 = arith.constant 0 : i32
    %c0_i32_0 = arith.constant 0 : i32
    %c0_i32_1 = arith.constant 0 : i32
    return %arg0, %c0_i32, %c0_i32_0 : i32, i32, i32
  }
  func.func @transform_3(%arg0: i32) -> (i32, i32, i32) {
    %c0_i32 = arith.constant 0 : i32
    %c0_i32_0 = arith.constant 0 : i32
    %c0_i32_1 = arith.constant 0 : i32
    return %arg0, %c0_i32, %c0_i32_0 : i32, i32, i32
  }
  func.func @transform_4(%arg0: i32) -> (i32, i32) {
    %c0_i32 = arith.constant 0 : i32
    %c0_i32_0 = arith.constant 0 : i32
    %c0_i32_1 = arith.constant 0 : i32
    return %c0_i32, %c0_i32_0 : i32, i32
  }
  func.func @transform_5(%arg0: i32) -> (i32, i32) {
    %c0_i32 = arith.constant 0 : i32
    %c0_i32_0 = arith.constant 0 : i32
    %c0_i32_1 = arith.constant 0 : i32
    return %c0_i32, %c0_i32_0 : i32, i32
  }
  func.func @transform_6(%arg0: i32) -> (i32, i32, i32) {
    %c0_i32 = arith.constant 0 : i32
    %c0_i32_0 = arith.constant 0 : i32
    %c0_i32_1 = arith.constant 0 : i32
    return %arg0, %c0_i32, %c0_i32_0 : i32, i32, i32
  }
}

</mosaic_0001>

<bundles_post_ra>
// kernel: tpu_custom_call.1
= control target key start
LH: loop header
LB: loop body
LE: loop exit
PB: predicated region body
PF: predicated region fallthrough
CT: control target
= control target key end

     0   :  { %7 = vsyncpa [#allocation3], 0  ;;  %s651_s0 = inlined_call_operand.hbm [shape: f32[8,128], index: 0, kind: input, shape index: {}]   ;;  %s652_s1 = inlined_call_operand.hbm [shape: f32[16,128], index: 1, kind: input, shape index: {}]   ;;  %s653_s2 = inlined_call_operand.hbm [shape: f32[16,128], index: 2, kind: output, shape index: {}]  }
   0x1   :  { %8 = vsyncpa [#allocation6], 0 }
   0x2   :  { %10 = vsyncpa [#allocation6 + $0x1], 0 }
   0x3   :  { %11 = vsyncpa [#allocation4], 0 }
   0x4   :  { %13 = vsyncpa [#allocation4 + $0x1], 0  ;;  %s485_s9 = smov 0   ;;  %s487_s10 = smov 0  }
   0x5   :  { %s489_s11 = smov 0   ;;  %s491_s12 = smov 0  }
   0x6 LB: > { %s506_s13 = sadd.s32 4294967295, %s465_s12   ;;  %s272_s14 = sadd.s32 4294967294, %s465_s12   ;;  %s465_s12 = sphi %s491_s12, %s676_s12   ;;  %s461_s11 = sphi %s489_s11, %s675_s11   ;;  %s457_s10 = sphi %s487_s10, %s674_s10   ;;  %s453_s9 = sphi %s485_s9, %s673_s9  }
   0x7   : > { %p60_p0 = scmp.ne.s32.totalorder %s457_s10, %s453_s9  ;;  %p654_p1 = scmp.eq.s32.totalorder %s506_s13, 0 }
   0x8   : > { %p90_p3 = scmp.eq.s32.totalorder %s272_s14, 1  ;;  %p273_p5 = scmp.ge.s32.totalorder %s465_s12, 1 }
   0x9   : > { %p515_p4 = por %p654_p1, %p60_p0  ;;  %p97_p7 = scmp.lt.s32.totalorder %s465_s12, 3 }
   0xa   : > { %p520_p6 = por %p90_p3, %p60_p0  ;;  %s467_s18 = smov [#allocation2]  }
   0xb   : > { %s658_s15 = scalar_select %p515_p4, 1, 0 }
   0xc   : > { %s659_s16 = scalar_select %p520_p6, 1, 0 }
   0xd   : > { %p525_p8 = pnand %p273_p5, %p97_p7  ;;  %s110_s19 = sshll.u32 %s467_s18, 4  ;;  %s111_s19 = int_to_ptr.vmem [resolvable:$true] %s110_s19 }
   0xe   : > { %s533_s20 = sadd.s32 1, %s465_s12   ;;  %s47_s24 = sadd.s32 1, %s461_s11 }
   0xf   : > { %s660_s17 = scalar_select %p525_p8, 1, 0 }
  0x10   : > { %p294_p10 = pneg %p525_p8  ;;  %s44_s22 = ssub.s32 %s465_s12, %s533_s20 }
  0x11   : > { %p543_p12 = scmp.eq.s32.totalorder %s44_s22, 0  ;;  %p54_p13 = scmp.ne.s32.totalorder %s461_s11, %s457_s10 }
  0x12   : > { %p537_p11 = pnand %p294_p10, %p654_p1  ;;  %s354_s25 = scalar_lea.vmem %s111_s19, 128 }
  0x13   : > { %p355_p3 = scmp.ne.s32.totalorder %s111_s19, %s354_s25  ;;  %p362_p9 = scmp.lt.s32.totalorder %s111_s19, %s111_s19 }
  0x14   : > { %p345_p0 = pneg %p537_p11  ;;  %p363_p2 = scmp.lt.s32.totalorder %s354_s25, %s354_s25 }
  0x16   : > { %p357_p5 = pnand %p355_p3, %p345_p0  ;;  %p364_p10 = por %p363_p2, %p362_p9 }
  0x18   : > { %p358_p7 = pneg %p357_p5 }
  0x1a   : > { %p365_p1 = pnand %p364_p10, %p358_p7 }
  0x1c   : > { %368 = shalt.err (!%p365_p1)
}
  0x1d   : > { %297 = dma.hbm_to_vmem [thread:$0]  (!%p537_p11), %s651_s0, 128, %s111_s19, [#allocation3]  }
  0x1e   : > { %s560_s28 = scalar_select %p543_p12, %s461_s11, %s47_s24  }
  0x1f   : > { %p55_p1 = scmp.eq.s32.totalorder %s465_s12, 0  ;;  %p663_p2 = scmp.eq.s32.totalorder %s506_s13, 1 }
  0x20   : > { %p307_p0 = scmp.lt.s32.totalorder %s465_s12, 2  ;;  %s121_s30 = sand.u32 1, %s461_s11  }
  0x21   : > { %p568_p9 = por %p663_p2, %p54_p13  ;;  %p56_p3 = por %p55_p1, %p54_p13 }
  0x22   : > { %s276_s3 = sshll.u32 %s121_s30, 3  ;;  %s277_s4 = sshll.u32 %s465_s12, 7 }
  0x23   : > { %s664_s29 = scalar_select %p568_p9, 1, 0 }
  0x24   : > { %s581_s7 = scalar_lea.hbm %s652_s1, %s277_s4  ;;  %s125_s8 = scalar_lea.vmem [#allocation5], %s276_s3 }
  0x25   : > { %s132_s14 = sshll.u32 %s125_s8, 4  ;;  %p583_p11 = pnand %p307_p0, %p56_p3  ;;  %s133_s14 = int_to_ptr.vmem [resolvable:$true] %s132_s14 }
  0x26   : > { %s122_s19 = scalar_lea.sflag [#allocation6], %s121_s30  ;;  %s369_s21 = scalar_lea.hbm %s581_s7, 128 }
  0x27   : > { %p370_p12 = scmp.ne.s32.totalorder %s581_s7, %s369_s21  ;;  %p371_p13 = pneg %p583_p11 }
  0x28   : > { %s374_s24 = scalar_lea.hbm %s652_s1, 256  ;;  %p375_p10 = scmp.lt.s32.totalorder %s581_s7, %s652_s1 }
  0x29   : > { %p372_p5 = pnand %p371_p13, %p370_p12  ;;  %p376_p1 = scmp.lt.s32.totalorder %s374_s24, %s369_s21 }
  0x2b   : > { %p373_p7 = pneg %p372_p5  ;;  %p377_p2 = por %p376_p1, %p375_p10 }
  0x2d   : > { %p378_p0 = pnand %p377_p2, %p373_p7 }
  0x2f   : > { %381 = shalt.err (!%p378_p0)
}
  0x30   : > { %s382_s27 = scalar_lea.vmem %s133_s14, 128  ;;  %s468_s30 = smov [#allocation5]  }
  0x31   : > { %p383_p3 = scmp.ne.s32.totalorder %s133_s14, %s382_s27  ;;  %s387_s3 = sshll.u32 %s468_s30, 4  ;;  %s388_s3 = int_to_ptr.vmem [resolvable:$false] %s387_s3 }
  0x32   : > { %s389_s4 = scalar_lea.vmem %s388_s3, 256  ;;  %p390_p12 = scmp.lt.s32.totalorder %s133_s14, %s388_s3 }
  0x33   : > { %p385_p6 = pnand %p383_p3, %p371_p13  ;;  %p391_p5 = scmp.lt.s32.totalorder %s389_s4, %s382_s27 }
  0x35   : > { %p386_p9 = pneg %p385_p6  ;;  %p392_p4 = por %p391_p5, %p390_p12 }
  0x37   : > { %p393_p8 = pnand %p392_p4, %p386_p9 }
  0x39   : > { %396 = shalt.err (!%p393_p8)
}
  0x3a   : > { %301 = dma.hbm_to_vmem [thread:$0]  (!%p583_p11), %s581_s7, 128, %s133_s14, %s122_s19  }
  0x3b   : > { %p666_p7 = scmp.ne.s32.totalorder %s660_s17, 0 }
  0x3c   : > { %p667_p10 = scmp.eq.s32.totalorder (!%p666_p7), %s506_s13, 0 }
  0x3d   : > { %141 = sbr.rel (%p666_p7) target bundleno = 96 (0x60), region = 28 }
  0x42   : > { %440 = dma.done.wait (%p667_p10), [#allocation3], 128   ;;  %p668_p6 = pmov %p667_p10 }
  0x43   : > { %s608_s5 = sand.u32 1, %s457_s10   ;;  %p669_p4 = scmp.ne.s32.totalorder %s658_s15, 0 }
  0x44   : > { %442 = vsyncadd (%p668_p6), [#allocation3], 4294967168  ;;  %s280_s6 = sshll.u32 %s608_s5, 3  ;;  %s148_s8 = scalar_lea.sflag [#allocation6], %s608_s5 }
  0x45   : > { %s151_s18 = scalar_lea.vmem [#allocation5], %s280_s6 }
  0x46   : > { %444 = dma.done.wait (%p669_p4), %s148_s8, 128  }
  0x47   : > { %446 = vsyncadd (%p669_p4), %s148_s8, 4294967168  ;;  %s171_s17 = scalar_lea.vmem [#allocation7], %s280_s6  ;;  %s283_s14 = sshll.u32 %s506_s13, 7  ;;  %v172_v0 = vld [vmem:[#allocation2] sm:$0xff]  ;;  %v173_v1 = vld [vmem:[%s151_s18] sm:$0xff] }
  0x48   : > { %s190_s7 = sshll.u32 %s171_s17, 4  ;;  %v174_v2 = vadd.f32 %v173_v1, %v172_v0  ;;  %s188_s22 = scalar_lea.hbm %s653_s2, %s283_s14  ;;  %s191_s7 = int_to_ptr.vmem [resolvable:$true] %s190_s7 }
  0x49   : > { %s177_s23 = scalar_lea.sflag [#allocation4], %s608_s5  ;;  %s397_s24 = scalar_lea.vmem %s191_s7, 128 }
  0x4a   : > { %175 = vst [vmem:[%s171_s17] sm:$0xff] %v174_v2  ;;  %p398_p8 = scmp.ne.s32.totalorder %s191_s7, %s397_s24  ;;  %p670_p9 = scmp.ne.s32.totalorder %s664_s29, 0 }
  0x4b   : > { %s469_s15 = smov [#allocation7]  }
  0x4c   : > { %p399_p11 = pnand %p398_p8, %p670_p9  ;;  %s401_s25 = sshll.u32 %s469_s15, 4  ;;  %s402_s25 = int_to_ptr.vmem [resolvable:$false] %s401_s25 }
  0x4d   : > { %s403_s26 = scalar_lea.vmem %s402_s25, 256  ;;  %p404_p1 = scmp.lt.s32.totalorder %s191_s7, %s402_s25 }
  0x4e   : > { %p400_p13 = pneg %p399_p11  ;;  %p405_p2 = scmp.lt.s32.totalorder %s403_s26, %s397_s24 }
  0x50   : > { %p406_p0 = por %p405_p2, %p404_p1 }
  0x52   : > { %p407_p3 = pnand %p406_p0, %p400_p13 }
  0x54   : > { %410 = shalt.err (!%p407_p3)
}
  0x55   : > { %s411_s13 = scalar_lea.hbm %s188_s22, 128  ;;  %s415_s3 = scalar_lea.hbm %s653_s2, 256 }
  0x56   : > { %p412_p12 = scmp.ne.s32.totalorder %s188_s22, %s411_s13  ;;  %p416_p10 = scmp.lt.s32.totalorder %s188_s22, %s653_s2 }
  0x57   : > { %p417_p6 = scmp.lt.s32.totalorder %s415_s3, %s411_s13 }
  0x58   : > { %p413_p5 = pnand %p412_p12, %p670_p9 }
  0x59   : > { %p418_p4 = por %p417_p6, %p416_p10 }
  0x5a   : > { %p414_p7 = pneg %p413_p5 }
  0x5c   : > { %p419_p8 = pnand %p418_p4, %p414_p7 }
  0x5e   : > { %422 = shalt.err (!%p419_p8)
}
  0x5f   : > { %292 = dma.vmem_to_hbm [thread:$0]  (%p670_p9), %s191_s7, 128, %s188_s22, %s177_s23  }
  0x60 PF: > { %s202_s6 = sand.u32 1, %s453_s9   ;;  %p671_p11 = scmp.ne.s32.totalorder %s659_s16, 0 }
  0x61   : > { %p672_p13 = scmp.ge.s32.totalorder %s465_s12, 2  ;;  %s203_s8 = scalar_lea.sflag [#allocation4], %s202_s6 }
  0x63   : > { %p303_p1 = pnand %p672_p13, %p671_p11 }
  0x65   : > { %p304_p2 = pneg %p303_p1 }
  0x67   : > { %448 = dma.done.wait (%p304_p2), %s203_s8, 128  }
  0x68   : > { %450 = vsyncadd (%p304_p2), %s203_s8, 4294967168  ;;  %p16_p0 = scmp.ge.s32.totalorder %s533_s20, 4   ;;  %s673_s9 = smov %s457_s10 }
  0x69   : > { %s674_s10 = smov %s461_s11  ;;  %s675_s11 = smov %s560_s28 }
  0x6a   : > { %s676_s12 = smov %s533_s20  ;;  %18 = sbr.rel (!%p16_p0) target bundleno = 6 (0x6), region = 78 }
  0x6f   :  { %208 = vsyncpa [#allocation3], 1 }
  0x70   :  { %210 = vsyncpa [#allocation3 + $0x1], 1 }
  0x71   :  { %211 = vsyncpa [#allocation6], 1 }
  0x72   :  { %213 = vsyncpa [#allocation6 + $0x1], 1 }
  0x73   :  { %214 = vsyncpa [#allocation4], 1 }
  0x74   :  { %216 = vsyncpa [#allocation4 + $0x1], 1 }

// kernel: tpu_custom_call.1
= control target key start
LH: loop header
LB: loop body
LE: loop exit
PB: predicated region body
PF: predicated region fallthrough
CT: control target
= control target key end

     0   :  { %s11164_s21 = smov 0   ;;  %s15334_s0 = inlined_call_operand.vmem [shape: bf16[2,552,4], index: 0, kind: input, shape index: {}]   ;;  %s15335_s1 = inlined_call_operand.vmem [shape: bf16[9,4,8], index: 1, kind: input, shape index: {}]   ;;  %s15336_s2 = inlined_call_operand.vmem [shape: f32[2,1,8], index: 2, kind: input, shape index: {}]   ;;  %s15337_s3 = inlined_call_operand.vmem [shape: f32[2,1,8], index: 3, kind: input, shape index: {}]   ;;  %s15338_s4 = inlined_call_operand.vmem [shape: f32[384,1], index: 4, kind: input, shape index: {}]   ;;  %s15339_s5 = inlined_call_operand.vmem [shape: f32[1,8], index: 5, kind: input, shape index: {}]   ;;  %s15340_s6 = inlined_call_operand.vmem [shape: bf16[2,480,8], index: 6, kind: output, shape index: {}]  }
   0x1 LB: > { %s9444_s22 = sadd.s32 4294967295, %s11126_s21   ;;  %p9448_p0 = scmp.ge.s32.totalorder %s11126_s21, 1  ;;  %s11126_s21 = sphi %s11164_s21, %s16_s21  }
   0x2   : > { %p228_p1 = scmp.lt.s32.totalorder %s11126_s21, 3 }
   0x4   : > { %p229_p2 = pnand %p9448_p0, %p228_p1 }
   0x6   : > { %232 = sbr.rel (%p229_p2) target bundleno = 1220 (0x4c4), region = 44 }
   0xb   : > { %v9451_v0 = vld [vmem:[%s15335_s1 + $0x2] sm:$0x3]  ;;  %vm834_vm0 = vcmask 1041408   ;;  %p264_p3 = scmp.lt.s32.totalorder %s9444_s22, 1  ;;  %v9543_v2 = vld [vmem:[%s15335_s1 + $0x4] sm:$0x3] }
   0xc   : > { %10825 = vmatprep.subr.msk.bf16.mxu0 %vm834_vm0, %v9451_v0  ;;  %10826 = vmatprep.subr.msk.bf16.mxu1 %vm834_vm0, %v9451_v0  ;;  %v836_v1 = vsel %vm834_vm0, %v9451_v0, 0  ;;  %v341_v3 = vld [vmem:[%s15335_s1] sm:$0x3]  ;;  %vm498_vm1 = vsmask.f32 7424  ;;  %vm743_vm2 = vcmask 31744  }
   0xd   : > { %10266 = vmatpush3.bf16.msra.mxu0 %v836_v1  ;;  %10824 = vmatpush3.bf16.msra.mxu1 %v836_v1  ;;  %s15815_s22 = smov (!%p264_p3, %s9444_s22), 1  ;;  %v1606_v8 = vsel %vm834_vm0, %v9543_v2, 0  ;;  %v1172_v16 = vsel %vm834_vm0, %v341_v3, 0  ;;  %v11234_v33 = vld [vmem:[%s15335_s1 + $0x8] sm:$0x3]  ;;  %vm1453_vm3 = vcmask 1046528  }
   0xe   : > { %10828 = vmatprep.subr.msk.bf16.mxu0 %vm834_vm0, %v9543_v2  ;;  %10827 = vmatprep.subr.msk.bf16.mxu1 %vm834_vm0, %v341_v3  ;;  %s10835_s29 = smul.u32 276, %s15815_s22  ;;  %v11253_v45 = vld [vmem:[%s15335_s1 + $0x6] sm:$0x3]  ;;  %vm9310_vm4 = vcmask 60416   ;;  %vm5975_vm5 = vcmask 64512  }
   0xf   : > { %s10836_s23 = smul.u32 240, %s15815_s22 }
  0x10   : > { %s11192_s8 = scalar_lea.vmem %s15334_s0, %s10835_s29  ;;  %s13590_s29 = scalar_lea.vmem %s15337_s3, %s15815_s22 }
  0x11   : > { %v281_v4 = vld [vmem:[%s11192_s8] sm:$0xf]  ;;  %v11196_v5 = vld [vmem:[%s11192_s8 + $0x4] sm:$0xf]  ;;  %v11202_v7 = vld [vmem:[%s11192_s8 + $0x8] sm:$0xff]   ;;  %s12159_s26 = scalar_lea.vmem %s15340_s6, %s10836_s23  ;;  %s13549_s23 = scalar_lea.vmem %s15336_s2, %s15815_s22 }
  0x12   : > { %v11199_v6 = vcombine.low %v281_v4, %v11196_v5  ;;  %v507_v11 = vshll.u32 %v11202_v7, 16  ;;  %v511_v12 = vshrl.u32 %v11202_v7, 16  ;;  %v11210_v13 = vld [vmem:[%s11192_s8 + $0x80] sm:$0xff]   ;;  %v11213_v14 = vld [vmem:[%s11192_s8 + $0x88] sm:$0xff]   ;;  %v11216_v15 = vld [vmem:[%s11192_s8 + $0x10] sm:$0xff]  }
  0x13   : > { %v627_v19 = vshll.u32 %v11210_v13, 16  ;;  %v631_v20 = vshrl.u32 %v11210_v13, 16  ;;  %v635_v21 = vshll.u32 %v11213_v14, 16  ;;  %v639_v22 = vshrl.u32 %v11213_v14, 16  ;;  %v10949_v24 = vld [vmem:[%s11192_s8 + $0x90] sm:$0xff]   ;;  %v11228_v28 = vld [vmem:[%s11192_s8 + $0x18] sm:$0xff]  }
  0x14   : > { %v500_v9 = vshrl.u32 %v11199_v6, 16  ;;  %v502_v10 = vshll.u32 %v11199_v6, 16  ;;  %v509_v18 = vrot.slane %v507_v11, 1  ;;  %v515_v23 = vshll.u32 %v11216_v15, 16  ;;  %v11240_v37 = vld [vmem:[%s11192_s8 + $0x98] sm:$0xff]   ;;  %v11243_v39 = vld [vmem:[%s11192_s8 + $0x20] sm:$0xff]  }
  0x15   : > { %v11225_v27 = vrot.slane %v627_v19, 1  ;;  %v637_v29 = vrot.slane %v635_v21, 1  ;;  %v643_v31 = vshll.u32 %v10949_v24, 16  ;;  %v519_v32 = vshrl.u32 %v11216_v15, 16  ;;  %v11248_v44 = vld [vmem:[%s11192_s8 + $0xa0] sm:$0xff]   ;;  %v11260_v50 = vld [vmem:[%s11192_s8 + $0x28] sm:$0xff]  }
  0x16   : > { %v504_v17 = vrot.slane %v502_v10, 1  ;;  %v513_v26 = vor.u32 %v511_v12, %v509_v18  ;;  %v517_v30 = vrot.slane %v515_v23, 1  ;;  %v523_v36 = vshll.u32 %v11228_v28, 16  ;;  %v11275_v62 = vld [vmem:[%s11192_s8 + $0xa8] sm:$0xff]   ;;  %v11285_v10 = vld [vmem:[%s11192_s8 + $0x30] sm:$0xff]   ;;  %v11297_v23 = vld [vmem:[%s11192_s8 + $0x38] sm:$0xff]  }
  0x17   : > { %v633_v35 = vor.u32 %v631_v20, %v11225_v27  ;;  %v647_v38 = vshrl.u32 %v10949_v24, 16  ;;  %v641_v40 = vor.u32 %v639_v22, %v637_v29  ;;  %v645_v42 = vrot.slane %v643_v31, 1  ;;  %v11288_v11 = vld [vmem:[%s11192_s8 + $0xb0] sm:$0xff]  }
  0x18   : > { %v505_v25 = vor.u32 %v504_v17, %v500_v9  ;;  %v518_v41 = vsel %vm498_vm1, %v513_v26, %v517_v30  ;;  %v521_v43 = vor.u32 %v519_v32, %v517_v30  ;;  %v525_v47 = vrot.slane %v523_v36, 1  ;;  %v11311_v36 = vld [vmem:[%s11192_s8 + $0x40] sm:$0xff]  }
  0x19   : > { %v638_v46 = vsel %vm498_vm1, %v633_v35, %v637_v29  ;;  %v651_v48 = vshll.u32 %v11240_v37, 16  ;;  %v527_v49 = vshrl.u32 %v11228_v28, 16  ;;  %v646_v51 = vsel %vm498_vm1, %v641_v40, %v645_v42 }
  0x1a   : > { %v510_v34 = vsel %vm498_vm1, %v505_v25, %v509_v18  ;;  %10299 = vmatprep.mubr.msk.bf16.mxu1 %vm743_vm2, %v638_v46  ;;  %v649_v52 = vor.u32 %v647_v38, %v645_v42  ;;  %v531_v53 = vshll.u32 %v11243_v39, 16  ;;  %v655_v54 = vshrl.u32 %v11240_v37, 16  ;;  %v11302_v25 = vld [vmem:[%s11192_s8 + $0xb8] sm:$0xff]   ;;  %v11314_v38 = vld [vmem:[%s11192_s8 + $0xc0] sm:$0xff]   ;;  %v11318_v42 = vld [vmem:[%s11192_s8 + $0x48] sm:$0xff]  }
  0x1b   : > { %10267 = vmatprep.mubr.msk.bf16.mxu0 %vm743_vm2, %v510_v34  ;;  %10300 = vmatmul.mubr.msk.bf16.vlgmr.msra.gmra.mxu1 %vm743_vm2, %v646_v51  ;;  %v526_v55 = vsel %vm498_vm1, %v521_v43, %v525_v47  ;;  %v653_v56 = vrot.slane %v651_v48, 1  ;;  %v529_v57 = vor.u32 %v527_v49, %v525_v47  ;;  %v659_v58 = vshll.u32 %v11248_v44, 16  ;;  %v11322_v49 = vld [vmem:[%s11192_s8 + $0xc8] sm:$0xff]  }
  0x1c   : > { %10268 = vmatmul.mubr.msk.bf16.vlgmr.msra.gmra.mxu0 %vm743_vm2, %v518_v41  ;;  %10328 = vmatpush3.bf16.msra.mxu1 %v1172_v16  ;;  %v533_v59 = vrot.slane %v531_v53, 1  ;;  %v535_v60 = vshrl.u32 %v11243_v39, 16  ;;  %v539_v61 = vshll.u32 %v11260_v50, 16  ;;  %v663_v2 = vshrl.u32 %v11248_v44, 16 }
  0x1d   : > { %10390 = vmatpush3.bf16.msra.mxu0 %v1606_v8  ;;  %10271 = vmatprep.mubr.msk.bf16.mxu0 %vm743_vm2, %v526_v55  ;;  %v654_v63 = vsel %vm498_vm1, %v649_v52, %v653_v56  ;;  %v657_v0 = vor.u32 %v655_v54, %v653_v56  ;;  %v661_v1 = vrot.slane %v659_v58, 1  ;;  %v667_v9 = vshll.u32 %v11275_v62, 16 }
  0x1e   : > { %10830 = vmatprep.subr.msk.bf16.mxu0 %vm834_vm0, %v11234_v33  ;;  %10829 = vmatprep.subr.msk.bf16.mxu1 %vm834_vm0, %v11253_v45  ;;  %v534_v3 = vsel %vm498_vm1, %v529_v57, %v533_v59  ;;  %v537_v4 = vor.u32 %v535_v60, %v533_v59  ;;  %v541_v8 = vrot.slane %v539_v61, 1  ;;  %v543_v17 = vshrl.u32 %v11260_v50, 16  ;;  %v11334_v60 = vld [vmem:[%s11192_s8 + $0x50] sm:$0xff]  }
  0x1f   : > { %10303 = vmatprep.mubr.msk.bf16.mxu1 %vm743_vm2, %v654_v63  ;;  %v662_v12 = vsel %vm498_vm1, %v657_v0, %v661_v1  ;;  %v665_v16 = vor.u32 %v663_v2, %v661_v1  ;;  %v671_v18 = vshrl.u32 %v11275_v62, 16  ;;  %v669_v20 = vrot.slane %v667_v9, 1  ;;  %v11341_v2 = vld [vmem:[%s11192_s8 + $0xd0] sm:$0xff]   ;;  %v11345_v9 = vld [vmem:[%s11192_s8 + $0x58] sm:$0xff]  }
  0x20   : > { %v542_v19 = vsel %vm498_vm1, %v537_v4, %v541_v8  ;;  %v547_v21 = vshll.u32 %v11285_v10, 16  ;;  %v675_v22 = vshll.u32 %v11288_v11, 16  ;;  %v551_v24 = vshrl.u32 %v11285_v10, 16 }
  0x21   : > { %v670_v26 = vsel %vm498_vm1, %v665_v16, %v669_v20  ;;  %v545_v29 = vor.u32 %v543_v17, %v541_v8  ;;  %v555_v32 = vshll.u32 %v11297_v23, 16  ;;  %v679_v34 = vshrl.u32 %v11288_v11, 16 }
  0x22   : > { %v549_v30 = vrot.slane %v547_v21, 1  ;;  %v677_v31 = vrot.slane %v675_v22, 1  ;;  %v683_v35 = vshll.u32 %v11302_v25, 16  ;;  %v673_v40 = vor.u32 %v671_v18, %v669_v20 }
  0x23   : > { %10304 = vmatmul.mubr.msk.bf16.gmra.mxu1 %vm743_vm2, %v662_v12  ;;  %v557_v43 = vrot.slane %v555_v32, 1  ;;  %v563_v48 = vshll.u32 %v11311_v36, 16  ;;  %v559_v52 = vshrl.u32 %v11297_v23, 16  ;;  %v691_v53 = vshll.u32 %v11314_v38, 16 }
  0x24   : > { %10272 = vmatmul.mubr.msk.bf16.gmra.mxu0 %vm743_vm2, %v534_v3  ;;  %10307 = vmatprep.mubr.msk.bf16.mxu1 %vm743_vm2, %v670_v26  ;;  %v553_v41 = vor.u32 %v551_v24, %v549_v30  ;;  %v681_v46 = vor.u32 %v679_v34, %v677_v31  ;;  %v685_v47 = vrot.slane %v683_v35, 1  ;;  %v550_v51 = vsel %vm498_vm1, %v545_v29, %v549_v30  ;;  %v11361_v34 = vld [vmem:[%s11192_s8 + $0x60] sm:$0xff]  }
  0x25   : > { %10275 = vmatprep.mubr.msk.bf16.mxu0 %vm743_vm2, %v542_v19  ;;  %v567_v55 = vshrl.u32 %v11311_v36, 16  ;;  %v571_v56 = vshll.u32 %v11318_v42, 16  ;;  %v678_v57 = vsel %vm498_vm1, %v673_v40, %v677_v31  ;;  %v687_v58 = vshrl.u32 %v11302_v25, 16  ;;  %v11350_v19 = vld [vmem:[%s11192_s8 + $0xd8] sm:$0xff]  }
  0x26   : > { %v558_v54 = vsel %vm498_vm1, %v553_v41, %v557_v43  ;;  %v695_v59 = vshrl.u32 %v11314_v38, 16  ;;  %v686_v61 = vsel %vm498_vm1, %v681_v46, %v685_v47  ;;  %v565_v63 = vrot.slane %v563_v48, 1  ;;  %v11369_v46 = vld [vmem:[%s11192_s8 + $0xe0] sm:$0xff]  }
  0x27   : > { %v699_v0 = vshll.u32 %v11322_v49, 16  ;;  %v561_v1 = vor.u32 %v559_v52, %v557_v43  ;;  %v693_v3 = vrot.slane %v691_v53, 1  ;;  %v573_v8 = vrot.slane %v571_v56, 1  ;;  %v11373_v52 = vld [vmem:[%s11192_s8 + $0x68] sm:$0xff]  }
  0x28   : > { %v569_v4 = vor.u32 %v567_v55, %v565_v63  ;;  %v689_v12 = vor.u32 %v687_v58, %v685_v47  ;;  %v579_v16 = vshll.u32 %v11334_v60, 16  ;;  %v575_v21 = vshrl.u32 %v11318_v42, 16 }
  0x29   : > { %v697_v17 = vor.u32 %v695_v59, %v693_v3  ;;  %v701_v18 = vrot.slane %v699_v0, 1  ;;  %v566_v20 = vsel %vm498_vm1, %v561_v1, %v565_v63  ;;  %v707_v22 = vshll.u32 %v11341_v2, 16 }
  0x2a   : > { %v574_v24 = vsel %vm498_vm1, %v569_v4, %v573_v8  ;;  %v583_v26 = vshrl.u32 %v11334_v60, 16  ;;  %v587_v29 = vshll.u32 %v11345_v9, 16  ;;  %v694_v30 = vsel %vm498_vm1, %v689_v12, %v693_v3  ;;  %v11389_v12 = vld [vmem:[%s11192_s8 + $0x70] sm:$0xff]  }
  0x2b   : > { %10308 = vmatmul.mubr.msk.bf16.gmra.mxu1 %vm743_vm2, %v678_v57  ;;  %v581_v31 = vrot.slane %v579_v16, 1  ;;  %v703_v32 = vshrl.u32 %v11322_v49, 16  ;;  %v702_v35 = vsel %vm498_vm1, %v697_v17, %v701_v18  ;;  %v711_v40 = vshrl.u32 %v11341_v2, 16  ;;  %v11378_v57 = vld [vmem:[%s11192_s8 + $0xe8] sm:$0xff]  }
  0x2c   : > { %10276 = vmatmul.mubr.msk.bf16.gmra.mxu0 %vm743_vm2, %v550_v51  ;;  %10311 = vmatprep.mubr.msk.bf16.mxu1 %vm743_vm2, %v686_v61  ;;  %v715_v41 = vshll.u32 %v11350_v19, 16  ;;  %v577_v43 = vor.u32 %v575_v21, %v573_v8  ;;  %v709_v47 = vrot.slane %v707_v22, 1  ;;  %v589_v51 = vrot.slane %v587_v29, 1  ;;  %v11397_v22 = vld [vmem:[%s11192_s8 + $0xf0] ss:$0 sps:$4 sm:$0x11]  }
  0x2d   : > { %10279 = vmatprep.mubr.msk.bf16.mxu0 %vm743_vm2, %v558_v54  ;;  %v585_v48 = vor.u32 %v583_v26, %v581_v31  ;;  %v705_v53 = vor.u32 %v703_v32, %v701_v18  ;;  %v595_v54 = vshll.u32 %v11361_v34, 16  ;;  %v591_v59 = vshrl.u32 %v11345_v9, 16  ;;  %v11401_v29 = vld [vmem:[%s11192_s8 + $0x78] sm:$0xff]  }
  0x2e   : > { %v713_v55 = vor.u32 %v711_v40, %v709_v47  ;;  %v717_v56 = vrot.slane %v715_v41, 1  ;;  %v582_v58 = vsel %vm498_vm1, %v577_v43, %v581_v31  ;;  %v723_v61 = vshll.u32 %v11369_v46, 16 }
  0x2f   : > { %v590_v63 = vsel %vm498_vm1, %v585_v48, %v589_v51  ;;  %v599_v0 = vshrl.u32 %v11361_v34, 16  ;;  %v603_v1 = vshll.u32 %v11373_v52, 16  ;;  %v710_v3 = vsel %vm498_vm1, %v705_v53, %v709_v47 }
  0x30   : > { %v597_v4 = vrot.slane %v595_v54, 1  ;;  %v719_v8 = vshrl.u32 %v11350_v19, 16  ;;  %v718_v16 = vsel %vm498_vm1, %v713_v55, %v717_v56  ;;  %v727_v17 = vshrl.u32 %v11369_v46, 16 }
  0x31   : > { %v731_v18 = vshll.u32 %v11378_v57, 16  ;;  %v725_v21 = vrot.slane %v723_v61, 1  ;;  %v605_v26 = vrot.slane %v603_v1, 1  ;;  %v607_v41 = vshrl.u32 %v11373_v52, 16 }
  0x32   : > { %v615_v47 = vshrl.u32 %v11389_v12, 16  ;;  %v619_v48 = vshll.u32 %v11401_v29, 16  ;;  %v735_v53 = vshrl.u32 %v11378_v57, 16  ;;  %v739_v54 = vshll.u32 %v11397_v22, 16 }
  0x33   : > { %10312 = vmatmul.mubr.msk.bf16.gmra.mxu1 %vm743_vm2, %v694_v30  ;;  %v721_v30 = vor.u32 %v719_v8, %v717_v56  ;;  %v729_v31 = vor.u32 %v727_v17, %v725_v21  ;;  %v733_v32 = vrot.slane %v731_v18, 1 }
  0x34   : > { %10280 = vmatmul.mubr.msk.bf16.gmra.mxu0 %vm743_vm2, %v566_v20  ;;  %10315 = vmatprep.mubr.msk.bf16.mxu1 %vm743_vm2, %v702_v35  ;;  %v593_v20 = vor.u32 %v591_v59, %v589_v51  ;;  %v611_v35 = vshll.u32 %v11389_v12, 16  ;;  %v621_v61 = vrot.slane %v619_v48, 1  ;;  %v741_v1 = vrot.slane %v739_v54, 1 }
  0x35   : > { %10283 = vmatprep.mubr.msk.bf16.mxu0 %vm743_vm2, %v574_v24  ;;  %v601_v24 = vor.u32 %v599_v0, %v597_v4  ;;  %v726_v51 = vsel %vm498_vm1, %v721_v30, %v725_v21  ;;  %v734_v55 = vsel %vm498_vm1, %v729_v31, %v733_v32  ;;  %v737_v0 = vor.u32 %v735_v53, %v733_v32  ;;  %v11440_v31 = vld [vmem:[%s15335_s1 + $0xa] sm:$0x3] }
  0x36   : > { %v598_v40 = vsel %vm498_vm1, %v593_v20, %v597_v4  ;;  %v613_v56 = vrot.slane %v611_v35, 1  ;;  %v623_v4 = vshrl.u32 %v11401_v29, 16  ;;  %v1455_v21 = vrot.slane %v11202_v7, 1 }
  0x37   : > { %v606_v43 = vsel %vm498_vm1, %v601_v24, %v605_v26  ;;  %v742_v17 = vsel %vm498_vm1, %v737_v0, %v741_v1  ;;  %v1457_v30 = vrot.slane %v11216_v15, 1  ;;  %v1461_v35 = vrot.slane %v11243_v39, 1  ;;  %v11101_v0 = vld [vmem:[%s11192_s8 + $0x90] sm:$0xff]   ;;  %v11102_v1 = vld [vmem:[%s11192_s8 + $0x88] sm:$0xff]  }
  0x38   : > { %v617_v59 = vor.u32 %v615_v47, %v613_v56  ;;  %v625_v18 = vor.u32 %v623_v4, %v621_v61  ;;  %v1469_v47 = vrot.slane %v11311_v36, 1  ;;  %v1477_v54 = vrot.slane %v11361_v34, 1 }
  0x39   : > { %v1493_v4 = vrot.slane %v11248_v44, 1  ;;  %v11105_v44 = vld [vmem:[%s11192_s8 + $0xa8] sm:$0xff]  }
  0x3a   : > { %v622_v8 = vsel %vm498_vm1, %v617_v59, %v621_v61  ;;  %v630_v24 = vsel %vm498_vm1, %v625_v18, %v11225_v27  ;;  %v1458_v27 = vsel %vm1453_vm3, %v1455_v21, %v1457_v30  ;;  %v1485_v59 = vrot.slane %v11210_v13, 1  ;;  %v11100_v61 = vld [vmem:[%s11192_s8 + $0x80] sm:$0xff]  }
  0x3b   : > { %10316 = vmatmul.mubr.msk.bf16.gmra.mxu1 %vm743_vm2, %v710_v3  ;;  %v1489_v13 = vrot.slane %v11101_v0, 1 }
  0x3c   : > { %10284 = vmatmul.mubr.msk.bf16.gmra.mxu0 %vm743_vm2, %v582_v58  ;;  %10319 = vmatprep.mubr.msk.bf16.mxu1 %vm743_vm2, %v718_v16  ;;  %v609_v58 = vor.u32 %v607_v41, %v605_v26  ;;  %v1465_v41 = vrot.slane %v11285_v10, 1 }
  0x3d   : > { %10287 = vmatprep.mubr.msk.bf16.mxu0 %vm743_vm2, %v590_v63  ;;  %v1447_v63 = vld [vmem:[%s11192_s8] sm:$0xe] }
  0x3e   : > { %v614_v3 = vsel %vm498_vm1, %v609_v58, %v613_v56  ;;  %v9544_v16 = vcombine.low %v1447_v63, %v11196_v5  ;;  %v2244_v5 = vsel %vm834_vm0, %v11253_v45, 0  ;;  %v3130_v45 = vsel %vm834_vm0, %v11234_v33, 0 }
  0x3f   : > { %v1481_v56 = vrot.slane %v11389_v12, 1 }
  0x40   : > { %v1454_v20 = vrot.slane %v9544_v16, 1  ;;  %v1495_v16 = vrot.slane %v11275_v62, 1 }
  0x42   : > { %v1456_v26 = vsel %vm1453_vm3, %v1454_v20, %v1455_v21  ;;  %v1496_v18 = vsel %vm1453_vm3, %v1493_v4, %v1495_v16  ;;  %v1497_v20 = vrot.slane %v11288_v11, 1  ;;  %v1499_v21 = vrot.slane %v11302_v25, 1 }
  0x43   : > { %10320 = vmatmul.mubr.msk.bf16.gmra.mxu1 %vm743_vm2, %v726_v51  ;;  %v1473_v51 = vrot.slane %v11334_v60, 1 }
  0x44   : > { %10288 = vmatmul.mubr.msk.bf16.gmra.mxu0 %vm743_vm2, %v598_v40  ;;  %10323 = vmatprep.mubr.msk.bf16.mxu1 %vm743_vm2, %v734_v55  ;;  %v1498_v62 = vsel %vm1453_vm3, %v1495_v16, %v1497_v20 }
  0x45   : > { %10291 = vmatprep.mubr.msk.bf16.mxu0 %vm743_vm2, %v606_v43 }
  0x4b   : > { %10324 = vmatmul.mubr.msk.bf16.gmra.mxu1 %vm743_vm2, %v742_v17  ;;  %v11104_v17 = vld [vmem:[%s11192_s8 + $0xa0] sm:$0xff]  }
  0x4c   : > { %10292 = vmatmul.mubr.msk.bf16.gmra.mxu0 %vm743_vm2, %v614_v3  ;;  %10329 = vmatprep.mubr.msk.bf16.mxu1 %vm743_vm2, %v11199_v6  ;;  %v1459_v6 = vrot.slane %v11228_v28, 1 }
  0x4d   : > { %10295 = vmatprep.mubr.msk.bf16.mxu0 %vm743_vm2, %v622_v8  ;;  %v11103_v8 = vld [vmem:[%s11192_s8 + $0x98] sm:$0xff]  }
  0x4e   : > { %v1460_v32 = vsel %vm1453_vm3, %v1457_v30, %v1459_v6  ;;  %v1462_v33 = vsel %vm1453_vm3, %v1459_v6, %v1461_v35  ;;  %v1505_v6 = vrot.slane %v11341_v2, 1 }
  0x53   : > { %10330 = vmatmul.mubr.msk.bf16.vlgmr.msra.gmra.mxu1 %vm743_vm2, %v11202_v7  ;;  %v11457_v7 = vld [vmem:[%s15335_s1 + $0xc] sm:$0x3] }
  0x54   : > { %10296 = vmatmul.mubr.msk.bf16.gmra.mxu0 %vm743_vm2, %v630_v24  ;;  %10452 = vmatpush3.bf16.msra.mxu1 %v2244_v5  ;;  %v1500_v24 = vsel %vm1453_vm3, %v1497_v20, %v1499_v21  ;;  %v1501_v5 = vrot.slane %v11314_v38, 1 }
  0x55   : > { %10391 = vmatprep.mubr.msk.bf16.mxu0 %vm743_vm2, %v1456_v26  ;;  %10333 = vmatprep.mubr.msk.bf16.mxu1 %vm743_vm2, %v11216_v15  ;;  %v1463_v15 = vrot.slane %v11260_v50, 1  ;;  %v1503_v26 = vrot.slane %v11322_v49, 1 }
  0x56   : > { %10831 = vmatprep.subr.msk.bf16.mxu1 %vm834_vm0, %v11440_v31 }
  0x57   : > { %v1464_v40 = vsel %vm1453_vm3, %v1461_v35, %v1463_v15  ;;  %v1504_v30 = vsel %vm1453_vm3, %v1501_v5, %v1503_v26 }
  0x5b   : > { %10334 = vmatmul.mubr.msk.bf16.gmra.mxu1 %vm743_vm2, %v11228_v28  ;;  %v1467_v28 = vrot.slane %v11297_v23, 1 }
  0x5c   : > { %10392 = vmatmul.mubr.msk.bf16.vlgmr.msra.gmra.mxu0 %vm743_vm2, %v1458_v27  ;;  %10337 = vmatprep.mubr.msk.bf16.mxu1 %vm743_vm2, %v11243_v39  ;;  %v1466_v39 = vsel %vm1453_vm3, %v1463_v15, %v1465_v41  ;;  %v11580_v27 = vld [vmem:[%s11192_s8 + $0x10] sm:$0xf]  ;;  %v11592_v15 = vld [vmem:[%s11192_s8 + $0x14] sm:$0xff]  }
  0x5d   : > { %10514 = vmatpush3.bf16.msra.mxu0 %v3130_v45  ;;  %10395 = vmatprep.mubr.msk.bf16.mxu0 %vm743_vm2, %v1460_v32  ;;  %v1468_v43 = vsel %vm1453_vm3, %v1465_v41, %v1467_v28  ;;  %v1506_v45 = vsel %vm1453_vm3, %v1503_v26, %v1505_v6  ;;  %v10987_v26 = vld [vmem:[%s11192_s8 + $0x3c] sm:$0xff]  }
  0x5e   : > { %10832 = vmatprep.subr.msk.bf16.mxu0 %vm834_vm0, %v11457_v7 }
  0x63   : > { %10338 = vmatmul.mubr.msk.bf16.gmra.mxu1 %vm743_vm2, %v11260_v50  ;;  %v1471_v50 = vrot.slane %v11318_v42, 1 }
  0x64   : > { %10396 = vmatmul.mubr.msk.bf16.gmra.mxu0 %vm743_vm2, %v1462_v33  ;;  %10341 = vmatprep.mubr.msk.bf16.mxu1 %vm743_vm2, %v11285_v10  ;;  %v1470_v10 = vsel %vm1453_vm3, %v1467_v28, %v1469_v47 }
  0x65   : > { %10399 = vmatprep.mubr.msk.bf16.mxu0 %vm743_vm2, %v1464_v40  ;;  %v1472_v48 = vsel %vm1453_vm3, %v1469_v47, %v1471_v50  ;;  %v10976_v47 = vld [vmem:[%s11192_s8 + $0xc] sm:$0xff]  }
  0x6b   : > { %10342 = vmatmul.mubr.msk.bf16.gmra.mxu1 %vm743_vm2, %v11297_v23  ;;  %v1475_v23 = vrot.slane %v11345_v9, 1 }
  0x6c   : > { %10400 = vmatmul.mubr.msk.bf16.gmra.mxu0 %vm743_vm2, %v1466_v39  ;;  %10345 = vmatprep.mubr.msk.bf16.mxu1 %vm743_vm2, %v11311_v36  ;;  %v1474_v36 = vsel %vm1453_vm3, %v1471_v50, %v1473_v51  ;;  %v1513_v50 = vrot.slane %v11397_v22, 1 }
  0x6d   : > { %10403 = vmatprep.mubr.msk.bf16.mxu0 %vm743_vm2, %v1468_v43  ;;  %v1476_v53 = vsel %vm1453_vm3, %v1473_v51, %v1475_v23  ;;  %v2803_v43 = vshll.u32 %v11592_v15, 16 }
  0x73   : > { %10346 = vmatmul.mubr.msk.bf16.gmra.mxu1 %vm743_vm2, %v11318_v42  ;;  %v1479_v42 = vrot.slane %v11373_v52, 1 }
  0x74   : > { %10404 = vmatmul.mubr.msk.bf16.gmra.mxu0 %vm743_vm2, %v1470_v10  ;;  %10349 = vmatprep.mubr.msk.bf16.mxu1 %vm743_vm2, %v11334_v60  ;;  %v1478_v60 = vsel %vm1453_vm3, %v1475_v23, %v1477_v54  ;;  %v2805_v10 = vrot.slane %v2803_v43, 1 }
  0x75   : > { %10407 = vmatprep.mubr.msk.bf16.mxu0 %vm743_vm2, %v1472_v48  ;;  %v1480_v55 = vsel %vm1453_vm3, %v1477_v54, %v1479_v42  ;;  %v11609_v48 = vld [vmem:[%s11192_s8 + $0x24] sm:$0xff]  }
  0x7b   : > { %10350 = vmatmul.mubr.msk.bf16.gmra.mxu1 %vm743_vm2, %v11345_v9  ;;  %v1483_v9 = vrot.slane %v11401_v29, 1 }
  0x7c   : > { %10408 = vmatmul.mubr.msk.bf16.gmra.mxu0 %vm743_vm2, %v1474_v36  ;;  %10353 = vmatprep.mubr.msk.bf16.mxu1 %vm743_vm2, %v11361_v34  ;;  %v1482_v34 = vsel %vm1453_vm3, %v1479_v42, %v1481_v56  ;;  %v2807_v36 = vshrl.u32 %v11592_v15, 16  ;;  %v10978_v42 = vld [vmem:[%s11192_s8 + $0x1c] sm:$0xff]  }
  0x7d   : > { %10411 = vmatprep.mubr.msk.bf16.mxu0 %vm743_vm2, %v1476_v53  ;;  %v1484_v58 = vsel %vm1453_vm3, %v1481_v56, %v1483_v9  ;;  %v10977_v53 = vld [vmem:[%s11192_s8 + $0x14] sm:$0xff]   ;;  %v11624_v56 = vld [vmem:[%s11192_s8 + $0x2c] sm:$0xff]  }
  0x83   : > { %10354 = vmatmul.mubr.msk.bf16.gmra.mxu1 %vm743_vm2, %v11373_v52  ;;  %v1487_v52 = vrot.slane %v11213_v14, 1  ;;  %v1491_v14 = vrot.slane %v11240_v37, 1 }
  0x84   : > { %10412 = vmatmul.mubr.msk.bf16.gmra.mxu0 %vm743_vm2, %v1478_v60  ;;  %10357 = vmatprep.mubr.msk.bf16.mxu1 %vm743_vm2, %v11389_v12  ;;  %v1486_v12 = vsel %vm1453_vm3, %v1483_v9, %v1485_v59  ;;  %v3623_v60 = vsel %vm834_vm0, %v11440_v31, 0  ;;  %v2809_v9 = vor.u32 %v2807_v36, %v2805_v10  ;;  %v2827_v31 = vshll.u32 %v11624_v56, 16 }
  0x85   : > { %10415 = vmatprep.mubr.msk.bf16.mxu0 %vm743_vm2, %v1480_v55  ;;  %v1488_v63 = vsel %vm1453_vm3, %v1485_v59, %v1487_v52  ;;  %v1492_v3 = vsel %vm1453_vm3, %v1489_v13, %v1491_v14  ;;  %v1494_v37 = vsel %vm1453_vm3, %v1491_v14, %v1493_v4 }
  0x86   : > { %v2829_v4 = vrot.slane %v2827_v31, 1 }
  0x8b   : > { %10358 = vmatmul.mubr.msk.bf16.gmra.mxu1 %vm743_vm2, %v11401_v29  ;;  %v1490_v29 = vsel %vm1453_vm3, %v1487_v52, %v1489_v13  ;;  %v11634_v52 = vld [vmem:[%s11192_s8 + $0x34] sm:$0xff]  }
  0x8c   : > { %10416 = vmatmul.mubr.msk.bf16.gmra.mxu0 %vm743_vm2, %v1482_v34  ;;  %10361 = vmatprep.mubr.msk.bf16.mxu1 %vm743_vm2, %v11100_v61  ;;  %v11630_v34 = vld [vmem:[%s15335_s1 + $0xe] sm:$0x3]  ;;  %v2835_v14 = vshll.u32 %v11634_v52, 16 }
  0x8d   : > { %10419 = vmatprep.mubr.msk.bf16.mxu0 %vm743_vm2, %v1484_v58 }
  0x93   : > { %10362 = vmatmul.mubr.msk.bf16.gmra.mxu1 %vm743_vm2, %v11102_v1  ;;  %v2831_v1 = vshrl.u32 %v11624_v56, 16 }
  0x94   : > { %10420 = vmatmul.mubr.msk.bf16.gmra.mxu0 %vm743_vm2, %v1486_v12  ;;  %10365 = vmatprep.mubr.msk.bf16.mxu1 %vm743_vm2, %v11101_v0  ;;  %v2823_v12 = vshrl.u32 %v11609_v48, 16  ;;  %v4261_v0 = vsel %vm834_vm0, %v11457_v7, 0 }
  0x95   : > { %10423 = vmatprep.mubr.msk.bf16.mxu0 %vm743_vm2, %v1488_v63  ;;  %v10981_v63 = vld [vmem:[%s11192_s8 + $0x24] sm:$0xff]   ;;  %v2833_v16 = vor.u32 %v2831_v1, %v2829_v4 }
  0x9b   : > { %10366 = vmatmul.mubr.msk.bf16.gmra.mxu1 %vm743_vm2, %v11103_v8  ;;  %v11656_v8 = vld [vmem:[%s11192_s8 + $0x3c] sm:$0xff]  }
  0x9c   : > { %10424 = vmatmul.mubr.msk.bf16.gmra.mxu0 %vm743_vm2, %v1490_v29  ;;  %10369 = vmatprep.mubr.msk.bf16.mxu1 %vm743_vm2, %v11104_v17  ;;  %v10983_v29 = vld [vmem:[%s11192_s8 + $0x2c] sm:$0xff]   ;;  %v2837_v17 = vrot.slane %v2835_v14, 1 }
  0x9d   : > { %10427 = vmatprep.mubr.msk.bf16.mxu0 %vm743_vm2, %v1492_v3  ;;  %v11652_v3 = vld [vmem:[%s15335_s1 + $0x10] sm:$0x3] }
  0xa3   : > { %10370 = vmatmul.mubr.msk.bf16.gmra.mxu1 %vm743_vm2, %v11105_v44  ;;  %v2839_v44 = vshrl.u32 %v11634_v52, 16 }
  0xa4   : > { %10428 = vmatmul.mubr.msk.bf16.gmra.mxu0 %vm743_vm2, %v1494_v37  ;;  %10373 = vmatprep.mubr.msk.bf16.mxu1 %vm743_vm2, %v11288_v11  ;;  %v1502_v11 = vsel %vm1453_vm3, %v1499_v21, %v1501_v5  ;;  %v11661_v37 = vld [vmem:[%s11192_s8 + $0x44] sm:$0xff]   ;;  %v10985_v21 = vld [vmem:[%s11192_s8 + $0x34] sm:$0xff]  }
  0xa5   : > { %10431 = vmatprep.mubr.msk.bf16.mxu0 %vm743_vm2, %v1496_v18  ;;  %v2843_v18 = vshll.u32 %v11656_v8, 16  ;;  %v2851_v5 = vshll.u32 %v11661_v37, 16 }
  0xab   : > { %10374 = vmatmul.mubr.msk.bf16.gmra.mxu1 %vm743_vm2, %v11302_v25  ;;  %v1507_v25 = vrot.slane %v11350_v19, 1 }
  0xac   : > { %10432 = vmatmul.mubr.msk.bf16.gmra.mxu0 %vm743_vm2, %v1498_v62  ;;  %10377 = vmatprep.mubr.msk.bf16.mxu1 %vm743_vm2, %v11314_v38  ;;  %v2579_v38 = vld [vmem:[%s11192_s8 + $0xc] sm:$0xf]  ;;  %v2838_v62 = vsel %vm498_vm1, %v2833_v16, %v2837_v17 }
  0xad   : > { %10435 = vmatprep.mubr.msk.bf16.mxu0 %vm743_vm2, %v1500_v24  ;;  %v1508_v32 = vsel %vm1453_vm3, %v1505_v6, %v1507_v25  ;;  %v9637_v35 = vcombine.low %v2579_v38, %v11580_v27  ;;  %v2847_v24 = vshrl.u32 %v11656_v8, 16  ;;  %v11678_v6 = vld [vmem:[%s11192_s8 + $0x4c] sm:$0xff]  }
  0xae   : > { %15389 = vst [vmem:[#allocation3_spill] sm:$0xff] %v11678_v6 }
  0xaf   : > { %v2798_v33 = vshll.u32 %v9637_v35, 16  ;;  %v2796_v28 = vshrl.u32 %v9637_v35, 16  ;;  %v2853_v35 = vrot.slane %v2851_v5, 1  ;;  %v11755_v5 = vld [vmem:[%s11192_s8 + $0x74] sm:$0xff]  }
  0xb0   : > { %15403 = vst [vmem:[#allocation17_spill] sm:$0xff] %v11755_v5 }
  0xb1   : > { %v2800_v39 = vrot.slane %v2798_v33, 1 }
  0xb3   : > { %10378 = vmatmul.mubr.msk.bf16.gmra.mxu1 %vm743_vm2, %v11322_v49  ;;  %v1509_v49 = vrot.slane %v11369_v46, 1 }
  0xb4   : > { %10436 = vmatmul.mubr.msk.bf16.gmra.mxu0 %vm743_vm2, %v1502_v11  ;;  %10381 = vmatprep.mubr.msk.bf16.mxu1 %vm743_vm2, %v11341_v2  ;;  %v1511_v2 = vrot.slane %v11378_v57, 1 }
  0xb5   : > { %10439 = vmatprep.mubr.msk.bf16.mxu0 %vm743_vm2, %v1504_v30  ;;  %v1510_v40 = vsel %vm1453_vm3, %v1507_v25, %v1509_v49  ;;  %v2845_v30 = vrot.slane %v2843_v18, 1  ;;  %v2841_v25 = vor.u32 %v2839_v44, %v2837_v17  ;;  %v11746_v18 = vld [vmem:[%s11192_s8 + $0x6c] sm:$0xff]  }
  0xb6   : > { %v1512_v41 = vsel %vm1453_vm3, %v1509_v49, %v1511_v2  ;;  %v1514_v23 = vsel %vm1453_vm3, %v1511_v2, %v1513_v50  ;;  %v11687_v49 = vld [vmem:[%s11192_s8 + $0x54] sm:$0xff]   ;;  %15401 = vst [vmem:[#allocation15_spill] sm:$0xff] %v11746_v18 }
  0xb7   : > { %15391 = vst [vmem:[#allocation5_spill] sm:$0xff] %v11687_v49 }
  0xbb   : > { %10382 = vmatmul.mubr.msk.bf16.gmra.mxu1 %vm743_vm2, %v11350_v19  ;;  %v11602_v19 = vld [vmem:[%s11192_s8 + $0x1c] sm:$0xff]  }
  0xbc   : > { %10440 = vmatmul.mubr.msk.bf16.gmra.mxu0 %vm743_vm2, %v1506_v45  ;;  %10385 = vmatprep.mubr.msk.bf16.mxu1 %vm743_vm2, %v11369_v46  ;;  %v2801_v46 = vor.u32 %v2800_v39, %v2796_v28  ;;  %v2811_v51 = vshll.u32 %v11602_v19, 16  ;;  %v2815_v54 = vshrl.u32 %v11602_v19, 16  ;;  %v2855_v28 = vshrl.u32 %v11661_v37, 16 }
  0xbd   : > { %10443 = vmatprep.mubr.msk.bf16.mxu0 %vm743_vm2, %v1508_v32  ;;  %v2849_v32 = vor.u32 %v2847_v24, %v2845_v30 }
  0xbe   : > { %v2806_v22 = vsel %vm498_vm1, %v2801_v46, %v2805_v10  ;;  %v2813_v55 = vrot.slane %v2811_v51, 1  ;;  %v2863_v46 = vshrl.u32 %v11678_v6, 16  ;;  %v2867_v10 = vshll.u32 %v11687_v49, 16  ;;  %v10991_v51 = vld [vmem:[%s11192_s8 + $0x4c] sm:$0xff]  }
  0xbf   : > { %v2854_v50 = vsel %vm498_vm1, %v2849_v32, %v2853_v35 }
  0xc0   : > { %v2817_v58 = vor.u32 %v2815_v54, %v2813_v55  ;;  %v2814_v61 = vsel %vm498_vm1, %v2809_v9, %v2813_v55  ;;  %v2857_v54 = vor.u32 %v2855_v28, %v2853_v35  ;;  %v2869_v55 = vrot.slane %v2867_v10, 1  ;;  %v11721_v9 = vld [vmem:[%s11192_s8 + $0x64] sm:$0xff]   ;;  %v10999_v10 = vld [vmem:[%s11192_s8 + $0x6c] sm:$0xff]  }
  0xc1   : > { %15397 = vst [vmem:[#allocation11_spill] sm:$0xff] %v11721_v9  ;;  %v2887_v35 = vshrl.u32 %v11721_v9, 16  ;;  %v10997_v28 = vld [vmem:[%s11192_s8 + $0x64] sm:$0xff]  }
  0xc3   : > { %10386 = vmatmul.mubr.msk.bf16.gmra.mxu1 %vm743_vm2, %v11378_v57  ;;  %v2819_v57 = vshll.u32 %v11609_v48, 16 }
  0xc4   : > { %10444 = vmatmul.mubr.msk.bf16.gmra.mxu0 %vm743_vm2, %v1510_v40  ;;  %10453 = vmatprep.mubr.msk.bf16.mxu1 %vm743_vm2, %v10976_v47  ;;  %v2859_v40 = vshll.u32 %v11678_v6, 16  ;;  %v10989_v47 = vld [vmem:[%s11192_s8 + $0x44] sm:$0xff]   ;;  %v11947_v6 = vld [vmem:[%s11192_s8 + $0xd4] sm:$0xff]  }
  0xc5   : > { %10447 = vmatprep.mubr.msk.bf16.mxu0 %vm743_vm2, %v1512_v41  ;;  %v2821_v59 = vrot.slane %v2819_v57, 1  ;;  %v2846_v41 = vsel %vm498_vm1, %v2841_v25, %v2845_v30  ;;  %v2891_v25 = vshll.u32 %v11746_v18, 16 }
  0xc7   : > { %v2822_v13 = vsel %vm498_vm1, %v2817_v58, %v2821_v59  ;;  %v2825_v7 = vor.u32 %v2823_v12, %v2821_v59  ;;  %v2871_v12 = vshrl.u32 %v11687_v49, 16 }
  0xc9   : > { %v2830_v20 = vsel %vm498_vm1, %v2825_v7, %v2829_v4  ;;  %v10995_v4 = vld [vmem:[%s11192_s8 + $0x5c] sm:$0xff]  }
  0xcb   : > { %10454 = vmatmul.mubr.msk.bf16.vlgmr.msra.gmra.mxu1 %vm743_vm2, %v10977_v53  ;;  %v2861_v53 = vrot.slane %v2859_v40, 1 }
  0xcc   : > { %10448 = vmatmul.mubr.msk.bf16.gmra.mxu0 %vm743_vm2, %v1514_v23  ;;  %10576 = vmatpush3.bf16.msra.mxu1 %v3623_v60 }
  0xcd   : > { %10515 = vmatprep.mubr.msk.bf16.mxu0 %vm743_vm2, %v2806_v22  ;;  %10457 = vmatprep.mubr.msk.bf16.mxu1 %vm743_vm2, %v10978_v42  ;;  %v11712_v22 = vld [vmem:[%s11192_s8 + $0x5c] sm:$0xff]   ;;  %v2865_v60 = vor.u32 %v2863_v46, %v2861_v53  ;;  %v2899_v46 = vshll.u32 %v11755_v5, 16 }
  0xce   : > { %10833 = vmatprep.subr.msk.bf16.mxu1 %vm834_vm0, %v11630_v34  ;;  %15395 = vst [vmem:[#allocation9_spill] sm:$0xff] %v11712_v22  ;;  %v2875_v31 = vshll.u32 %v11712_v22, 16  ;;  %v2879_v14 = vshrl.u32 %v11712_v22, 16  ;;  %v11017_v22 = vld [vmem:[%s11192_s8 + $0xb4] sm:$0xff]  }
  0xcf   : > { %v2870_v1 = vsel %vm498_vm1, %v2865_v60, %v2869_v55  ;;  %v11780_v60 = vld [vmem:[%s11192_s8 + $0x7c] sm:$0xff]  }
  0xd0   : > { %v2877_v17 = vrot.slane %v2875_v31, 1  ;;  %15407 = vst [vmem:[#allocation21_spill] sm:$0xff] %v11780_v60 }
  0xd3   : > { %10458 = vmatmul.mubr.msk.bf16.gmra.mxu1 %vm743_vm2, %v10981_v63 }
  0xd4   : > { %10516 = vmatmul.mubr.msk.bf16.vlgmr.msra.gmra.mxu0 %vm743_vm2, %v2814_v61  ;;  %10461 = vmatprep.mubr.msk.bf16.mxu1 %vm743_vm2, %v10983_v29  ;;  %v2862_v61 = vsel %vm498_vm1, %v2857_v54, %v2861_v53  ;;  %v2883_v29 = vshll.u32 %v11721_v9, 16  ;;  %v2893_v54 = vrot.slane %v2891_v25, 1  ;;  %v11001_v25 = vld [vmem:[%s11192_s8 + $0x74] sm:$0xff]   ;;  %v11919_v9 = vld [vmem:[%s11192_s8 + $0xc4] sm:$0xff]  }
  0xd5   : > { %10638 = vmatpush3.bf16.msra.mxu0 %v4261_v0  ;;  %10519 = vmatprep.mubr.msk.bf16.mxu0 %vm743_vm2, %v2822_v13  ;;  %v10993_v13 = vld [vmem:[%s11192_s8 + $0x54] sm:$0xff]  }
  0xd6   : > { %10834 = vmatprep.subr.msk.bf16.mxu0 %vm834_vm0, %v11652_v3  ;;  %v2885_v24 = vrot.slane %v2883_v29, 1 }
  0xdb   : > { %v11681_v38 = vpop.f32.mrf.mxu1  ;;  %10462 = vmatmul.mubr.msk.bf16.gmra.mxu1 %vm743_vm2, %v10985_v21 }
  0xdc   : > { %v11674_v11 = vpop.f32.mrf.mxu0  ;;  %10520 = vmatmul.mubr.msk.bf16.gmra.mxu0 %vm743_vm2, %v2830_v20  ;;  %15390 = vst [vmem:[#allocation4_spill] sm:$0xff] %v11681_v38  ;;  %10465 = vmatprep.mubr.msk.bf16.mxu1 %vm743_vm2, %v10987_v26  ;;  %v2873_v20 = vor.u32 %v2871_v12, %v2869_v55  ;;  %v2889_v55 = vor.u32 %v2887_v35, %v2885_v24  ;;  %v2911_v35 = vshrl.u32 %v11780_v60, 16 }
  0xdd   : > { %10523 = vmatprep.mubr.msk.bf16.mxu0 %vm743_vm2, %v2838_v62  ;;  %v11690_v2 = vpop.f32.mrf.mxu1  ;;  %v2881_v62 = vor.u32 %v2879_v14, %v2877_v17 }
  0xde   : > { %v11684_v45 = vpop.f32.mrf.mxu0  ;;  %15392 = vst [vmem:[#allocation6_spill] sm:$0xff] %v11690_v2  ;;  %v2878_v32 = vsel %vm498_vm1, %v2873_v20, %v2877_v17  ;;  %v2894_v17 = vsel %vm498_vm1, %v2889_v55, %v2893_v54  ;;  %v2903_v20 = vshrl.u32 %v11755_v5, 16  ;;  %v11019_v2 = vld [vmem:[%s11192_s8 + $0xbc] sm:$0xff]  }
  0xdf   : > { %v11697_v39 = vpop.f32.mrf.mxu1 }
  0xe0   : > { %v11692_v33 = vpop.f32.mrf.mxu0  ;;  %15393 = vst [vmem:[#allocation7_spill] sm:$0xff] %v11697_v39 }
  0xe1   : > { %v11706_v23 = vpop.f32.mrf.mxu1 }
  0xe2   : > { %v11699_v43 = vpop.f32.mrf.mxu0  ;;  %15394 = vst [vmem:[#allocation8_spill] sm:$0xff] %v11706_v23 }
  0xe3   : > { %v11715_v57 = vpop.f32.mrf.mxu1  ;;  %10466 = vmatmul.mubr.msk.bf16.gmra.mxu1 %vm743_vm2, %v10989_v47  ;;  %v2886_v47 = vsel %vm498_vm1, %v2881_v62, %v2885_v24 }
  0xe4   : > { %v11708_v36 = vpop.f32.mrf.mxu0  ;;  %10524 = vmatmul.mubr.msk.bf16.gmra.mxu0 %vm743_vm2, %v2846_v41  ;;  %15396 = vst [vmem:[#allocation10_spill] sm:$0xff] %v11715_v57  ;;  %10469 = vmatprep.mubr.msk.bf16.mxu1 %vm743_vm2, %v10991_v51 }
  0xe5   : > { %10527 = vmatprep.mubr.msk.bf16.mxu0 %vm743_vm2, %v2854_v50  ;;  %v11724_v58 = vpop.f32.mrf.mxu1  ;;  %v2895_v50 = vshrl.u32 %v11746_v18, 16 }
  0xe6   : > { %v11718_v42 = vpop.f32.mrf.mxu0  ;;  %15398 = vst [vmem:[#allocation12_spill] sm:$0xff] %v11724_v58 }
  0xe7   : > { %v11731_v63 = vpop.f32.mrf.mxu1  ;;  %v2897_v12 = vor.u32 %v2895_v50, %v2893_v54  ;;  %v11814_v54 = vld [vmem:[%s11192_s8 + $0x8c] sm:$0xff]  }
  0xe8   : > { %v11726_v59 = vpop.f32.mrf.mxu0  ;;  %15399 = vst [vmem:[#allocation13_spill] sm:$0xff] %v11731_v63  ;;  %15413 = vst [vmem:[#allocation27_spill] sm:$0xff] %v11814_v54  ;;  %v11015_v63 = vld [vmem:[%s11192_s8 + $0xac] sm:$0xff]  }
  0xe9   : > { %v11740_v7 = vpop.f32.mrf.mxu1 }
  0xea   : > { %v11733_v0 = vpop.f32.mrf.mxu0  ;;  %15400 = vst [vmem:[#allocation14_spill] sm:$0xff] %v11740_v7 }
  0xeb   : > { %v11749_v44 = vpop.f32.mrf.mxu1  ;;  %10470 = vmatmul.mubr.msk.bf16.gmra.mxu1 %vm743_vm2, %v10993_v13  ;;  %v2901_v13 = vrot.slane %v2899_v46, 1 }
  0xec   : > { %v11742_v16 = vpop.f32.mrf.mxu0  ;;  %10528 = vmatmul.mubr.msk.bf16.gmra.mxu0 %vm743_vm2, %v2862_v61  ;;  %15402 = vst [vmem:[#allocation16_spill] sm:$0xff] %v11749_v44  ;;  %10473 = vmatprep.mubr.msk.bf16.mxu1 %vm743_vm2, %v10995_v4  ;;  %v2907_v4 = vshll.u32 %v11780_v60, 16  ;;  %v11011_v44 = vld [vmem:[%s11192_s8 + $0x9c] sm:$0xff]  }
  0xed   : > { %10531 = vmatprep.mubr.msk.bf16.mxu0 %vm743_vm2, %v2870_v1  ;;  %v11758_v26 = vpop.f32.mrf.mxu1  ;;  %v11789_v1 = vld [vmem:[%s11192_s8 + $0x84] sm:$0xff]   ;;  %v2905_v55 = vor.u32 %v2903_v20, %v2901_v13 }
  0xee   : > { %v11752_v21 = vpop.f32.mrf.mxu0  ;;  %15404 = vst [vmem:[#allocation18_spill] sm:$0xff] %v11758_v26  ;;  %15409 = vst [vmem:[#allocation23_spill] sm:$0xff] %v11789_v1  ;;  %v11857_v26 = vld [vmem:[%s11192_s8 + $0xa4] sm:$0xff]  }
  0xef   : > { %v11765_v40 = vpop.f32.mrf.mxu1  ;;  %15421 = vst [vmem:[#allocation35_spill] sm:$0xff] %v11857_v26 }
  0xf0   : > { %v11760_v30 = vpop.f32.mrf.mxu0  ;;  %15405 = vst [vmem:[#allocation19_spill] sm:$0xff] %v11765_v40 }
  0xf1   : > { %v11774_v51 = vpop.f32.mrf.mxu1 }
  0xf2   : > { %v11767_v41 = vpop.f32.mrf.mxu0  ;;  %15406 = vst [vmem:[#allocation20_spill] sm:$0xff] %v11774_v51  ;;  %v11007_v51 = vld [vmem:[%s11192_s8 + $0x8c] sm:$0xff]  }
  0xf3   : > { %v11783_v31 = vpop.f32.mrf.mxu1  ;;  %10474 = vmatmul.mubr.msk.bf16.gmra.mxu1 %vm743_vm2, %v10997_v28  ;;  %v2915_v28 = vshll.u32 %v11789_v1, 16 }
  0xf4   : > { %v11776_v53 = vpop.f32.mrf.mxu0  ;;  %10532 = vmatmul.mubr.msk.bf16.gmra.mxu0 %vm743_vm2, %v2878_v32  ;;  %15408 = vst [vmem:[#allocation22_spill] sm:$0xff] %v11783_v31  ;;  %10477 = vmatprep.mubr.msk.bf16.mxu1 %vm743_vm2, %v10999_v10  ;;  %v2902_v32 = vsel %vm498_vm1, %v2897_v12, %v2901_v13  ;;  %v2909_v10 = vrot.slane %v2907_v4, 1  ;;  %v11823_v31 = vld [vmem:[%s11192_s8 + $0x94] sm:$0xff]  }
  0xf5   : > { %10535 = vmatprep.mubr.msk.bf16.mxu0 %vm743_vm2, %v2886_v47  ;;  %v11792_v14 = vpop.f32.mrf.mxu1  ;;  %v11003_v47 = vld [vmem:[%s11192_s8 + $0x7c] sm:$0xff]   ;;  %15415 = vst [vmem:[#allocation29_spill] sm:$0xff] %v11823_v31 }
  0xf6   : > { %v11786_v61 = vpop.f32.mrf.mxu0  ;;  %15410 = vst [vmem:[#allocation24_spill] sm:$0xff] %v11792_v14  ;;  %v2913_v14 = vor.u32 %v2911_v35, %v2909_v10  ;;  %v2910_v20 = vsel %vm498_vm1, %v2905_v55, %v2909_v10  ;;  %v11005_v35 = vld [vmem:[%s11192_s8 + $0x84] sm:$0xff]   ;;  %v11848_v55 = vld [vmem:[%s11192_s8 + $0x9c] sm:$0xff]  }
  0xf7   : > { %v11799_v62 = vpop.f32.mrf.mxu1  ;;  %15419 = vst [vmem:[#allocation33_spill] sm:$0xff] %v11848_v55 }
  0xf8   : > { %v11794_v29 = vpop.f32.mrf.mxu0  ;;  %15411 = vst [vmem:[#allocation25_spill] sm:$0xff] %v11799_v62 }
  0xf9   : > { %v11808_v50 = vpop.f32.mrf.mxu1 }
  0xfa   : > { %v11801_v24 = vpop.f32.mrf.mxu0  ;;  %15412 = vst [vmem:[#allocation26_spill] sm:$0xff] %v11808_v50  ;;  %v2917_v50 = vrot.slane %v2915_v28, 1 }
  0xfb   : > { %v11817_v12 = vpop.f32.mrf.mxu1  ;;  %10478 = vmatmul.mubr.msk.bf16.gmra.mxu1 %vm743_vm2, %v11001_v25  ;;  %v2919_v25 = vshrl.u32 %v11789_v1, 16 }
  0xfc   : > { %v11810_v46 = vpop.f32.mrf.mxu0  ;;  %10536 = vmatmul.mubr.msk.bf16.gmra.mxu0 %vm743_vm2, %v2894_v17  ;;  %15414 = vst [vmem:[#allocation28_spill] sm:$0xff] %v11817_v12  ;;  %10481 = vmatprep.mubr.msk.bf16.mxu1 %vm743_vm2, %v11003_v47  ;;  %v2923_v17 = vshll.u32 %v11814_v54, 16  ;;  %v2918_v28 = vsel %vm498_vm1, %v2913_v14, %v2917_v50  ;;  %v2927_v47 = vshrl.u32 %v11814_v54, 16 }
  0xfd   : > { %10539 = vmatprep.mubr.msk.bf16.mxu0 %vm743_vm2, %v2902_v32  ;;  %v11826_v4 = vpop.f32.mrf.mxu1 }
  0xfe   : > { %v11820_v62 = vpop.f32.mrf.mxu0  ;;  %15416 = vst [vmem:[#allocation30_spill] sm:$0xff] %v11826_v4  ;;  %v2931_v4 = vshll.u32 %v11823_v31, 16  ;;  %v2925_v10 = vrot.slane %v2923_v17, 1 }
  0xff   : > { %v11833_v32 = vpop.f32.mrf.mxu1 }
 0x100   : > { %v11828_v13 = vpop.f32.mrf.mxu0  ;;  %15417 = vst [vmem:[#allocation31_spill] sm:$0xff] %v11833_v32  ;;  %v2921_v32 = vor.u32 %v2919_v25, %v2917_v50  ;;  %v2929_v1 = vor.u32 %v2927_v47, %v2925_v10 }
 0x101   : > { %v11842_v60 = vpop.f32.mrf.mxu1 }
 0x102   : > { %v11835_v12 = vpop.f32.mrf.mxu0  ;;  %15418 = vst [vmem:[#allocation32_spill] sm:$0xff] %v11842_v60  ;;  %v2933_v60 = vrot.slane %v2931_v4, 1  ;;  %v2926_v25 = vsel %vm498_vm1, %v2921_v32, %v2925_v10  ;;  %v11009_v4 = vld [vmem:[%s11192_s8 + $0x94] sm:$0xff]   ;;  %v11882_v10 = vld [vmem:[%s11192_s8 + $0xac] sm:$0xff]  }
 0x103   : > { %v11851_v14 = vpop.f32.mrf.mxu1  ;;  %10482 = vmatmul.mubr.msk.bf16.gmra.mxu1 %vm743_vm2, %v11005_v35  ;;  %v2935_v35 = vshrl.u32 %v11823_v31, 16  ;;  %15425 = vst [vmem:[#allocation39_spill] sm:$0xff] %v11882_v10 }
 0x104   : > { %v11844_v40 = vpop.f32.mrf.mxu0  ;;  %10540 = vmatmul.mubr.msk.bf16.gmra.mxu0 %vm743_vm2, %v2910_v20  ;;  %15420 = vst [vmem:[#allocation34_spill] sm:$0xff] %v11851_v14  ;;  %10485 = vmatprep.mubr.msk.bf16.mxu1 %vm743_vm2, %v11007_v51  ;;  %v2939_v20 = vshll.u32 %v11848_v55, 16  ;;  %v2934_v47 = vsel %vm498_vm1, %v2929_v1, %v2933_v60  ;;  %v2943_v51 = vshrl.u32 %v11848_v55, 16 }
 0x105   : > { %10543 = vmatprep.mubr.msk.bf16.mxu0 %vm743_vm2, %v2918_v28  ;;  %v11860_v17 = vpop.f32.mrf.mxu1 }
 0x106   : > { %v11854_v54 = vpop.f32.mrf.mxu0  ;;  %15422 = vst [vmem:[#allocation36_spill] sm:$0xff] %v11860_v17  ;;  %v2947_v17 = vshll.u32 %v11857_v26, 16  ;;  %v2941_v32 = vrot.slane %v2939_v20, 1 }
 0x107   : > { %v11867_v28 = vpop.f32.mrf.mxu1 }
 0x108   : > { %v11862_v50 = vpop.f32.mrf.mxu0  ;;  %15423 = vst [vmem:[#allocation37_spill] sm:$0xff] %v11867_v28  ;;  %v2937_v28 = vor.u32 %v2935_v35, %v2933_v60  ;;  %v2945_v31 = vor.u32 %v2943_v51, %v2941_v32  ;;  %v2949_v18 = vrot.slane %v2947_v17, 1  ;;  %v2955_v60 = vshll.u32 %v11882_v10, 16  ;;  %v11013_v51 = vld [vmem:[%s11192_s8 + $0xa4] sm:$0xff]  }
 0x109   : > { %v11876_v7 = vpop.f32.mrf.mxu1 }
 0x10a   : > { %v11869_v14 = vpop.f32.mrf.mxu0  ;;  %15424 = vst [vmem:[#allocation38_spill] sm:$0xff] %v11876_v7  ;;  %v11889_v7 = vld [vmem:[%s11192_s8 + $0xb4] sm:$0xff]   ;;  %v2942_v35 = vsel %vm498_vm1, %v2937_v28, %v2941_v32  ;;  %v2950_v17 = vsel %vm498_vm1, %v2945_v31, %v2949_v18  ;;  %v2957_v28 = vrot.slane %v2955_v60, 1  ;;  %v11912_v32 = vld [vmem:[%s11192_s8 + $0xbc] sm:$0xff]  }
 0x10b   : > { %v10325_v1 = vpop.f32.mrf.mxu1  ;;  %10486 = vmatmul.mubr.msk.bf16.gmra.mxu1 %vm743_vm2, %v11009_v4  ;;  %15426 = vst [vmem:[#allocation40_spill] sm:$0xff] %v11889_v7  ;;  %v2951_v4 = vshrl.u32 %v11857_v26, 16  ;;  %15429 = vst [vmem:[#allocation43_spill] sm:$0xff] %v11912_v32 }
 0x10c   : > { %v11878_v5 = vpop.f32.mrf.mxu0  ;;  %10544 = vmatmul.mubr.msk.bf16.gmra.mxu0 %vm743_vm2, %v2926_v25  ;;  %10489 = vmatprep.mubr.msk.bf16.mxu1 %vm743_vm2, %v11011_v44  ;;  %v2959_v44 = vshrl.u32 %v11882_v10, 16 }
 0x10d   : > { %10547 = vmatprep.mubr.msk.bf16.mxu0 %vm743_vm2, %v2934_v47  ;;  %v11892_v25 = vpop.f32.mrf.mxu1 }
 0x10e   : > { %v11886_v55 = vpop.f32.mrf.mxu0  ;;  %15427 = vst [vmem:[#allocation41_spill] sm:$0xff] %v11892_v25  ;;  %v2963_v25 = vshll.u32 %v11889_v7, 16  ;;  %v2961_v10 = vor.u32 %v2959_v44, %v2957_v28 }
 0x10f   : > { %v10326_v47 = vpop.f32.mrf.mxu1 }
 0x110   : > { %v11894_v20 = vpop.f32.mrf.mxu0  ;;  %v2953_v47 = vor.u32 %v2951_v4, %v2949_v18  ;;  %v2965_v23 = vrot.slane %v2963_v25, 1  ;;  %v2971_v18 = vshll.u32 %v11912_v32, 16 }
 0x111   : > { %v11906_v58 = vpop.f32.mrf.mxu1 }
 0x112   : > { %v11899_v1 = vpop.f32.mrf.mxu0  ;;  %15428 = vst [vmem:[#allocation42_spill] sm:$0xff] %v11906_v58 }
 0x113   : > { %v10331_v26 = vpop.f32.mrf.mxu1  ;;  %10490 = vmatmul.mubr.msk.bf16.gmra.mxu1 %vm743_vm2, %v11013_v51  ;;  %v2958_v51 = vsel %vm498_vm1, %v2953_v47, %v2957_v28  ;;  %v2973_v28 = vrot.slane %v2971_v18, 1  ;;  %v11939_v47 = vld [vmem:[%s11192_s8 + $0xcc] sm:$0xff]  }
 0x114   : > { %v11908_v57 = vpop.f32.mrf.mxu0  ;;  %10548 = vmatmul.mubr.msk.bf16.gmra.mxu0 %vm743_vm2, %v2942_v35  ;;  %v1217_v58 = vadd.f32 %v10331_v26, %v11674_v11  ;;  %10493 = vmatprep.mubr.msk.bf16.mxu1 %vm743_vm2, %v11015_v63  ;;  %v2966_v11 = vsel %vm498_vm1, %v2961_v10, %v2965_v23  ;;  %v2975_v63 = vshrl.u32 %v11912_v32, 16  ;;  %v2979_v26 = vshll.u32 %v11919_v9, 16  ;;  %15430 = vst [vmem:[#allocation44_spill] sm:$0xff] %v11939_v47 }
 0x115   : > { %10551 = vmatprep.mubr.msk.bf16.mxu0 %vm743_vm2, %v2950_v17  ;;  %v1208_v60 = vpop.f32.mrf.mxu1  ;;  %v2967_v17 = vshrl.u32 %v11889_v7, 16 }
 0x116   : > { %v11916_v31 = vpop.f32.mrf.mxu0  ;;  %v1209_v4 = vadd.f32 %v1208_v60, %v11684_v45  ;;  %v2981_v49 = vrot.slane %v2979_v26, 1  ;;  %v2995_v26 = vshll.u32 %v11947_v6, 16 }
 0x117   : > { %v10332_v25 = vpop.f32.mrf.mxu1  ;;  %v2969_v10 = vor.u32 %v2967_v17, %v2965_v23  ;;  %v2987_v23 = vshll.u32 %v11939_v47, 16 }
 0x118   : > { %v11923_v35 = vpop.f32.mrf.mxu0  ;;  %v1220_v39 = vadd.f32 %v10332_v25, %v11692_v33  ;;  %v2977_v25 = vor.u32 %v2975_v63, %v2973_v28 }
 0x119   : > { %v1211_v38 = vpop.f32.mrf.mxu1  ;;  %v2974_v17 = vsel %vm498_vm1, %v2969_v10, %v2973_v28  ;;  %v2989_v28 = vrot.slane %v2987_v23, 1  ;;  %v11969_v10 = vld [vmem:[%s11192_s8 + $0xdc] sm:$0xff]  }
 0x11a   : > { %v11929_v44 = vpop.f32.mrf.mxu0  ;;  %v1212_v60 = vadd.f32 %v1211_v38, %v11699_v43  ;;  %15432 = vst [vmem:[#allocation46_spill] sm:$0xff] %v11969_v10 }
 0x11b   : > { %v10335_v32 = vpop.f32.mrf.mxu1  ;;  %10494 = vmatmul.mubr.msk.bf16.gmra.mxu1 %vm743_vm2, %v11017_v22 }
 0x11c   : > { %v10393_v45 = vpop.f32.mrf.mxu0  ;;  %10552 = vmatmul.mubr.msk.bf16.gmra.mxu0 %vm743_vm2, %v2958_v51  ;;  %v1233_v18 = vadd.f32 %v10335_v32, %v11708_v36  ;;  %10497 = vmatprep.mubr.msk.bf16.mxu1 %vm743_vm2, %v11019_v2  ;;  %v11021_v32 = vld [vmem:[%s11192_s8 + $0xc4] sm:$0xff]   ;;  %v2991_v2 = vshrl.u32 %v11939_v47, 16 }
 0x11d   : > { %v11942_v7 = vadd.f32 %v10393_v45, %v1217_v58  ;;  %10555 = vmatprep.mubr.msk.bf16.mxu0 %vm743_vm2, %v2966_v11  ;;  %v1224_v38 = vpop.f32.mrf.mxu1  ;;  %v2983_v11 = vshrl.u32 %v11919_v9, 16 }
 0x11e   : > { %v1642_v33 = vpop.f32.mrf.mxu0  ;;  %v1225_v58 = vadd.f32 %v1224_v38, %v11718_v42 }
 0x11f   : > { %v11950_v51 = vadd.f32 %v1642_v33, %v1209_v4  ;;  %v10336_v63 = vpop.f32.mrf.mxu1  ;;  %v2982_v4 = vsel %vm498_vm1, %v2977_v25, %v2981_v49  ;;  %v2985_v47 = vor.u32 %v2983_v11, %v2981_v49 }
 0x120   : > { %v10394_v43 = vpop.f32.mrf.mxu0  ;;  %v1236_v45 = vadd.f32 %v10336_v63, %v11726_v59  ;;  %v2997_v63 = vrot.slane %v2995_v26, 1 }
 0x121   : > { %v11955_v22 = vadd.f32 %v10394_v43, %v1220_v39  ;;  %v11023_v39 = vld [vmem:[%s11192_s8 + $0xcc] sm:$0xff]   ;;  %v1227_v42 = vpop.f32.mrf.mxu1 }
 0x122   : > { %v1645_v36 = vpop.f32.mrf.mxu0  ;;  %v1228_v43 = vadd.f32 %v1227_v42, %v11733_v0 }
 0x123   : > { %15431 = vst [vmem:[#allocation45_spill] sm:$0xff] %v11955_v22  ;;  %v11964_v33 = vadd.f32 %v1645_v36, %v1212_v60  ;;  %v10339_v22 = vpop.f32.mrf.mxu1  ;;  %10498 = vmatmul.mubr.msk.bf16.gmra.mxu1 %vm743_vm2, %v11021_v32  ;;  %v2993_v60 = vor.u32 %v2991_v2, %v2989_v28  ;;  %v11977_v36 = vld [vmem:[%s11192_s8 + $0xe4] sm:$0xff]   ;;  %v2999_v2 = vshrl.u32 %v11947_v6, 16 }
 0x124   : > { %v10397_v38 = vpop.f32.mrf.mxu0  ;;  %10556 = vmatmul.mubr.msk.bf16.gmra.mxu0 %vm743_vm2, %v2974_v17  ;;  %15433 = vst [vmem:[#allocation47_spill] sm:$0xff] %v11977_v36  ;;  %v1249_v23 = vadd.f32 %v10339_v22, %v11742_v16  ;;  %10501 = vmatprep.mubr.msk.bf16.mxu1 %vm743_vm2, %v11023_v39  ;;  %v3007_v39 = vshrl.u32 %v11969_v10, 16  ;;  %v3011_v42 = vshll.u32 %v11977_v36, 16 }
 0x125   : > { %v11972_v25 = vadd.f32 %v10397_v38, %v1233_v18  ;;  %10559 = vmatprep.mubr.msk.bf16.mxu0 %vm743_vm2, %v2982_v4  ;;  %v1240_v0 = vpop.f32.mrf.mxu1  ;;  %v3003_v18 = vshll.u32 %v11969_v10, 16  ;;  %v2990_v4 = vsel %vm498_vm1, %v2985_v47, %v2989_v28  ;;  %v2998_v22 = vsel %vm498_vm1, %v2993_v60, %v2997_v63  ;;  %v11034_v28 = vld [vmem:[%s11192_s8 + $0xec] sm:$0xff]  }
 0x126   : > { %v1658_v59 = vpop.f32.mrf.mxu0  ;;  %v1241_v11 = vadd.f32 %v1240_v0, %v11752_v21  ;;  %v11027_v21 = vld [vmem:[%s11192_s8 + $0xdc] sm:$0xff]   ;;  %v3001_v60 = vor.u32 %v2999_v2, %v2997_v63  ;;  %v3019_v2 = vshll.u32 %v11034_v28, 16 }
 0x127   : > { %v11980_v17 = vadd.f32 %v1658_v59, %v1225_v58  ;;  %v10340_v26 = vpop.f32.mrf.mxu1  ;;  %v11025_v58 = vld [vmem:[%s11192_s8 + $0xd4] sm:$0xff]   ;;  %v3005_v47 = vrot.slane %v3003_v18, 1 }
 0x128   : > { %v10398_v49 = vpop.f32.mrf.mxu0  ;;  %v1252_v38 = vadd.f32 %v10340_v26, %v11760_v30  ;;  %v3013_v26 = vrot.slane %v3011_v42, 1  ;;  %v3465_v42 = vld [vmem:[%s11192_s8 + $0xc] sm:$0xe] }
 0x129   : > { %v11985_v32 = vadd.f32 %v10398_v49, %v1236_v45  ;;  %v1243_v45 = vpop.f32.mrf.mxu1 }
 0x12a   : > { %v1661_v16 = vpop.f32.mrf.mxu0  ;;  %v1244_v49 = vadd.f32 %v1243_v45, %v11767_v41 }
 0x12b   : > { %15434 = vst [vmem:[#allocation48_spill] sm:$0xff] %v11985_v32  ;;  %v11994_v59 = vadd.f32 %v1661_v16, %v1228_v43  ;;  %v10343_v10 = vpop.f32.mrf.mxu1  ;;  %10502 = vmatmul.mubr.msk.bf16.gmra.mxu1 %vm743_vm2, %v11025_v58  ;;  %v3009_v43 = vor.u32 %v3007_v39, %v3005_v47  ;;  %v12005_v16 = vld [vmem:[%s11192_s8 + $0xf4] sm:$0xff]   ;;  %v3006_v39 = vsel %vm498_vm1, %v3001_v60, %v3005_v47  ;;  %v3021_v60 = vrot.slane %v3019_v2, 1 }
 0x12c   : > { %v10401_v0 = vpop.f32.mrf.mxu0  ;;  %10560 = vmatmul.mubr.msk.bf16.gmra.mxu0 %vm743_vm2, %v2990_v4  ;;  %v1265_v18 = vadd.f32 %v10343_v10, %v11776_v53  ;;  %10505 = vmatprep.mubr.msk.bf16.mxu1 %vm743_vm2, %v11027_v21  ;;  %v11029_v53 = vld [vmem:[%s11192_s8 + $0xe4] sm:$0xff]   ;;  %v3027_v21 = vshll.u32 %v12005_v16, 16  ;;  %v3472_v2 = vrot.slane %v11592_v15, 1 }
 0x12d   : > { %v12000_v32 = vadd.f32 %v10401_v0, %v1249_v23  ;;  %10563 = vmatprep.mubr.msk.bf16.mxu0 %vm743_vm2, %v2998_v22  ;;  %v1256_v41 = vpop.f32.mrf.mxu1  ;;  %v3015_v23 = vshrl.u32 %v11977_v36, 16  ;;  %v3014_v10 = vsel %vm498_vm1, %v3009_v43, %v3013_v26  ;;  %v11031_v36 = vld [vmem:[%s11192_s8 + $0xec] sm:$0xff]  }
 0x12e   : > { %v1674_v30 = vpop.f32.mrf.mxu0  ;;  %v1257_v58 = vadd.f32 %v1256_v41, %v11786_v61  ;;  %v9699_v41 = vcombine.low %v3465_v42, %v11580_v27 }
 0x12f   : > { %v12008_v4 = vadd.f32 %v1674_v30, %v1241_v11  ;;  %v10344_v45 = vpop.f32.mrf.mxu1  ;;  %v3023_v11 = vshrl.u32 %v11034_v28, 16  ;;  %v3017_v47 = vor.u32 %v3015_v23, %v3013_v26  ;;  %v11037_v28 = vld [vmem:[%s11192_s8 + $0xfc] ss:$0 sps:$4 sm:$0x11]  }
 0x130   : > { %v10402_v63 = vpop.f32.mrf.mxu0  ;;  %v1268_v30 = vadd.f32 %v10344_v45, %v11794_v29  ;;  %v3029_v45 = vrot.slane %v3027_v21, 1  ;;  %v3471_v23 = vrot.slane %v9699_v41, 1 }
 0x131   : > { %15435 = vst [vmem:[#allocation49_spill] sm:$0xff] %v12008_v4  ;;  %v12013_v22 = vadd.f32 %v10402_v63, %v1252_v38  ;;  %v1259_v61 = vpop.f32.mrf.mxu1 }
 0x132   : > { %v1677_v0 = vpop.f32.mrf.mxu0  ;;  %v1260_v63 = vadd.f32 %v1259_v61, %v11801_v24  ;;  %v3473_v15 = vsel %vm1453_vm3, %v3471_v23, %v3472_v2 }
 0x133   : > { %15436 = vst [vmem:[#allocation50_spill] sm:$0xff] %v12013_v22  ;;  %v12021_v4 = vadd.f32 %v1677_v0, %v1244_v49  ;;  %v10347_v43 = vpop.f32.mrf.mxu1  ;;  %10506 = vmatmul.mubr.msk.bf16.gmra.mxu1 %vm743_vm2, %v11029_v53  ;;  %v3025_v49 = vor.u32 %v3023_v11, %v3021_v60  ;;  %v3031_v53 = vshrl.u32 %v12005_v16, 16 }
 0x134   : > { %v10405_v38 = vpop.f32.mrf.mxu0  ;;  %10564 = vmatmul.mubr.msk.bf16.gmra.mxu0 %vm743_vm2, %v3006_v39  ;;  %v1281_v39 = vadd.f32 %v10347_v43, %v11810_v46  ;;  %10509 = vmatprep.mubr.msk.bf16.mxu1 %vm743_vm2, %v11031_v36 }
 0x135   : > { %v12027_v22 = vadd.f32 %v10405_v38, %v1265_v18  ;;  %10567 = vmatprep.mubr.msk.bf16.mxu0 %vm743_vm2, %v3014_v10  ;;  %v1272_v27 = vpop.f32.mrf.mxu1  ;;  %v3022_v18 = vsel %vm498_vm1, %v3017_v47, %v3021_v60  ;;  %v3035_v10 = vshll.u32 %v11037_v28, 16  ;;  %v3030_v21 = vsel %vm498_vm1, %v3025_v49, %v3029_v45 }
 0x136   : > { %v1690_v29 = vpop.f32.mrf.mxu0  ;;  %v1273_v42 = vadd.f32 %v1272_v27, %v11820_v62  ;;  %v3033_v60 = vor.u32 %v3031_v53, %v3029_v45  ;;  %v3476_v45 = vrot.slane %v11609_v48, 1  ;;  %v5147_v48 = vsel %vm834_vm0, %v11630_v34, 0 }
 0x137   : > { %v12033_v26 = vadd.f32 %v1690_v29, %v1257_v58  ;;  %v10348_v11 = vpop.f32.mrf.mxu1  ;;  %v11033_v58 = vld [vmem:[%s11192_s8 + $0xf4] sm:$0xff]   ;;  %v3037_v41 = vrot.slane %v3035_v10, 1  ;;  %v3474_v29 = vrot.slane %v11602_v19, 1  ;;  %v3478_v34 = vrot.slane %v11624_v56, 1 }
 0x138   : > { %v10406_v24 = vpop.f32.mrf.mxu0  ;;  %v1284_v36 = vadd.f32 %v10348_v11, %v11828_v13 }
 0x139   : > { %v12039_v0 = vadd.f32 %v10406_v24, %v1268_v30  ;;  %v1275_v38 = vpop.f32.mrf.mxu1  ;;  %v3038_v24 = vsel %vm498_vm1, %v3033_v60, %v3037_v41  ;;  %v3475_v10 = vsel %vm1453_vm3, %v3472_v2, %v3474_v29  ;;  %v11040_v41 = vld [vmem:[%s11192_s8 + $0x28] sm:$0xff]   ;;  %v3479_v56 = vsel %vm1453_vm3, %v3476_v45, %v3478_v34 }
 0x13a   : > { %v1693_v46 = vpop.f32.mrf.mxu0  ;;  %v1276_v62 = vadd.f32 %v1275_v38, %v11835_v12 }
 0x13b   : > { %v12045_v61 = vadd.f32 %v1693_v46, %v1260_v63  ;;  %v10351_v28 = vpop.f32.mrf.mxu1  ;;  %10510 = vmatmul.mubr.msk.bf16.gmra.mxu1 %vm743_vm2, %v11033_v58 }
 0x13c   : > { %v10409_v47 = vpop.f32.mrf.mxu0  ;;  %10568 = vmatmul.mubr.msk.bf16.gmra.mxu0 %vm743_vm2, %v3022_v18  ;;  %v1297_v63 = vadd.f32 %v10351_v28, %v11844_v40  ;;  %10577 = vmatprep.mubr.msk.bf16.mxu1 %vm743_vm2, %v3473_v15  ;;  %v11038_v18 = vld [vmem:[%s11192_s8 + $0x18] sm:$0xff]   ;;  %v3480_v15 = vrot.slane %v11634_v52, 1 }
 0x13d   : > { %v12050_v30 = vadd.f32 %v10409_v47, %v1281_v39  ;;  %10571 = vmatprep.mubr.msk.bf16.mxu0 %vm743_vm2, %v3030_v21  ;;  %v1288_v12 = vpop.f32.mrf.mxu1  ;;  %v11039_v47 = vld [vmem:[%s11192_s8 + $0x20] sm:$0xff]  }
 0x13e   : > { %v1706_v13 = vpop.f32.mrf.mxu0  ;;  %v1289_v39 = vadd.f32 %v1288_v12, %v11854_v54  ;;  %v3477_v54 = vsel %vm1453_vm3, %v3474_v29, %v3476_v45  ;;  %v3481_v52 = vsel %vm1453_vm3, %v3478_v34, %v3480_v15 }
 0x13f   : > { %v12055_v43 = vadd.f32 %v1706_v13, %v1273_v42  ;;  %v10352_v23 = vpop.f32.mrf.mxu1 }
 0x140   : > { %v10410_v49 = vpop.f32.mrf.mxu0  ;;  %v1300_v40 = vadd.f32 %v10352_v23, %v11862_v50 }
 0x141   : > { %v12061_v27 = vadd.f32 %v10410_v49, %v1284_v36  ;;  %v1291_v19 = vpop.f32.mrf.mxu1 }
 0x142   : > { %v1709_v53 = vpop.f32.mrf.mxu0  ;;  %v1292_v46 = vadd.f32 %v1291_v19, %v11869_v14 }
 0x143   : > { %v12066_v42 = vadd.f32 %v1709_v53, %v1276_v62  ;;  %v10355_v50 = vpop.f32.mrf.mxu1  ;;  %10578 = vmatmul.mubr.msk.bf16.vlgmr.msra.gmra.mxu1 %vm743_vm2, %v3475_v10  ;;  %v11041_v53 = vld [vmem:[%s11192_s8 + $0x30] sm:$0xff]  }
 0x144   : > { %v10413_v11 = vpop.f32.mrf.mxu0  ;;  %10572 = vmatmul.mubr.msk.bf16.gmra.mxu0 %vm743_vm2, %v3038_v24  ;;  %v1313_v21 = vadd.f32 %v10355_v50, %v11878_v5  ;;  %10700 = vmatpush3.bf16.msra.mxu1 %v5147_v48  ;;  %v5640_v5 = vsel %vm834_vm0, %v11652_v3, 0 }
 0x145   : > { %v12074_v58 = vadd.f32 %v10413_v11, %v1297_v63  ;;  %10639 = vmatprep.mubr.msk.bf16.mxu0 %vm743_vm2, %v11038_v18  ;;  %10581 = vmatprep.mubr.msk.bf16.mxu1 %vm743_vm2, %v3477_v54  ;;  %v1304_v38 = vpop.f32.mrf.mxu1  ;;  %v3482_v18 = vrot.slane %v11656_v8, 1  ;;  %v11042_v11 = vld [vmem:[%s11192_s8 + $0x38] sm:$0xff]  }
 0x146   : > { %v1722_v2 = vpop.f32.mrf.mxu0  ;;  %v1305_v62 = vadd.f32 %v1304_v38, %v11886_v55 }
 0x147   : > { %v12079_v36 = vadd.f32 %v1722_v2, %v1289_v39  ;;  %v10356_v28 = vpop.f32.mrf.mxu1  ;;  %v3483_v50 = vsel %vm1453_vm3, %v3480_v15, %v3482_v18 }
 0x148   : > { %v10414_v14 = vpop.f32.mrf.mxu0  ;;  %v1316_v63 = vadd.f32 %v10356_v28, %v11894_v20  ;;  %v15438_v28 = vld [vmem:[#allocation5_spill] sm:$0xff] }
 0x149   : > { %v12086_v60 = vadd.f32 %v10414_v14, %v1300_v40  ;;  %v1307_v12 = vpop.f32.mrf.mxu1  ;;  %v3484_v40 = vrot.slane %v11661_v37, 1  ;;  %v15437_v14 = vld [vmem:[#allocation3_spill] sm:$0xff] }
 0x14a   : > { %v1725_v13 = vpop.f32.mrf.mxu0  ;;  %v1308_v55 = vadd.f32 %v1307_v12, %v11899_v1  ;;  %v15439_v12 = vld [vmem:[#allocation4_spill] sm:$0xff] }
 0x14b   : > { %v12092_v29 = vadd.f32 %v1725_v13, %v1292_v46  ;;  %v10359_v3 = vpop.f32.mrf.mxu1  ;;  %10582 = vmatmul.mubr.msk.bf16.gmra.mxu1 %vm743_vm2, %v3479_v56  ;;  %v3485_v37 = vsel %vm1453_vm3, %v3482_v18, %v3484_v40  ;;  %v3488_v13 = vrot.slane %v15438_v28, 1  ;;  %v15440_v18 = vld [vmem:[#allocation6_spill] sm:$0xff] }
 0x14c   : > { %v10417_v49 = vpop.f32.mrf.mxu0  ;;  %10640 = vmatmul.mubr.msk.bf16.vlgmr.msra.gmra.mxu0 %vm743_vm2, %v11039_v47  ;;  %v1329_v45 = vadd.f32 %v10359_v3, %v11908_v57  ;;  %10585 = vmatprep.mubr.msk.bf16.mxu1 %vm743_vm2, %v3481_v52  ;;  %v3486_v47 = vrot.slane %v15437_v14, 1 }
 0x14d   : > { %v12098_v39 = vadd.f32 %v10417_v49, %v1313_v21  ;;  %10762 = vmatpush3.bf16.msra.mxu0 %v5640_v5  ;;  %10643 = vmatprep.mubr.msk.bf16.mxu0 %vm743_vm2, %v11040_v41  ;;  %v1320_v23 = vpop.f32.mrf.mxu1  ;;  %v11043_v41 = vld [vmem:[%s11192_s8 + $0x40] sm:$0xff]   ;;  %v11044_v5 = vld [vmem:[%s11192_s8 + $0x48] sm:$0xff]  }
 0x14e   : > { %v1738_v20 = vpop.f32.mrf.mxu0  ;;  %v1321_v10 = vadd.f32 %v1320_v23, %v11916_v31 }
 0x14f   : > { %v12103_v24 = vadd.f32 %v1738_v20, %v1305_v62  ;;  %v10360_v48 = vpop.f32.mrf.mxu1 }
 0x150   : > { %v10418_v1 = vpop.f32.mrf.mxu0  ;;  %v1332_v57 = vadd.f32 %v10360_v48, %v11923_v35 }
 0x151   : > { %v12110_v19 = vadd.f32 %v10418_v1, %v1316_v63  ;;  %v1323_v8 = vpop.f32.mrf.mxu1 }
 0x152   : > { %v1741_v54 = vpop.f32.mrf.mxu0  ;;  %v1324_v31 = vadd.f32 %v1323_v8, %v11929_v44 }
 0x153   : > { %v12114_v46 = vadd.f32 %v1741_v54, %v1308_v55  ;;  %v10363_v34 = vpop.f32.mrf.mxu1  ;;  %10586 = vmatmul.mubr.msk.bf16.gmra.mxu1 %vm743_vm2, %v3483_v50  ;;  %v3487_v55 = vsel %vm1453_vm3, %v3484_v40, %v3486_v47  ;;  %v15442_v54 = vld [vmem:[#allocation9_spill] sm:$0xff] }
 0x154   : > { %v10421_v2 = vpop.f32.mrf.mxu0  ;;  %10644 = vmatmul.mubr.msk.bf16.gmra.mxu0 %vm743_vm2, %v11041_v53  ;;  %10589 = vmatprep.mubr.msk.bf16.mxu1 %vm743_vm2, %v3485_v37  ;;  %v1345_v49 = vadd.f32 %v10363_v34, %v15439_v12  ;;  %v15443_v37 = vld [vmem:[#allocation11_spill] sm:$0xff]  ;;  %v11128_v34 = vmov 0  }
 0x155   : > { %v12120_v21 = vadd.f32 %v10421_v2, %v1329_v45  ;;  %10647 = vmatprep.mubr.msk.bf16.mxu0 %vm743_vm2, %v11042_v11  ;;  %v1336_v15 = vpop.f32.mrf.mxu1  ;;  %v3489_v45 = vsel %vm1453_vm3, %v3486_v47, %v3488_v13  ;;  %v15441_v11 = vld [vmem:[#allocation7_spill] sm:$0xff]  ;;  %v11045_v2 = vld [vmem:[%s11192_s8 + $0x50] sm:$0xff]   ;;  %10943 = vset.pattern.permute.xlu1 %v11128_v34  ;;  %9359 = vst.msk [vmem:[%s12159_s26] sm:$0xf] %vm9310_vm4, %v11128_v34  ;;  %9360 = vst.msk [vmem:[%s12159_s26 + $0x4] sm:$0xf] %vm9310_vm4, %v11128_v34 }
 0x156   : > { %v1754_v35 = vpop.f32.mrf.mxu0  ;;  %v1337_v23 = vadd.f32 %v1336_v15, %v15440_v18  ;;  %10942 = vset.pattern.permute.xlu0 %v11128_v34  ;;  %v11046_v15 = vld [vmem:[%s11192_s8 + $0x58] sm:$0xff]   ;;  %9361 = vst.msk [vmem:[%s12159_s26 + $0x8] sm:$0xf] %vm9310_vm4, %v11128_v34  ;;  %9362 = vst.msk [vmem:[%s12159_s26 + $0xc] sm:$0xf] %vm9310_vm4, %v11128_v34 }
 0x157   : > { %v12124_v38 = vadd.f32 %v1754_v35, %v1321_v10  ;;  %v10364_v63 = vpop.f32.mrf.mxu1  ;;  %v15444_v35 = vld [vmem:[#allocation8_spill] sm:$0xff]  ;;  %9363 = vst.msk [vmem:[%s12159_s26 + $0x10] sm:$0xf] %vm9310_vm4, %v11128_v34  ;;  %9364 = vst.msk [vmem:[%s12159_s26 + $0x14] sm:$0xf] %vm9310_vm4, %v11128_v34 }
 0x158   : > { %v10422_v62 = vpop.f32.mrf.mxu0  ;;  %v1348_v40 = vadd.f32 %v10364_v63, %v15441_v11  ;;  %9365 = vst.msk [vmem:[%s12159_s26 + $0xd8] sm:$0xf] %vm9310_vm4, %v11128_v34  ;;  %9366 = vst.msk [vmem:[%s12159_s26 + $0xdc] sm:$0xf] %vm9310_vm4, %v11128_v34  ;;  %v15445_v63 = vld [vmem:[#allocation10_spill] sm:$0xff] }
 0x159   : > { %v12130_v44 = vadd.f32 %v10422_v62, %v1332_v57  ;;  %v1339_v3 = vpop.f32.mrf.mxu1  ;;  %v3490_v57 = vrot.slane %v15442_v54, 1  ;;  %v7473_v62 = vld [vmem:[%s15338_s4 + $0x10] sm:$0xff]  ;;  %9367 = vst.msk [vmem:[%s12159_s26 + $0xe0] sm:$0xf] %vm9310_vm4, %v11128_v34  ;;  %9368 = vst.msk [vmem:[%s12159_s26 + $0xe4] sm:$0xf] %vm9310_vm4, %v11128_v34 }
 0x15a   : > { %v1757_v56 = vpop.f32.mrf.mxu0  ;;  %v1340_v14 = vadd.f32 %v1339_v3, %v15444_v35  ;;  %9369 = vst.msk [vmem:[%s12159_s26 + $0xe8] sm:$0xf] %vm9310_vm4, %v11128_v34  ;;  %9370 = vst.msk [vmem:[%s12159_s26 + $0xec] sm:$0xf] %vm9310_vm4, %v11128_v34  ;;  %7531 = vperm.xlu1 %10943, %v7473_v62   ;;  %v11047_v35 = vld [vmem:[%s11192_s8 + $0x60] sm:$0xff]   ;;  %v15450_v62 = vld [vmem:[#allocation14_spill] sm:$0xff] }
 0x15b   : > { %v12134_v52 = vadd.f32 %v1757_v56, %v1324_v31  ;;  %v10367_v53 = vpop.f32.mrf.mxu1  ;;  %10590 = vmatmul.mubr.msk.bf16.gmra.mxu1 %vm743_vm2, %v3487_v55  ;;  %v3492_v31 = vrot.slane %v15443_v37, 1  ;;  %v7478_v37 = vld [vmem:[%s15338_s4 + $0x38] sm:$0xff] }
 0x15c   : > { %v10425_v20 = vpop.f32.mrf.mxu0  ;;  %10648 = vmatmul.mubr.msk.bf16.gmra.mxu0 %vm743_vm2, %v11043_v41  ;;  %10593 = vmatprep.mubr.msk.bf16.mxu1 %vm743_vm2, %v3489_v45  ;;  %v7471_v41 = vld [vmem:[%s15338_s4] sm:$0xff]  ;;  %v1361_v56 = vadd.f32 %v10367_v53, %v15445_v63  ;;  %v15446_v45 = vld [vmem:[#allocation12_spill] sm:$0xff]  ;;  %v7474_v53 = vld [vmem:[%s15338_s4 + $0x18] sm:$0xff] }
 0x15d   : > { %v12140_v1 = vadd.f32 %v10425_v20, %v1345_v49  ;;  %10651 = vmatprep.mubr.msk.bf16.mxu0 %vm743_vm2, %v11044_v5  ;;  %v1352_v50 = vpop.f32.mrf.mxu1  ;;  %7521 = vperm.xlu0 %10942, %v7471_v41   ;;  %v3491_v49 = vsel %vm1453_vm3, %v3488_v13, %v3490_v57  ;;  %v3493_v20 = vsel %vm1453_vm3, %v3490_v57, %v3492_v31  ;;  %v7472_v13 = vld [vmem:[%s15338_s4 + $0x8] sm:$0xff] }
 0x15e   : > { %v1770_v10 = vpop.f32.mrf.mxu0  ;;  %v1353_v18 = vadd.f32 %v1352_v50, %v15446_v45  ;;  %7536 = vperm.xlu1 %10943, %v7474_v53   ;;  %v15448_v50 = vld [vmem:[#allocation15_spill] sm:$0xff]  ;;  %v11048_v63 = vld [vmem:[%s11192_s8 + $0x68] sm:$0xff]  }
 0x15f   : > { %v12145_v48 = vadd.f32 %v1770_v10, %v1337_v23  ;;  %v10368_v28 = vpop.f32.mrf.mxu1 }
 0x160   : > { %v10426_v8 = vpop.f32.mrf.mxu0 }
 0x161   : > { %v12153_v47 = vadd.f32 %v10426_v8, %v1348_v40  ;;  %v1355_v55 = vpop.f32.mrf.mxu1  ;;  %v15447_v40 = vld [vmem:[#allocation13_spill] sm:$0xff]  ;;  %v3494_v8 = vrot.slane %v15448_v50, 1  ;;  %7526 = vperm.xlu0 %10942, %v7472_v13  }
 0x162   : > { %v1773_v5 = vpop.f32.mrf.mxu0  ;;  %v1364_v54 = vadd.f32 %v10368_v28, %v15447_v40  ;;  %v1356_v41 = vadd.f32 %v1355_v55, %v15450_v62  ;;  %v7476_v28 = vld [vmem:[%s15338_s4 + $0x28] sm:$0xff]  ;;  %v15452_v40 = vld [vmem:[#allocation18_spill] sm:$0xff] }
 0x163   : > { %v12192_v12 = vadd.f32 %v1773_v5, %v1340_v14  ;;  %v10371_v10 = vpop.f32.mrf.mxu1  ;;  %10594 = vmatmul.mubr.msk.bf16.gmra.mxu1 %vm743_vm2, %v3491_v49  ;;  %v15449_v14 = vld [vmem:[#allocation17_spill] sm:$0xff]  ;;  %7546 = vperm.xlu1 %10943, %v7476_v28   ;;  %v3495_v55 = vsel %vm1453_vm3, %v3492_v31, %v3494_v8 }
 0x164   : > { %v10429_v3 = vpop.f32.mrf.mxu0  ;;  %10652 = vmatmul.mubr.msk.bf16.gmra.mxu0 %vm743_vm2, %v11045_v2  ;;  %10597 = vmatprep.mubr.msk.bf16.mxu1 %vm743_vm2, %v3493_v20  ;;  %v15451_v20 = vld [vmem:[#allocation16_spill] sm:$0xff]  ;;  %v7477_v31 = vld [vmem:[%s15338_s4 + $0x30] sm:$0xff] }
 0x165   : > { %v12200_v23 = vadd.f32 %v10429_v3, %v1361_v56  ;;  %10655 = vmatprep.mubr.msk.bf16.mxu0 %vm743_vm2, %v11046_v15  ;;  %v1368_v2 = vpop.f32.mrf.mxu1  ;;  %v3496_v15 = vrot.slane %v15449_v14, 1  ;;  %v7475_v56 = vld [vmem:[%s15338_s4 + $0x20] sm:$0xff]  ;;  %v1377_v45 = vadd.f32 %v10371_v10, %v15451_v20  ;;  %v15454_v14 = vld [vmem:[#allocation21_spill] sm:$0xff]  ;;  %v15456_v20 = vld [vmem:[#allocation20_spill] sm:$0xff] }
 0x166   : > { %v1786_v11 = vpop.f32.mrf.mxu0  ;;  %7541 = vperm.xlu0 %10942, %v7475_v56   ;;  %v3498_v62 = vrot.slane %v15454_v14, 1  ;;  %v11049_v28 = vld [vmem:[%s11192_s8 + $0x70] sm:$0xff]   ;;  %v15455_v56 = vld [vmem:[#allocation23_spill] sm:$0xff] }
 0x167   : > { %v12211_v57 = vadd.f32 %v1786_v11, %v1353_v18  ;;  %v10372_v49 = vpop.f32.mrf.mxu1  ;;  %v3497_v11 = vsel %vm1453_vm3, %v3494_v8, %v3496_v15  ;;  %7556 = vperm.xlu1 %10943, %v7478_v37   ;;  %v15458_v37 = vld [vmem:[#allocation22_spill] sm:$0xff] }
 0x168   : > { %v10430_v34 = vpop.f32.mrf.mxu0 }
 0x169   : > { %v12218_v5 = vadd.f32 %v10430_v34, %v1364_v54  ;;  %v1371_v53 = vpop.f32.mrf.mxu1  ;;  %v1369_v54 = vadd.f32 %v1368_v2, %v15452_v40  ;;  %v15453_v2 = vld [vmem:[#allocation19_spill] sm:$0xff] }
 0x16a   : > { %v1789_v3 = vpop.f32.mrf.mxu0  ;;  %v1380_v34 = vadd.f32 %v10372_v49, %v15453_v2  ;;  %7551 = vperm.xlu0 %10942, %v7477_v31   ;;  %v7480_v49 = vld [vmem:[%s15338_s4 + $0x48] sm:$0xff] }
 0x16b   : > { %v12228_v18 = vadd.f32 %v1789_v3, %v1356_v41  ;;  %v10375_v10 = vpop.f32.mrf.mxu1  ;;  %10598 = vmatmul.mubr.msk.bf16.gmra.mxu1 %vm743_vm2, %v3495_v55  ;;  %v3500_v3 = vrot.slane %v15455_v56, 1  ;;  %v11050_v55 = vld [vmem:[%s11192_s8 + $0x78] sm:$0xff]   ;;  %7566 = vperm.xlu1 %10943, %v7480_v49  }
 0x16c   : > { %v10433_v13 = vpop.f32.mrf.mxu0  ;;  %10656 = vmatmul.mubr.msk.bf16.gmra.mxu0 %vm743_vm2, %v11047_v35  ;;  %10601 = vmatprep.mubr.msk.bf16.mxu1 %vm743_vm2, %v3497_v11  ;;  %v7479_v11 = vld [vmem:[%s15338_s4 + $0x40] sm:$0xff]  ;;  %v1393_v31 = vadd.f32 %v10375_v10, %v15458_v37  ;;  %v7482_v10 = vld [vmem:[%s15338_s4 + $0x58] sm:$0xff] }
 0x16d   : > { %v12236_v50 = vadd.f32 %v10433_v13, %v1377_v45  ;;  %10659 = vmatprep.mubr.msk.bf16.mxu0 %vm743_vm2, %v11048_v63  ;;  %v1384_v41 = vpop.f32.mrf.mxu1  ;;  %v1372_v45 = vadd.f32 %v1371_v53, %v15456_v20  ;;  %v3499_v53 = vsel %vm1453_vm3, %v3496_v15, %v3498_v62  ;;  %v3501_v14 = vsel %vm1453_vm3, %v3498_v62, %v3500_v3  ;;  %v7481_v15 = vld [vmem:[%s15338_s4 + $0x50] sm:$0xff] }
 0x16e   : > { %v1802_v8 = vpop.f32.mrf.mxu0  ;;  %7561 = vperm.xlu0 %10942, %v7479_v11  }
 0x16f   : > { %v12247_v35 = vadd.f32 %v1802_v8, %v1369_v54  ;;  %v10376_v40 = vpop.f32.mrf.mxu1  ;;  %7576 = vperm.xlu1 %10943, %v7482_v10  }
 0x170   : > { %v10434_v63 = vpop.f32.mrf.mxu0 }
 0x171   : > { %v12254_v13 = vadd.f32 %v10434_v63, %v1380_v34  ;;  %v1387_v2 = vpop.f32.mrf.mxu1  ;;  %v15460_v63 = vld [vmem:[#allocation24_spill] sm:$0xff] }
 0x172   : > { %v1805_v54 = vpop.f32.mrf.mxu0  ;;  %v1385_v56 = vadd.f32 %v1384_v41, %v15460_v63  ;;  %v15462_v41 = vld [vmem:[#allocation25_spill] sm:$0xff]  ;;  %7571 = vperm.xlu0 %10942, %v7481_v15   ;;  %v15468_v15 = vld [vmem:[#allocation28_spill] sm:$0xff] }
 0x173   : > { %15457 = vst [vmem:[#allocation3_spill] sm:$0xff] %v12254_v13  ;;  %v12264_v8 = vadd.f32 %v1805_v54, %v1372_v45  ;;  %v10379_v45 = vpop.f32.mrf.mxu1  ;;  %10602 = vmatmul.mubr.msk.bf16.gmra.mxu1 %vm743_vm2, %v3499_v53  ;;  %v11052_v53 = vld [vmem:[%s11192_s8 + $0x88] sm:$0xff]  }
 0x174   : > { %v10437_v34 = vpop.f32.mrf.mxu0  ;;  %10660 = vmatmul.mubr.msk.bf16.gmra.mxu0 %vm743_vm2, %v11049_v28  ;;  %v1396_v28 = vadd.f32 %v10376_v40, %v15462_v41  ;;  %10605 = vmatprep.mubr.msk.bf16.mxu1 %vm743_vm2, %v3501_v14  ;;  %v7484_v40 = vld [vmem:[%s15338_s4 + $0x68] sm:$0xff]  ;;  %v7483_v14 = vld [vmem:[%s15338_s4 + $0x60] sm:$0xff] }
 0x175   : > { %15459 = vst [vmem:[#allocation5_spill] sm:$0xff] %v12264_v8  ;;  %v12270_v20 = vadd.f32 %v10437_v34, %v1393_v31  ;;  %10663 = vmatprep.mubr.msk.bf16.mxu0 %vm743_vm2, %v11050_v55  ;;  %v15464_v55 = vld [vmem:[#allocation27_spill] sm:$0xff]  ;;  %v1400_v54 = vpop.f32.mrf.mxu1  ;;  %v15465_v34 = vld [vmem:[#allocation29_spill] sm:$0xff]  ;;  %7586 = vperm.xlu1 %10943, %v7484_v40  }
 0x176   : > { %v1818_v62 = vpop.f32.mrf.mxu0  ;;  %v3502_v11 = vrot.slane %v15464_v55, 1  ;;  %v11051_v31 = vld [vmem:[%s11192_s8 + $0x80] sm:$0xff]   ;;  %v3504_v63 = vrot.slane %v15465_v34, 1  ;;  %7581 = vperm.xlu0 %10942, %v7483_v14  }
 0x177   : > { %15461 = vst [vmem:[#allocation4_spill] sm:$0xff] %v12270_v20  ;;  %v12281_v49 = vadd.f32 %v1818_v62, %v1385_v56  ;;  %v15466_v20 = vld [vmem:[#allocation26_spill] sm:$0xff]  ;;  %v10380_v56 = vpop.f32.mrf.mxu1  ;;  %v1409_v62 = vadd.f32 %v10379_v45, %v15468_v15 }
 0x178   : > { %v10438_v37 = vpop.f32.mrf.mxu0  ;;  %v1388_v8 = vadd.f32 %v1387_v2, %v15466_v20  ;;  %v3503_v2 = vsel %vm1453_vm3, %v3500_v3, %v3502_v11  ;;  %v3505_v55 = vsel %vm1453_vm3, %v3502_v11, %v3504_v63  ;;  %v7485_v3 = vld [vmem:[%s15338_s4 + $0x70] sm:$0xff] }
 0x179   : > { %15463 = vst [vmem:[#allocation6_spill] sm:$0xff] %v12281_v49  ;;  %v12288_v13 = vadd.f32 %v10438_v37, %v1396_v28  ;;  %v1403_v20 = vpop.f32.mrf.mxu1  ;;  %v15470_v37 = vld [vmem:[#allocation30_spill] sm:$0xff] }
 0x17a   : > { %v1821_v10 = vpop.f32.mrf.mxu0  ;;  %v1401_v34 = vadd.f32 %v1400_v54, %v15470_v37  ;;  %v15472_v54 = vld [vmem:[#allocation31_spill] sm:$0xff]  ;;  %7591 = vperm.xlu0 %10942, %v7485_v3   ;;  %v15477_v3 = vld [vmem:[#allocation34_spill] sm:$0xff] }
 0x17b   : > { %15467 = vst [vmem:[#allocation7_spill] sm:$0xff] %v12288_v13  ;;  %v12298_v41 = vadd.f32 %v1821_v10, %v1388_v8  ;;  %v7486_v8 = vld [vmem:[%s15338_s4 + $0x78] sm:$0xff]  ;;  %v10383_v45 = vpop.f32.mrf.mxu1  ;;  %10606 = vmatmul.mubr.msk.bf16.gmra.mxu1 %vm743_vm2, %v3503_v2 }
 0x17c   : > { %v10441_v28 = vpop.f32.mrf.mxu0  ;;  %10664 = vmatmul.mubr.msk.bf16.gmra.mxu0 %vm743_vm2, %v11051_v31  ;;  %7596 = vperm.xlu1 %10943, %v7486_v8   ;;  %v1412_v31 = vadd.f32 %v10380_v56, %v15472_v54  ;;  %v11054_v2 = vld [vmem:[%s11192_s8 + $0x98] sm:$0xff]   ;;  %v7488_v56 = vld [vmem:[%s15338_s4 + $0x88] sm:$0xff] }
 0x17d   : > { %15469 = vst [vmem:[#allocation9_spill] sm:$0xff] %v12298_v41  ;;  %v12304_v13 = vadd.f32 %v10441_v28, %v1409_v62  ;;  %10667 = vmatprep.mubr.msk.bf16.mxu0 %vm743_vm2, %v11052_v53  ;;  %10609 = vmatprep.mubr.msk.bf16.mxu1 %vm743_vm2, %v3505_v55  ;;  %v15473_v53 = vld [vmem:[#allocation33_spill] sm:$0xff]  ;;  %v1416_v10 = vpop.f32.mrf.mxu1  ;;  %v15474_v28 = vld [vmem:[#allocation35_spill] sm:$0xff] }
 0x17e   : > { %v1834_v11 = vpop.f32.mrf.mxu0  ;;  %v3506_v14 = vrot.slane %v15473_v53, 1  ;;  %v11053_v62 = vld [vmem:[%s11192_s8 + $0x90] sm:$0xff]   ;;  %v3508_v37 = vrot.slane %v15474_v28, 1  ;;  %v7487_v55 = vld [vmem:[%s15338_s4 + $0x80] sm:$0xff] }
 0x17f   : > { %15471 = vst [vmem:[#allocation11_spill] sm:$0xff] %v12304_v13  ;;  %v12315_v40 = vadd.f32 %v1834_v11, %v1401_v34  ;;  %v15475_v13 = vld [vmem:[#allocation32_spill] sm:$0xff]  ;;  %v10384_v34 = vpop.f32.mrf.mxu1  ;;  %v1425_v11 = vadd.f32 %v10383_v45, %v15477_v3  ;;  %7601 = vperm.xlu0 %10942, %v7487_v55  }
 0x180   : > { %v10442_v15 = vpop.f32.mrf.mxu0  ;;  %v1404_v41 = vadd.f32 %v1403_v20, %v15475_v13  ;;  %7606 = vperm.xlu1 %10943, %v7488_v56   ;;  %v3507_v13 = vsel %vm1453_vm3, %v3504_v63, %v3506_v14  ;;  %v3509_v53 = vsel %vm1453_vm3, %v3506_v14, %v3508_v37  ;;  %v7489_v63 = vld [vmem:[%s15338_s4 + $0x90] sm:$0xff] }
 0x181   : > { %v12322_v49 = vadd.f32 %v10442_v15, %v1412_v31  ;;  %v1419_v20 = vpop.f32.mrf.mxu1  ;;  %v15479_v15 = vld [vmem:[#allocation36_spill] sm:$0xff] }
 0x182   : > { %v1837_v8 = vpop.f32.mrf.mxu0  ;;  %v1417_v28 = vadd.f32 %v1416_v10, %v15479_v15  ;;  %v15481_v10 = vld [vmem:[#allocation37_spill] sm:$0xff] }
 0x183   : > { %15476 = vst [vmem:[#allocation8_spill] sm:$0xff] %v12322_v49  ;;  %v12332_v54 = vadd.f32 %v1837_v8, %v1404_v41  ;;  %v7490_v41 = vld [vmem:[%s15338_s4 + $0x98] sm:$0xff]  ;;  %v10387_v45 = vpop.f32.mrf.mxu1  ;;  %10610 = vmatmul.mubr.msk.bf16.gmra.mxu1 %vm743_vm2, %v3507_v13  ;;  %7611 = vperm.xlu0 %10942, %v7489_v63   ;;  %v11056_v13 = vld [vmem:[%s11192_s8 + $0xa8] sm:$0xff]  }
 0x184   : > { %v10445_v31 = vpop.f32.mrf.mxu0  ;;  %10668 = vmatmul.mubr.msk.bf16.gmra.mxu0 %vm743_vm2, %v11053_v62  ;;  %7616 = vperm.xlu1 %10943, %v7490_v41   ;;  %v1428_v62 = vadd.f32 %v10384_v34, %v15481_v10  ;;  %v7492_v34 = vld [vmem:[%s15338_s4 + $0xa8] sm:$0xff] }
 0x185   : > { %15478 = vst [vmem:[#allocation10_spill] sm:$0xff] %v12332_v54  ;;  %v12338_v49 = vadd.f32 %v10445_v31, %v1425_v11  ;;  %10671 = vmatprep.mubr.msk.bf16.mxu0 %vm743_vm2, %v11054_v2  ;;  %10613 = vmatprep.mubr.msk.bf16.mxu1 %vm743_vm2, %v3509_v53  ;;  %v15482_v2 = vld [vmem:[#allocation39_spill] sm:$0xff]  ;;  %v1432_v8 = vpop.f32.mrf.mxu1  ;;  %v15483_v31 = vld [vmem:[#allocation40_spill] sm:$0xff] }
 0x186   : > { %v1850_v14 = vpop.f32.mrf.mxu0  ;;  %v3510_v55 = vrot.slane %v15482_v2, 1  ;;  %v11055_v11 = vld [vmem:[%s11192_s8 + $0xa0] sm:$0xff]   ;;  %v3512_v15 = vrot.slane %v15483_v31, 1 }
 0x187   : > { %15480 = vst [vmem:[#allocation12_spill] sm:$0xff] %v12338_v49  ;;  %v12349_v56 = vadd.f32 %v1850_v14, %v1417_v28  ;;  %v15484_v49 = vld [vmem:[#allocation38_spill] sm:$0xff]  ;;  %v7491_v53 = vld [vmem:[%s15338_s4 + $0xa0] sm:$0xff]  ;;  %v10388_v28 = vpop.f32.mrf.mxu1 }
 0x188   : > { %v10446_v3 = vpop.f32.mrf.mxu0  ;;  %v1420_v45 = vadd.f32 %v1419_v20, %v15484_v49  ;;  %7626 = vperm.xlu1 %10943, %v7492_v34   ;;  %v3511_v14 = vsel %vm1453_vm3, %v3508_v37, %v3510_v55  ;;  %7621 = vperm.xlu0 %10942, %v7491_v53   ;;  %v3513_v10 = vsel %vm1453_vm3, %v3510_v55, %v3512_v15  ;;  %v7493_v37 = vld [vmem:[%s15338_s4 + $0xb0] sm:$0xff] }
 0x189   : > { %v12356_v54 = vadd.f32 %v10446_v3, %v1428_v62  ;;  %v1435_v49 = vpop.f32.mrf.mxu1  ;;  %v15486_v62 = vld [vmem:[#allocation41_spill] sm:$0xff]  ;;  %v7494_v3 = vld [vmem:[%s15338_s4 + $0xb8] sm:$0xff] }
 0x18a   : > { %v1853_v41 = vpop.f32.mrf.mxu0  ;;  %v1433_v2 = vadd.f32 %v1432_v8, %v15486_v62  ;;  %v15487_v8 = vld [vmem:[#allocation43_spill] sm:$0xff]  ;;  %v11057_v28 = vld [vmem:[%s11192_s8 + $0xb0] sm:$0xff]  }
 0x18b   : > { %v12365_v63 = vadd.f32 %v1853_v41, %v1420_v45  ;;  %v10455_v31 = vpop.f32.mrf.mxu1  ;;  %10614 = vmatmul.mubr.msk.bf16.gmra.mxu1 %vm743_vm2, %v3511_v14  ;;  %v3516_v41 = vrot.slane %v11919_v9, 1 }
 0x18c   : > { %v10449_v20 = vpop.f32.mrf.mxu0  ;;  %10672 = vmatmul.mubr.msk.bf16.gmra.mxu0 %vm743_vm2, %v11055_v11  ;;  %7636 = vperm.xlu1 %10943, %v7494_v3   ;;  %v2521_v55 = vadd.f32 %v10455_v31, %v11942_v7  ;;  %v7496_v7 = vld [vmem:[%s15338_s4 + $0xc8] sm:$0xff] }
 0x18d   : > { %15485 = vst [vmem:[#allocation13_spill] sm:$0xff] %v12365_v63  ;;  %10675 = vmatprep.mubr.msk.bf16.mxu0 %vm743_vm2, %v11056_v13  ;;  %10617 = vmatprep.mubr.msk.bf16.mxu1 %vm743_vm2, %v3513_v10  ;;  %v3514_v13 = vrot.slane %v15487_v8, 1  ;;  %v2280_v34 = vpop.f32.mrf.mxu1  ;;  %v15488_v20 = vld [vmem:[#allocation42_spill] sm:$0xff]  ;;  %v7495_v10 = vld [vmem:[%s15338_s4 + $0xc0] sm:$0xff] }
 0x18e   : > { %v1866_v11 = vpop.f32.mrf.mxu0  ;;  %7631 = vperm.xlu0 %10942, %v7493_v37   ;;  %v1436_v62 = vadd.f32 %v1435_v49, %v15488_v20  ;;  %v2519_v14 = vadd.f32 %v2280_v34, %v11950_v51  ;;  %v11058_v63 = vld [vmem:[%s11192_s8 + $0xb8] sm:$0xff]   ;;  %v15489_v37 = vld [vmem:[#allocation45_spill] sm:$0xff] }
 0x18f   : > { %v12380_v45 = vadd.f32 %v1866_v11, %v1433_v2  ;;  %v10456_v2 = vpop.f32.mrf.mxu1  ;;  %v3515_v9 = vsel %vm1453_vm3, %v3512_v15, %v3514_v13  ;;  %v3517_v8 = vsel %vm1453_vm3, %v3514_v13, %v3516_v41  ;;  %v7498_v20 = vld [vmem:[%s15338_s4 + $0xd8] sm:$0xff]  ;;  %v7497_v15 = vld [vmem:[%s15338_s4 + $0xd0] sm:$0xff] }
 0x190   : > { %v10450_v53 = vpop.f32.mrf.mxu0  ;;  %7646 = vperm.xlu1 %10943, %v7496_v7   ;;  %v2522_v31 = vadd.f32 %v10456_v2, %v15489_v37  ;;  %v11059_v2 = vld [vmem:[%s11192_s8 + $0xc0] sm:$0xff]  }
 0x191   : > { %v2283_v51 = vpop.f32.mrf.mxu1 }
 0x192   : > { %v1869_v3 = vpop.f32.mrf.mxu0  ;;  %7641 = vperm.xlu0 %10942, %v7495_v10   ;;  %v2520_v34 = vadd.f32 %v2283_v51, %v11964_v33 }
 0x193   : > { %v12396_v11 = vadd.f32 %v1869_v3, %v1436_v62  ;;  %v10459_v62 = vpop.f32.mrf.mxu1  ;;  %10618 = vmatmul.mubr.msk.bf16.gmra.mxu1 %vm743_vm2, %v3515_v9  ;;  %v3520_v3 = vrot.slane %v11947_v6, 1  ;;  %v11060_v9 = vld [vmem:[%s11192_s8 + $0xc8] sm:$0xff]  }
 0x194   : > { %v10517_v49 = vpop.f32.mrf.mxu0  ;;  %10676 = vmatmul.mubr.msk.bf16.gmra.mxu0 %vm743_vm2, %v11057_v28  ;;  %7656 = vperm.xlu1 %10943, %v7498_v20   ;;  %v2525_v33 = vadd.f32 %v10459_v62, %v11972_v25  ;;  %v7500_v25 = vld [vmem:[%s15338_s4 + $0xe8] sm:$0xff] }
 0x195   : > { %v12402_v53 = vadd.f32 %v10517_v49, %v2521_v55  ;;  %10679 = vmatprep.mubr.msk.bf16.mxu0 %vm743_vm2, %v11058_v63  ;;  %10621 = vmatprep.mubr.msk.bf16.mxu1 %vm743_vm2, %v3517_v8  ;;  %v15490_v63 = vld [vmem:[#allocation44_spill] sm:$0xff]  ;;  %v2296_v7 = vpop.f32.mrf.mxu1 }
 0x196   : > { %v3166_v13 = vpop.f32.mrf.mxu0  ;;  %v3518_v28 = vrot.slane %v15490_v63, 1  ;;  %7651 = vperm.xlu0 %10942, %v7497_v15   ;;  %v2523_v37 = vadd.f32 %v2296_v7, %v11980_v17  ;;  %v15491_v20 = vld [vmem:[#allocation48_spill] sm:$0xff] }
 0x197   : > { %v12413_v55 = vadd.f32 %v3166_v13, %v2519_v14  ;;  %v7499_v14 = vld [vmem:[%s15338_s4 + $0xe0] sm:$0xff]  ;;  %v10460_v49 = vpop.f32.mrf.mxu1 }
 0x198   : > { %v10518_v10 = vpop.f32.mrf.mxu0  ;;  %7666 = vperm.xlu1 %10943, %v7500_v25   ;;  %v2526_v15 = vadd.f32 %v10460_v49, %v15491_v20  ;;  %v3519_v6 = vsel %vm1453_vm3, %v3516_v41, %v3518_v28  ;;  %v3521_v13 = vsel %vm1453_vm3, %v3518_v28, %v3520_v3  ;;  %v7501_v41 = vld [vmem:[%s15338_s4 + $0xf0] sm:$0xff] }
 0x199   : > { %v12420_v51 = vadd.f32 %v10518_v10, %v2522_v31  ;;  %v2299_v17 = vpop.f32.mrf.mxu1  ;;  %v11061_v49 = vld [vmem:[%s11192_s8 + $0xd0] sm:$0xff]  }
 0x19a   : > { %v3169_v8 = vpop.f32.mrf.mxu0  ;;  %7661 = vperm.xlu0 %10942, %v7499_v14   ;;  %v2524_v63 = vadd.f32 %v2299_v17, %v11994_v59  ;;  %v11062_v17 = vld [vmem:[%s11192_s8 + $0xd8] sm:$0xff]  }
 0x19b   : > { %v12430_v62 = vadd.f32 %v3169_v8, %v2520_v34  ;;  %v7502_v34 = vld [vmem:[%s15338_s4 + $0xf8] sm:$0xff]  ;;  %v10463_v10 = vpop.f32.mrf.mxu1  ;;  %10622 = vmatmul.mubr.msk.bf16.gmra.mxu1 %vm743_vm2, %v3519_v6  ;;  %v15496_v8 = vld [vmem:[#allocation47_spill] sm:$0xff]  ;;  %v15497_v6 = vld [vmem:[#allocation49_spill] sm:$0xff] }
 0x19c   : > { %v10521_v31 = vpop.f32.mrf.mxu0  ;;  %10680 = vmatmul.mubr.msk.bf16.gmra.mxu0 %vm743_vm2, %v11059_v2  ;;  %7676 = vperm.xlu1 %10943, %v7502_v34   ;;  %v15495_v2 = vld [vmem:[#allocation46_spill] sm:$0xff]  ;;  %v3524_v20 = vrot.slane %v15496_v8, 1 }
 0x19d   : > { %15492 = vst [vmem:[#allocation15_spill] sm:$0xff] %v12430_v62  ;;  %v12436_v7 = vadd.f32 %v10521_v31, %v2525_v33  ;;  %10683 = vmatprep.mubr.msk.bf16.mxu0 %vm743_vm2, %v11060_v9  ;;  %v2529_v33 = vadd.f32 %v10463_v10, %v12000_v32  ;;  %10625 = vmatprep.mubr.msk.bf16.mxu1 %vm743_vm2, %v3521_v13  ;;  %v3522_v9 = vrot.slane %v15495_v2, 1  ;;  %v2312_v25 = vpop.f32.mrf.mxu1  ;;  %v4596_v31 = vld [vmem:[%s11192_s8 + $0x18] sm:$0xf]  ;;  %v12459_v34 = vld [vmem:[%s11192_s8 + $0x1c] sm:$0xf] }
 0x19e   : > { %v3182_v59 = vpop.f32.mrf.mxu0  ;;  %7671 = vperm.xlu0 %10942, %v7501_v41   ;;  %v7504_v32 = vld [vmem:[%s15338_s4 + $0x108] sm:$0xff]  ;;  %v15499_v10 = vld [vmem:[#allocation50_spill] sm:$0xff] }
 0x19f   : > { %15493 = vst [vmem:[#allocation17_spill] sm:$0xff] %v12436_v7  ;;  %v12447_v28 = vadd.f32 %v3182_v59, %v2523_v37  ;;  %v2527_v7 = vadd.f32 %v2312_v25, %v15497_v6  ;;  %v7503_v37 = vld [vmem:[%s15338_s4 + $0x100] sm:$0xff]  ;;  %v10464_v13 = vpop.f32.mrf.mxu1  ;;  %v3525_v8 = vsel %vm1453_vm3, %v3522_v9, %v3524_v20  ;;  %v9792_v6 = vcombine.low %v4596_v31, %v12459_v34 }
 0x1a0   : > { %v10522_v14 = vpop.f32.mrf.mxu0  ;;  %7686 = vperm.xlu1 %10943, %v7504_v32   ;;  %v2530_v59 = vadd.f32 %v10464_v13, %v15499_v10  ;;  %v11063_v13 = vld [vmem:[%s11192_s8 + $0xe0] sm:$0xff]  }
 0x1a1   : > { %15494 = vst [vmem:[#allocation14_spill] sm:$0xff] %v12447_v28  ;;  %v12456_v62 = vadd.f32 %v10522_v14, %v2526_v15  ;;  %v3523_v15 = vsel %vm1453_vm3, %v3520_v3, %v3522_v9  ;;  %v2315_v25 = vpop.f32.mrf.mxu1  ;;  %v7506_v3 = vld [vmem:[%s15338_s4 + $0x118] sm:$0xff]  ;;  %v12493_v10 = vld [vmem:[%s11192_s8 + $0x20] sm:$0xff]  }
 0x1a2   : > { %v3185_v41 = vpop.f32.mrf.mxu0  ;;  %7681 = vperm.xlu0 %10942, %v7503_v37  }
 0x1a3   : > { %15498 = vst [vmem:[#allocation16_spill] sm:$0xff] %v12456_v62  ;;  %v12468_v2 = vadd.f32 %v3185_v41, %v2524_v63  ;;  %v2528_v62 = vadd.f32 %v2315_v25, %v12021_v4  ;;  %v7505_v63 = vld [vmem:[%s15338_s4 + $0x110] sm:$0xff]  ;;  %10626 = vmatmul.mubr.msk.bf16.gmra.mxu1 %vm743_vm2, %v3523_v15  ;;  %v3528_v41 = vrot.slane %v12005_v16, 1  ;;  %v4815_v15 = vshll.u32 %v9792_v6, 16 }
 0x1a4   : > { %v10525_v14 = vpop.f32.mrf.mxu0  ;;  %10684 = vmatmul.mubr.msk.bf16.gmra.mxu0 %vm743_vm2, %v11061_v49  ;;  %v10467_v49 = vpop.f32.mrf.mxu1  ;;  %7696 = vperm.xlu1 %10943, %v7506_v3  }
 0x1a5   : > { %v12475_v28 = vadd.f32 %v10525_v14, %v2529_v33  ;;  %10687 = vmatprep.mubr.msk.bf16.mxu0 %vm743_vm2, %v11062_v17  ;;  %v2533_v4 = vadd.f32 %v10467_v49, %v12027_v22  ;;  %10629 = vmatprep.mubr.msk.bf16.mxu1 %vm743_vm2, %v3525_v8  ;;  %v11106_v17 = vld [vmem:[%s11192_s8 + $0xec] sm:$0xff]   ;;  %v7507_v8 = vld [vmem:[%s15338_s4 + $0x120] sm:$0xff] }
 0x1a6   : > { %v3198_v9 = vpop.f32.mrf.mxu0  ;;  %v3526_v31 = vrot.slane %v11106_v17, 1  ;;  %7691 = vperm.xlu0 %10942, %v7505_v63   ;;  %v2328_v32 = vpop.f32.mrf.mxu1  ;;  %v11064_v22 = vld [vmem:[%s11192_s8 + $0xe8] sm:$0xff]  }
 0x1a7   : > { %v12486_v33 = vadd.f32 %v3198_v9, %v2527_v7  ;;  %v2531_v25 = vadd.f32 %v2328_v32, %v12033_v26  ;;  %v7508_v7 = vld [vmem:[%s15338_s4 + $0x128] sm:$0xff]  ;;  %v4813_v32 = vshrl.u32 %v9792_v6, 16  ;;  %v7509_v6 = vld [vmem:[%s15338_s4 + $0x130] sm:$0xff] }
 0x1a8   : > { %v10526_v37 = vpop.f32.mrf.mxu0  ;;  %v10468_v3 = vpop.f32.mrf.mxu1  ;;  %7706 = vperm.xlu1 %10943, %v7508_v7   ;;  %v3527_v26 = vsel %vm1453_vm3, %v3524_v20, %v3526_v31  ;;  %v3529_v17 = vsel %vm1453_vm3, %v3526_v31, %v3528_v41  ;;  %v7510_v20 = vld [vmem:[%s15338_s4 + $0x138] sm:$0xff] }
 0x1a9   : > { %v12496_v14 = vadd.f32 %v10526_v37, %v2530_v59  ;;  %v2534_v16 = vadd.f32 %v10468_v3, %v12039_v0  ;;  %v4817_v37 = vrot.slane %v4815_v15, 1  ;;  %v12524_v15 = vld [vmem:[%s11192_s8 + $0x28] sm:$0xff]  }
 0x1aa   : > { %v3201_v63 = vpop.f32.mrf.mxu0  ;;  %7701 = vperm.xlu0 %10942, %v7507_v8   ;;  %v2331_v59 = vpop.f32.mrf.mxu1  ;;  %v5482_v8 = vld [vmem:[%s11192_s8 + $0x18] sm:$0xe] }
 0x1ab   : > { %15500 = vst [vmem:[#allocation18_spill] sm:$0xff] %v12496_v14  ;;  %v12506_v49 = vadd.f32 %v3201_v63, %v2528_v62  ;;  %v4820_v14 = vshll.u32 %v12493_v10, 16  ;;  %v2532_v0 = vadd.f32 %v2331_v59, %v12045_v61  ;;  %10630 = vmatmul.mubr.msk.bf16.gmra.mxu1 %vm743_vm2, %v3527_v26  ;;  %v11065_v59 = vld [vmem:[%s11192_s8 + $0xf0] sm:$0xff]   ;;  %v4818_v26 = vor.u32 %v4817_v37, %v4813_v32 }
 0x1ac   : > { %v10529_v9 = vpop.f32.mrf.mxu0  ;;  %10688 = vmatmul.mubr.msk.bf16.gmra.mxu0 %vm743_vm2, %v11063_v13  ;;  %v10471_v31 = vpop.f32.mrf.mxu1  ;;  %7716 = vperm.xlu1 %10943, %v7510_v20   ;;  %v4828_v32 = vshll.u32 %v12524_v15, 16 }
 0x1ad   : > { %15501 = vst [vmem:[#allocation19_spill] sm:$0xff] %v12506_v49  ;;  %v12513_v62 = vadd.f32 %v10529_v9, %v2533_v4  ;;  %10691 = vmatprep.mubr.msk.bf16.mxu0 %vm743_vm2, %v11064_v22  ;;  %v2537_v61 = vadd.f32 %v10471_v31, %v12050_v30  ;;  %10633 = vmatprep.mubr.msk.bf16.mxu1 %vm743_vm2, %v3529_v17  ;;  %v11107_v22 = vld [vmem:[%s11192_s8 + $0xfc] ss:$0 sps:$4 sm:$0x11]   ;;  %v4822_v9 = vrot.slane %v4820_v14, 1  ;;  %v7511_v17 = vld [vmem:[%s15338_s4 + $0x140] sm:$0xff] }
 0x1ae   : > { %v3214_v13 = vpop.f32.mrf.mxu0  ;;  %v3530_v7 = vrot.slane %v11107_v22, 1  ;;  %7711 = vperm.xlu0 %10942, %v7509_v6   ;;  %v2344_v3 = vpop.f32.mrf.mxu1  ;;  %v11066_v30 = vld [vmem:[%s11192_s8 + $0xf8] sm:$0xff]   ;;  %v9854_v14 = vcombine.low %v5482_v8, %v12459_v34 }
 0x1af   : > { %15502 = vst [vmem:[#allocation21_spill] sm:$0xff] %v12513_v62  ;;  %v12527_v4 = vadd.f32 %v3214_v13, %v2531_v25  ;;  %v12534_v62 = vld [vmem:[%s11192_s8 + $0x30] sm:$0xff]   ;;  %v2535_v20 = vadd.f32 %v2344_v3, %v12055_v43  ;;  %v7512_v25 = vld [vmem:[%s15338_s4 + $0x148] sm:$0xff]  ;;  %v4824_v13 = vshrl.u32 %v12493_v10, 16 }
 0x1b0   : > { %v10530_v63 = vpop.f32.mrf.mxu0  ;;  %v10472_v6 = vpop.f32.mrf.mxu1  ;;  %7726 = vperm.xlu1 %10943, %v7512_v25   ;;  %v3531_v37 = vsel %vm1453_vm3, %v3528_v41, %v3530_v7  ;;  %v4836_v34 = vshll.u32 %v12534_v62, 16  ;;  %v7514_v41 = vld [vmem:[%s15338_s4 + $0x158] sm:$0xff]  ;;  %v7513_v7 = vld [vmem:[%s15338_s4 + $0x150] sm:$0xff] }
 0x1b1   : > { %v12537_v49 = vadd.f32 %v10530_v63, %v2534_v16  ;;  %v2538_v43 = vadd.f32 %v10472_v6, %v12061_v27  ;;  %v4823_v63 = vsel %vm498_vm1, %v4818_v26, %v4822_v9  ;;  %v4830_v26 = vrot.slane %v4828_v32, 1  ;;  %v12570_v25 = vld [vmem:[%s11192_s8 + $0x38] sm:$0xff]   ;;  %v12578_v32 = vld [vmem:[%s11192_s8 + $0x40] sm:$0xff]  }
 0x1b2   : > { %v3217_v31 = vpop.f32.mrf.mxu0  ;;  %7721 = vperm.xlu0 %10942, %v7511_v17   ;;  %v2347_v22 = vpop.f32.mrf.mxu1  ;;  %v4826_v6 = vor.u32 %v4824_v13, %v4822_v9  ;;  %v7515_v9 = vld [vmem:[%s15338_s4 + $0x160] sm:$0xff] }
 0x1b3   : > { %15503 = vst [vmem:[#allocation23_spill] sm:$0xff] %v12537_v49  ;;  %v12549_v16 = vadd.f32 %v3217_v31, %v2532_v0  ;;  %v4832_v49 = vshrl.u32 %v12524_v15, 16  ;;  %v2536_v27 = vadd.f32 %v2347_v22, %v12066_v42  ;;  %10634 = vmatmul.mubr.msk.bf16.gmra.mxu1 %vm743_vm2, %v3531_v37  ;;  %v5488_v42 = vrot.slane %v9854_v14, 1  ;;  %v11069_v37 = vld [vmem:[%s11192_s8 + $0x100] sm:$0xff]  }
 0x1b4   : > { %v10533_v3 = vpop.f32.mrf.mxu0  ;;  %10692 = vmatmul.mubr.msk.bf16.gmra.mxu0 %vm743_vm2, %v11065_v59  ;;  %v10475_v8 = vpop.f32.mrf.mxu1  ;;  %7736 = vperm.xlu1 %10943, %v7514_v41   ;;  %v4840_v41 = vshrl.u32 %v12534_v62, 16 }
 0x1b5   : > { %v12558_v0 = vadd.f32 %v10533_v3, %v2537_v61  ;;  %10695 = vmatprep.mubr.msk.bf16.mxu0 %vm743_vm2, %v11066_v30  ;;  %v5489_v61 = vrot.slane %v12493_v10, 1  ;;  %v2541_v30 = vadd.f32 %v10475_v8, %v12074_v58  ;;  %10701 = vmatprep.mubr.msk.bf16.mxu1 %vm743_vm2, %v4823_v63  ;;  %v4834_v3 = vor.u32 %v4832_v49, %v4830_v26  ;;  %v7516_v58 = vld [vmem:[%s15338_s4 + $0x168] sm:$0xff] }
 0x1b6   : > { %v3230_v59 = vpop.f32.mrf.mxu0  ;;  %7731 = vperm.xlu0 %10942, %v7513_v7   ;;  %v2360_v31 = vpop.f32.mrf.mxu1  ;;  %v4844_v49 = vshll.u32 %v12570_v25, 16 }
 0x1b7   : > { %15504 = vst [vmem:[#allocation20_spill] sm:$0xff] %v12558_v0  ;;  %v12573_v17 = vadd.f32 %v3230_v59, %v2535_v20  ;;  %v4838_v0 = vrot.slane %v4836_v34, 1  ;;  %v2539_v10 = vadd.f32 %v2360_v31, %v12079_v36  ;;  %v5490_v63 = vsel %vm1453_vm3, %v5488_v42, %v5489_v61 }
 0x1b8   : > { %v10534_v22 = vpop.f32.mrf.mxu0  ;;  %v10476_v20 = vpop.f32.mrf.mxu1  ;;  %7746 = vperm.xlu1 %10943, %v7516_v58   ;;  %v4848_v42 = vshrl.u32 %v12570_v25, 16  ;;  %v4852_v31 = vshll.u32 %v12578_v32, 16  ;;  %v12614_v58 = vld [vmem:[%s11192_s8 + $0x48] sm:$0xff]  }
 0x1b9   : > { %v12581_v14 = vadd.f32 %v10534_v22, %v2538_v43  ;;  %v2542_v34 = vadd.f32 %v10476_v20, %v12086_v60  ;;  %v4831_v43 = vsel %vm498_vm1, %v4826_v6, %v4830_v26  ;;  %v4839_v59 = vsel %vm498_vm1, %v4834_v3, %v4838_v0  ;;  %v7518_v6 = vld [vmem:[%s15338_s4 + $0x178] sm:$0xff]  ;;  %v7517_v22 = vld [vmem:[%s15338_s4 + $0x170] sm:$0xff] }
 0x1ba   : > { %v3233_v13 = vpop.f32.mrf.mxu0  ;;  %7741 = vperm.xlu0 %10942, %v7515_v9   ;;  %v2363_v7 = vpop.f32.mrf.mxu1  ;;  %v5491_v26 = vrot.slane %v12524_v15, 1  ;;  %v4842_v20 = vor.u32 %v4840_v41, %v4838_v0  ;;  %v4860_v0 = vshll.u32 %v12614_v58, 16 }
 0x1bb   : > { %v12592_v36 = vadd.f32 %v3233_v13, %v2536_v27  ;;  %v2540_v60 = vadd.f32 %v2363_v7, %v12092_v29  ;;  %10702 = vmatmul.mubr.msk.bf16.vlgmr.msra.gmra.mxu1 %vm743_vm2, %v4831_v43  ;;  %v4846_v29 = vrot.slane %v4844_v49, 1  ;;  %v12621_v43 = vld [vmem:[%s11192_s8 + $0x50] sm:$0xff]  }
 0x1bc   : > { %v10537_v8 = vpop.f32.mrf.mxu0  ;;  %10696 = vmatmul.mubr.msk.bf16.gmra.mxu0 %vm743_vm2, %v11069_v37  ;;  %v10479_v37 = vpop.f32.mrf.mxu1  ;;  %7756 = vperm.xlu1 %10943, %v7518_v6   ;;  %v5492_v6 = vsel %vm1453_vm3, %v5489_v61, %v5491_v26 }
 0x1bd   : > { %v12601_v27 = vadd.f32 %v10537_v8, %v2541_v30  ;;  %10763 = vmatprep.mubr.msk.bf16.mxu0 %vm743_vm2, %v5490_v63  ;;  %v5493_v30 = vrot.slane %v12534_v62, 1  ;;  %v2545_v15 = vadd.f32 %v10479_v37, %v12098_v39  ;;  %10705 = vmatprep.mubr.msk.bf16.mxu1 %vm743_vm2, %v4839_v59  ;;  %v4850_v7 = vor.u32 %v4848_v42, %v4846_v29 }
 0x1be   : > { %v3246_v3 = vpop.f32.mrf.mxu0  ;;  %7751 = vperm.xlu0 %10942, %v7517_v22   ;;  %v2376_v13 = vpop.f32.mrf.mxu1  ;;  %v4854_v8 = vrot.slane %v4852_v31, 1  ;;  %v4847_v42 = vsel %vm498_vm1, %v4842_v20, %v4846_v29  ;;  %v4856_v31 = vshrl.u32 %v12578_v32, 16  ;;  %v4864_v22 = vshrl.u32 %v12614_v58, 16 }
 0x1bf   : > { %15505 = vst [vmem:[#allocation22_spill] sm:$0xff] %v12601_v27  ;;  %v12617_v9 = vadd.f32 %v3246_v3, %v2539_v10  ;;  %v2543_v49 = vadd.f32 %v2376_v13, %v12103_v24  ;;  %v5494_v10 = vsel %vm1453_vm3, %v5491_v26, %v5493_v30  ;;  %v4868_v26 = vshll.u32 %v12621_v43, 16  ;;  %v12646_v13 = vld [vmem:[%s11192_s8 + $0x58] sm:$0xff]  }
 0x1c0   : > { %v10538_v63 = vpop.f32.mrf.mxu0  ;;  %v10480_v27 = vpop.f32.mrf.mxu1  ;;  %v4855_v61 = vsel %vm498_vm1, %v4850_v7, %v4854_v8  ;;  %v4862_v29 = vrot.slane %v4860_v0, 1  ;;  %v5497_v20 = vrot.slane %v12578_v32, 1 }
 0x1c1   : > { %v12624_v62 = vadd.f32 %v10538_v63, %v2542_v34  ;;  %v2546_v41 = vadd.f32 %v10480_v27, %v12110_v19 }
 0x1c2   : > { %v3249_v39 = vpop.f32.mrf.mxu0  ;;  %v2379_v24 = vpop.f32.mrf.mxu1 }
 0x1c3   : > { %v12630_v59 = vadd.f32 %v3249_v39, %v2540_v60  ;;  %v2544_v37 = vadd.f32 %v2379_v24, %v12114_v46  ;;  %v5495_v60 = vrot.slane %v12570_v25, 1  ;;  %10706 = vmatmul.mubr.msk.bf16.gmra.mxu1 %vm743_vm2, %v4847_v42  ;;  %v4858_v46 = vor.u32 %v4856_v31, %v4854_v8 }
 0x1c4   : > { %v10541_v34 = vpop.f32.mrf.mxu0  ;;  %10764 = vmatmul.mubr.msk.bf16.vlgmr.msra.gmra.mxu0 %vm743_vm2, %v5492_v6  ;;  %v10483_v27 = vpop.f32.mrf.mxu1  ;;  %10709 = vmatprep.mubr.msk.bf16.mxu1 %vm743_vm2, %v4855_v61  ;;  %v4866_v39 = vor.u32 %v4864_v22, %v4862_v29  ;;  %v4870_v25 = vrot.slane %v4868_v26, 1  ;;  %v4876_v8 = vshll.u32 %v12646_v13, 16  ;;  %v4872_v22 = vshrl.u32 %v12621_v43, 16 }
 0x1c5   : > { %v12639_v19 = vadd.f32 %v10541_v34, %v2545_v15  ;;  %10767 = vmatprep.mubr.msk.bf16.mxu0 %vm743_vm2, %v5494_v10  ;;  %v2549_v63 = vadd.f32 %v10483_v27, %v12120_v21  ;;  %v12653_v10 = vld [vmem:[%s11192_s8 + $0x60] sm:$0xff]   ;;  %v5496_v32 = vsel %vm1453_vm3, %v5493_v30, %v5495_v60  ;;  %v5498_v21 = vsel %vm1453_vm3, %v5495_v60, %v5497_v20 }
 0x1c6   : > { %v3262_v3 = vpop.f32.mrf.mxu0  ;;  %v2392_v15 = vpop.f32.mrf.mxu1  ;;  %v4863_v61 = vsel %vm498_vm1, %v4858_v46, %v4862_v29  ;;  %v4871_v30 = vsel %vm498_vm1, %v4866_v39, %v4870_v25  ;;  %v4880_v26 = vshrl.u32 %v12646_v13, 16  ;;  %v4884_v60 = vshll.u32 %v12653_v10, 16 }
 0x1c7   : > { %v12649_v7 = vadd.f32 %v3262_v3, %v2543_v49  ;;  %v2547_v42 = vadd.f32 %v2392_v15, %v12124_v38  ;;  %v4878_v46 = vrot.slane %v4876_v8, 1  ;;  %v5501_v15 = vrot.slane %v12621_v43, 1 }
 0x1c8   : > { %v10542_v6 = vpop.f32.mrf.mxu0  ;;  %v10484_v24 = vpop.f32.mrf.mxu1 }
 0x1c9   : > { %v12656_v0 = vadd.f32 %v10542_v6, %v2546_v41  ;;  %v2550_v49 = vadd.f32 %v10484_v24, %v12130_v44  ;;  %v12678_v6 = vld [vmem:[%s11192_s8 + $0x68] sm:$0xff]  }
 0x1ca   : > { %v3265_v34 = vpop.f32.mrf.mxu0  ;;  %v2395_v38 = vpop.f32.mrf.mxu1 }
 0x1cb   : > { %v12662_v31 = vadd.f32 %v3265_v34, %v2544_v37  ;;  %v2548_v27 = vadd.f32 %v2395_v38, %v12134_v52  ;;  %v5499_v37 = vrot.slane %v12614_v58, 1  ;;  %10710 = vmatmul.mubr.msk.bf16.gmra.mxu1 %vm743_vm2, %v4863_v61  ;;  %v4874_v52 = vor.u32 %v4872_v22, %v4870_v25 }
 0x1cc   : > { %v10545_v41 = vpop.f32.mrf.mxu0  ;;  %10768 = vmatmul.mubr.msk.bf16.gmra.mxu0 %vm743_vm2, %v5496_v32  ;;  %v10487_v3 = vpop.f32.mrf.mxu1  ;;  %10713 = vmatprep.mubr.msk.bf16.mxu1 %vm743_vm2, %v4871_v30  ;;  %v4882_v34 = vor.u32 %v4880_v26, %v4878_v46  ;;  %v4886_v58 = vrot.slane %v4884_v60, 1  ;;  %v4892_v25 = vshll.u32 %v12678_v6, 16  ;;  %v4888_v26 = vshrl.u32 %v12653_v10, 16 }
 0x1cd   : > { %v12671_v44 = vadd.f32 %v10545_v41, %v2549_v63  ;;  %10771 = vmatprep.mubr.msk.bf16.mxu0 %vm743_vm2, %v5498_v21  ;;  %v2553_v39 = vadd.f32 %v10487_v3, %v12140_v1  ;;  %v12685_v21 = vld [vmem:[%s11192_s8 + $0x70] sm:$0xff]   ;;  %v5500_v43 = vsel %vm1453_vm3, %v5497_v20, %v5499_v37  ;;  %v5502_v1 = vsel %vm1453_vm3, %v5499_v37, %v5501_v15 }
 0x1ce   : > { %v3278_v29 = vpop.f32.mrf.mxu0  ;;  %v2408_v63 = vpop.f32.mrf.mxu1  ;;  %v4879_v30 = vsel %vm498_vm1, %v4874_v52, %v4878_v46  ;;  %v4887_v20 = vsel %vm498_vm1, %v4882_v34, %v4886_v58  ;;  %v4896_v60 = vshrl.u32 %v12678_v6, 16  ;;  %v4900_v37 = vshll.u32 %v12685_v21, 16 }
 0x1cf   : > { %v12681_v32 = vadd.f32 %v3278_v29, %v2547_v42  ;;  %v2551_v61 = vadd.f32 %v2408_v63, %v12145_v48  ;;  %v4894_v52 = vrot.slane %v4892_v25, 1  ;;  %v5505_v63 = vrot.slane %v12653_v10, 1 }
 0x1d0   : > { %v10546_v24 = vpop.f32.mrf.mxu0  ;;  %v10488_v38 = vpop.f32.mrf.mxu1 }
 0x1d1   : > { %v12688_v8 = vadd.f32 %v10546_v24, %v2550_v49  ;;  %v2554_v42 = vadd.f32 %v10488_v38, %v12153_v47  ;;  %v12710_v24 = vld [vmem:[%s11192_s8 + $0x78] sm:$0xff]  }
 0x1d2   : > { %v3281_v41 = vpop.f32.mrf.mxu0  ;;  %v2411_v48 = vpop.f32.mrf.mxu1 }
 0x1d3   : > { %v12694_v22 = vadd.f32 %v3281_v41, %v2548_v27  ;;  %v2552_v3 = vadd.f32 %v2411_v48, %v12192_v12  ;;  %v5503_v27 = vrot.slane %v12646_v13, 1  ;;  %10714 = vmatmul.mubr.msk.bf16.gmra.mxu1 %vm743_vm2, %v4879_v30  ;;  %v4890_v12 = vor.u32 %v4888_v26, %v4886_v58 }
 0x1d4   : > { %v10549_v49 = vpop.f32.mrf.mxu0  ;;  %10772 = vmatmul.mubr.msk.bf16.gmra.mxu0 %vm743_vm2, %v5500_v43  ;;  %v10491_v29 = vpop.f32.mrf.mxu1  ;;  %10717 = vmatprep.mubr.msk.bf16.mxu1 %vm743_vm2, %v4887_v20  ;;  %v4898_v41 = vor.u32 %v4896_v60, %v4894_v52  ;;  %v4902_v13 = vrot.slane %v4900_v37, 1  ;;  %v4908_v58 = vshll.u32 %v12710_v24, 16  ;;  %v4904_v60 = vshrl.u32 %v12685_v21, 16 }
 0x1d5   : > { %v12703_v47 = vadd.f32 %v10549_v49, %v2553_v39  ;;  %10775 = vmatprep.mubr.msk.bf16.mxu0 %vm743_vm2, %v5502_v1  ;;  %v2557_v34 = vadd.f32 %v10491_v29, %v12200_v23  ;;  %v12717_v1 = vld [vmem:[%s11192_s8 + $0x80] sm:$0xff]   ;;  %v5504_v10 = vsel %vm1453_vm3, %v5501_v15, %v5503_v27  ;;  %v5506_v23 = vsel %vm1453_vm3, %v5503_v27, %v5505_v63 }
 0x1d6   : > { %v3294_v46 = vpop.f32.mrf.mxu0  ;;  %v2424_v39 = vpop.f32.mrf.mxu1  ;;  %v4895_v20 = vsel %vm498_vm1, %v4890_v12, %v4894_v52  ;;  %v4903_v15 = vsel %vm498_vm1, %v4898_v41, %v4902_v13  ;;  %v4912_v37 = vshrl.u32 %v12710_v24, 16  ;;  %v4916_v27 = vshll.u32 %v12717_v1, 16 }
 0x1d7   : > { %v12713_v43 = vadd.f32 %v3294_v46, %v2551_v61  ;;  %v2555_v30 = vadd.f32 %v2424_v39, %v12211_v57  ;;  %v4910_v12 = vrot.slane %v4908_v58, 1  ;;  %v5509_v39 = vrot.slane %v12685_v21, 1 }
 0x1d8   : > { %v10550_v38 = vpop.f32.mrf.mxu0  ;;  %v10492_v48 = vpop.f32.mrf.mxu1 }
 0x1d9   : > { %v12720_v25 = vadd.f32 %v10550_v38, %v2554_v42  ;;  %v2558_v61 = vadd.f32 %v10492_v48, %v12218_v5  ;;  %v12742_v38 = vld [vmem:[%s11192_s8 + $0x88] sm:$0xff]  }
 0x1da   : > { %v3297_v49 = vpop.f32.mrf.mxu0  ;;  %v2427_v57 = vpop.f32.mrf.mxu1 }
 0x1db   : > { %v12726_v26 = vadd.f32 %v3297_v49, %v2552_v3  ;;  %v2556_v29 = vadd.f32 %v2427_v57, %v12228_v18  ;;  %v5507_v3 = vrot.slane %v12678_v6, 1  ;;  %10718 = vmatmul.mubr.msk.bf16.gmra.mxu1 %vm743_vm2, %v4895_v20  ;;  %v4906_v18 = vor.u32 %v4904_v60, %v4902_v13 }
 0x1dc   : > { %v10553_v42 = vpop.f32.mrf.mxu0  ;;  %10776 = vmatmul.mubr.msk.bf16.gmra.mxu0 %vm743_vm2, %v5504_v10  ;;  %v10495_v46 = vpop.f32.mrf.mxu1  ;;  %10721 = vmatprep.mubr.msk.bf16.mxu1 %vm743_vm2, %v4903_v15  ;;  %v4914_v49 = vor.u32 %v4912_v37, %v4910_v12  ;;  %v4918_v6 = vrot.slane %v4916_v27, 1  ;;  %v4924_v13 = vshll.u32 %v12742_v38, 16  ;;  %v4920_v27 = vshrl.u32 %v12717_v1, 16 }
 0x1dd   : > { %v12735_v5 = vadd.f32 %v10553_v42, %v2557_v34  ;;  %10779 = vmatprep.mubr.msk.bf16.mxu0 %vm743_vm2, %v5506_v23  ;;  %v2561_v41 = vadd.f32 %v10495_v46, %v12236_v50  ;;  %v12749_v23 = vld [vmem:[%s11192_s8 + $0x90] sm:$0xff]   ;;  %v5508_v21 = vsel %vm1453_vm3, %v5505_v63, %v5507_v3  ;;  %v5510_v50 = vsel %vm1453_vm3, %v5507_v3, %v5509_v39 }
 0x1de   : > { %v3310_v52 = vpop.f32.mrf.mxu0  ;;  %v2440_v34 = vpop.f32.mrf.mxu1  ;;  %v4911_v37 = vsel %vm498_vm1, %v4906_v18, %v4910_v12  ;;  %v4919_v63 = vsel %vm498_vm1, %v4914_v49, %v4918_v6  ;;  %v4928_v46 = vshrl.u32 %v12742_v38, 16  ;;  %v4932_v3 = vshll.u32 %v12749_v23, 16 }
 0x1df   : > { %v12745_v10 = vadd.f32 %v3310_v52, %v2555_v30  ;;  %v2559_v20 = vadd.f32 %v2440_v34, %v12247_v35  ;;  %v15508_v30 = vld [vmem:[#allocation3_spill] sm:$0xff]  ;;  %v15510_v52 = vld [vmem:[#allocation5_spill] sm:$0xff]  ;;  %v5513_v49 = vrot.slane %v12717_v1, 1 }
 0x1e0   : > { %v10554_v48 = vpop.f32.mrf.mxu0  ;;  %v10496_v57 = vpop.f32.mrf.mxu1 }
 0x1e1   : > { %15506 = vst [vmem:[#allocation24_spill] sm:$0xff] %v12745_v10  ;;  %v12752_v58 = vadd.f32 %v10554_v48, %v2558_v61  ;;  %v2562_v60 = vadd.f32 %v10496_v57, %v15508_v30  ;;  %v12774_v57 = vld [vmem:[%s11192_s8 + $0x98] sm:$0xff]  }
 0x1e2   : > { %v3313_v42 = vpop.f32.mrf.mxu0  ;;  %v2443_v35 = vpop.f32.mrf.mxu1 }
 0x1e3   : > { %15507 = vst [vmem:[#allocation25_spill] sm:$0xff] %v12752_v58  ;;  %v12758_v15 = vadd.f32 %v3313_v42, %v2556_v29  ;;  %v2560_v34 = vadd.f32 %v2443_v35, %v15510_v52  ;;  %v5511_v29 = vrot.slane %v12710_v24, 1  ;;  %10722 = vmatmul.mubr.msk.bf16.gmra.mxu1 %vm743_vm2, %v4911_v37  ;;  %v15512_v42 = vld [vmem:[#allocation4_spill] sm:$0xff]  ;;  %v4934_v24 = vrot.slane %v4932_v3, 1  ;;  %v12781_v52 = vld [vmem:[%s11192_s8 + $0xa0] sm:$0xff]   ;;  %v15513_v37 = vld [vmem:[#allocation6_spill] sm:$0xff] }
 0x1e4   : > { %v10557_v61 = vpop.f32.mrf.mxu0  ;;  %10780 = vmatmul.mubr.msk.bf16.gmra.mxu0 %vm743_vm2, %v5508_v21  ;;  %v10499_v12 = vpop.f32.mrf.mxu1  ;;  %v4926_v21 = vrot.slane %v4924_v13, 1  ;;  %10725 = vmatprep.mubr.msk.bf16.mxu1 %vm743_vm2, %v4919_v63  ;;  %v4936_v3 = vshrl.u32 %v12749_v23, 16 }
 0x1e5   : > { %15509 = vst [vmem:[#allocation27_spill] sm:$0xff] %v12758_v15  ;;  %v12767_v48 = vadd.f32 %v10557_v61, %v2561_v41  ;;  %10783 = vmatprep.mubr.msk.bf16.mxu0 %vm743_vm2, %v5510_v50  ;;  %v2565_v30 = vadd.f32 %v10499_v12, %v15512_v42  ;;  %v4922_v41 = vor.u32 %v4920_v27, %v4918_v6  ;;  %v4940_v6 = vshll.u32 %v12774_v57, 16  ;;  %v15515_v27 = vld [vmem:[#allocation7_spill] sm:$0xff] }
 0x1e6   : > { %v3326_v18 = vpop.f32.mrf.mxu0  ;;  %v2456_v50 = vpop.f32.mrf.mxu1  ;;  %v4930_v61 = vor.u32 %v4928_v46, %v4926_v21  ;;  %v5512_v1 = vsel %vm1453_vm3, %v5509_v39, %v5511_v29  ;;  %v4944_v42 = vshrl.u32 %v12774_v57, 16 }
 0x1e7   : > { %15511 = vst [vmem:[#allocation29_spill] sm:$0xff] %v12767_v48  ;;  %v12777_v15 = vadd.f32 %v3326_v18, %v2559_v20  ;;  %v2563_v48 = vadd.f32 %v2456_v50, %v15513_v37  ;;  %v5514_v20 = vsel %vm1453_vm3, %v5511_v29, %v5513_v49  ;;  %v4927_v46 = vsel %vm498_vm1, %v4922_v41, %v4926_v21  ;;  %v15517_v50 = vld [vmem:[#allocation9_spill] sm:$0xff]  ;;  %v12806_v37 = vld [vmem:[%s11192_s8 + $0xa8] sm:$0xff]  }
 0x1e8   : > { %v10558_v35 = vpop.f32.mrf.mxu0  ;;  %v10500_v58 = vpop.f32.mrf.mxu1  ;;  %v4935_v39 = vsel %vm498_vm1, %v4930_v61, %v4934_v24  ;;  %v4948_v29 = vshll.u32 %v12781_v52, 16  ;;  %v4942_v41 = vrot.slane %v4940_v6, 1  ;;  %v5517_v61 = vrot.slane %v12749_v23, 1 }
 0x1e9   : > { %v12784_v13 = vadd.f32 %v10558_v35, %v2562_v60  ;;  %v2566_v63 = vadd.f32 %v10500_v58, %v15515_v27 }
 0x1ea   : > { %v3329_v10 = vpop.f32.mrf.mxu0  ;;  %v2459_v18 = vpop.f32.mrf.mxu1 }
 0x1eb   : > { %15514 = vst [vmem:[#allocation26_spill] sm:$0xff] %v12784_v13  ;;  %v12790_v12 = vadd.f32 %v3329_v10, %v2560_v34  ;;  %v2564_v35 = vadd.f32 %v2459_v18, %v15517_v50  ;;  %v5515_v10 = vrot.slane %v12742_v38, 1  ;;  %10726 = vmatmul.mubr.msk.bf16.gmra.mxu1 %vm743_vm2, %v4927_v46  ;;  %v4950_v38 = vrot.slane %v4948_v29, 1  ;;  %v12813_v50 = vld [vmem:[%s11192_s8 + $0xb0] sm:$0xff]  }
 0x1ec   : > { %v10561_v60 = vpop.f32.mrf.mxu0  ;;  %10784 = vmatmul.mubr.msk.bf16.gmra.mxu0 %vm743_vm2, %v5512_v1  ;;  %v10503_v34 = vpop.f32.mrf.mxu1  ;;  %v15519_v1 = vld [vmem:[#allocation11_spill] sm:$0xff]  ;;  %10729 = vmatprep.mubr.msk.bf16.mxu1 %vm743_vm2, %v4935_v39  ;;  %v4952_v29 = vshrl.u32 %v12781_v52, 16 }
 0x1ed   : > { %15516 = vst [vmem:[#allocation28_spill] sm:$0xff] %v12790_v12  ;;  %v12799_v58 = vadd.f32 %v10561_v60, %v2565_v30  ;;  %10787 = vmatprep.mubr.msk.bf16.mxu0 %vm743_vm2, %v5514_v20  ;;  %v2569_v27 = vadd.f32 %v10503_v34, %v15519_v1  ;;  %v4938_v30 = vor.u32 %v4936_v3, %v4934_v24  ;;  %v4956_v24 = vshll.u32 %v12806_v37, 16  ;;  %v15521_v3 = vld [vmem:[#allocation8_spill] sm:$0xff]  ;;  %v15523_v1 = vld [vmem:[#allocation10_spill] sm:$0xff] }
 0x1ee   : > { %v3342_v21 = vpop.f32.mrf.mxu0  ;;  %v2472_v20 = vpop.f32.mrf.mxu1  ;;  %v4946_v60 = vor.u32 %v4944_v42, %v4942_v41  ;;  %v5516_v23 = vsel %vm1453_vm3, %v5513_v49, %v5515_v10 }
 0x1ef   : > { %15518 = vst [vmem:[#allocation30_spill] sm:$0xff] %v12799_v58  ;;  %v12809_v12 = vadd.f32 %v3342_v21, %v2563_v48  ;;  %v2567_v46 = vadd.f32 %v2472_v20, %v12315_v40  ;;  %v5518_v48 = vsel %vm1453_vm3, %v5515_v10, %v5517_v61  ;;  %v4943_v42 = vsel %vm498_vm1, %v4938_v30, %v4942_v41 }
 0x1f0   : > { %v10562_v18 = vpop.f32.mrf.mxu0  ;;  %v10504_v58 = vpop.f32.mrf.mxu1  ;;  %v4951_v49 = vsel %vm498_vm1, %v4946_v60, %v4950_v38  ;;  %v4960_v21 = vshrl.u32 %v12806_v37, 16  ;;  %v4964_v10 = vshll.u32 %v12813_v50, 16  ;;  %v4958_v30 = vrot.slane %v4956_v24, 1  ;;  %v12838_v60 = vld [vmem:[%s11192_s8 + $0xb8] sm:$0xff]  }
 0x1f1   : > { %v12816_v6 = vadd.f32 %v10562_v18, %v2566_v63  ;;  %v2570_v39 = vadd.f32 %v10504_v58, %v15521_v3  ;;  %v5521_v18 = vrot.slane %v12781_v52, 1 }
 0x1f2   : > { %v3345_v13 = vpop.f32.mrf.mxu0  ;;  %v2475_v40 = vpop.f32.mrf.mxu1 }
 0x1f3   : > { %15520 = vst [vmem:[#allocation31_spill] sm:$0xff] %v12816_v6  ;;  %v12822_v34 = vadd.f32 %v3345_v13, %v2564_v35  ;;  %v2568_v20 = vadd.f32 %v2475_v40, %v15523_v1  ;;  %v5519_v13 = vrot.slane %v12774_v57, 1  ;;  %10730 = vmatmul.mubr.msk.bf16.gmra.mxu1 %vm743_vm2, %v4943_v42  ;;  %v4966_v57 = vrot.slane %v4964_v10, 1  ;;  %v12845_v1 = vld [vmem:[%s11192_s8 + $0xc0] sm:$0xff]  }
 0x1f4   : > { %v10565_v63 = vpop.f32.mrf.mxu0  ;;  %10788 = vmatmul.mubr.msk.bf16.gmra.mxu0 %vm743_vm2, %v5516_v23  ;;  %v10507_v35 = vpop.f32.mrf.mxu1  ;;  %v15525_v23 = vld [vmem:[#allocation12_spill] sm:$0xff]  ;;  %10733 = vmatprep.mubr.msk.bf16.mxu1 %vm743_vm2, %v4951_v49  ;;  %v4968_v10 = vshrl.u32 %v12813_v50, 16 }
 0x1f5   : > { %15522 = vst [vmem:[#allocation33_spill] sm:$0xff] %v12822_v34  ;;  %v12831_v58 = vadd.f32 %v10565_v63, %v2569_v27  ;;  %10791 = vmatprep.mubr.msk.bf16.mxu0 %vm743_vm2, %v5518_v48  ;;  %v2573_v3 = vadd.f32 %v10507_v35, %v15525_v23  ;;  %v4954_v27 = vor.u32 %v4952_v29, %v4950_v38  ;;  %v4972_v38 = vshll.u32 %v12838_v60, 16 }
 0x1f6   : > { %v3358_v41 = vpop.f32.mrf.mxu0  ;;  %v2488_v48 = vpop.f32.mrf.mxu1  ;;  %v4962_v63 = vor.u32 %v4960_v21, %v4958_v30  ;;  %v5520_v52 = vsel %vm1453_vm3, %v5517_v61, %v5519_v13  ;;  %v4976_v35 = vshrl.u32 %v12838_v60, 16 }
 0x1f7   : > { %15524 = vst [vmem:[#allocation35_spill] sm:$0xff] %v12831_v58  ;;  %v12841_v34 = vadd.f32 %v3358_v41, %v2567_v46  ;;  %v2571_v42 = vadd.f32 %v2488_v48, %v12349_v56  ;;  %v5522_v46 = vsel %vm1453_vm3, %v5519_v13, %v5521_v18  ;;  %v4959_v21 = vsel %vm498_vm1, %v4954_v27, %v4958_v30  ;;  %v15526_v41 = vld [vmem:[#allocation13_spill] sm:$0xff]  ;;  %v12870_v48 = vld [vmem:[%s11192_s8 + $0xc8] sm:$0xff]  }
 0x1f8   : > { %v10566_v40 = vpop.f32.mrf.mxu0  ;;  %v10508_v58 = vpop.f32.mrf.mxu1  ;;  %v4967_v61 = vsel %vm498_vm1, %v4962_v63, %v4966_v57  ;;  %v4980_v13 = vshll.u32 %v12845_v1, 16  ;;  %v4974_v30 = vrot.slane %v4972_v38, 1  ;;  %v5525_v27 = vrot.slane %v12813_v50, 1 }
 0x1f9   : > { %v12848_v24 = vadd.f32 %v10566_v40, %v2570_v39  ;;  %v2574_v29 = vadd.f32 %v10508_v58, %v12356_v54  ;;  %v4970_v63 = vor.u32 %v4968_v10, %v4966_v57  ;;  %v4988_v57 = vshll.u32 %v12870_v48, 16 }
 0x1fa   : > { %v3361_v6 = vpop.f32.mrf.mxu0  ;;  %v2491_v56 = vpop.f32.mrf.mxu1 }
 0x1fb   : > { %v12854_v49 = vadd.f32 %v3361_v6, %v2568_v20  ;;  %v2572_v23 = vadd.f32 %v2491_v56, %v15526_v41  ;;  %v5523_v6 = vrot.slane %v12806_v37, 1  ;;  %10734 = vmatmul.mubr.msk.bf16.gmra.mxu1 %vm743_vm2, %v4959_v21  ;;  %v4978_v56 = vor.u32 %v4976_v35, %v4974_v30 }
 0x1fc   : > { %v10569_v39 = vpop.f32.mrf.mxu0  ;;  %10792 = vmatmul.mubr.msk.bf16.gmra.mxu0 %vm743_vm2, %v5520_v52  ;;  %v10511_v20 = vpop.f32.mrf.mxu1  ;;  %10737 = vmatprep.mubr.msk.bf16.mxu1 %vm743_vm2, %v4967_v61  ;;  %v4975_v61 = vsel %vm498_vm1, %v4970_v63, %v4974_v30  ;;  %v4984_v35 = vshrl.u32 %v12845_v1, 16  ;;  %v4990_v63 = vrot.slane %v4988_v57, 1 }
 0x1fd   : > { %v12863_v54 = vadd.f32 %v10569_v39, %v2573_v3  ;;  %10795 = vmatprep.mubr.msk.bf16.mxu0 %vm743_vm2, %v5522_v46  ;;  %v4982_v46 = vrot.slane %v4980_v13, 1  ;;  %v12876_v39 = vld [vmem:[%s11192_s8 + $0xd0] sm:$0xff]   ;;  %v5524_v38 = vsel %vm1453_vm3, %v5521_v18, %v5523_v6  ;;  %v4992_v18 = vshrl.u32 %v12870_v48, 16 }
 0x1fe   : > { %v3374_v58 = vpop.f32.mrf.mxu0  ;;  %v2504_v3 = vpop.f32.mrf.mxu1 }
 0x1ff   : > { %v12872_v40 = vadd.f32 %v3374_v58, %v2571_v42  ;;  %v2575_v37 = vadd.f32 %v2504_v3, %v12380_v45  ;;  %v5526_v42 = vsel %vm1453_vm3, %v5523_v6, %v5525_v27  ;;  %v4983_v45 = vsel %vm498_vm1, %v4978_v56, %v4982_v46 }
 0x200   : > { %v10570_v52 = vpop.f32.mrf.mxu0  ;;  %v10512_v50 = vpop.f32.mrf.mxu1  ;;  %v5529_v3 = vrot.slane %v12845_v1, 1 }
 0x201   : > { %v12879_v21 = vadd.f32 %v10570_v52, %v2574_v29  ;;  %v4996_v29 = vshll.u32 %v12876_v39, 16  ;;  %v12898_v52 = vld [vmem:[%s11192_s8 + $0xd8] sm:$0xff]   ;;  %v4986_v50 = vor.u32 %v4984_v35, %v4982_v46 }
 0x202   : > { %v3377_v41 = vpop.f32.mrf.mxu0  ;;  %v2507_v13 = vpop.f32.mrf.mxu1 }
 0x203   : > { %v12884_v10 = vadd.f32 %v3377_v41, %v2572_v23  ;;  %v2576_v6 = vadd.f32 %v2507_v13, %v12396_v11  ;;  %v5527_v23 = vrot.slane %v12838_v60, 1  ;;  %10738 = vmatmul.mubr.msk.bf16.gmra.mxu1 %vm743_vm2, %v4975_v61  ;;  %v4998_v60 = vrot.slane %v4996_v29, 1  ;;  %v12905_v13 = vld [vmem:[%s11192_s8 + $0xe0] sm:$0xff]  }
 0x204   : > { %v10573_v20 = vpop.f32.mrf.mxu0  ;;  %10796 = vmatmul.mubr.msk.bf16.gmra.mxu0 %vm743_vm2, %v5524_v38  ;;  %v10579_v58 = vpop.f32.mrf.mxu1  ;;  %10741 = vmatprep.mubr.msk.bf16.mxu1 %vm743_vm2, %v4983_v45  ;;  %v4991_v35 = vsel %vm498_vm1, %v4986_v50, %v4990_v63  ;;  %v5000_v45 = vshrl.u32 %v12876_v39, 16 }
 0x205   : > { %15527 = vst [vmem:[#allocation32_spill] sm:$0xff] %v12884_v10  ;;  %10799 = vmatprep.mubr.msk.bf16.mxu0 %vm743_vm2, %v5526_v42  ;;  %v3900_v56 = vadd.f32 %v10579_v58, %v12402_v53  ;;  %v4994_v42 = vor.u32 %v4992_v18, %v4990_v63  ;;  %v5528_v57 = vsel %vm1453_vm3, %v5525_v27, %v5527_v23  ;;  %v5004_v53 = vshll.u32 %v12898_v52, 16  ;;  %v15530_v58 = vld [vmem:[#allocation15_spill] sm:$0xff] }
 0x206   : > { %v3390_v30 = vpop.f32.mrf.mxu0  ;;  %v3659_v11 = vpop.f32.mrf.mxu1  ;;  %v5530_v10 = vsel %vm1453_vm3, %v5527_v23, %v5529_v3  ;;  %v5008_v27 = vshrl.u32 %v12898_v52, 16  ;;  %v5012_v23 = vshll.u32 %v12905_v13, 16 }
 0x207   : > { %v12901_v38 = vadd.f32 %v3390_v30, %v2575_v37  ;;  %v3898_v61 = vadd.f32 %v3659_v11, %v12413_v55  ;;  %v4999_v55 = vsel %vm498_vm1, %v4994_v42, %v4998_v60  ;;  %v5006_v11 = vrot.slane %v5004_v53, 1  ;;  %v12928_v42 = vld [vmem:[%s11192_s8 + $0xe8] sm:$0xff]  }
 0x208   : > { %v10574_v41 = vpop.f32.mrf.mxu0  ;;  %v10580_v1 = vpop.f32.mrf.mxu1 }
 0x209   : > { %15528 = vst [vmem:[#allocation34_spill] sm:$0xff] %v12901_v38  ;;  %v3901_v46 = vadd.f32 %v10580_v1, %v12420_v51  ;;  %v5533_v41 = vrot.slane %v12876_v39, 1 }
 0x20a   : > { %v3393_v20 = vpop.f32.mrf.mxu0  ;;  %v3662_v18 = vpop.f32.mrf.mxu1 }
 0x20b   : > { %v12912_v37 = vadd.f32 %v3393_v20, %v2576_v6  ;;  %v3899_v30 = vadd.f32 %v3662_v18, %v15530_v58  ;;  %v5531_v6 = vrot.slane %v12870_v48, 1  ;;  %10742 = vmatmul.mubr.msk.bf16.gmra.mxu1 %vm743_vm2, %v4991_v35  ;;  %v5014_v48 = vrot.slane %v5012_v23, 1  ;;  %v12935_v58 = vld [vmem:[%s11192_s8 + $0xf0] sm:$0xff]   ;;  %v15533_v35 = vld [vmem:[#allocation14_spill] sm:$0xff] }
 0x20c   : > { %v10641_v29 = vpop.f32.mrf.mxu0  ;;  %10800 = vmatmul.mubr.msk.bf16.gmra.mxu0 %vm743_vm2, %v5528_v57  ;;  %v10583_v63 = vpop.f32.mrf.mxu1  ;;  %v15532_v57 = vld [vmem:[#allocation17_spill] sm:$0xff]  ;;  %10745 = vmatprep.mubr.msk.bf16.mxu1 %vm743_vm2, %v4999_v55  ;;  %v5016_v23 = vshrl.u32 %v12905_v13, 16 }
 0x20d   : > { %15529 = vst [vmem:[#allocation36_spill] sm:$0xff] %v12912_v37  ;;  %v12921_v51 = vadd.f32 %v10641_v29, %v3900_v56  ;;  %10803 = vmatprep.mubr.msk.bf16.mxu0 %vm743_vm2, %v5530_v10  ;;  %v3904_v1 = vadd.f32 %v10583_v63, %v15532_v57  ;;  %v5002_v56 = vor.u32 %v5000_v45, %v4998_v60  ;;  %v5020_v60 = vshll.u32 %v12928_v42, 16  ;;  %v15534_v45 = vld [vmem:[#allocation16_spill] sm:$0xff] }
 0x20e   : > { %v4297_v50 = vpop.f32.mrf.mxu0  ;;  %v3675_v10 = vpop.f32.mrf.mxu1  ;;  %v5010_v29 = vor.u32 %v5008_v27, %v5006_v11  ;;  %v5532_v39 = vsel %vm1453_vm3, %v5529_v3, %v5531_v6  ;;  %v5024_v57 = vshrl.u32 %v12928_v42, 16 }
 0x20f   : > { %15531 = vst [vmem:[#allocation37_spill] sm:$0xff] %v12921_v51  ;;  %v12931_v20 = vadd.f32 %v4297_v50, %v3898_v61  ;;  %v3902_v51 = vadd.f32 %v3675_v10, %v15533_v35  ;;  %v5534_v61 = vsel %vm1453_vm3, %v5531_v6, %v5533_v41  ;;  %v5007_v27 = vsel %vm498_vm1, %v5002_v56, %v5006_v11 }
 0x210   : > { %v10642_v18 = vpop.f32.mrf.mxu0  ;;  %v10584_v37 = vpop.f32.mrf.mxu1  ;;  %v5015_v3 = vsel %vm498_vm1, %v5010_v29, %v5014_v48  ;;  %v5028_v6 = vshll.u32 %v12935_v58, 16  ;;  %v5022_v56 = vrot.slane %v5020_v60, 1  ;;  %v12960_v29 = vld [vmem:[%s11192_s8 + $0xf8] sm:$0xff]  }
 0x211   : > { %v12938_v53 = vadd.f32 %v10642_v18, %v3901_v46  ;;  %v3905_v55 = vadd.f32 %v10584_v37, %v15534_v45  ;;  %v5537_v18 = vrot.slane %v12905_v13, 1 }
 0x212   : > { %v4300_v38 = vpop.f32.mrf.mxu0  ;;  %v3678_v50 = vpop.f32.mrf.mxu1  ;;  %v5026_v45 = vor.u32 %v5024_v57, %v5022_v56 }
 0x213   : > { %v12944_v63 = vadd.f32 %v4300_v38, %v3899_v30  ;;  %v3903_v10 = vadd.f32 %v3678_v50, %v12468_v2  ;;  %v5535_v38 = vrot.slane %v12898_v52, 1  ;;  %10746 = vmatmul.mubr.msk.bf16.gmra.mxu1 %vm743_vm2, %v5007_v27  ;;  %v5018_v2 = vor.u32 %v5016_v23, %v5014_v48  ;;  %v12967_v50 = vld [vmem:[%s11192_s8 + $0x100] sm:$0xff]   ;;  %v15536_v23 = vld [vmem:[#allocation18_spill] sm:$0xff] }
 0x214   : > { %v10645_v46 = vpop.f32.mrf.mxu0  ;;  %10804 = vmatmul.mubr.msk.bf16.gmra.mxu0 %vm743_vm2, %v5532_v39  ;;  %v10587_v30 = vpop.f32.mrf.mxu1  ;;  %10749 = vmatprep.mubr.msk.bf16.mxu1 %vm743_vm2, %v5015_v3  ;;  %v5030_v52 = vrot.slane %v5028_v6, 1  ;;  %v5036_v48 = vshll.u32 %v12960_v29, 16 }
 0x215   : > { %v12953_v37 = vadd.f32 %v10645_v46, %v3904_v1  ;;  %10807 = vmatprep.mubr.msk.bf16.mxu0 %vm743_vm2, %v5534_v61  ;;  %v3908_v35 = vadd.f32 %v10587_v30, %v12475_v28  ;;  %v5536_v13 = vsel %vm1453_vm3, %v5533_v41, %v5535_v38  ;;  %v5032_v28 = vshrl.u32 %v12935_v58, 16 }
 0x216   : > { %v4313_v11 = vpop.f32.mrf.mxu0  ;;  %v3691_v1 = vpop.f32.mrf.mxu1  ;;  %v5023_v6 = vsel %vm498_vm1, %v5018_v2, %v5022_v56  ;;  %v5031_v41 = vsel %vm498_vm1, %v5026_v45, %v5030_v52  ;;  %v5541_v45 = vrot.slane %v12935_v58, 1 }
 0x217   : > { %15535 = vst [vmem:[#allocation39_spill] sm:$0xff] %v12953_v37  ;;  %v12963_v39 = vadd.f32 %v4313_v11, %v3902_v51  ;;  %v3906_v27 = vadd.f32 %v3691_v1, %v12486_v33  ;;  %v5538_v51 = vsel %vm1453_vm3, %v5535_v38, %v5537_v18  ;;  %v5044_v11 = vshll.u32 %v12967_v50, 16  ;;  %v15538_v38 = vld [vmem:[#allocation19_spill] sm:$0xff] }
 0x218   : > { %v10646_v61 = vpop.f32.mrf.mxu0  ;;  %v10588_v46 = vpop.f32.mrf.mxu1  ;;  %v5034_v2 = vor.u32 %v5032_v28, %v5030_v52 }
 0x219   : > { %v12970_v60 = vadd.f32 %v10646_v61, %v3905_v55  ;;  %v3909_v3 = vadd.f32 %v10588_v46, %v15536_v23  ;;  %v5040_v55 = vshrl.u32 %v12960_v29, 16  ;;  %v15540_v46 = vld [vmem:[#allocation21_spill] sm:$0xff] }
 0x21a   : > { %v4316_v37 = vpop.f32.mrf.mxu0  ;;  %v3694_v30 = vpop.f32.mrf.mxu1 }
 0x21b   : > { %v12977_v57 = vadd.f32 %v4316_v37, %v3903_v10  ;;  %v3907_v1 = vadd.f32 %v3694_v30, %v15538_v38  ;;  %v5539_v10 = vrot.slane %v12928_v42, 1  ;;  %10750 = vmatmul.mubr.msk.bf16.gmra.mxu1 %vm743_vm2, %v5023_v6  ;;  %v5046_v38 = vrot.slane %v5044_v11, 1  ;;  %v15541_v6 = vld [vmem:[#allocation23_spill] sm:$0xff] }
 0x21c   : > { %v10649_v33 = vpop.f32.mrf.mxu0  ;;  %10808 = vmatmul.mubr.msk.bf16.gmra.mxu0 %vm743_vm2, %v5536_v13  ;;  %v10591_v37 = vpop.f32.mrf.mxu1  ;;  %v5038_v13 = vrot.slane %v5036_v48, 1  ;;  %10753 = vmatprep.mubr.msk.bf16.mxu1 %vm743_vm2, %v5031_v41 }
 0x21d   : > { %15537 = vst [vmem:[#allocation40_spill] sm:$0xff] %v12977_v57  ;;  %v12985_v61 = vadd.f32 %v10649_v33, %v3908_v35  ;;  %10811 = vmatprep.mubr.msk.bf16.mxu0 %vm743_vm2, %v5538_v51  ;;  %v3912_v23 = vadd.f32 %v10591_v37, %v15540_v46  ;;  %v11099_v35 = vld [vmem:[%s11192_s8 + $0x108] ss:$0 sps:$4 sm:$0x11]   ;;  %v5540_v52 = vsel %vm1453_vm3, %v5537_v18, %v5539_v10 }
 0x21e   : > { %v4329_v56 = vpop.f32.mrf.mxu0  ;;  %v3707_v30 = vpop.f32.mrf.mxu1  ;;  %v5042_v51 = vor.u32 %v5040_v55, %v5038_v13  ;;  %v5039_v58 = vsel %vm498_vm1, %v5034_v2, %v5038_v13  ;;  %v5052_v55 = vshll.u32 %v11099_v35, 16  ;;  %v5545_v13 = vrot.slane %v12967_v50, 1 }
 0x21f   : > { %15539 = vst [vmem:[#allocation38_spill] sm:$0xff] %v12985_v61  ;;  %v12992_v57 = vadd.f32 %v4329_v56, %v3906_v27  ;;  %v3910_v42 = vadd.f32 %v3707_v30, %v12527_v4  ;;  %v5542_v27 = vsel %vm1453_vm3, %v5539_v10, %v5541_v45  ;;  %v5048_v56 = vshrl.u32 %v12967_v50, 16  ;;  %v15542_v30 = vld [vmem:[#allocation20_spill] sm:$0xff] }
 0x220   : > { %v10650_v33 = vpop.f32.mrf.mxu0  ;;  %v10592_v28 = vpop.f32.mrf.mxu1  ;;  %v5047_v4 = vsel %vm498_vm1, %v5042_v51, %v5046_v38  ;;  %v5543_v10 = vrot.slane %v12960_v29, 1 }
 0x221   : > { %v12997_v61 = vadd.f32 %v10650_v33, %v3909_v3  ;;  %v3913_v37 = vadd.f32 %v10592_v28, %v15541_v6 }
 0x222   : > { %v4332_v48 = vpop.f32.mrf.mxu0  ;;  %v3710_v11 = vpop.f32.mrf.mxu1  ;;  %v5544_v29 = vsel %vm1453_vm3, %v5541_v45, %v5543_v10  ;;  %v5546_v50 = vsel %vm1453_vm3, %v5543_v10, %v5545_v13  ;;  %v5547_v45 = vrot.slane %v11099_v35, 1 }
 0x223   : > { %v13003_v41 = vadd.f32 %v4332_v48, %v3907_v1  ;;  %v3911_v18 = vadd.f32 %v3710_v11, %v12549_v16  ;;  %10754 = vmatmul.mubr.msk.bf16.gmra.mxu1 %vm743_vm2, %v5039_v58  ;;  %v5054_v16 = vrot.slane %v5052_v55, 1 }
 0x224   : > { %v10653_v46 = vpop.f32.mrf.mxu0  ;;  %10812 = vmatmul.mubr.msk.bf16.gmra.mxu0 %vm743_vm2, %v5540_v52  ;;  %v10595_v2 = vpop.f32.mrf.mxu1  ;;  %v5050_v52 = vor.u32 %v5048_v56, %v5046_v38  ;;  %10757 = vmatprep.mubr.msk.bf16.mxu1 %vm743_vm2, %v5047_v4 }
 0x225   : > { %v13009_v3 = vadd.f32 %v10653_v46, %v3912_v23  ;;  %10815 = vmatprep.mubr.msk.bf16.mxu0 %vm743_vm2, %v5542_v27  ;;  %v3916_v33 = vadd.f32 %v10595_v2, %v15542_v30 }
 0x226   : > { %v4345_v1 = vpop.f32.mrf.mxu0  ;;  %v3723_v23 = vpop.f32.mrf.mxu1  ;;  %v5055_v38 = vsel %vm498_vm1, %v5050_v52, %v5054_v16 }
 0x227   : > { %v13016_v28 = vadd.f32 %v4345_v1, %v3910_v42  ;;  %v3914_v48 = vadd.f32 %v3723_v23, %v12573_v17 }
 0x228   : > { %v10654_v51 = vpop.f32.mrf.mxu0  ;;  %v10596_v58 = vpop.f32.mrf.mxu1 }
 0x229   : > { %v13020_v27 = vadd.f32 %v10654_v51, %v3913_v37  ;;  %v3917_v11 = vadd.f32 %v10596_v58, %v12581_v14  ;;  %v15543_v14 = vld [vmem:[#allocation22_spill] sm:$0xff] }
 0x22a   : > { %v4348_v6 = vpop.f32.mrf.mxu0  ;;  %v3726_v56 = vpop.f32.mrf.mxu1 }
 0x22b   : > { %v13025_v42 = vadd.f32 %v4348_v6, %v3911_v18  ;;  %v3915_v17 = vadd.f32 %v3726_v56, %v12592_v36  ;;  %10758 = vmatmul.mubr.msk.bf16.gmra.mxu1 %vm743_vm2, %v5055_v38  ;;  %v5548_v36 = vsel %vm1453_vm3, %v5545_v13, %v5547_v45 }
 0x22c   : > { %v10657_v55 = vpop.f32.mrf.mxu0  ;;  %10816 = vmatmul.mubr.msk.bf16.gmra.mxu0 %vm743_vm2, %v5544_v29  ;;  %v10599_v46 = vpop.f32.mrf.mxu1 }
 0x22d   : > { %v13030_v37 = vadd.f32 %v10657_v55, %v3916_v33  ;;  %10819 = vmatprep.mubr.msk.bf16.mxu0 %vm743_vm2, %v5546_v50  ;;  %v3920_v18 = vadd.f32 %v10599_v46, %v15543_v14 }
 0x22e   : > { %v4361_v4 = vpop.f32.mrf.mxu0  ;;  %v3739_v2 = vpop.f32.mrf.mxu1 }
 0x22f   : > { %v13035_v10 = vadd.f32 %v4361_v4, %v3914_v48  ;;  %v3918_v30 = vadd.f32 %v3739_v2, %v12617_v9 }
 0x230   : > { %v10658_v1 = vpop.f32.mrf.mxu0  ;;  %v10600_v33 = vpop.f32.mrf.mxu1 }
 0x231   : > { %v13038_v52 = vadd.f32 %v10658_v1, %v3917_v11  ;;  %v3921_v35 = vadd.f32 %v10600_v33, %v12624_v62 }
 0x232   : > { %v4364_v16 = vpop.f32.mrf.mxu0  ;;  %v3742_v51 = vpop.f32.mrf.mxu1 }
 0x233   : > { %v13042_v23 = vadd.f32 %v4364_v16, %v3915_v17  ;;  %v3919_v48 = vadd.f32 %v3742_v51, %v12630_v59 }
 0x234   : > { %v10661_v29 = vpop.f32.mrf.mxu0  ;;  %10820 = vmatmul.mubr.msk.bf16.gmra.mxu0 %vm743_vm2, %v5548_v36  ;;  %v10603_v6 = vpop.f32.mrf.mxu1 }
 0x235   : > { %v13046_v58 = vadd.f32 %v10661_v29, %v3920_v18  ;;  %v3924_v50 = vadd.f32 %v10603_v6, %v12639_v19 }
 0x236   : > { %v4377_v9 = vpop.f32.mrf.mxu0  ;;  %v3755_v13 = vpop.f32.mrf.mxu1 }
 0x237   : > { %15544 = vst [vmem:[#allocation41_spill] sm:$0xff] %v13046_v58  ;;  %v13049_v11 = vadd.f32 %v4377_v9, %v3918_v30  ;;  %v3922_v62 = vadd.f32 %v3755_v13, %v12649_v7 }
 0x238   : > { %v10662_v38 = vpop.f32.mrf.mxu0  ;;  %v10604_v55 = vpop.f32.mrf.mxu1 }
 0x239   : > { %15545 = vst [vmem:[#allocation43_spill] sm:$0xff] %v13049_v11  ;;  %v13052_v56 = vadd.f32 %v10662_v38, %v3921_v35  ;;  %v3925_v45 = vadd.f32 %v10604_v55, %v12656_v0 }
 0x23a   : > { %v4380_v17 = vpop.f32.mrf.mxu0  ;;  %v3758_v59 = vpop.f32.mrf.mxu1 }
 0x23b   : > { %15546 = vst [vmem:[#allocation42_spill] sm:$0xff] %v13052_v56  ;;  %v13055_v46 = vadd.f32 %v4380_v17, %v3919_v48  ;;  %v3923_v14 = vadd.f32 %v3758_v59, %v12662_v31 }
 0x23c   : > { %v10665_v4 = vpop.f32.mrf.mxu0  ;;  %v10607_v19 = vpop.f32.mrf.mxu1 }
 0x23d   : > { %15547 = vst [vmem:[#allocation45_spill] sm:$0xff] %v13055_v46  ;;  %v13058_v18 = vadd.f32 %v10665_v4, %v3924_v50  ;;  %v3928_v1 = vadd.f32 %v10607_v19, %v12671_v44 }
 0x23e   : > { %v4393_v2 = vpop.f32.mrf.mxu0  ;;  %v3771_v7 = vpop.f32.mrf.mxu1 }
 0x23f   : > { %15548 = vst [vmem:[#allocation44_spill] sm:$0xff] %v13058_v18  ;;  %v13061_v30 = vadd.f32 %v4393_v2, %v3922_v62  ;;  %v3926_v33 = vadd.f32 %v3771_v7, %v12681_v32 }
 0x240   : > { %v10666_v36 = vpop.f32.mrf.mxu0  ;;  %v10608_v0 = vpop.f32.mrf.mxu1 }
 0x241   : > { %15549 = vst [vmem:[#allocation48_spill] sm:$0xff] %v13061_v30  ;;  %v13064_v16 = vadd.f32 %v10666_v36, %v3925_v45  ;;  %v3929_v51 = vadd.f32 %v10608_v0, %v12688_v8  ;;  %v15558_v0 = vld [vmem:[#allocation24_spill] sm:$0xff] }
 0x242   : > { %v4396_v35 = vpop.f32.mrf.mxu0  ;;  %v3774_v31 = vpop.f32.mrf.mxu1 }
 0x243   : > { %15550 = vst [vmem:[#allocation46_spill] sm:$0xff] %v13064_v16  ;;  %v13067_v29 = vadd.f32 %v4396_v35, %v3923_v14  ;;  %v3927_v6 = vadd.f32 %v3774_v31, %v12694_v22 }
 0x244   : > { %v10669_v48 = vpop.f32.mrf.mxu0  ;;  %v10611_v44 = vpop.f32.mrf.mxu1 }
 0x245   : > { %15551 = vst [vmem:[#allocation47_spill] sm:$0xff] %v13067_v29  ;;  %v13070_v9 = vadd.f32 %v10669_v48, %v3928_v1  ;;  %v3932_v13 = vadd.f32 %v10611_v44, %v12703_v47  ;;  %v15560_v48 = vld [vmem:[#allocation25_spill] sm:$0xff] }
 0x246   : > { %v4409_v50 = vpop.f32.mrf.mxu0  ;;  %v3787_v32 = vpop.f32.mrf.mxu1 }
 0x247   : > { %15552 = vst [vmem:[#allocation49_spill] sm:$0xff] %v13070_v9  ;;  %v13073_v38 = vadd.f32 %v4409_v50, %v3926_v33  ;;  %v3930_v55 = vadd.f32 %v3787_v32, %v12713_v43  ;;  %v15638_v9 = vld [vmem:[#allocation38_spill] sm:$0xff] }
 0x248   : > { %v10670_v62 = vpop.f32.mrf.mxu0  ;;  %v10612_v8 = vpop.f32.mrf.mxu1 }
 0x249   : > { %15553 = vst [vmem:[#allocation50_spill] sm:$0xff] %v13073_v38  ;;  %v13076_v17 = vadd.f32 %v10670_v62, %v3929_v51  ;;  %v3933_v59 = vadd.f32 %v10612_v8, %v12720_v25  ;;  %v15564_v8 = vld [vmem:[#allocation29_spill] sm:$0xff] }
 0x24a   : > { %v4412_v45 = vpop.f32.mrf.mxu0  ;;  %v3790_v22 = vpop.f32.mrf.mxu1 }
 0x24b   : > { %15554 = vst [vmem:[#allocation3_spill] sm:$0xff] %v13076_v17  ;;  %v13079_v4 = vadd.f32 %v4412_v45, %v3927_v6  ;;  %v3931_v19 = vadd.f32 %v3790_v22, %v12726_v26 }
 0x24c   : > { %v10673_v14 = vpop.f32.mrf.mxu0  ;;  %v10615_v47 = vpop.f32.mrf.mxu1 }
 0x24d   : > { %15555 = vst [vmem:[#allocation5_spill] sm:$0xff] %v13079_v4  ;;  %v13082_v2 = vadd.f32 %v10673_v14, %v3932_v13  ;;  %v3936_v7 = vadd.f32 %v10615_v47, %v12735_v5  ;;  %v15562_v13 = vld [vmem:[#allocation27_spill] sm:$0xff] }
 0x24e   : > { %v4425_v1 = vpop.f32.mrf.mxu0  ;;  %v3803_v43 = vpop.f32.mrf.mxu1 }
 0x24f   : > { %15556 = vst [vmem:[#allocation4_spill] sm:$0xff] %v13082_v2  ;;  %v13085_v36 = vadd.f32 %v4425_v1, %v3930_v55  ;;  %v3934_v35 = vadd.f32 %v3803_v43, %v15558_v0 }
 0x250   : > { %v10674_v33 = vpop.f32.mrf.mxu0  ;;  %v10616_v25 = vpop.f32.mrf.mxu1 }
 0x251   : > { %15557 = vst [vmem:[#allocation6_spill] sm:$0xff] %v13085_v36  ;;  %v13088_v51 = vadd.f32 %v10674_v33, %v3933_v59  ;;  %v3937_v6 = vadd.f32 %v10616_v25, %v15560_v48  ;;  %v15567_v33 = vld [vmem:[#allocation26_spill] sm:$0xff]  ;;  %v15569_v48 = vld [vmem:[#allocation28_spill] sm:$0xff] }
 0x252   : > { %v4428_v31 = vpop.f32.mrf.mxu0  ;;  %v3806_v26 = vpop.f32.mrf.mxu1 }
 0x253   : > { %15559 = vst [vmem:[#allocation7_spill] sm:$0xff] %v13088_v51  ;;  %v13091_v44 = vadd.f32 %v4428_v31, %v3931_v19  ;;  %v3935_v32 = vadd.f32 %v3806_v26, %v15562_v13 }
 0x254   : > { %v10677_v50 = vpop.f32.mrf.mxu0  ;;  %v10619_v5 = vpop.f32.mrf.mxu1 }
 0x255   : > { %15561 = vst [vmem:[#allocation9_spill] sm:$0xff] %v13091_v44  ;;  %v13094_v62 = vadd.f32 %v10677_v50, %v3936_v7  ;;  %v3940_v45 = vadd.f32 %v10619_v5, %v15564_v8  ;;  %v15571_v5 = vld [vmem:[#allocation30_spill] sm:$0xff] }
 0x256   : > { %v4441_v55 = vpop.f32.mrf.mxu0  ;;  %v3819_v59 = vpop.f32.mrf.mxu1 }
 0x257   : > { %15563 = vst [vmem:[#allocation11_spill] sm:$0xff] %v13094_v62  ;;  %v13097_v22 = vadd.f32 %v4441_v55, %v3934_v35  ;;  %v3938_v47 = vadd.f32 %v3819_v59, %v12777_v15 }
 0x258   : > { %v10678_v14 = vpop.f32.mrf.mxu0  ;;  %v10620_v19 = vpop.f32.mrf.mxu1 }
 0x259   : > { %15565 = vst [vmem:[#allocation8_spill] sm:$0xff] %v13097_v22  ;;  %v13100_v1 = vadd.f32 %v10678_v14, %v3937_v6  ;;  %v3941_v0 = vadd.f32 %v10620_v19, %v15567_v33  ;;  %v15574_v33 = vld [vmem:[#allocation31_spill] sm:$0xff] }
 0x25a   : > { %v4444_v43 = vpop.f32.mrf.mxu0  ;;  %v3822_v7 = vpop.f32.mrf.mxu1 }
 0x25b   : > { %15566 = vst [vmem:[#allocation10_spill] sm:$0xff] %v13100_v1  ;;  %v13103_v25 = vadd.f32 %v4444_v43, %v3935_v32  ;;  %v3939_v26 = vadd.f32 %v3822_v7, %v15569_v48  ;;  %v8109_v43 = vlaneseq  ;;  %v15576_v48 = vld [vmem:[#allocation33_spill] sm:$0xff]  ;;  %v15590_v1 = vld [vmem:[#allocation34_spill] sm:$0xff] }
 0x25c   : > { %v10681_v31 = vpop.f32.mrf.mxu0  ;;  %v10623_v35 = vpop.f32.mrf.mxu1 }
 0x25d   : > { %15568 = vst [vmem:[#allocation12_spill] sm:$0xff] %v13103_v25  ;;  %v13106_v50 = vadd.f32 %v10681_v31, %v3940_v45  ;;  %v3944_v55 = vadd.f32 %v10623_v35, %v15571_v5  ;;  %v13120_v5 = vshrl.u32 %v8109_v43, 7 }
 0x25e   : > { %v4457_v13 = vpop.f32.mrf.mxu0  ;;  %v3835_v15 = vpop.f32.mrf.mxu1 }
 0x25f   : > { %15570 = vst [vmem:[#allocation13_spill] sm:$0xff] %v13106_v50  ;;  %v13109_v8 = vadd.f32 %v4457_v13, %v3938_v47  ;;  %v3942_v59 = vadd.f32 %v3835_v15, %v12809_v12  ;;  %15578 = vst [vmem:[#allocation18_spill] sm:$0xff] %v13120_v5  ;;  %v15579_v12 = vld [vmem:[#allocation35_spill] sm:$0xff] }
 0x260   : > { %v10682_v6 = vpop.f32.mrf.mxu0  ;;  %v10624_v32 = vpop.f32.mrf.mxu1 }
 0x261   : > { %15572 = vst [vmem:[#allocation15_spill] sm:$0xff] %v13109_v8  ;;  %v13112_v14 = vadd.f32 %v10682_v6, %v3941_v0  ;;  %v3945_v25 = vadd.f32 %v10624_v32, %v15574_v33 }
 0x262   : > { %v4460_v19 = vpop.f32.mrf.mxu0  ;;  %v3838_v45 = vpop.f32.mrf.mxu1 }
 0x263   : > { %15573 = vst [vmem:[#allocation17_spill] sm:$0xff] %v13112_v14  ;;  %v13115_v7 = vadd.f32 %v4460_v19, %v3939_v26  ;;  %v3943_v50 = vadd.f32 %v3838_v45, %v15576_v48  ;;  %v13129_v45 = vadd.s32 8, %v13120_v5 }
 0x264   : > { %v10685_v31 = vpop.f32.mrf.mxu0  ;;  %v10627_v47 = vpop.f32.mrf.mxu1 }
 0x265   : > { %15575 = vst [vmem:[#allocation14_spill] sm:$0xff] %v13115_v7  ;;  %v13118_v35 = vadd.f32 %v10685_v31, %v3944_v55  ;;  %v3948_v0 = vadd.f32 %v10627_v47, %v15579_v12 }
 0x266   : > { %v4473_v13 = vpop.f32.mrf.mxu0  ;;  %v3851_v6 = vpop.f32.mrf.mxu1 }
 0x267   : > { %15577 = vst [vmem:[#allocation16_spill] sm:$0xff] %v13118_v35  ;;  %v13123_v15 = vadd.f32 %v4473_v13, %v3942_v59  ;;  %v3946_v32 = vadd.f32 %v3851_v6, %v12841_v34 }
 0x268   : > { %v10686_v14 = vpop.f32.mrf.mxu0  ;;  %v10628_v19 = vpop.f32.mrf.mxu1 }
 0x269   : > { %15580 = vst [vmem:[#allocation19_spill] sm:$0xff] %v13123_v15  ;;  %v13126_v26 = vadd.f32 %v10686_v14, %v3945_v25  ;;  %v3949_v55 = vadd.f32 %v10628_v19, %v12848_v24  ;;  %v13138_v34 = vmul.u32.u64.low 2863311531, %v13129_v45  ;;  %v13139_v25 = vmul.u32.u64.high 2863311531, %v13129_v45, %v13138_v34 }
 0x26a   : > { %v4476_v33 = vpop.f32.mrf.mxu0  ;;  %v3854_v43 = vpop.f32.mrf.mxu1  ;;  %v13142_v14 = vadd.s32 16, %v13120_v5 }
 0x26b   : > { %15581 = vst [vmem:[#allocation21_spill] sm:$0xff] %v13126_v26  ;;  %v13132_v31 = vadd.f32 %v4476_v33, %v3943_v50  ;;  %v3947_v59 = vadd.f32 %v3854_v43, %v12854_v49  ;;  %v13148_v50 = vadd.s32 40, %v13120_v5  ;;  %v13155_v43 = vadd.s32 24, %v13120_v5 }
 0x26c   : > { %v10689_v48 = vpop.f32.mrf.mxu0  ;;  %v10631_v13 = vpop.f32.mrf.mxu1 }
 0x26d   : > { %15582 = vst [vmem:[#allocation23_spill] sm:$0xff] %v13132_v31  ;;  %v13135_v47 = vadd.f32 %v10689_v48, %v3948_v0  ;;  %v3952_v6 = vadd.f32 %v10631_v13, %v12863_v54  ;;  %v13151_v0 = vmul.u32.u64.low 2863311531, %v13120_v5  ;;  %v13152_v33 = vmul.u32.u64.high 2863311531, %v13120_v5, %v13151_v0 }
 0x26e   : > { %v4489_v12 = vpop.f32.mrf.mxu0  ;;  %v3867_v19 = vpop.f32.mrf.mxu1  ;;  %v13161_v54 = vadd.s32 32, %v13120_v5  ;;  %v13171_v0 = vmul.u32.u64.low 2863311531, %v13148_v50  ;;  %v13172_v26 = vmul.u32.u64.high 2863311531, %v13148_v50, %v13171_v0 }
 0x26f   : > { %15583 = vst [vmem:[#allocation20_spill] sm:$0xff] %v13135_v47  ;;  %v13145_v24 = vadd.f32 %v4489_v12, %v3946_v32  ;;  %v3950_v48 = vadd.f32 %v3867_v19, %v12872_v40  ;;  %v8116_v0 = vadd.s32 48, %v13120_v5 }
 0x270   : > { %v10690_v49 = vpop.f32.mrf.mxu0  ;;  %v10632_v32 = vpop.f32.mrf.mxu1 }
 0x271   : > { %15584 = vst [vmem:[#allocation22_spill] sm:$0xff] %v13145_v24  ;;  %v13158_v34 = vadd.f32 %v10690_v49, %v3949_v55  ;;  %v13164_v12 = vmul.u32.u64.low 2863311531, %v13142_v14  ;;  %v13165_v24 = vmul.u32.u64.high 2863311531, %v13142_v14, %v13164_v12  ;;  %v3953_v47 = vadd.f32 %v10632_v32, %v12879_v21 }
 0x272   : > { %v4492_v13 = vpop.f32.mrf.mxu0  ;;  %v3870_v40 = vpop.f32.mrf.mxu1  ;;  %v13175_v19 = vmul.u32.u64.low 2863311531, %v13155_v43  ;;  %v13176_v49 = vmul.u32.u64.high 2863311531, %v13155_v43, %v13175_v19  ;;  %v13182_v12 = vmul.u32.u64.low 2863311531, %v13161_v54  ;;  %v13183_v7 = vmul.u32.u64.high 2863311531, %v13161_v54, %v13182_v12 }
 0x273   : > { %15585 = vst [vmem:[#allocation24_spill] sm:$0xff] %v13158_v34  ;;  %v13168_v31 = vadd.f32 %v4492_v13, %v3947_v59  ;;  %v15587_v34 = vld [vmem:[#allocation32_spill] sm:$0xff]  ;;  %v8175_v13 = vshrl.u32 %v13139_v25, 4  ;;  %v8164_v19 = vshrl.u32 %v13152_v33, 4  ;;  %v8186_v12 = vshrl.u32 %v13165_v24, 4 }
 0x274   : > { %v10693_v55 = vpop.f32.mrf.mxu0  ;;  %v3951_v15 = vadd.f32 %v3870_v40, %v15587_v34  ;;  %v10635_v21 = vpop.f32.mrf.mxu1  ;;  %v8197_v33 = vshrl.u32 %v13176_v49, 4 }
 0x275   : > { %15586 = vst [vmem:[#allocation25_spill] sm:$0xff] %v13168_v31  ;;  %v13179_v35 = vadd.f32 %v10693_v55, %v3952_v6  ;;  %v8176_v25 = vmul.u32 24, %v8175_v13  ;;  %v8165_v62 = vmul.u32 24, %v8164_v19 }
 0x276   : > { %v4505_v59 = vpop.f32.mrf.mxu0  ;;  %v3883_v31 = vpop.f32.mrf.mxu1  ;;  %v8187_v24 = vmul.u32 24, %v8186_v12  ;;  %v8198_v49 = vmul.u32 24, %v8197_v33 }
 0x277   : > { %15588 = vst [vmem:[#allocation27_spill] sm:$0xff] %v13179_v35  ;;  %v13185_v32 = vadd.f32 %v4505_v59, %v3950_v48  ;;  %v3954_v34 = vadd.f32 %v3883_v31, %v15590_v1  ;;  %v13194_v21 = vmul.u32.u64.low 2863311531, %v8116_v0  ;;  %v13195_v35 = vmul.u32.u64.high 2863311531, %v8116_v0, %v13194_v21  ;;  %v15593_v1 = vld [vmem:[#allocation36_spill] sm:$0xff] }
 0x278   : > { %v10694_v8 = vpop.f32.mrf.mxu0  ;;  %v10636_v40 = vpop.f32.mrf.mxu1  ;;  %v8219_v59 = vshrl.u32 %v13172_v26, 4  ;;  %v8208_v31 = vshrl.u32 %v13183_v7, 4  ;;  %v13210_v19 = vsub.s32 %v13120_v5, %v8165_v62  ;;  %v13213_v12 = vsub.s32 %v13142_v14, %v8187_v24 }
 0x279   : > { %15589 = vst [vmem:[#allocation29_spill] sm:$0xff] %v13185_v32  ;;  %v13191_v6 = vadd.f32 %v10694_v8, %v3953_v47  ;;  %v13226_v14 = vsub.s32 %v13155_v43, %v8198_v49  ;;  %v15605_v24 = vmov 0 }
 0x27a   : > { %v4508_v55 = vpop.f32.mrf.mxu0  ;;  %v3886_v32 = vpop.f32.mrf.mxu1  ;;  %v8220_v26 = vmul.u32 24, %v8219_v59  ;;  %15596 = vst [vmem:[#allocation33_spill] sm:$0xff] %v13210_v19  ;;  %15597 = vst [vmem:[#allocation35_spill] sm:$0xff] %v13213_v12  ;;  %vm8686_vm8 = vcmp.ne.s32.totalorder %v13210_v19, 0  ;;  %vm8734_vm9 = vcmp.lt.s32.totalorder %v13210_v19, 0  ;;  %vm8688_vm10 = vcmp.ne.s32.totalorder %v13213_v12, 0 }
 0x27b   : > { %15591 = vst [vmem:[#allocation26_spill] sm:$0xff] %v13191_v6  ;;  %v13197_v48 = vadd.f32 %v4508_v55, %v3951_v15  ;;  %v3955_v8 = vadd.f32 %v3886_v32, %v15593_v1  ;;  %v8230_v6 = vshrl.u32 %v13195_v35, 4  ;;  %v13207_v15 = vsub.s32 %v13129_v45, %v8176_v25  ;;  %15601 = vst [vmem:[#allocation36_spill] sm:$0xff] %v13226_v14 }
 0x27c   : > { %v10697_v22 = vpop.f32.mrf.mxu0  ;;  %v10703_v47 = vpop.f32.mrf.mxu1  ;;  %v8209_v32 = vmul.u32 24, %v8208_v31  ;;  %v13220_v45 = vsub.s32 %v13148_v50, %v8220_v26  ;;  %v13233_v50 = vadd.s32 72, %v13120_v5  ;;  %vm8736_vm11 = vcmp.lt.s32.totalorder %v13213_v12, 0  ;;  %vm13258_vm15 = vmand %vm8734_vm9, %vm8686_vm8 }
 0x27d   : > { %15592 = vst [vmem:[#allocation28_spill] sm:$0xff] %v13197_v48  ;;  %15595 = vst [vmem:[#allocation31_spill] sm:$0xff] %v13207_v15  ;;  %v8231_v35 = vmul.u32 24, %v8230_v6  ;;  %vm8687_vm6 = vcmp.ne.s32.totalorder %v13207_v15, 0  ;;  %vm8735_vm7 = vcmp.lt.s32.totalorder %v13207_v15, 0  ;;  %vm8689_vm0 = vcmp.ne.s32.totalorder %v13226_v14, 0 }
 0x27e   : > { %v4521_v40 = vpop.f32.mrf.mxu0  ;;  %v5183_v13 = vpop.f32.mrf.mxu1  ;;  %15600 = vst [vmem:[#allocation34_spill] sm:$0xff] %v13220_v45  ;;  %v13230_v33 = vsub.s32 %v13161_v54, %v8209_v32  ;;  %vm13248_vm12 = vmand %vm8735_vm7, %vm8687_vm6  ;;  %vm8691_vm13 = vcmp.ne.s32.totalorder %v13220_v45, 0  ;;  %vm8739_vm14 = vcmp.lt.s32.totalorder %v13220_v45, 0  ;;  %vm8737_vm1 = vcmp.lt.s32.totalorder %v13226_v14, 0 }
 0x27f   : > { %v13204_v21 = vadd.f32 %v4521_v40, %v3954_v34  ;;  %v15598_v34 = vld [vmem:[#allocation37_spill] sm:$0xff]  ;;  %v5422_v6 = vadd.f32 %v5183_v13, %v12931_v20  ;;  %v13240_v43 = vsub.s32 %v8116_v0, %v8231_v35  ;;  %v15606_v24 = vsel %vm13248_vm12, 4294967295, %v15605_v24  ;;  %vm13274_vm2 = vmand %vm8736_vm11, %vm8688_vm10 }
 0x280   : > { %v10698_v22 = vpop.f32.mrf.mxu0  ;;  %v10704_v55 = vpop.f32.mrf.mxu1  ;;  %v5424_v1 = vadd.f32 %v10703_v47, %v15598_v34  ;;  %15602 = vst [vmem:[#allocation37_spill] sm:$0xff] %v13230_v33  ;;  %v13236_v47 = vadd.s32 24, %v13207_v15  ;;  %15607 = vst [vmem:[#allocation53_spill] sm:$0xff] %v15606_v24  ;;  %vm8690_vm3 = vcmp.ne.s32.totalorder %v13230_v33, 0  ;;  %vm8738_vm6 = vcmp.lt.s32.totalorder %v13230_v33, 0 }
 0x281   : > { %15594 = vst [vmem:[#allocation30_spill] sm:$0xff] %v13204_v21  ;;  %15604 = vst [vmem:[#allocation52_spill] sm:$0xff] %v13240_v43  ;;  %v5425_v20 = vadd.f32 %v10704_v55, %v12938_v53  ;;  %v15608_v53 = vmov 0  ;;  %v13265_v13 = vmul.u32.u64.low 2863311531, %v13233_v50  ;;  %v13266_v22 = vmul.u32.u64.high 2863311531, %v13233_v50, %v13265_v13 }
 0x282   : > { %v4524_v7 = vpop.f32.mrf.mxu0  ;;  %v5186_v62 = vpop.f32.mrf.mxu1  ;;  %15603 = vst [vmem:[#allocation51_spill] sm:$0xff] %v13236_v47  ;;  %v15609_v53 = vsel %vm13258_vm15, 4294967295, %v15608_v53  ;;  %v15611_v55 = vmov 0  ;;  %v13281_v34 = vadd.s32 24, %v13210_v19  ;;  %vm13290_vm7 = vmand %vm8739_vm14, %vm8691_vm13  ;;  %vm8692_vm8 = vcmp.ne.s32.totalorder %v13240_v43, 0 }
 0x283   : > { %v13216_v40 = vadd.f32 %v4524_v7, %v3955_v8  ;;  %15610 = vst [vmem:[#allocation54_spill] sm:$0xff] %v15609_v53  ;;  %v5423_v49 = vadd.f32 %v5186_v62, %v12944_v63  ;;  %v15612_v55 = vsel %vm13274_vm2, 4294967295, %v15611_v55  ;;  %v13284_v63 = vadd.s32 24, %v13213_v12  ;;  %v15619_v62 = vld [vmem:[#allocation39_spill] sm:$0xff]  ;;  %vm13305_vm10 = vmand %vm8737_vm1, %vm8689_vm0 }
 0x284   : > { %v10765_v25 = vpop.f32.mrf.mxu0  ;;  %v10707_v8 = vpop.f32.mrf.mxu1  ;;  %15613 = vst [vmem:[#allocation55_spill] sm:$0xff] %v15612_v55  ;;  %15614 = vst [vmem:[#allocation56_spill] sm:$0xff] %v13281_v34  ;;  %vm8740_vm9 = vcmp.lt.s32.totalorder %v13240_v43, 0  ;;  %v13321_v13 = vadd.s32 24, %v13226_v14  ;;  %v15631_v21 = vmov 0 }
 0x285   : > { %15599 = vst [vmem:[#allocation32_spill] sm:$0xff] %v13216_v40  ;;  %v5917_v59 = vadd.f32 %v10765_v25, %v5424_v1  ;;  %15615 = vst [vmem:[#allocation57_spill] sm:$0xff] %v13284_v63  ;;  %v15616_v1 = vmov 0  ;;  %v5428_v25 = vadd.f32 %v10707_v8, %v15619_v62  ;;  %v15625_v8 = vmov 0 }
 0x286   : > { %v5676_v31 = vpop.f32.mrf.mxu0  ;;  %v5199_v26 = vpop.f32.mrf.mxu1  ;;  %v15617_v1 = vsel %vm13290_vm7, 4294967295, %v15616_v1  ;;  %vm13316_vm11 = vmand %vm8738_vm6, %vm8690_vm3  ;;  %15628 = vst [vmem:[#allocation62_spill] sm:$0xff] %v13321_v13 }
 0x287   : > { %5978 = vst.msk [vmem:[#allocation2 + $0x10] sm:$0xff] %vm5975_vm5, %v5917_v59  ;;  %v5915_v54 = vadd.f32 %v5676_v31, %v5422_v6  ;;  %15618 = vst [vmem:[#allocation58_spill] sm:$0xff] %v15617_v1  ;;  %v13299_v59 = vadd.s32 24, %v13220_v45  ;;  %v15621_v31 = vmov 0  ;;  %v15626_v8 = vsel %vm13316_vm11, 4294967295, %v15625_v8 }
 0x288   : > { %v10766_v0 = vpop.f32.mrf.mxu0  ;;  %v10708_v7 = vpop.f32.mrf.mxu1  ;;  %v15622_v31 = vsel %vm13305_vm10, 4294967295, %v15621_v31  ;;  %15627 = vst [vmem:[#allocation61_spill] sm:$0xff] %v15626_v8  ;;  %v5426_v62 = vadd.f32 %v5199_v26, %v12963_v39  ;;  %vm13336_vm13 = vmand %vm8740_vm9, %vm8692_vm8 }
 0x289   : > { %5976 = vst.msk [vmem:[#allocation2] sm:$0xff] %vm5975_vm5, %v5915_v54  ;;  %v5918_v32 = vadd.f32 %v10766_v0, %v5425_v20  ;;  %15620 = vst [vmem:[#allocation39_spill] sm:$0xff] %v13299_v59  ;;  %v13310_v20 = vadd.s32 56, %v13120_v5  ;;  %v15632_v21 = vsel %vm13336_vm13, 4294967295, %v15631_v21 }
 0x28a   : > { %v5679_v35 = vpop.f32.mrf.mxu0  ;;  %15623 = vst [vmem:[#allocation59_spill] sm:$0xff] %v15622_v31  ;;  %v5202_v54 = vpop.f32.mrf.mxu1  ;;  %15633 = vst [vmem:[#allocation65_spill] sm:$0xff] %v15632_v21 }
 0x28b   : > { %5979 = vst.msk [vmem:[#allocation2 + $0x18] sm:$0xff] %vm5975_vm5, %v5918_v32  ;;  %v5916_v6 = vadd.f32 %v5679_v35, %v5423_v49  ;;  %15624 = vst [vmem:[#allocation60_spill] sm:$0xff] %v13310_v20  ;;  %v13324_v49 = vadd.s32 24, %v13230_v33  ;;  %v13327_v32 = vadd.s32 24, %v13240_v43  ;;  %v8263_v35 = vshrl.u32 %v13266_v22, 4 }
 0x28c   : > { %v10769_v0 = vpop.f32.mrf.mxu0  ;;  %v13341_v48 = vmul.u32.u64.low 2863311531, %v13310_v20  ;;  %v13342_v44 = vmul.u32.u64.high 2863311531, %v13310_v20, %v13341_v48  ;;  %v10711_v36 = vpop.f32.mrf.mxu1 }
 0x28d   : > { %15629 = vst [vmem:[#allocation63_spill] sm:$0xff] %v13324_v49  ;;  %15630 = vst [vmem:[#allocation64_spill] sm:$0xff] %v13327_v32  ;;  %v5921_v40 = vadd.f32 %v10769_v0, %v5428_v25  ;;  %v8264_v25 = vmul.u32 24, %v8263_v35  ;;  %v5432_v29 = vadd.f32 %v10711_v36, %v15638_v9 }
 0x28e   : > { %5977 = vst.msk [vmem:[#allocation2 + $0x8] sm:$0xff] %vm5975_vm5, %v5916_v6  ;;  %15634 = vst [vmem:[#allocation66_spill] sm:$0xff] %v13342_v44  ;;  %v6038_v51 = vld [vmem:[#allocation2 + $0x10] sm:$0xff]  ;;  %v5692_v22 = vpop.f32.mrf.mxu0  ;;  %v5429_v6 = vadd.f32 %v10708_v7, %v12970_v60  ;;  %v5215_v4 = vpop.f32.mrf.mxu1  ;;  %v13380_v60 = vadd.s32 64, %v13120_v5 }
 0x28f   : > { %5982 = vst.msk [vmem:[#allocation2 + $0x30] sm:$0xff] %vm5975_vm5, %v5921_v40  ;;  %v5919_v0 = vadd.f32 %v5692_v22, %v5426_v62  ;;  %v13375_v35 = vsub.s32 %v13233_v50, %v8264_v25  ;;  %v6086_v62 = vmul.f32 0.0625, %v6038_v51  ;;  %v15636_v22 = vld [vmem:[#allocation40_spill] sm:$0xff]  ;;  %v13389_v25 = vadd.f32 %v5215_v4, %v12992_v57 }
 0x290   : > { %v6036_v2 = vld [vmem:[#allocation2] sm:$0xff]  ;;  %v10770_v17 = vpop.f32.mrf.mxu0  ;;  %v5427_v39 = vadd.f32 %v5202_v54, %v15636_v22  ;;  %15637 = vst [vmem:[#allocation40_spill] sm:$0xff] %v13380_v60  ;;  %v10712_v33 = vpop.f32.mrf.mxu1 }
 0x291   : > { %15635 = vst [vmem:[#allocation67_spill] sm:$0xff] %v13375_v35  ;;  %5980 = vst.msk [vmem:[#allocation2 + $0x20] sm:$0xff] %vm5975_vm5, %v5919_v0  ;;  %v5922_v48 = vadd.f32 %v10770_v17, %v5429_v6  ;;  %vm8695_vm14 = vcmp.ne.s32.totalorder %v13375_v35, 0  ;;  %vm8743_vm0 = vcmp.lt.s32.totalorder %v13375_v35, 0  ;;  %v13386_v51 = vadd.s32 24, %v13375_v35 }
 0x292   : > { %v6039_v26 = vld [vmem:[#allocation2 + $0x18] sm:$0xff]  ;;  %v5695_v21 = vpop.f32.mrf.mxu0  ;;  %v6084_v50 = vmul.f32 0.0625, %v6036_v2  ;;  %vm13392_vm1 = vmand %vm8743_vm0, %vm8695_vm14  ;;  %v15640_v6 = vmov 0  ;;  %v5218_v2 = vpop.f32.mrf.mxu1 }
 0x293   : > { %v6134_v38 = vld [vmem:[#allocation2 + $0x11] sm:$0xff]  ;;  %15639 = vst [vmem:[#allocation38_spill] sm:$0xff] %v13386_v51  ;;  %5983 = vst.msk [vmem:[#allocation2 + $0x38] sm:$0xff] %vm5975_vm5, %v5922_v48  ;;  %v15641_v6 = vsel %vm13392_vm1, 4294967295, %v15640_v6  ;;  %v6087_v36 = vmul.f32 0.0625, %v6039_v26  ;;  %v6567_v22 = vmul.f32 0.1875, %v6039_v26 }
 0x294   : > { %v6278_v40 = vld [vmem:[#allocation2 + $0x12] sm:$0xff]  ;;  %v6182_v54 = vmul.f32 0.1875, %v6134_v38  ;;  %15642 = vst [vmem:[#allocation68_spill] sm:$0xff] %v15641_v6  ;;  %v5920_v38 = vadd.f32 %v5695_v21, %v5427_v39  ;;  %v10773_v49 = vpop.f32.mrf.mxu0  ;;  %v10715_v26 = vpop.f32.mrf.mxu1 }
 0x295   : > { %v6422_v17 = vld [vmem:[#allocation2 + $0x13] sm:$0xff]  ;;  %v6326_v0 = vmul.f32 0.1875, %v6278_v40  ;;  %v6037_v7 = vld [vmem:[#allocation2 + $0x8] sm:$0xff]  ;;  %v13398_v40 = vadd.f32 %v10712_v33, %v12997_v61  ;;  %v13408_v33 = vadd.f32 %v5218_v2, %v13003_v41  ;;  %v13419_v41 = vadd.f32 %v10715_v26, %v13009_v3 }
 0x296   : > { %v6132_v43 = vld [vmem:[#allocation2 + $0x1] sm:$0xff]  ;;  %v6133_v32 = vld [vmem:[#allocation2 + $0x9] sm:$0xff]  ;;  %v6230_v8 = vadd.f32 %v6182_v54, %v6086_v62  ;;  %v6085_v57 = vmul.f32 0.0625, %v6037_v7  ;;  %v6470_v45 = vmul.f32 0.0625, %v6422_v17  ;;  %5981 = vst.msk [vmem:[#allocation2 + $0x28] sm:$0xff] %vm5975_vm5, %v5920_v38  ;;  %v13401_v12 = vpop.f32.mrf.mxu0  ;;  %v5925_v38 = vadd.f32 %v10773_v49, %v5432_v29  ;;  %v13410_v63 = vpop.f32.mrf.mxu1 }
 0x297   : > { %v6180_v4 = vmul.f32 0.1875, %v6132_v43  ;;  %v6181_v14 = vmul.f32 0.1875, %v6133_v32  ;;  %v6276_v48 = vld [vmem:[#allocation2 + $0x2] sm:$0xff]  ;;  %v6277_v13 = vld [vmem:[#allocation2 + $0xa] sm:$0xff] }
 0x298   : > { %v6420_v31 = vld [vmem:[#allocation2 + $0x3] sm:$0xff]  ;;  %v6324_v59 = vmul.f32 0.1875, %v6276_v48  ;;  %v6421_v1 = vld [vmem:[#allocation2 + $0xb] sm:$0xff]  ;;  %v6374_v43 = vadd.f32 %v6326_v0, %v6230_v8  ;;  %v6325_v7 = vmul.f32 0.1875, %v6277_v13  ;;  %v6135_v48 = vld [vmem:[#allocation2 + $0x19] sm:$0xff]  ;;  %v13412_v55 = vpop.f32.mrf.mxu0  ;;  %5986 = vst.msk [vmem:[#allocation2 + $0x50] sm:$0xff] %vm5975_vm5, %v5925_v38  ;;  %v13422_v29 = vpop.f32.mrf.mxu1 }
 0x299   : > { %v6042_v9 = vld [vmem:[#allocation2 + $0x30] sm:$0xff]  ;;  %v6228_v32 = vadd.f32 %v6180_v4, %v6084_v50  ;;  %v6229_v39 = vadd.f32 %v6181_v14, %v6085_v57  ;;  %v6468_v62 = vmul.f32 0.0625, %v6420_v31  ;;  %v6469_v54 = vmul.f32 0.0625, %v6421_v1  ;;  %v6040_v17 = vld [vmem:[#allocation2 + $0x20] sm:$0xff] }
 0x29a   : > { %v6279_v61 = vld [vmem:[#allocation2 + $0x1a] sm:$0xff]  ;;  %v6090_v21 = vmul.f32 0.0625, %v6042_v9  ;;  %v13414_v8 = vmul.f32 0.1875, %v6042_v9  ;;  %v13416_v13 = vadd.f32 %v6470_v45, %v6374_v43  ;;  %v6088_v1 = vmul.f32 0.0625, %v6040_v17  ;;  %v6138_v0 = vld [vmem:[#allocation2 + $0x31] sm:$0xff]  ;;  %v13424_v49 = vpop.f32.mrf.mxu0  ;;  %v13426_v35 = vpop.f32.mrf.mxu1 }
 0x29b   : > { %v6372_v19 = vadd.f32 %v6324_v59, %v6228_v32  ;;  %v6373_v6 = vadd.f32 %v6325_v7, %v6229_v39  ;;  %v6423_v14 = vld [vmem:[#allocation2 + $0x1b] sm:$0xff]  ;;  %v6183_v31 = vmul.f32 0.1875, %v6135_v48  ;;  %v6327_v9 = vmul.f32 0.1875, %v6279_v61  ;;  %v6282_v4 = vld [vmem:[#allocation2 + $0x32] sm:$0xff] }
 0x29c   : > { %v6043_v50 = vld [vmem:[#allocation2 + $0x38] sm:$0xff]  ;;  %v6471_v57 = vmul.f32 0.0625, %v6423_v14  ;;  %v6568_v43 = vmul.f32 0.1875, %v6040_v17  ;;  %v6666_v32 = vmul.f32 0.5625, %v6135_v48  ;;  %v6186_v39 = vmul.f32 0.1875, %v6138_v0  ;;  %v13428_v3 = vpop.f32.mrf.mxu0  ;;  %v13432_v48 = vpop.f32.mrf.mxu1 }
 0x29d   : > { %v6516_v59 = vadd.f32 %v6468_v62, %v6372_v19  ;;  %v6517_v2 = vadd.f32 %v6469_v54, %v6373_v6  ;;  %v6231_v45 = vadd.f32 %v6183_v31, %v6087_v36  ;;  %v6426_v7 = vld [vmem:[#allocation2 + $0x33] sm:$0xff]  ;;  %v6765_v38 = vmul.f32 0.5625, %v6279_v61  ;;  %v6041_v53 = vld [vmem:[#allocation2 + $0x28] sm:$0xff] }
 0x29e   : > { %v6864_v51 = vmul.f32 0.1875, %v6423_v14  ;;  %v13430_v34 = vmul.f32 0.0625, %v6043_v50  ;;  %v6136_v19 = vld [vmem:[#allocation2 + $0x21] sm:$0xff]  ;;  %v6137_v6 = vld [vmem:[#allocation2 + $0x29] sm:$0xff]  ;;  %v6234_v15 = vadd.f32 %v6186_v39, %v6090_v21  ;;  %v6330_v36 = vmul.f32 0.1875, %v6282_v4  ;;  %v13434_v31 = vpop.f32.mrf.mxu0 }
 0x29f   : > { %v6615_v26 = vadd.f32 %v6567_v22, %v6516_v59  ;;  %v6375_v62 = vadd.f32 %v6327_v9, %v6231_v45  ;;  %v6616_v54 = vadd.f32 %v6568_v43, %v6517_v2  ;;  %v6280_v17 = vld [vmem:[#allocation2 + $0x22] sm:$0xff]  ;;  %v6474_v24 = vmul.f32 0.0625, %v6426_v7  ;;  %v6281_v61 = vld [vmem:[#allocation2 + $0x2a] sm:$0xff]  ;;  %v13438_v9 = vpop.f32.mrf.mxu1 }
 0x2a0   : > { %15643 = vst [vmem:[#allocation69_spill] sm:$0xff] %v13430_v34  ;;  %v13436_v16 = vmul.f32 0.1875, %v6043_v50  ;;  %v6089_v22 = vmul.f32 0.0625, %v6041_v53  ;;  %v6669_v59 = vmul.f32 0.5625, %v6138_v0  ;;  %v6184_v34 = vmul.f32 0.1875, %v6136_v19  ;;  %v6424_v20 = vld [vmem:[#allocation2 + $0x23] sm:$0xff]  ;;  %v13440_v21 = vpop.f32.mrf.mxu0 }
 0x2a1   : > { %v6714_v47 = vadd.f32 %v6666_v32, %v6615_v26  ;;  %v6519_v14 = vadd.f32 %v6471_v57, %v6375_v62  ;;  %v6185_v5 = vmul.f32 0.1875, %v6137_v6  ;;  %v6378_v45 = vadd.f32 %v6330_v36, %v6234_v15  ;;  %v10720_v18 = vpop.f32.mrf.mxu1  ;;  %v6425_v57 = vld [vmem:[#allocation2 + $0x2b] sm:$0xff] }
 0x2a2   : > { %v6768_v43 = vmul.f32 0.5625, %v6282_v4  ;;  %v6328_v39 = vmul.f32 0.1875, %v6280_v17  ;;  %v6232_v26 = vadd.f32 %v6184_v34, %v6088_v1  ;;  %v6329_v30 = vmul.f32 0.1875, %v6281_v61  ;;  %v13443_v60 = vpop.f32.mrf.mxu0 }
 0x2a3   : > { %v6813_v2 = vadd.f32 %v6765_v38, %v6714_v47  ;;  %v6618_v32 = vadd.f32 %v13414_v8, %v6519_v14  ;;  %v6233_v50 = vadd.f32 %v6185_v5, %v6089_v22  ;;  %v6472_v62 = vmul.f32 0.0625, %v6424_v20  ;;  %v5250_v15 = vpop.f32.mrf.mxu1 }
 0x2a4   : > { %v6569_v46 = vmul.f32 0.1875, %v6041_v53  ;;  %v6667_v44 = vmul.f32 0.5625, %v6136_v19  ;;  %v6376_v11 = vadd.f32 %v6328_v39, %v6232_v26  ;;  %v6668_v47 = vmul.f32 0.5625, %v6137_v6  ;;  %v10781_v4 = vpop.f32.mrf.mxu0 }
 0x2a5   : > { %v6912_v0 = vadd.f32 %v6864_v51, %v6813_v2  ;;  %v6717_v56 = vadd.f32 %v6669_v59, %v6618_v32  ;;  %v6377_v58 = vadd.f32 %v6329_v30, %v6233_v50  ;;  %v6766_v1 = vmul.f32 0.5625, %v6280_v17  ;;  %v6046_v2 = vld [vmem:[#allocation2 + $0x50] sm:$0xff]  ;;  %v10723_v53 = vpop.f32.mrf.mxu1 }
 0x2a6   : > { %v6617_v34 = vadd.f32 %v6569_v46, %v13416_v13  ;;  %v6715_v5 = vadd.f32 %v6667_v44, %v6616_v54  ;;  %v13447_v36 = vadd.f32 %v6474_v24, %v6378_v45  ;;  %v6867_v51 = vmul.f32 0.1875, %v6426_v7  ;;  %v5740_v19 = vpop.f32.mrf.mxu0 }
 0x2a7   : > { %v6966_v38 = vadd.f32 %v6912_v0, %v13414_v8  ;;  %v6816_v22 = vadd.f32 %v6768_v43, %v6717_v56  ;;  %v6473_v14 = vmul.f32 0.0625, %v6425_v57  ;;  %v6520_v39 = vadd.f32 %v6472_v62, %v6376_v11  ;;  %v5263_v44 = vpop.f32.mrf.mxu1 }
 0x2a8   : > { %v6716_v30 = vadd.f32 %v6668_v47, %v6617_v34  ;;  %v6814_v6 = vadd.f32 %v6766_v1, %v6715_v5  ;;  %v6767_v8 = vmul.f32 0.5625, %v6281_v61  ;;  %v6865_v46 = vmul.f32 0.1875, %v6424_v20  ;;  %v10782_v13 = vpop.f32.mrf.mxu0  ;;  %v15649_v5 = vld [vmem:[#allocation45_spill] sm:$0xff] }
 0x2a9   : > { %v7020_v32 = vadd.f32 %v6966_v38, %v6669_v59  ;;  %v13449_v26 = vadd.f32 %v6867_v51, %v6816_v22  ;;  %v13451_v50 = vadd.f32 %v6473_v14, %v6377_v58  ;;  %v6866_v54 = vmul.f32 0.1875, %v6425_v57  ;;  %v10724_v58 = vpop.f32.mrf.mxu1  ;;  %v15650_v22 = vld [vmem:[#allocation40_spill] sm:$0xff] }
 0x2aa   : > { %v13453_v56 = vmul.f32 0.0625, %v6046_v2  ;;  %v13455_v7 = vmul.f32 0.1875, %v6046_v2  ;;  %v6815_v17 = vadd.f32 %v6767_v8, %v6716_v30  ;;  %v6913_v45 = vadd.f32 %v6865_v46, %v6814_v6  ;;  %v5743_v0 = vpop.f32.mrf.mxu0 }
 0x2ab   : > { %v7074_v24 = vadd.f32 %v7020_v32, %v6768_v43  ;;  %v5923_v11 = vadd.f32 %v13401_v12, %v13389_v25  ;;  %v5926_v59 = vadd.f32 %v13412_v55, %v13398_v40  ;;  %v5434_v20 = vadd.f32 %v13410_v63, %v13016_v28  ;;  %v5266_v63 = vpop.f32.mrf.mxu1  ;;  %v15652_v32 = vld [vmem:[#allocation48_spill] sm:$0xff] }
 0x2ac   : > { %v13466_v43 = vadd.f32 %v13436_v16, %v6520_v39  ;;  %v5437_v57 = vadd.f32 %v13422_v29, %v13020_v27  ;;  %v5435_v12 = vadd.f32 %v13426_v35, %v13025_v42  ;;  %v5924_v55 = vadd.f32 %v13424_v49, %v13408_v33  ;;  %v10785_v40 = vpop.f32.mrf.mxu0 }
 0x2ad   : > { %v13461_v61 = vadd.f32 %v7074_v24, %v6867_v51  ;;  %5984 = vst.msk [vmem:[#allocation2 + $0x40] sm:$0xff] %vm5975_vm5, %v5923_v11  ;;  %5987 = vst.msk [vmem:[#allocation2 + $0x58] sm:$0xff] %vm5975_vm5, %v5926_v59  ;;  %v5440_v25 = vadd.f32 %v13432_v48, %v13030_v37  ;;  %v5929_v28 = vadd.f32 %v13428_v3, %v13419_v41  ;;  %v10727_v49 = vpop.f32.mrf.mxu1  ;;  %v15655_v59 = vld [vmem:[#allocation46_spill] sm:$0xff] }
 0x2ae   : > { %v5438_v27 = vadd.f32 %v13438_v9, %v13035_v10  ;;  %v5927_v29 = vadd.f32 %v13434_v31, %v5434_v20  ;;  %v5441_v62 = vadd.f32 %v10720_v18, %v13038_v52  ;;  %v5930_v42 = vadd.f32 %v13440_v21, %v5437_v57  ;;  %5985 = vst.msk [vmem:[#allocation2 + $0x48] sm:$0xff] %vm5975_vm5, %v5924_v55  ;;  %v5756_v3 = vpop.f32.mrf.mxu0  ;;  %v15644_v52 = vld [vmem:[#allocation41_spill] sm:$0xff] }
 0x2af   : > { %v6914_v35 = vadd.f32 %v6866_v54, %v6815_v17  ;;  %5990 = vst.msk [vmem:[#allocation2 + $0x70] sm:$0xff] %vm5975_vm5, %v5929_v28  ;;  %v5439_v37 = vadd.f32 %v5250_v15, %v13042_v23  ;;  %v5928_v33 = vadd.f32 %v13443_v60, %v5435_v12  ;;  %v5933_v41 = vadd.f32 %v10781_v4, %v5440_v25  ;;  %v15645_v23 = vld [vmem:[#allocation43_spill] sm:$0xff]  ;;  %v15646_v60 = vld [vmem:[#allocation42_spill] sm:$0xff]  ;;  %v5279_v38 = vpop.f32.mrf.mxu1  ;;  %v15653_v54 = vld [vmem:[#allocation60_spill] sm:$0xff] }
 0x2b0   : > { %v6967_v10 = vadd.f32 %v6913_v45, %v13436_v16  ;;  %5988 = vst.msk [vmem:[#allocation2 + $0x60] sm:$0xff] %vm5975_vm5, %v5927_v29  ;;  %5991 = vst.msk [vmem:[#allocation2 + $0x78] sm:$0xff] %vm5975_vm5, %v5930_v42  ;;  %v5444_v18 = vadd.f32 %v10723_v53, %v15644_v52  ;;  %v5931_v48 = vadd.f32 %v5740_v19, %v5438_v27  ;;  %v15647_v15 = vld [vmem:[#allocation66_spill] sm:$0xff]  ;;  %v10786_v34 = vpop.f32.mrf.mxu0  ;;  %v15651_v53 = vld [vmem:[#allocation44_spill] sm:$0xff] }
 0x2b1   : > { %v5934_v31 = vadd.f32 %v10782_v13, %v5441_v62  ;;  %5989 = vst.msk [vmem:[#allocation2 + $0x68] sm:$0xff] %vm5975_vm5, %v5928_v33  ;;  %5994 = vst.msk [vmem:[#allocation2 + $0x90] sm:$0xff] %vm5975_vm5, %v5933_v41  ;;  %v5442_v9 = vadd.f32 %v5263_v44, %v15645_v23  ;;  %v5445_v21 = vadd.f32 %v10724_v58, %v15646_v60  ;;  %v15648_v4 = vshrl.u32 %v15647_v15, 4  ;;  %v10728_v6 = vpop.f32.mrf.mxu1  ;;  %v15654_v45 = vld [vmem:[#allocation18_spill] sm:$0xff] }
 0x2b2   : > { %v5932_v47 = vadd.f32 %v5743_v0, %v5439_v37  ;;  %5992 = vst.msk [vmem:[#allocation2 + $0x80] sm:$0xff] %vm5975_vm5, %v5931_v48  ;;  %v5443_v1 = vadd.f32 %v5266_v63, %v15649_v5  ;;  %v13503_v51 = vmul.u32.u64.low 2863311531, %v15650_v22  ;;  %v13504_v14 = vmul.u32.u64.high 2863311531, %v15650_v22, %v13503_v51  ;;  %v5759_v46 = vpop.f32.mrf.mxu0  ;;  %v15656_v37 = vld [vmem:[#allocation69_spill] sm:$0xff] }
 0x2b3   : > { %v8242_v16 = vmul.u32 24, %v15648_v4  ;;  %5995 = vst.msk [vmem:[#allocation2 + $0x98] sm:$0xff] %vm5975_vm5, %v5934_v31  ;;  %v5937_v2 = vadd.f32 %v10785_v40, %v5444_v18  ;;  %v13509_v19 = vadd.f32 %v10727_v49, %v15651_v53  ;;  %v13512_v39 = vadd.f32 %v5279_v38, %v15652_v32 }
 0x2b4   : > { %5993 = vst.msk [vmem:[#allocation2 + $0x88] sm:$0xff] %vm5975_vm5, %v5932_v47  ;;  %v5935_v30 = vadd.f32 %v5756_v3, %v5442_v9  ;;  %v5938_v8 = vadd.f32 %v10786_v34, %v5445_v21  ;;  %v6044_v44 = vld [vmem:[#allocation2 + $0x40] sm:$0xff]  ;;  %v13519_v11 = vadd.s32 80, %v15654_v45  ;;  %v13522_v58 = vadd.f32 %v10728_v6, %v15655_v59  ;;  %v6047_v25 = vld [vmem:[#allocation2 + $0x58] sm:$0xff] }
 0x2b5   : > { %v6139_v13 = vld [vmem:[#allocation2 + $0x39] sm:$0xff]  ;;  %v13515_v17 = vsub.s32 %v15653_v54, %v8242_v16  ;;  %5998 = vst.msk [vmem:[#allocation2 + $0xb0] sm:$0xff] %vm5975_vm5, %v5937_v2  ;;  %v5936_v0 = vadd.f32 %v5759_v46, %v5443_v1  ;;  %v6092_v20 = vmul.f32 0.0625, %v6044_v44  ;;  %v6572_v55 = vmul.f32 0.1875, %v6044_v44  ;;  %v6142_v62 = vld [vmem:[#allocation2 + $0x51] sm:$0xff]  ;;  %v6045_v9 = vld [vmem:[#allocation2 + $0x48] sm:$0xff] }
 0x2b6   : > { %v6283_v24 = vld [vmem:[#allocation2 + $0x3a] sm:$0xff]  ;;  %v6187_v57 = vmul.f32 0.1875, %v6139_v13  ;;  %5996 = vst.msk [vmem:[#allocation2 + $0xa0] sm:$0xff] %vm5975_vm5, %v5935_v30  ;;  %5999 = vst.msk [vmem:[#allocation2 + $0xb8] sm:$0xff] %vm5975_vm5, %v5938_v8  ;;  %v13527_v28 = vadd.s32 104, %v15654_v45  ;;  %v6670_v27 = vmul.f32 0.5625, %v6139_v13 }
 0x2b7   : > { %v6427_v12 = vld [vmem:[#allocation2 + $0x3b] sm:$0xff]  ;;  %v6331_v63 = vmul.f32 0.1875, %v6283_v24  ;;  %v6769_v29 = vmul.f32 0.5625, %v6283_v24  ;;  %v6286_v42 = vld [vmem:[#allocation2 + $0x52] sm:$0xff]  ;;  %5997 = vst.msk [vmem:[#allocation2 + $0xa8] sm:$0xff] %vm5975_vm5, %v5936_v0  ;;  %v6620_v41 = vadd.f32 %v6572_v55, %v13451_v50  ;;  %v13532_v3 = vadd.f32 %v6914_v35, %v6572_v55  ;;  %v6141_v16 = vld [vmem:[#allocation2 + $0x49] sm:$0xff] }
 0x2b8   : > { %v6475_v40 = vmul.f32 0.0625, %v6427_v12  ;;  %v6235_v33 = vadd.f32 %v6187_v57, %v15656_v37  ;;  %v6868_v49 = vmul.f32 0.1875, %v6427_v12  ;;  %v6430_v52 = vld [vmem:[#allocation2 + $0x53] sm:$0xff]  ;;  %v6718_v18 = vadd.f32 %v6670_v27, %v13466_v43  ;;  %v6140_v60 = vld [vmem:[#allocation2 + $0x41] sm:$0xff]  ;;  %v6285_v1 = vld [vmem:[#allocation2 + $0x4a] sm:$0xff] }
 0x2b9   : > { %v7021_v48 = vadd.f32 %v6967_v10, %v6670_v27  ;;  %v13535_v31 = vmul.f32 0.0625, %v6047_v25  ;;  %v6190_v23 = vmul.f32 0.1875, %v6142_v62  ;;  %v6334_v47 = vmul.f32 0.1875, %v6286_v42  ;;  %v6284_v5 = vld [vmem:[#allocation2 + $0x42] sm:$0xff]  ;;  %v6429_v12 = vld [vmem:[#allocation2 + $0x4b] sm:$0xff] }
 0x2ba   : > { %v6379_v21 = vadd.f32 %v6331_v63, %v6235_v33  ;;  %v6478_v15 = vmul.f32 0.0625, %v6430_v52  ;;  %v13537_v4 = vmul.f32 0.1875, %v6047_v25  ;;  %v6817_v38 = vadd.f32 %v6769_v29, %v6718_v18  ;;  %v6428_v8 = vld [vmem:[#allocation2 + $0x43] sm:$0xff] }
 0x2bb   : > { %v7075_v50 = vadd.f32 %v7021_v48, %v6769_v29  ;;  %v6238_v35 = vadd.f32 %v6190_v23, %v13453_v56  ;;  %v6673_v34 = vmul.f32 0.5625, %v6142_v62  ;;  %v6772_v10 = vmul.f32 0.5625, %v6286_v42  ;;  %v13551_v42 = vpop.permute.xlu0 %7521 }
 0x2bc   : > { %v6523_v43 = vadd.f32 %v6475_v40, %v6379_v21  ;;  %v6093_v51 = vmul.f32 0.0625, %v6045_v9  ;;  %v6188_v2 = vmul.f32 0.1875, %v6140_v60  ;;  %v6916_v53 = vadd.f32 %v6868_v49, %v6817_v38  ;;  %v13557_v38 = vld [vmem:[%s13549_s23] ss:$0 sm:$0xff] }
 0x2bd   : > { %v7129_v32 = vadd.f32 %v7075_v50, %v6868_v49  ;;  %v6382_v30 = vadd.f32 %v6334_v47, %v6238_v35  ;;  %v6189_v6 = vmul.f32 0.1875, %v6141_v16  ;;  %v6332_v13 = vmul.f32 0.1875, %v6284_v5 }
 0x2be   : > { %v6622_v46 = vadd.f32 %v13455_v7, %v6523_v43  ;;  %v6236_v44 = vadd.f32 %v6188_v2, %v6092_v20  ;;  %v6333_v24 = vmul.f32 0.1875, %v6285_v1  ;;  %v6970_v59 = vadd.f32 %v6916_v53, %v13455_v7  ;;  %v6050_v53 = vld [vmem:[#allocation2 + $0x70] sm:$0xff] }
 0x2bf   : > { %v13541_v54 = vadd.f32 %v6478_v15, %v6382_v30  ;;  %v7189_v0 = vadd.f32 %v7129_v32, %v13453_v56  ;;  %v6237_v57 = vadd.f32 %v6189_v6, %v6093_v51  ;;  %v6871_v25 = vmul.f32 0.1875, %v6430_v52 }
 0x2c0   : > { %v6721_v55 = vadd.f32 %v6673_v34, %v6622_v46  ;;  %v6380_v63 = vadd.f32 %v6332_v13, %v6236_v44  ;;  %v6476_v40 = vmul.f32 0.0625, %v6428_v8  ;;  %v7024_v20 = vadd.f32 %v6970_v59, %v6673_v34  ;;  %v7527_v44 = vpop.permute.xlu0 %7526  ;;  %v6431_v59 = vld [vmem:[#allocation2 + $0x5b] sm:$0xff] }
 0x2c1   : > { %v7249_v27 = vadd.f32 %v7189_v0, %v6190_v23  ;;  %v6381_v29 = vadd.f32 %v6333_v24, %v6237_v57  ;;  %v6573_v62 = vmul.f32 0.1875, %v6045_v9  ;;  %v6477_v56 = vmul.f32 0.0625, %v6429_v12 }
 0x2c2   : > { %v6820_v7 = vadd.f32 %v6772_v10, %v6721_v55  ;;  %v6524_v37 = vadd.f32 %v6476_v40, %v6380_v63  ;;  %v6671_v33 = vmul.f32 0.5625, %v6140_v60  ;;  %v7078_v49 = vadd.f32 %v7024_v20, %v6772_v10 }
 0x2c3   : > { %v7309_v52 = vadd.f32 %v7249_v27, %v6334_v47  ;;  %v6621_v18 = vadd.f32 %v6573_v62, %v13447_v36  ;;  %v6672_v48 = vmul.f32 0.5625, %v6141_v16  ;;  %v6525_v50 = vadd.f32 %v6477_v56, %v6381_v29 }
 0x2c4   : > { %v13554_v21 = vadd.f32 %v6871_v25, %v6820_v7  ;;  %v6719_v35 = vadd.f32 %v6671_v33, %v6620_v41  ;;  %v6770_v23 = vmul.f32 0.5625, %v6284_v5  ;;  %v13559_v34 = vadd.f32 %v7078_v49, %v6871_v25  ;;  %v6048_v41 = vld [vmem:[#allocation2 + $0x60] sm:$0xff] }
 0x2c5   : > { %v7369_v9 = vadd.f32 %v7309_v52, %v6478_v15  ;;  %v6720_v43 = vadd.f32 %v6672_v48, %v6621_v18  ;;  %v6771_v2 = vmul.f32 0.5625, %v6285_v1  ;;  %v6869_v60 = vmul.f32 0.1875, %v6428_v8  ;;  %v6143_v5 = vld [vmem:[#allocation2 + $0x59] sm:$0xff] }
 0x2c6   : > { %v6818_v32 = vadd.f32 %v6770_v23, %v6719_v35  ;;  %v6969_v47 = vadd.f32 %v13449_v26, %v6573_v62  ;;  %v7022_v36 = vadd.f32 %v13532_v3, %v6671_v33  ;;  %v6870_v30 = vmul.f32 0.1875, %v6429_v12  ;;  %v13568_v15 = vld [vmem:[%s15339_s5] ss:$0 sm:$0xff] }
 0x2c7   : > { %v7424_v16 = vmul.f32 %v13557_v38, %v7369_v9  ;;  %v6819_v10 = vadd.f32 %v6771_v2, %v6720_v43  ;;  %v7188_v46 = vadd.f32 %v13461_v61, %v6093_v51  ;;  %v13570_v26 = vmul.f32 0.0625, %v6050_v53  ;;  %v6287_v3 = vld [vmem:[#allocation2 + $0x5a] sm:$0xff] }
 0x2c8   : > { %v6917_v1 = vadd.f32 %v6869_v60, %v6818_v32  ;;  %v7023_v8 = vadd.f32 %v6969_v47, %v6672_v48  ;;  %v7076_v13 = vadd.f32 %v7022_v36, %v6770_v23  ;;  %v15658_v61 = vld [vmem:[#allocation51_spill] sm:$0xff]  ;;  %v13581_v40 = vmul.f32 0.1875, %v6050_v53 }
 0x2c9   : > { %v7760_v0 = vadd.f32 %v7527_v44, %v7424_v16  ;;  %v15659_v51 = vld [vmem:[#allocation31_spill] sm:$0xff]  ;;  %v6918_v25 = vadd.f32 %v6870_v30, %v6819_v10  ;;  %v7248_v63 = vadd.f32 %v7188_v46, %v6189_v6  ;;  %v13583_v29 = vmul.f32 0.0625, %v6048_v41  ;;  %v6051_v46 = vld [vmem:[#allocation2 + $0x78] sm:$0xff] }
 0x2ca   : > { %v15660_v12 = vsel %vm13248_vm12, %v15658_v61, %v15659_v51  ;;  %v7077_v20 = vadd.f32 %v7023_v8, %v6771_v2  ;;  %v7130_v27 = vadd.f32 %v7076_v13, %v6869_v60  ;;  %v6191_v62 = vmul.f32 0.1875, %v6143_v5  ;;  %v13597_v47 = vld [vmem:[%s13590_s29] ss:$0 sm:$0xff]  ;;  %v15664_v13 = vld [vmem:[#allocation56_spill] sm:$0xff]  ;;  %v6434_v61 = vld [vmem:[#allocation2 + $0x73] sm:$0xff] }
 0x2cb   : > { %vm13577_vm3 = vcmp.lt.s32.totalorder %v15660_v12, 16  ;;  %v7815_v7 = vadd.f32 %v13568_v15, %v7760_v0  ;;  %v7308_v33 = vadd.f32 %v7248_v63, %v6333_v24  ;;  %v6335_v49 = vmul.f32 0.1875, %v6287_v3 }
 0x2cc   : > { %v6479_v52 = vmul.f32 0.0625, %v6431_v59  ;;  %v6239_v6 = vadd.f32 %v6191_v62, %v13535_v31  ;;  %v6576_v18 = vmul.f32 0.1875, %v6048_v41  ;;  %v6623_v48 = vadd.f32 %v13537_v4, %v6524_v37  ;;  %v6146_v37 = vld [vmem:[#allocation2 + $0x71] sm:$0xff] }
 0x2cd   : > { %v6674_v35 = vmul.f32 0.5625, %v6143_v5  ;;  %vm7863_vm12 = vcmp.ge.f32.partialorder %v7815_v7, 0.0  ;;  %v7911_v23 = vmul.f32 0.2, %v7815_v7  ;;  %v7131_v9 = vadd.f32 %v7077_v20, %v6870_v30  ;;  %v6290_v30 = vld [vmem:[#allocation2 + $0x72] sm:$0xff] }
 0x2ce   : > { %v7368_v43 = vadd.f32 %v7308_v33, %v6477_v56  ;;  %v6383_v2 = vadd.f32 %v6335_v49, %v6239_v6  ;;  %v13594_v24 = vadd.f32 %v6576_v18, %v6525_v50  ;;  %v6773_v32 = vmul.f32 0.5625, %v6287_v3  ;;  %v15665_v3 = vld [vmem:[#allocation33_spill] sm:$0xff] }
 0x2cf   : > { %v6722_v53 = vadd.f32 %v6674_v35, %v6623_v48  ;;  %v7959_v60 = vsel %vm7863_vm12, %v7815_v7, %v7911_v23  ;;  %v6872_v16 = vmul.f32 0.1875, %v6431_v59  ;;  %v6971_v10 = vadd.f32 %v6917_v1, %v13537_v4  ;;  %v7532_v23 = vpop.permute.xlu1 %7531 }
 0x2d0   : > { %v7423_v36 = vmul.f32 %v13557_v38, %v7368_v43  ;;  %v8007_v41 = vmul.f32 1.4142135, %v7959_v60  ;;  %v6527_v5 = vadd.f32 %v6479_v52, %v6383_v2  ;;  %v7190_v56 = vadd.f32 %v7130_v27, %v13535_v31  ;;  %v6144_v60 = vld [vmem:[#allocation2 + $0x61] sm:$0xff] }
 0x2d1   : > { %v6821_v44 = vadd.f32 %v6773_v32, %v6722_v53  ;;  %v15666_v0 = vsel %vm13258_vm15, %v15664_v13, %v15665_v3  ;;  %v13612_v4 = vadd.f32 %v6918_v25, %v6576_v18  ;;  %v7025_v1 = vadd.f32 %v6971_v10, %v6674_v35  ;;  %v6288_v13 = vld [vmem:[#allocation2 + $0x62] sm:$0xff] }
 0x2d2   : > { %v7759_v50 = vadd.f32 %v13551_v42, %v7423_v36  ;;  %vm13608_vm6 = vcmp.lt.s32.totalorder %v15666_v0, 16  ;;  %v13615_v59 = vadd.f32 %v7131_v9, %v13583_v29  ;;  %v8062_v31 = vmul.f32 %v13597_v47, %v8007_v41  ;;  %v6145_v41 = vld [vmem:[#allocation2 + $0x69] sm:$0xff] }
 0x2d3   : > { %v7250_v51 = vadd.f32 %v7190_v56, %v6191_v62  ;;  %v13618_v42 = vmul.f32 0.0625, %v6051_v46  ;;  %v6194_v12 = vmul.f32 0.1875, %v6146_v37  ;;  %v6920_v20 = vadd.f32 %v6872_v16, %v6821_v44 }
 0x2d4   : > { %v7814_v63 = vadd.f32 %v13568_v15, %v7759_v50  ;;  %v7079_v27 = vadd.f32 %v7025_v1, %v6773_v32  ;;  %v6338_v7 = vmul.f32 0.1875, %v6290_v30  ;;  %v9071_v25 = vsel %vm13577_vm3, %v8062_v31, 0.0  ;;  %v6049_v32 = vld [vmem:[#allocation2 + $0x68] sm:$0xff] }
 0x2d5   : > { %v7310_v33 = vadd.f32 %v7250_v51, %v6335_v49  ;;  %v6242_v6 = vadd.f32 %v6194_v12, %v13570_v26  ;;  %v6482_v18 = vmul.f32 0.0625, %v6434_v61  ;;  %v9939_v48 = vpack.c.bf16 %v9071_v25, %v9071_v25 }
 0x2d6   : > { %vm7862_vm15 = vcmp.ge.f32.partialorder %v7814_v63, 0.0  ;;  %v7910_v35 = vmul.f32 0.2, %v7814_v63  ;;  %v7133_v62 = vadd.f32 %v7079_v27, %v6872_v16  ;;  %v6626_v2 = vadd.f32 %v13581_v40, %v6527_v5 }
 0x2d7   : > { %v7370_v9 = vadd.f32 %v7310_v33, %v6479_v52  ;;  %v6386_v43 = vadd.f32 %v6338_v7, %v6242_v6  ;;  %v6677_v53 = vmul.f32 0.5625, %v6146_v37  ;;  %9312 = vst.msk [vmem:[%s12159_s26 + $0x1c] sm:$0xf] %vm9310_vm4, %v9939_v48  ;;  %v13627_v36 = vmul.f32 0.1875, %v6051_v46  ;;  %v6432_v6 = vld [vmem:[#allocation2 + $0x63] sm:$0xff]  ;;  %v13645_v48 = vpop.permute.xlu1 %7536 }
 0x2d8   : > { %v7958_v55 = vsel %vm7862_vm15, %v7814_v63, %v7910_v35  ;;  %v6776_v49 = vmul.f32 0.5625, %v6290_v30  ;;  %v6974_v10 = vadd.f32 %v6920_v20, %v13581_v40  ;;  %v7193_v37 = vadd.f32 %v7133_v62, %v13570_v26  ;;  %v15670_v30 = vld [vmem:[#allocation57_spill] sm:$0xff]  ;;  %v15671_v40 = vld [vmem:[#allocation35_spill] sm:$0xff] }
 0x2d9   : > { %v8006_v44 = vmul.f32 1.4142135, %v7958_v55  ;;  %v7425_v16 = vmul.f32 %v13557_v38, %v7370_v9  ;;  %v13631_v56 = vadd.f32 %v6482_v18, %v6386_v43  ;;  %v6725_v52 = vadd.f32 %v6677_v53, %v6626_v2  ;;  %v6289_v20 = vld [vmem:[#allocation2 + $0x6a] sm:$0xff] }
 0x2da   : > { %v7028_v50 = vadd.f32 %v6974_v10, %v6677_v53  ;;  %v6097_v5 = vmul.f32 0.0625, %v6049_v32  ;;  %v6192_v8 = vmul.f32 0.1875, %v6144_v60  ;;  %v15672_v1 = vsel %vm13274_vm2, %v15670_v30, %v15671_v40  ;;  %v6433_v55 = vld [vmem:[#allocation2 + $0x6b] sm:$0xff] }
 0x2db   : > { %v8061_v3 = vmul.f32 %v13597_v47, %v8006_v44  ;;  %v7761_v46 = vadd.f32 %v7532_v23, %v7425_v16  ;;  %vm13640_vm8 = vcmp.lt.s32.totalorder %v15672_v1, 16  ;;  %v6824_v51 = vadd.f32 %v6776_v49, %v6725_v52  ;;  %v7547_v40 = vpop.permute.xlu1 %7546 }
 0x2dc   : > { %v6193_v63 = vmul.f32 0.1875, %v6145_v41  ;;  %v6875_v27 = vmul.f32 0.1875, %v6434_v61  ;;  %v7082_v26 = vadd.f32 %v7028_v50, %v6776_v49  ;;  %v7253_v25 = vadd.f32 %v7193_v37, %v6194_v12 }
 0x2dd   : > { %v6240_v33 = vadd.f32 %v6192_v8, %v13583_v29  ;;  %v9070_v35 = vsel %vm13608_vm6, %v8061_v3, 0.0  ;;  %v7816_v62 = vadd.f32 %v13568_v15, %v7761_v46  ;;  %v6336_v9 = vmul.f32 0.1875, %v6288_v13 }
 0x2de   : > { %v6241_v23 = vadd.f32 %v6193_v63, %v6097_v5  ;;  %v9938_v43 = vpack.c.bf16 %v9070_v35, %v9070_v35  ;;  %v13650_v2 = vadd.f32 %v6875_v27, %v6824_v51  ;;  %v7313_v53 = vadd.f32 %v7253_v25, %v6338_v7  ;;  %v15677_v35 = vld [vmem:[#allocation34_spill] sm:$0xff] }
 0x2df   : > { %v6337_v61 = vmul.f32 0.1875, %v6289_v20  ;;  %vm7864_vm2 = vcmp.ge.f32.partialorder %v7816_v62, 0.0  ;;  %v7912_v12 = vmul.f32 0.2, %v7816_v62  ;;  %v6384_v29 = vadd.f32 %v6336_v9, %v6240_v33  ;;  %v15676_v33 = vld [vmem:[#allocation39_spill] sm:$0xff] }
 0x2e0   : > { %v6480_v49 = vmul.f32 0.0625, %v6432_v6  ;;  %9311 = vst.msk [vmem:[%s12159_s26 + $0x18] sm:$0xf] %vm9310_vm4, %v9938_v43  ;;  %v13654_v10 = vadd.f32 %v7082_v26, %v6875_v27  ;;  %v7373_v57 = vadd.f32 %v7313_v53, %v6482_v18  ;;  %v6577_v16 = vmul.f32 0.1875, %v6049_v32 }
 0x2e1   : > { %v6385_v44 = vadd.f32 %v6337_v61, %v6241_v23  ;;  %v7960_v52 = vsel %vm7864_vm2, %v7816_v62, %v7912_v12  ;;  %v6481_v50 = vmul.f32 0.0625, %v6433_v55  ;;  %v6675_v3 = vmul.f32 0.5625, %v6144_v60  ;;  %v15688_v62 = vld [vmem:[#allocation63_spill] sm:$0xff] }
 0x2e2   : > { %v6528_v37 = vadd.f32 %v6480_v49, %v6384_v29  ;;  %v8008_v46 = vmul.f32 1.4142135, %v7960_v52  ;;  %v7428_v7 = vmul.f32 %v13557_v38, %v7373_v57  ;;  %v6625_v0 = vadd.f32 %v6577_v16, %v13541_v54 }
 0x2e3   : > { %v6676_v30 = vmul.f32 0.5625, %v6145_v41  ;;  %v6529_v1 = vadd.f32 %v6481_v50, %v6385_v44  ;;  %v6723_v51 = vadd.f32 %v6675_v3, %v13594_v24  ;;  %v6774_v25 = vmul.f32 0.5625, %v6288_v13 }
 0x2e4   : > { %v6775_v27 = vmul.f32 0.5625, %v6289_v20  ;;  %v8063_v18 = vmul.f32 %v13597_v47, %v8008_v46  ;;  %v7764_v26 = vadd.f32 %v7547_v40, %v7428_v7  ;;  %v15678_v60 = vsel %vm13290_vm7, %v15676_v33, %v15677_v35  ;;  %v6054_v46 = vld [vmem:[#allocation2 + $0x90] sm:$0xff]  ;;  %v6291_v40 = vld [vmem:[#allocation2 + $0x7a] sm:$0xff] }
 0x2e5   : > { %vm13665_vm9 = vcmp.lt.s32.totalorder %v15678_v60, 16  ;;  %v6724_v54 = vadd.f32 %v6676_v30, %v6625_v0  ;;  %v6873_v41 = vmul.f32 0.1875, %v6432_v6  ;;  %v6822_v23 = vadd.f32 %v6774_v25, %v6723_v51 }
 0x2e6   : > { %v6973_v43 = vadd.f32 %v13554_v21, %v6577_v16  ;;  %v7026_v24 = vadd.f32 %v13612_v4, %v6675_v3  ;;  %v7192_v13 = vadd.f32 %v13559_v34, %v6097_v5  ;;  %v9072_v20 = vsel %vm13640_vm8, %v8063_v18, 0.0  ;;  %v6052_v3 = vld [vmem:[#allocation2 + $0x80] sm:$0xff] }
 0x2e7   : > { %v7819_v53 = vadd.f32 %v13568_v15, %v7764_v26  ;;  %v6823_v12 = vadd.f32 %v6775_v27, %v6724_v54  ;;  %v7251_v29 = vadd.f32 %v13615_v59, %v6192_v8  ;;  %v9940_v57 = vpack.c.bf16 %v9072_v20, %v9072_v20  ;;  %v6147_v34 = vld [vmem:[#allocation2 + $0x79] sm:$0xff] }
 0x2e8   : > { %v6874_v44 = vmul.f32 0.1875, %v6433_v55  ;;  %v7027_v52 = vadd.f32 %v6973_v43, %v6676_v30  ;;  %v7080_v6 = vadd.f32 %v7026_v24, %v6774_v25  ;;  %v6921_v16 = vadd.f32 %v6873_v41, %v6822_v23  ;;  %v6435_v26 = vld [vmem:[#allocation2 + $0x7b] sm:$0xff]  ;;  %v7542_v24 = vpop.permute.xlu0 %7541 }
 0x2e9   : > { %vm7867_vm7 = vcmp.ge.f32.partialorder %v7819_v53, 0.0  ;;  %v7915_v21 = vmul.f32 0.2, %v7819_v53  ;;  %v7252_v4 = vadd.f32 %v7192_v13, %v6193_v63  ;;  %9313 = vst.msk [vmem:[%s12159_s26 + $0x20] sm:$0xf] %vm9310_vm4, %v9940_v57  ;;  %v7311_v0 = vadd.f32 %v7251_v29, %v6336_v9 }
 0x2ea   : > { %v6922_v5 = vadd.f32 %v6874_v44, %v6823_v12  ;;  %v7081_v31 = vadd.f32 %v7027_v52, %v6775_v27  ;;  %v7134_v7 = vadd.f32 %v7080_v6, %v6873_v41  ;;  %v13678_v8 = vmul.f32 0.0625, %v6054_v46  ;;  %v15683_v12 = vld [vmem:[#allocation36_spill] sm:$0xff] }
 0x2eb   : > { %v7963_v51 = vsel %vm7867_vm7, %v7819_v53, %v7915_v21  ;;  %v7312_v59 = vadd.f32 %v7252_v4, %v6337_v61  ;;  %v13680_v55 = vmul.f32 0.1875, %v6054_v46  ;;  %v7371_v25 = vadd.f32 %v7311_v0, %v6480_v49  ;;  %v15682_v53 = vld [vmem:[#allocation62_spill] sm:$0xff]  ;;  %v15689_v46 = vld [vmem:[#allocation37_spill] sm:$0xff] }
 0x2ec   : > { %v8011_v30 = vmul.f32 1.4142135, %v7963_v51  ;;  %v13682_v18 = vmul.f32 0.0625, %v6052_v3  ;;  %v6195_v63 = vmul.f32 0.1875, %v6147_v34  ;;  %v7135_v32 = vadd.f32 %v7081_v31, %v6874_v44  ;;  %v6055_v51 = vld [vmem:[#allocation2 + $0x98] sm:$0xff] }
 0x2ed   : > { %v7372_v33 = vadd.f32 %v7312_v59, %v6481_v50  ;;  %v6339_v35 = vmul.f32 0.1875, %v6291_v40  ;;  %v6580_v60 = vmul.f32 0.1875, %v6052_v3  ;;  %v7426_v9 = vmul.f32 %v13557_v38, %v7371_v25 }
 0x2ee   : > { %v8066_v27 = vmul.f32 %v13597_v47, %v8011_v30  ;;  %v6243_v61 = vadd.f32 %v6195_v63, %v13618_v42  ;;  %v6627_v54 = vadd.f32 %v13627_v36, %v6528_v37  ;;  %v6483_v23 = vmul.f32 0.0625, %v6435_v26  ;;  %v15695_v37 = vld [vmem:[#allocation52_spill] sm:$0xff] }
 0x2ef   : > { %v7427_v41 = vmul.f32 %v13557_v38, %v7372_v33  ;;  %v13689_v49 = vadd.f32 %v6580_v60, %v6529_v1  ;;  %v6678_v43 = vmul.f32 0.5625, %v6147_v34  ;;  %v7762_v13 = vadd.f32 %v13645_v48, %v7426_v9 }
 0x2f0   : > { %v9075_v50 = vsel %vm13665_vm9, %v8066_v27, 0.0  ;;  %v15684_v29 = vsel %vm13305_vm10, %v15682_v53, %v15683_v12  ;;  %v6387_v57 = vadd.f32 %v6339_v35, %v6243_v61  ;;  %v6777_v1 = vmul.f32 0.5625, %v6291_v40  ;;  %v6150_v27 = vld [vmem:[#allocation2 + $0x91] sm:$0xff] }
 0x2f1   : > { %vm13699_vm14 = vcmp.lt.s32.totalorder %v15684_v29, 16  ;;  %v9943_v44 = vpack.c.bf16 %v9075_v50, %v9075_v50  ;;  %v7763_v52 = vadd.f32 %v7542_v24, %v7427_v41  ;;  %v15690_v21 = vsel %vm13316_vm11, %v15688_v62, %v15689_v46  ;;  %v6294_v61 = vld [vmem:[#allocation2 + $0x92] sm:$0xff]  ;;  %v7552_v46 = vpop.permute.xlu0 %7551 }
 0x2f2   : > { %vm13708_vm0 = vcmp.lt.s32.totalorder %v15690_v21, 16  ;;  %v6726_v4 = vadd.f32 %v6678_v43, %v6627_v54  ;;  %v6975_v3 = vadd.f32 %v6921_v16, %v13627_v36  ;;  %v7817_v34 = vadd.f32 %v13568_v15, %v7762_v13  ;;  %v6438_v54 = vld [vmem:[#allocation2 + $0x93] sm:$0xff] }
 0x2f3   : > { %v6531_v31 = vadd.f32 %v6483_v23, %v6387_v57  ;;  %v6876_v0 = vmul.f32 0.1875, %v6435_v26  ;;  %v7194_v40 = vadd.f32 %v7134_v7, %v13618_v42  ;;  %9316 = vst.msk [vmem:[%s12159_s26 + $0x2c] sm:$0xf] %vm9310_vm4, %v9943_v44  ;;  %v7818_v59 = vadd.f32 %v13568_v15, %v7763_v52 }
 0x2f4   : > { %v6825_v30 = vadd.f32 %v6777_v1, %v6726_v4  ;;  %v13718_v25 = vadd.f32 %v6922_v5, %v6580_v60  ;;  %v7029_v33 = vadd.f32 %v6975_v3, %v6678_v43  ;;  %vm7865_vm10 = vcmp.ge.f32.partialorder %v7817_v34, 0.0 }
 0x2f5   : > { %v7913_v9 = vmul.f32 0.2, %v7817_v34  ;;  %v13721_v36 = vadd.f32 %v7135_v32, %v13682_v18  ;;  %v7254_v16 = vadd.f32 %v7194_v40, %v6195_v63  ;;  %vm7866_vm11 = vcmp.ge.f32.partialorder %v7818_v59, 0.0 }
 0x2f6   : > { %v7914_v26 = vmul.f32 0.2, %v7818_v59  ;;  %v7083_v42 = vadd.f32 %v7029_v33, %v6777_v1  ;;  %v13723_v7 = vmul.f32 0.0625, %v6055_v51  ;;  %v6924_v24 = vadd.f32 %v6876_v0, %v6825_v30  ;;  %v15694_v33 = vld [vmem:[#allocation64_spill] sm:$0xff] }
 0x2f7   : > { %v7961_v41 = vsel %vm7865_vm10, %v7817_v34, %v7913_v9  ;;  %v7314_v50 = vadd.f32 %v7254_v16, %v6339_v35  ;;  %v6198_v5 = vmul.f32 0.1875, %v6150_v27  ;;  %v6342_v20 = vmul.f32 0.1875, %v6294_v61  ;;  %v6053_v34 = vld [vmem:[#allocation2 + $0x88] sm:$0xff] }
 0x2f8   : > { %v7962_v60 = vsel %vm7866_vm11, %v7818_v59, %v7914_v26  ;;  %v8009_v43 = vmul.f32 1.4142135, %v7961_v41  ;;  %v7137_v13 = vadd.f32 %v7083_v42, %v6876_v0  ;;  %v6486_v63 = vmul.f32 0.0625, %v6438_v54  ;;  %v6148_v0 = vld [vmem:[#allocation2 + $0x81] sm:$0xff]  ;;  %v13749_v42 = vpop.permute.xlu1 %7556 }
 0x2f9   : > { %v8010_v53 = vmul.f32 1.4142135, %v7962_v60  ;;  %v7374_v12 = vadd.f32 %v7314_v50, %v6483_v23  ;;  %v6246_v32 = vadd.f32 %v6198_v5, %v13678_v8  ;;  %v13727_v57 = vmul.f32 0.1875, %v6055_v51 }
 0x2fa   : > { %v8064_v29 = vmul.f32 %v13597_v47, %v8009_v43  ;;  %v6630_v1 = vadd.f32 %v13680_v55, %v6531_v31  ;;  %v6681_v44 = vmul.f32 0.5625, %v6150_v27  ;;  %v6780_v62 = vmul.f32 0.5625, %v6294_v61  ;;  %v6149_v31 = vld [vmem:[#allocation2 + $0x89] sm:$0xff] }
 0x2fb   : > { %v8065_v52 = vmul.f32 %v13597_v47, %v8010_v53  ;;  %v7429_v35 = vmul.f32 %v13557_v38, %v7374_v12  ;;  %v6390_v6 = vadd.f32 %v6342_v20, %v6246_v32  ;;  %v6978_v4 = vadd.f32 %v6924_v24, %v13680_v55  ;;  %v6293_v43 = vld [vmem:[#allocation2 + $0x8a] sm:$0xff] }
 0x2fc   : > { %v9073_v23 = vsel %vm13699_vm14, %v8064_v29, 0.0  ;;  %v6729_v21 = vadd.f32 %v6681_v44, %v6630_v1  ;;  %v7197_v3 = vadd.f32 %v7137_v13, %v13678_v8  ;;  %v15696_v27 = vsel %vm13336_vm13, %v15694_v33, %v15695_v37  ;;  %v6292_v8 = vld [vmem:[#allocation2 + $0x82] sm:$0xff] }
 0x2fd   : > { %v9074_v40 = vsel %vm13708_vm0, %v8065_v52, 0.0  ;;  %v9941_v51 = vpack.c.bf16 %v9073_v23, %v9073_v23  ;;  %v7765_v59 = vadd.f32 %v7552_v46, %v7429_v35  ;;  %vm13743_vm3 = vcmp.lt.s32.totalorder %v15696_v27, 16  ;;  %v6436_v29 = vld [vmem:[#allocation2 + $0x83] sm:$0xff]  ;;  %v6437_v23 = vld [vmem:[#allocation2 + $0x8b] sm:$0xff] }
 0x2fe   : > { %v13747_v55 = vadd.f32 %v6486_v63, %v6390_v6  ;;  %v9942_v16 = vpack.c.bf16 %v9074_v40, %v9074_v40  ;;  %v6828_v61 = vadd.f32 %v6780_v62, %v6729_v21  ;;  %v7032_v26 = vadd.f32 %v6978_v4, %v6681_v44 }
 0x2ff   : > { %v7257_v48 = vadd.f32 %v7197_v3, %v6198_v5  ;;  %9314 = vst.msk [vmem:[%s12159_s26 + $0x24] sm:$0xf] %vm9310_vm4, %v9941_v51  ;;  %v7820_v41 = vadd.f32 %v13568_v15, %v7765_v59  ;;  %v6101_v24 = vmul.f32 0.0625, %v6053_v34  ;;  %v6196_v50 = vmul.f32 0.1875, %v6148_v0  ;;  %v7567_v59 = vpop.permute.xlu1 %7566 }
 0x300   : > { %v6197_v60 = vmul.f32 0.1875, %v6149_v31  ;;  %9315 = vst.msk [vmem:[%s12159_s26 + $0x28] sm:$0xf] %vm9310_vm4, %v9942_v16  ;;  %v6879_v13 = vmul.f32 0.1875, %v6438_v54  ;;  %v7086_v53 = vadd.f32 %v7032_v26, %v6780_v62  ;;  %v6340_v32 = vmul.f32 0.1875, %v6292_v8  ;;  %v15701_v26 = vld [vmem:[#allocation67_spill] sm:$0xff] }
 0x301   : > { %v7317_v12 = vadd.f32 %v7257_v48, %v6342_v20  ;;  %vm7868_vm13 = vcmp.ge.f32.partialorder %v7820_v41, 0.0  ;;  %v7916_v1 = vmul.f32 0.2, %v7820_v41  ;;  %v6244_v5 = vadd.f32 %v6196_v50, %v13682_v18  ;;  %v6154_v16 = vld [vmem:[#allocation2 + $0xb1] sm:$0xff] }
 0x302   : > { %v6245_v44 = vadd.f32 %v6197_v60, %v6101_v24  ;;  %v13757_v52 = vadd.f32 %v6879_v13, %v6828_v61  ;;  %v13759_v35 = vadd.f32 %v7086_v53, %v6879_v13  ;;  %v6341_v46 = vmul.f32 0.1875, %v6293_v43  ;;  %v15700_v61 = vld [vmem:[#allocation38_spill] sm:$0xff] }
 0x303   : > { %v7377_v6 = vadd.f32 %v7317_v12, %v6486_v63  ;;  %v7964_v21 = vsel %vm7868_vm13, %v7820_v41, %v7916_v1  ;;  %v6388_v4 = vadd.f32 %v6340_v32, %v6244_v5  ;;  %v6484_v3 = vmul.f32 0.0625, %v6436_v29 }
 0x304   : > { %v6581_v54 = vmul.f32 0.1875, %v6053_v34  ;;  %v8012_v62 = vmul.f32 1.4142135, %v7964_v21  ;;  %v6389_v40 = vadd.f32 %v6341_v46, %v6245_v44  ;;  %v6679_v51 = vmul.f32 0.5625, %v6148_v0 }
 0x305   : > { %v7432_v20 = vmul.f32 %v13557_v38, %v7377_v6  ;;  %v6485_v30 = vmul.f32 0.0625, %v6437_v23  ;;  %v13762_v18 = vadd.f32 %v6484_v3, %v6388_v4  ;;  %v6680_v37 = vmul.f32 0.5625, %v6149_v31 }
 0x306   : > { %v6629_v33 = vadd.f32 %v6581_v54, %v13631_v56  ;;  %v8067_v63 = vmul.f32 %v13597_v47, %v8012_v62  ;;  %v15702_v34 = vsel %vm13392_vm1, %v15700_v61, %v15701_v26  ;;  %v6727_v0 = vadd.f32 %v6679_v51, %v13689_v49 }
 0x307   : > { %v7768_v27 = vadd.f32 %v7567_v59, %v7432_v20  ;;  %vm13771_vm12 = vcmp.lt.s32.totalorder %v15702_v34, 16  ;;  %v6778_v41 = vmul.f32 0.5625, %v6292_v8  ;;  %v13776_v13 = vadd.f32 %v6485_v30, %v6389_v40  ;;  %v6151_v34 = vld [vmem:[#allocation2 + $0x99] sm:$0xff] }
 0x308   : > { %v6728_v56 = vadd.f32 %v6680_v37, %v6629_v33  ;;  %v6779_v31 = vmul.f32 0.5625, %v6293_v43  ;;  %v6877_v53 = vmul.f32 0.1875, %v6436_v29  ;;  %v9076_v12 = vsel %vm13743_vm3, %v8067_v63, 0.0 }
 0x309   : > { %v7823_v1 = vadd.f32 %v13568_v15, %v7768_v27  ;;  %v6826_v5 = vadd.f32 %v6778_v41, %v6727_v0  ;;  %v6977_v44 = vadd.f32 %v13650_v2, %v6581_v54  ;;  %v9944_v6 = vpack.c.bf16 %v9076_v12, %v9076_v12  ;;  %v6056_v27 = vld [vmem:[#allocation2 + $0xa0] sm:$0xff] }
 0x30a   : > { %v6827_v21 = vadd.f32 %v6779_v31, %v6728_v56  ;;  %v7030_v4 = vadd.f32 %v13718_v25, %v6679_v51  ;;  %v7196_v49 = vadd.f32 %v13654_v10, %v6101_v24  ;;  %v6878_v62 = vmul.f32 0.1875, %v6437_v23  ;;  %v6058_v23 = vld [vmem:[#allocation2 + $0xb0] sm:$0xff]  ;;  %v7562_v56 = vpop.permute.xlu0 %7561 }
 0x30b   : > { %vm7871_vm1 = vcmp.ge.f32.partialorder %v7823_v1, 0.0  ;;  %v7919_v8 = vmul.f32 0.2, %v7823_v1  ;;  %v7031_v20 = vadd.f32 %v6977_v44, %v6680_v37  ;;  %9317 = vst.msk [vmem:[%s12159_s26 + $0x30] sm:$0xf] %vm9310_vm4, %v9944_v6  ;;  %v13786_v43 = vadd.f32 %v6877_v53, %v6826_v5 }
 0x30c   : > { %v7084_v9 = vadd.f32 %v7030_v4, %v6778_v41  ;;  %v7255_v29 = vadd.f32 %v13721_v36, %v6196_v50  ;;  %v7256_v40 = vadd.f32 %v7196_v49, %v6197_v60  ;;  %v8252_v54 = vshrl.u32 %v13504_v14, 4 }
 0x30d   : > { %v7967_v59 = vsel %vm7871_vm1, %v7823_v1, %v7919_v8  ;;  %v7085_v2 = vadd.f32 %v7031_v20, %v6779_v31  ;;  %vm8693_vm6 = vcmp.ne.s32.totalorder %v13515_v17, 0  ;;  %v6926_v10 = vadd.f32 %v6878_v62, %v6827_v21 }
 0x30e   : > { %v8015_v25 = vmul.f32 1.4142135, %v7967_v59  ;;  %v7315_v24 = vadd.f32 %v7255_v29, %v6340_v32  ;;  %v7316_v51 = vadd.f32 %v7256_v40, %v6341_v46  ;;  %v7138_v33 = vadd.f32 %v7084_v9, %v6877_v53  ;;  %v6439_v53 = vld [vmem:[#allocation2 + $0x9b] sm:$0xff] }
 0x30f   : > { %v8253_v37 = vmul.u32 24, %v8252_v54  ;;  %vm8741_vm15 = vcmp.lt.s32.totalorder %v13515_v17, 0  ;;  %v8837_v63 = vadd.s32 24, %v13515_v17  ;;  %v13794_v50 = vadd.f32 %v7085_v2, %v6878_v62 }
 0x310   : > { %v8070_v36 = vmul.f32 %v13597_v47, %v8015_v25  ;;  %v7375_v60 = vadd.f32 %v7315_v24, %v6484_v3  ;;  %v7376_v14 = vadd.f32 %v7316_v51, %v6485_v30  ;;  %vm13798_vm8 = vmand %vm8741_vm15, %vm8693_vm6  ;;  %v13806_v61 = vmul.f32 0.0625, %v6058_v23 }
 0x311   : > { %v8254_v32 = vsub.s32 %v15650_v22, %v8253_v37  ;;  %v8885_v46 = vsel %vm13798_vm8, %v8837_v63, %v13515_v17  ;;  %v13808_v26 = vmul.f32 0.1875, %v6058_v23  ;;  %v13814_v41 = vmul.f32 0.0625, %v6056_v27  ;;  %v6295_v22 = vld [vmem:[#allocation2 + $0x9a] sm:$0xff] }
 0x312   : > { %v9079_v3 = vsel %vm13771_vm12, %v8070_v36, 0.0  ;;  %v7430_v30 = vmul.f32 %v13557_v38, %v7375_v60  ;;  %v7431_v0 = vmul.f32 %v13557_v38, %v7376_v14  ;;  %vm13817_vm14 = vcmp.lt.s32.totalorder %v8885_v46, 16  ;;  %v6059_v14 = vld [vmem:[#allocation2 + $0xb8] sm:$0xff] }
 0x313   : > { %v9947_v31 = vpack.c.bf16 %v9079_v3, %v9079_v3  ;;  %vm8694_vm2 = vcmp.ne.s32.totalorder %v8254_v32, 0  ;;  %vm8742_vm9 = vcmp.lt.s32.totalorder %v8254_v32, 0  ;;  %v8838_v17 = vadd.s32 24, %v8254_v32 }
 0x314   : > { %v7766_v12 = vadd.f32 %v13749_v42, %v7430_v30  ;;  %v7767_v1 = vadd.f32 %v7562_v56, %v7431_v0  ;;  %vm8790_vm7 = vmand %vm8742_vm9, %vm8694_vm2  ;;  %v6199_v5 = vmul.f32 0.1875, %v6151_v34  ;;  %v6343_v6 = vmul.f32 0.1875, %v6295_v22  ;;  %v6298_v30 = vld [vmem:[#allocation2 + $0xb2] sm:$0xff] }
 0x315   : > { %9320 = vst.msk [vmem:[%s12159_s26 + $0x3c] sm:$0xf] %vm9310_vm4, %v9947_v31  ;;  %v8886_v44 = vsel %vm8790_vm7, %v8838_v17, %v8254_v32  ;;  %v6584_v21 = vmul.f32 0.1875, %v6056_v27  ;;  %v6631_v4 = vadd.f32 %v13727_v57, %v13762_v18  ;;  %v6487_v62 = vmul.f32 0.0625, %v6439_v53 }
 0x316   : > { %v7821_v49 = vadd.f32 %v13568_v15, %v7766_v12  ;;  %v7822_v8 = vadd.f32 %v13568_v15, %v7767_v1  ;;  %v6247_v42 = vadd.f32 %v6199_v5, %v13723_v7  ;;  %vm13828_vm0 = vcmp.lt.s32.totalorder %v8886_v44, 16 }
 0x317   : > { %v13833_v9 = vadd.f32 %v6584_v21, %v13776_v13  ;;  %v6682_v29 = vmul.f32 0.5625, %v6151_v34  ;;  %v6781_v40 = vmul.f32 0.5625, %v6295_v22  ;;  %v6880_v25 = vmul.f32 0.1875, %v6439_v53 }
 0x318   : > { %vm7869_vm10 = vcmp.ge.f32.partialorder %v7821_v49, 0.0  ;;  %vm7870_vm11 = vcmp.ge.f32.partialorder %v7822_v8, 0.0  ;;  %v7917_v59 = vmul.f32 0.2, %v7821_v49  ;;  %v7918_v18 = vmul.f32 0.2, %v7822_v8 }
 0x319   : > { %v6391_v2 = vadd.f32 %v6343_v6, %v6247_v42  ;;  %v6730_v54 = vadd.f32 %v6682_v29, %v6631_v4  ;;  %v6979_v24 = vadd.f32 %v13786_v43, %v13727_v57  ;;  %v13837_v37 = vadd.f32 %v6926_v10, %v6584_v21  ;;  %v6442_v57 = vld [vmem:[#allocation2 + $0xb3] sm:$0xff] }
 0x31a   : > { %v7965_v51 = vsel %vm7869_vm10, %v7821_v49, %v7917_v59  ;;  %v7966_v23 = vsel %vm7870_vm11, %v7822_v8, %v7918_v18  ;;  %v7198_v63 = vadd.f32 %v7138_v33, %v13723_v7  ;;  %v13848_v7 = vadd.f32 %v13794_v50, %v13814_v41 }
 0x31b   : > { %v8013_v13 = vmul.f32 1.4142135, %v7965_v51  ;;  %v8014_v27 = vmul.f32 1.4142135, %v7966_v23  ;;  %v6535_v36 = vadd.f32 %v6487_v62, %v6391_v2  ;;  %v6829_v60 = vadd.f32 %v6781_v40, %v6730_v54  ;;  %v5282_v54 = vpop.f32.mrf.mxu1 }
 0x31c   : > { %v7033_v32 = vadd.f32 %v6979_v24, %v6682_v29  ;;  %v7258_v46 = vadd.f32 %v7198_v63, %v6199_v5  ;;  %v13841_v34 = vmul.u32.u64.low 2863311531, %v13519_v11  ;;  %v13842_v3 = vmul.u32.u64.high 2863311531, %v13519_v11, %v13841_v34  ;;  %v6057_v63 = vld [vmem:[#allocation2 + $0xa8] sm:$0xff] }
 0x31d   : > { %v8068_v43 = vmul.f32 %v13597_v47, %v8013_v13  ;;  %v8069_v10 = vmul.f32 %v13597_v47, %v8014_v27  ;;  %v6928_v0 = vadd.f32 %v6880_v25, %v6829_v60  ;;  %v13850_v56 = vmul.f32 0.0625, %v6059_v14  ;;  %v6153_v34 = vld [vmem:[#allocation2 + $0xa9] sm:$0xff] }
 0x31e   : > { %v7087_v33 = vadd.f32 %v7033_v32, %v6781_v40  ;;  %v7318_v22 = vadd.f32 %v7258_v46, %v6343_v6  ;;  %v6202_v31 = vmul.f32 0.1875, %v6154_v16  ;;  %v6346_v12 = vmul.f32 0.1875, %v6298_v30  ;;  %v7572_v40 = vpop.permute.xlu0 %7571  ;;  %v15711_v32 = vld [vmem:[#allocation47_spill] sm:$0xff] }
 0x31f   : > { %v9077_v17 = vsel %vm13817_vm14, %v8068_v43, 0.0  ;;  %v9078_v53 = vsel %vm13828_vm0, %v8069_v10, 0.0  ;;  %v6490_v1 = vmul.f32 0.0625, %v6442_v57  ;;  %v8274_v4 = vshrl.u32 %v13842_v3, 4  ;;  %v6152_v46 = vld [vmem:[#allocation2 + $0xa1] sm:$0xff]  ;;  %v13879_v3 = vpop.permute.xlu1 %7576 }
 0x320   : > { %v9945_v5 = vpack.c.bf16 %v9077_v17, %v9077_v17  ;;  %v9946_v44 = vpack.c.bf16 %v9078_v53, %v9078_v53  ;;  %v7141_v21 = vadd.f32 %v7087_v33, %v6880_v25  ;;  %v7378_v50 = vadd.f32 %v7318_v22, %v6487_v62 }
 0x321   : > { %v6250_v6 = vadd.f32 %v6202_v31, %v13806_v61  ;;  %v6634_v49 = vadd.f32 %v13808_v26, %v6535_v36  ;;  %v6685_v8 = vmul.f32 0.5625, %v6154_v16  ;;  %v13864_v42 = vmul.f32 0.1875, %v6059_v14 }
 0x322   : > { %9318 = vst.msk [vmem:[%s12159_s26 + $0x34] sm:$0xf] %vm9310_vm4, %v9945_v5  ;;  %9319 = vst.msk [vmem:[%s12159_s26 + $0x38] sm:$0xf] %vm9310_vm4, %v9946_v44  ;;  %v7433_v48 = vmul.f32 %v13557_v38, %v7378_v50  ;;  %v6784_v20 = vmul.f32 0.5625, %v6298_v30  ;;  %v6982_v29 = vadd.f32 %v6928_v0, %v13808_v26  ;;  %v8275_v62 = vmul.u32 24, %v8274_v4 }
 0x323   : > { %v6394_v59 = vadd.f32 %v6346_v12, %v6250_v6  ;;  %v6733_v18 = vadd.f32 %v6685_v8, %v6634_v49  ;;  %v7201_v2 = vadd.f32 %v7141_v21, %v13806_v61  ;;  %v6883_v14 = vmul.f32 0.1875, %v6442_v57  ;;  %v6297_v5 = vld [vmem:[#allocation2 + $0xaa] sm:$0xff] }
 0x324   : > { %v7769_v25 = vadd.f32 %v7572_v40, %v7433_v48  ;;  %v7036_v24 = vadd.f32 %v6982_v29, %v6685_v8  ;;  %v13869_v51 = vmul.u32.u64.low 2863311531, %v13527_v28  ;;  %v13870_v23 = vmul.u32.u64.high 2863311531, %v13527_v28, %v13869_v51  ;;  %v6440_v44 = vld [vmem:[#allocation2 + $0xa3] sm:$0xff] }
 0x325   : > { %v8276_v13 = vsub.s32 %v13519_v11, %v8275_v62  ;;  %v13873_v27 = vadd.f32 %v6490_v1, %v6394_v59  ;;  %v6832_v36 = vadd.f32 %v6784_v20, %v6733_v18  ;;  %v7261_v26 = vadd.f32 %v7201_v2, %v6202_v31  ;;  %v6296_v11 = vld [vmem:[#allocation2 + $0xa2] sm:$0xff]  ;;  %v7587_v59 = vpop.permute.xlu1 %7586 }
 0x326   : > { %v7824_v60 = vadd.f32 %v13568_v15, %v7769_v25  ;;  %v7090_v16 = vadd.f32 %v7036_v24, %v6784_v20  ;;  %v13877_v61 = vadd.f32 %v5282_v54, %v15711_v32  ;;  %v6105_v43 = vmul.f32 0.0625, %v6057_v63  ;;  %v10789_v32 = vpop.f32.mrf.mxu0 }
 0x327   : > { %vm8696_vm3 = vcmp.ne.s32.totalorder %v8276_v13, 0  ;;  %vm8744_vm13 = vcmp.lt.s32.totalorder %v8276_v13, 0  ;;  %v8840_v30 = vadd.s32 24, %v8276_v13  ;;  %v13885_v57 = vadd.f32 %v6883_v14, %v6832_v36 }
 0x328   : > { %vm7872_vm12 = vcmp.ge.f32.partialorder %v7824_v60, 0.0  ;;  %v7920_v10 = vmul.f32 0.2, %v7824_v60  ;;  %vm13881_vm1 = vmand %vm8744_vm13, %vm8696_vm3  ;;  %v7321_v33 = vadd.f32 %v7261_v26, %v6346_v12  ;;  %v8307_v31 = vshrl.u32 %v13870_v23, 4  ;;  %v6441_v12 = vld [vmem:[#allocation2 + $0xab] sm:$0xff] }
 0x329   : > { %v8888_v22 = vsel %vm13881_vm1, %v8840_v30, %v8276_v13  ;;  %v6200_v17 = vmul.f32 0.1875, %v6152_v46  ;;  %v6201_v53 = vmul.f32 0.1875, %v6153_v34  ;;  %v13890_v50 = vadd.f32 %v7090_v16, %v6883_v14 }
 0x32a   : > { %v7968_v21 = vsel %vm7872_vm12, %v7824_v60, %v7920_v10  ;;  %v7381_v4 = vadd.f32 %v7321_v33, %v6490_v1  ;;  %v6344_v6 = vmul.f32 0.1875, %v6296_v11  ;;  %v8308_v8 = vmul.u32 24, %v8307_v31  ;;  %v10731_v31 = vpop.f32.mrf.mxu1 }
 0x32b   : > { %v8016_v49 = vmul.f32 1.4142135, %v7968_v21  ;;  %v6248_v48 = vadd.f32 %v6200_v17, %v13814_v41  ;;  %v6249_v20 = vadd.f32 %v6201_v53, %v6105_v43  ;;  %vm8936_vm6 = vcmp.lt.s32.totalorder %v8888_v22, 16 }
 0x32c   : > { %v7436_v29 = vmul.f32 %v13557_v38, %v7381_v4  ;;  %v6345_v40 = vmul.f32 0.1875, %v6297_v5  ;;  %v6488_v62 = vmul.f32 0.0625, %v6440_v44  ;;  %v8309_v2 = vsub.s32 %v13527_v28, %v8308_v8 }
 0x32d   : > { %v8071_v18 = vmul.f32 %v13597_v47, %v8016_v49  ;;  %v6392_v54 = vadd.f32 %v6344_v6, %v6248_v48  ;;  %v6585_v25 = vmul.f32 0.1875, %v6057_v63  ;;  %v6489_v51 = vmul.f32 0.0625, %v6441_v12  ;;  %v5772_v48 = vpop.f32.mrf.mxu0 }
 0x32e   : > { %v7772_v1 = vadd.f32 %v7587_v59, %v7436_v29  ;;  %v6393_v24 = vadd.f32 %v6345_v40, %v6249_v20  ;;  %v6683_v23 = vmul.f32 0.5625, %v6152_v46  ;;  %vm8699_vm15 = vcmp.ne.s32.totalorder %v8309_v2, 0 }
 0x32f   : > { %v9080_v41 = vsel %vm8936_vm6, %v8071_v18, 0.0  ;;  %vm8747_vm8 = vcmp.lt.s32.totalorder %v8309_v2, 0  ;;  %v8843_v13 = vadd.s32 24, %v8309_v2  ;;  %v6536_v26 = vadd.f32 %v6488_v62, %v6392_v54 }
 0x330   : > { %v9948_v36 = vpack.c.bf16 %v9080_v41, %v9080_v41  ;;  %v7827_v38 = vadd.f32 %v13568_v15, %v7772_v1  ;;  %vm8795_vm2 = vmand %vm8747_vm8, %vm8699_vm15  ;;  %v6684_v60 = vmul.f32 0.5625, %v6153_v34  ;;  %v6633_v28 = vadd.f32 %v6585_v25, %v13747_v55 }
 0x331   : > { %v8891_v14 = vsel %vm8795_vm2, %v8843_v13, %v8309_v2  ;;  %v6731_v63 = vadd.f32 %v6683_v23, %v13833_v9  ;;  %v6782_v16 = vmul.f32 0.5625, %v6296_v11  ;;  %v13905_v10 = vadd.f32 %v6489_v51, %v6393_v24  ;;  %v15716_v24 = vld [vmem:[#allocation49_spill] sm:$0xff] }
 0x332   : > { %9321 = vst.msk [vmem:[%s12159_s26 + $0x40] sm:$0xf] %vm9310_vm4, %v9948_v36  ;;  %vm7875_vm9 = vcmp.ge.f32.partialorder %v7827_v38, 0.0  ;;  %v7923_v46 = vmul.f32 0.2, %v7827_v38  ;;  %vm13901_vm7 = vcmp.lt.s32.totalorder %v8891_v14, 16  ;;  %v6732_v15 = vadd.f32 %v6684_v60, %v6633_v28 }
 0x333   : > { %v6783_v0 = vmul.f32 0.5625, %v6297_v5  ;;  %v6830_v34 = vadd.f32 %v6782_v16, %v6731_v63  ;;  %v6881_v33 = vmul.f32 0.1875, %v6440_v44  ;;  %v6981_v55 = vadd.f32 %v13757_v52, %v6585_v25  ;;  %v13928_v36 = vld [vmem:[%s13549_s23] ss:$0 sm:$0xff] }
 0x334   : > { %v7971_v22 = vsel %vm7875_vm9, %v7827_v38, %v7923_v46  ;;  %v7034_v9 = vadd.f32 %v13837_v37, %v6683_v23  ;;  %v7200_v11 = vadd.f32 %v13759_v35, %v6105_v43  ;;  %v6882_v49 = vmul.f32 0.1875, %v6441_v12 }
 0x335   : > { %v8019_v21 = vmul.f32 1.4142135, %v7971_v22  ;;  %v6831_v4 = vadd.f32 %v6783_v0, %v6732_v15  ;;  %v7259_v8 = vadd.f32 %v13848_v7, %v6200_v17  ;;  %v7035_v20 = vadd.f32 %v6981_v55, %v6684_v60  ;;  %v5295_v7 = vpop.f32.mrf.mxu1 }
 0x336   : > { %v7088_v29 = vadd.f32 %v7034_v9, %v6782_v16  ;;  %v7260_v59 = vadd.f32 %v7200_v11, %v6201_v53  ;;  %v8121_v5 = vadd.s32 88, %v15654_v45  ;;  %v6929_v18 = vadd.f32 %v6881_v33, %v6830_v34  ;;  %v7582_v16 = vpop.permute.xlu0 %7581  ;;  %v15718_v9 = vld [vmem:[#allocation3_spill] sm:$0xff] }
 0x337   : > { %v8074_v44 = vmul.f32 %v13597_v47, %v8019_v21  ;;  %v7319_v52 = vadd.f32 %v7259_v8, %v6344_v6  ;;  %v8122_v37 = vadd.s32 96, %v15654_v45  ;;  %v13914_v35 = vadd.f32 %v6882_v49, %v6831_v4  ;;  %v10790_v47 = vpop.f32.mrf.mxu0  ;;  %v10732_v63 = vpop.f32.mrf.mxu1 }
 0x338   : > { %v7089_v43 = vadd.f32 %v7035_v20, %v6783_v0  ;;  %v7142_v12 = vadd.f32 %v7088_v29, %v6881_v33  ;;  %v7320_v2 = vadd.f32 %v7260_v59, %v6345_v40  ;;  %v13922_v23 = vadd.f32 %v10731_v31, %v15716_v24 }
 0x339   : > { %v9083_v17 = vsel %vm13901_vm7, %v8074_v44, 0.0  ;;  %v7379_v53 = vadd.f32 %v7319_v52, %v6488_v62  ;;  %v13918_v54 = vmul.u32.u64.low 2863311531, %v8121_v5  ;;  %v13919_v25 = vmul.u32.u64.high 2863311531, %v8121_v5, %v13918_v54  ;;  %v5775_v0 = vpop.f32.mrf.mxu0  ;;  %v5298_v20 = vpop.f32.mrf.mxu1 }
 0x33a   : > { %v9951_v1 = vpack.c.bf16 %v9083_v17, %v9083_v17  ;;  %v7380_v6 = vadd.f32 %v7320_v2, %v6489_v51  ;;  %v5941_v41 = vadd.f32 %v10789_v32, %v13509_v19  ;;  %v13925_v13 = vadd.f32 %v7089_v43, %v6882_v49  ;;  %v15717_v51 = vld [vmem:[#allocation50_spill] sm:$0xff] }
 0x33b   : > { %v7434_v40 = vmul.f32 %v13928_v36, %v7379_v53  ;;  %v13931_v38 = vmul.u32.u64.low 2863311531, %v8122_v37  ;;  %v13932_v60 = vmul.u32.u64.high 2863311531, %v8122_v37, %v13931_v38  ;;  %v13939_v14 = vadd.f32 %v5295_v7, %v15717_v51  ;;  %v15721_v7 = vld [vmem:[#allocation5_spill] sm:$0xff] }
 0x33c   : > { %9324 = vst.msk [vmem:[%s12159_s26 + $0x4c] sm:$0xf] %vm9310_vm4, %v9951_v1  ;;  %v7435_v62 = vmul.f32 %v13928_v36, %v7380_v6  ;;  %v5939_v19 = vadd.f32 %v5772_v48, %v13512_v39  ;;  %v13943_v28 = vadd.f32 %v13864_v42, %v6536_v26  ;;  %v8285_v46 = vshrl.u32 %v13919_v25, 4 }
 0x33d   : > { %6002 = vst.msk [vmem:[#allocation2 + $0xd0] sm:$0xff] %vm5975_vm5, %v5941_v41  ;;  %v7770_v32 = vadd.f32 %v13879_v3, %v7434_v40  ;;  %v13948_v30 = vadd.f32 %v6929_v18, %v13864_v42  ;;  %v13951_v15 = vadd.s32 112, %v15654_v45  ;;  %v13955_v39 = vadd.f32 %v7142_v12, %v13850_v56  ;;  %v13964_v42 = vld [vmem:[%s15339_s5] ss:$0 sm:$0xff] }
 0x33e   : > { %v7771_v34 = vadd.f32 %v7582_v16, %v7435_v62  ;;  %6000 = vst.msk [vmem:[#allocation2 + $0xc0] sm:$0xff] %vm5975_vm5, %v5939_v19  ;;  %v5942_v26 = vadd.f32 %v10790_v47, %v13522_v58  ;;  %v13959_v33 = vadd.s32 136, %v15654_v45  ;;  %v8286_v22 = vmul.u32 24, %v8285_v46  ;;  %v13992_v47 = vld [vmem:[%s13590_s29] ss:$0 sm:$0xff] }
 0x33f   : > { %v7825_v3 = vadd.f32 %v13964_v42, %v7770_v32  ;;  %v8296_v55 = vshrl.u32 %v13932_v60, 4  ;;  %v13969_v11 = vadd.f32 %v10732_v63, %v15718_v9  ;;  %v5940_v4 = vadd.f32 %v5775_v0, %v13877_v61 }
 0x340   : > { %v7826_v31 = vadd.f32 %v13964_v42, %v7771_v34  ;;  %v13973_v58 = vmul.u32.u64.low 2863311531, %v13951_v15  ;;  %v13974_v21 = vmul.u32.u64.high 2863311531, %v13951_v15, %v13973_v58  ;;  %6003 = vst.msk [vmem:[#allocation2 + $0xd8] sm:$0xff] %vm5975_vm5, %v5942_v26  ;;  %v8287_v8 = vsub.s32 %v8121_v5, %v8286_v22 }
 0x341   : > { %vm7873_vm14 = vcmp.ge.f32.partialorder %v7825_v3, 0.0  ;;  %v7921_v49 = vmul.f32 0.2, %v7825_v3  ;;  %v8297_v48 = vmul.u32 24, %v8296_v55  ;;  %6001 = vst.msk [vmem:[#allocation2 + $0xc8] sm:$0xff] %vm5975_vm5, %v5940_v4  ;;  %v13989_v17 = vadd.f32 %v5298_v20, %v15721_v7 }
 0x342   : > { %vm7874_vm0 = vcmp.ge.f32.partialorder %v7826_v31, 0.0  ;;  %v7922_v29 = vmul.f32 0.2, %v7826_v31  ;;  %v13979_v59 = vmul.u32.u64.low 2863311531, %v13959_v33  ;;  %v13980_v44 = vmul.u32.u64.high 2863311531, %v13959_v33, %v13979_v59 }
 0x343   : > { %v7969_v18 = vsel %vm7873_vm14, %v7825_v3, %v7921_v49  ;;  %v8298_v52 = vsub.s32 %v8122_v37, %v8297_v48  ;;  %vm8697_vm10 = vcmp.ne.s32.totalorder %v8287_v8, 0  ;;  %vm8745_vm11 = vcmp.lt.s32.totalorder %v8287_v8, 0 }
 0x344   : > { %v6062_v61 = vld [vmem:[#allocation2 + $0xd0] sm:$0xff]  ;;  %v7970_v43 = vsel %vm7874_vm0, %v7826_v31, %v7922_v29  ;;  %v8017_v12 = vmul.f32 1.4142135, %v7969_v18  ;;  %vm13984_vm3 = vmand %vm8745_vm11, %vm8697_vm10  ;;  %v8841_v2 = vadd.s32 24, %v8287_v8  ;;  %v8318_v29 = vshrl.u32 %v13974_v21, 4 }
 0x345   : > { %v8018_v53 = vmul.f32 1.4142135, %v7970_v43  ;;  %vm8698_vm13 = vcmp.ne.s32.totalorder %v8298_v52, 0  ;;  %vm8746_vm12 = vcmp.lt.s32.totalorder %v8298_v52, 0  ;;  %v8842_v54 = vadd.s32 24, %v8298_v52  ;;  %v6060_v25 = vld [vmem:[#allocation2 + $0xc0] sm:$0xff] }
 0x346   : > { %v8072_v37 = vmul.f32 %v13992_v47, %v8017_v12  ;;  %vm8794_vm1 = vmand %vm8746_vm12, %vm8698_vm13  ;;  %v8889_v1 = vsel %vm13984_vm3, %v8841_v2, %v8287_v8  ;;  %v13997_v6 = vmul.f32 0.0625, %v6062_v61  ;;  %v13999_v24 = vmul.f32 0.1875, %v6062_v61  ;;  %v6155_v41 = vld [vmem:[#allocation2 + $0xb9] sm:$0xff] }
 0x347   : > { %v6299_v40 = vld [vmem:[#allocation2 + $0xba] sm:$0xff]  ;;  %v8073_v38 = vmul.f32 %v13992_v47, %v8018_v53  ;;  %v8890_v60 = vsel %vm8794_vm1, %v8842_v54, %v8298_v52  ;;  %vm8937_vm6 = vcmp.lt.s32.totalorder %v8889_v1, 16  ;;  %v6203_v62 = vmul.f32 0.1875, %v6155_v41  ;;  %v6158_v31 = vld [vmem:[#allocation2 + $0xd1] sm:$0xff] }
 0x348   : > { %v6443_v51 = vld [vmem:[#allocation2 + $0xbb] sm:$0xff]  ;;  %vm8938_vm15 = vcmp.lt.s32.totalorder %v8890_v60, 16  ;;  %v9081_v19 = vsel %vm8937_vm6, %v8072_v37, 0.0  ;;  %v14002_v63 = vmul.f32 0.0625, %v6060_v25  ;;  %v6347_v16 = vmul.f32 0.1875, %v6299_v40  ;;  %v6302_v59 = vld [vmem:[#allocation2 + $0xd2] sm:$0xff] }
 0x349   : > { %v9082_v32 = vsel %vm8938_vm15, %v8073_v38, 0.0  ;;  %v9949_v46 = vpack.c.bf16 %v9081_v19, %v9081_v19  ;;  %v6251_v0 = vadd.f32 %v6203_v62, %v13850_v56  ;;  %v6588_v34 = vmul.f32 0.1875, %v6060_v25  ;;  %v6063_v9 = vld [vmem:[#allocation2 + $0xd8] sm:$0xff]  ;;  %v6061_v60 = vld [vmem:[#allocation2 + $0xc8] sm:$0xff] }
 0x34a   : > { %v9950_v26 = vpack.c.bf16 %v9082_v32, %v9082_v32  ;;  %v6491_v3 = vmul.f32 0.0625, %v6443_v51  ;;  %v6686_v22 = vmul.f32 0.5625, %v6155_v41  ;;  %v6785_v55 = vmul.f32 0.5625, %v6299_v40  ;;  %v6446_v18 = vld [vmem:[#allocation2 + $0xd3] sm:$0xff] }
 0x34b   : > { %9322 = vst.msk [vmem:[%s12159_s26 + $0x44] sm:$0xf] %vm9310_vm4, %v9949_v46  ;;  %v6395_v58 = vadd.f32 %v6347_v16, %v6251_v0  ;;  %v14008_v4 = vadd.f32 %v6588_v34, %v13905_v10  ;;  %v6884_v49 = vmul.f32 0.1875, %v6443_v51  ;;  %v14011_v8 = vadd.f32 %v13914_v35, %v6588_v34  ;;  %v6156_v46 = vld [vmem:[#allocation2 + $0xc1] sm:$0xff]  ;;  %v6157_v0 = vld [vmem:[#allocation2 + $0xc9] sm:$0xff] }
 0x34c   : > { %9323 = vst.msk [vmem:[%s12159_s26 + $0x48] sm:$0xf] %vm9310_vm4, %v9950_v26  ;;  %v6734_v56 = vadd.f32 %v6686_v22, %v13943_v28  ;;  %v7037_v48 = vadd.f32 %v13948_v30, %v6686_v22  ;;  %v7262_v20 = vadd.f32 %v13955_v39, %v6203_v62  ;;  %v14021_v10 = vadd.f32 %v13925_v13, %v14002_v63  ;;  %v7592_v62 = vpop.permute.xlu0 %7591 }
 0x34d   : > { %v6539_v52 = vadd.f32 %v6491_v3, %v6395_v58  ;;  %v14023_v61 = vmul.f32 0.0625, %v6063_v9  ;;  %v6206_v35 = vmul.f32 0.1875, %v6158_v31  ;;  %v8319_v28 = vmul.u32 24, %v8318_v29  ;;  %v6301_v29 = vld [vmem:[#allocation2 + $0xca] sm:$0xff] }
 0x34e   : > { %v6833_v43 = vadd.f32 %v6785_v55, %v6734_v56  ;;  %v7091_v12 = vadd.f32 %v7037_v48, %v6785_v55  ;;  %v7322_v5 = vadd.f32 %v7262_v20, %v6347_v16  ;;  %v6350_v2 = vmul.f32 0.1875, %v6302_v59  ;;  %v6300_v20 = vld [vmem:[#allocation2 + $0xc2] sm:$0xff] }
 0x34f   : > { %v6254_v30 = vadd.f32 %v6206_v35, %v13997_v6  ;;  %v6494_v39 = vmul.f32 0.0625, %v6446_v18  ;;  %v6638_v21 = vadd.f32 %v13999_v24, %v6539_v52  ;;  %v8320_v25 = vsub.s32 %v13951_v15, %v8319_v28 }
 0x350   : > { %v6932_v7 = vadd.f32 %v6884_v49, %v6833_v43  ;;  %v7145_v53 = vadd.f32 %v7091_v12, %v6884_v49  ;;  %v7382_v54 = vadd.f32 %v7322_v5, %v6491_v3  ;;  %v14028_v37 = vmul.f32 0.1875, %v6063_v9  ;;  %v14042_v49 = vpop.permute.xlu1 %7596 }
 0x351   : > { %v6398_v13 = vadd.f32 %v6350_v2, %v6254_v30  ;;  %v6689_v1 = vmul.f32 0.5625, %v6158_v31  ;;  %v6788_v41 = vmul.f32 0.5625, %v6302_v59  ;;  %vm8700_vm8 = vcmp.ne.s32.totalorder %v8320_v25, 0 }
 0x352   : > { %v7437_v40 = vmul.f32 %v13928_v36, %v7382_v54  ;;  %vm8748_vm2 = vcmp.lt.s32.totalorder %v8320_v25, 0  ;;  %v8844_v38 = vadd.s32 24, %v8320_v25  ;;  %v6986_v15 = vadd.f32 %v6932_v7, %v13999_v24  ;;  %v6444_v7 = vld [vmem:[#allocation2 + $0xc3] sm:$0xff] }
 0x353   : > { %vm14031_vm9 = vmand %vm8748_vm2, %vm8700_vm8  ;;  %v14035_v19 = vadd.f32 %v6494_v39, %v6398_v13  ;;  %v6737_v16 = vadd.f32 %v6689_v1, %v6638_v21  ;;  %v7205_v32 = vadd.f32 %v7145_v53, %v13997_v6  ;;  %v6887_v3 = vmul.f32 0.1875, %v6446_v18 }
 0x354   : > { %v7773_v34 = vadd.f32 %v7592_v62, %v7437_v40  ;;  %v8892_v26 = vsel %vm14031_vm9, %v8844_v38, %v8320_v25  ;;  %v8351_v22 = vshrl.u32 %v13980_v44, 4  ;;  %v7040_v9 = vadd.f32 %v6986_v15, %v6689_v1  ;;  %v6445_v25 = vld [vmem:[#allocation2 + $0xcb] sm:$0xff] }
 0x355   : > { %v6836_v55 = vadd.f32 %v6788_v41, %v6737_v16  ;;  %v7265_v31 = vadd.f32 %v7205_v32, %v6206_v35  ;;  %v6109_v58 = vmul.f32 0.0625, %v6061_v60  ;;  %v6204_v48 = vmul.f32 0.1875, %v6156_v46 }
 0x356   : > { %v7828_v56 = vadd.f32 %v13964_v42, %v7773_v34  ;;  %v8352_v24 = vmul.u32 24, %v8351_v22  ;;  %v14045_v6 = vmul.f32 0.1875, %v6157_v0  ;;  %vm14047_vm7 = vcmp.lt.s32.totalorder %v8892_v26, 16 }
 0x357   : > { %v14051_v18 = vadd.f32 %v6887_v3, %v6836_v55  ;;  %v7094_v44 = vadd.f32 %v7040_v9, %v6788_v41  ;;  %v7325_v52 = vadd.f32 %v7265_v31, %v6350_v2  ;;  %v6252_v12 = vadd.f32 %v6204_v48, %v14002_v63  ;;  %v7607_v41 = vpop.permute.xlu1 %7606  ;;  %v10793_v31 = vpop.f32.mrf.mxu0 }
 0x358   : > { %vm7876_vm14 = vcmp.ge.f32.partialorder %v7828_v56, 0.0  ;;  %v7924_v35 = vmul.f32 0.2, %v7828_v56  ;;  %v8353_v43 = vsub.s32 %v13959_v33, %v8352_v24  ;;  %v6253_v28 = vadd.f32 %v14045_v6, %v6109_v58 }
 0x359   : > { %v7385_v5 = vadd.f32 %v7325_v52, %v6494_v39  ;;  %v6348_v30 = vmul.f32 0.1875, %v6300_v20  ;;  %v6349_v21 = vmul.f32 0.1875, %v6301_v29  ;;  %v14056_v1 = vadd.f32 %v7094_v44, %v6887_v3 }
 0x35a   : > { %v7972_v53 = vsel %vm7876_vm14, %v7828_v56, %v7924_v35  ;;  %vm8703_vm0 = vcmp.ne.s32.totalorder %v8353_v43, 0  ;;  %vm8751_vm10 = vcmp.lt.s32.totalorder %v8353_v43, 0  ;;  %v8847_v54 = vadd.s32 24, %v8353_v43 }
 0x35b   : > { %v8020_v13 = vmul.f32 1.4142135, %v7972_v53  ;;  %v7440_v2 = vmul.f32 %v13928_v36, %v7385_v5  ;;  %vm8799_vm11 = vmand %vm8751_vm10, %vm8703_vm0  ;;  %v6396_v33 = vadd.f32 %v6348_v30, %v6252_v12  ;;  %v6397_v39 = vadd.f32 %v6349_v21, %v6253_v28  ;;  %v5788_v53 = vpop.f32.mrf.mxu0 }
 0x35c   : > { %v8895_v63 = vsel %vm8799_vm11, %v8847_v54, %v8353_v43  ;;  %v6492_v40 = vmul.f32 0.0625, %v6444_v7  ;;  %v6589_v38 = vmul.f32 0.1875, %v6061_v60  ;;  %v6493_v16 = vmul.f32 0.0625, %v6445_v25  ;;  %v10735_v43 = vpop.f32.mrf.mxu1 }
 0x35d   : > { %v8075_v62 = vmul.f32 %v13992_v47, %v8020_v13  ;;  %v7776_v51 = vadd.f32 %v7607_v41, %v7440_v2  ;;  %v6687_v15 = vmul.f32 0.5625, %v6156_v46  ;;  %vm14060_vm3 = vcmp.lt.s32.totalorder %v8895_v63, 16 }
 0x35e   : > { %v6540_v34 = vadd.f32 %v6492_v40, %v6396_v33  ;;  %v6637_v26 = vadd.f32 %v6589_v38, %v13873_v27  ;;  %v6688_v3 = vmul.f32 0.5625, %v6157_v0  ;;  %v6786_v9 = vmul.f32 0.5625, %v6300_v20  ;;  %v5311_v63 = vpop.f32.mrf.mxu1 }
 0x35f   : > { %v9084_v22 = vsel %vm14047_vm7, %v8075_v62, 0.0  ;;  %v7831_v55 = vadd.f32 %v13964_v42, %v7776_v51  ;;  %v6735_v60 = vadd.f32 %v6687_v15, %v14008_v4  ;;  %v14069_v46 = vadd.f32 %v6493_v16, %v6397_v39 }
 0x360   : > { %v9952_v56 = vpack.c.bf16 %v9084_v22, %v9084_v22  ;;  %v6736_v24 = vadd.f32 %v6688_v3, %v6637_v26  ;;  %v6787_v44 = vmul.f32 0.5625, %v6301_v29  ;;  %v6885_v27 = vmul.f32 0.1875, %v6444_v7 }
 0x361   : > { %vm7879_vm13 = vcmp.ge.f32.partialorder %v7831_v55, 0.0  ;;  %v7927_v52 = vmul.f32 0.2, %v7831_v55  ;;  %v6834_v35 = vadd.f32 %v6786_v9, %v6735_v60  ;;  %v6985_v59 = vadd.f32 %v13885_v57, %v6589_v38  ;;  %v15729_v60 = vld [vmem:[#allocation6_spill] sm:$0xff] }
 0x362   : > { %9325 = vst.msk [vmem:[%s12159_s26 + $0x50] sm:$0xf] %vm9310_vm4, %v9952_v56  ;;  %v6835_v0 = vadd.f32 %v6787_v44, %v6736_v24  ;;  %v7038_v12 = vadd.f32 %v14011_v8, %v6687_v15  ;;  %v7204_v4 = vadd.f32 %v13890_v50, %v6109_v58  ;;  %v6886_v5 = vmul.f32 0.1875, %v6445_v25  ;;  %v15728_v25 = vld [vmem:[#allocation4_spill] sm:$0xff]  ;;  %v10794_v15 = vpop.f32.mrf.mxu0 }
 0x363   : > { %v7975_v20 = vsel %vm7879_vm13, %v7831_v55, %v7927_v52  ;;  %v7263_v28 = vadd.f32 %v14021_v10, %v6204_v48  ;;  %v8125_v29 = vadd.s32 120, %v15654_v45  ;;  %v6933_v13 = vadd.f32 %v6885_v27, %v6834_v35 }
 0x364   : > { %v8023_v54 = vmul.f32 1.4142135, %v7975_v20  ;;  %v7039_v7 = vadd.f32 %v6985_v59, %v6688_v3  ;;  %v7092_v2 = vadd.f32 %v7038_v12, %v6786_v9  ;;  %v14078_v33 = vadd.f32 %v6886_v5, %v6835_v0  ;;  %v5791_v35 = vpop.f32.mrf.mxu0 }
 0x365   : > { %v7264_v41 = vadd.f32 %v7204_v4, %v14045_v6  ;;  %v7323_v57 = vadd.f32 %v7263_v28, %v6348_v30  ;;  %v8126_v8 = vadd.s32 128, %v15654_v45  ;;  %v14084_v10 = vadd.f32 %v10735_v43, %v15728_v25 }
 0x366   : > { %v8078_v50 = vmul.f32 %v13992_v47, %v8023_v54  ;;  %v7093_v58 = vadd.f32 %v7039_v7, %v6787_v44  ;;  %v5945_v48 = vadd.f32 %v10793_v31, %v13922_v23  ;;  %v7146_v30 = vadd.f32 %v7092_v2, %v6885_v27  ;;  %v7602_v27 = vpop.permute.xlu0 %7601 }
 0x367   : > { %v7324_v39 = vadd.f32 %v7264_v41, %v6349_v21  ;;  %v7383_v38 = vadd.f32 %v7323_v57, %v6492_v40  ;;  %v14087_v62 = vmul.u32.u64.low 2863311531, %v8125_v29  ;;  %v14088_v51 = vmul.u32.u64.high 2863311531, %v8125_v29, %v14087_v62  ;;  %v10736_v40 = vpop.f32.mrf.mxu1 }
 0x368   : > { %v9087_v6 = vsel %vm14060_vm3, %v8078_v50, 0.0  ;;  %v14092_v26 = vmul.u32.u64.low 2863311531, %v8126_v8  ;;  %v14093_v3 = vmul.u32.u64.high 2863311531, %v8126_v8, %v14092_v26  ;;  %6006 = vst.msk [vmem:[#allocation2 + $0xf0] sm:$0xff] %vm5975_vm5, %v5945_v48  ;;  %v14096_v55 = vadd.f32 %v7093_v58, %v6886_v5  ;;  %v15731_v50 = vld [vmem:[#allocation9_spill] sm:$0xff] }
 0x369   : > { %v9955_v22 = vpack.c.bf16 %v9087_v6, %v9087_v6  ;;  %v7384_v23 = vadd.f32 %v7324_v39, %v6493_v16  ;;  %v7438_v21 = vmul.f32 %v13928_v36, %v7383_v38  ;;  %v14100_v9 = vadd.f32 %v5311_v63, %v15729_v60  ;;  %v5314_v20 = vpop.f32.mrf.mxu1 }
 0x36a   : > { %v5943_v31 = vadd.f32 %v5788_v53, %v13939_v14  ;;  %v14104_v32 = vadd.f32 %v14028_v37, %v6540_v34  ;;  %v14107_v56 = vadd.f32 %v6933_v13, %v14028_v37  ;;  %v8329_v44 = vshrl.u32 %v14088_v51, 4  ;;  %v15730_v34 = vld [vmem:[#allocation7_spill] sm:$0xff] }
 0x36b   : > { %9328 = vst.msk [vmem:[%s12159_s26 + $0x5c] sm:$0xf] %vm9310_vm4, %v9955_v22  ;;  %v7439_v24 = vmul.f32 %v13928_v36, %v7384_v23  ;;  %v7774_v16 = vadd.f32 %v14042_v49, %v7438_v21  ;;  %v14115_v52 = vadd.s32 144, %v15654_v45  ;;  %v8340_v14 = vshrl.u32 %v14093_v3, 4 }
 0x36c   : > { %6004 = vst.msk [vmem:[#allocation2 + $0xe0] sm:$0xff] %vm5975_vm5, %v5943_v31  ;;  %v14120_v37 = vadd.f32 %v7146_v30, %v14023_v61  ;;  %v14123_v43 = vadd.f32 %v10736_v40, %v15730_v34  ;;  %v5946_v0 = vadd.f32 %v10794_v15, %v13969_v11  ;;  %v8330_v12 = vmul.u32 24, %v8329_v44 }
 0x36d   : > { %v7775_v49 = vadd.f32 %v7602_v27, %v7439_v24  ;;  %v7829_v59 = vadd.f32 %v13964_v42, %v7774_v16  ;;  %v14128_v4 = vadd.s32 168, %v15654_v45  ;;  %v8341_v5 = vmul.u32 24, %v8340_v14 }
 0x36e   : > { %v14131_v28 = vmul.u32.u64.low 2863311531, %v14115_v52  ;;  %v14132_v53 = vmul.u32.u64.high 2863311531, %v14115_v52, %v14131_v28  ;;  %6007 = vst.msk [vmem:[#allocation2 + $0xf8] sm:$0xff] %vm5975_vm5, %v5946_v0  ;;  %v5944_v54 = vadd.f32 %v5791_v35, %v13989_v17  ;;  %v8331_v7 = vsub.s32 %v8125_v29, %v8330_v12 }
 0x36f   : > { %v7830_v13 = vadd.f32 %v13964_v42, %v7775_v49  ;;  %vm7877_vm12 = vcmp.ge.f32.partialorder %v7829_v59, 0.0  ;;  %v7925_v11 = vmul.f32 0.2, %v7829_v59  ;;  %v6066_v2 = vld [vmem:[#allocation2 + $0xf0] sm:$0xff]  ;;  %v8342_v41 = vsub.s32 %v8126_v8, %v8341_v5 }
 0x370   : > { %v14137_v57 = vmul.f32 0.0625, %v6066_v2  ;;  %v14139_v63 = vmul.f32 0.1875, %v6066_v2  ;;  %v14142_v58 = vadd.f32 %v5314_v20, %v15731_v50  ;;  %6005 = vst.msk [vmem:[#allocation2 + $0xe8] sm:$0xff] %vm5975_vm5, %v5944_v54  ;;  %vm8701_vm6 = vcmp.ne.s32.totalorder %v8331_v7, 0 }
 0x371   : > { %vm7878_vm1 = vcmp.ge.f32.partialorder %v7830_v13, 0.0  ;;  %v7926_v25 = vmul.f32 0.2, %v7830_v13  ;;  %v7973_v48 = vsel %vm7877_vm12, %v7829_v59, %v7925_v11  ;;  %vm8702_vm15 = vcmp.ne.s32.totalorder %v8342_v41, 0 }
 0x372   : > { %v8021_v17 = vmul.f32 1.4142135, %v7973_v48  ;;  %vm8749_vm8 = vcmp.lt.s32.totalorder %v8331_v7, 0  ;;  %vm8750_vm2 = vcmp.lt.s32.totalorder %v8342_v41, 0  ;;  %v8845_v39 = vadd.s32 24, %v8331_v7 }
 0x373   : > { %v7974_v29 = vsel %vm7878_vm1, %v7830_v13, %v7926_v25  ;;  %vm14145_vm9 = vmand %vm8749_vm8, %vm8701_vm6  ;;  %v8846_v38 = vadd.s32 24, %v8342_v41  ;;  %v6064_v62 = vld [vmem:[#allocation2 + $0xe0] sm:$0xff]  ;;  %v14150_v15 = vadd.s32 152, %v15654_v45  ;;  %v8362_v23 = vshrl.u32 %v14132_v53, 4 }
 0x374   : > { %v6159_v51 = vld [vmem:[#allocation2 + $0xd9] sm:$0xff]  ;;  %v8022_v6 = vmul.f32 1.4142135, %v7974_v29  ;;  %v8076_v30 = vmul.f32 %v13992_v47, %v8021_v17  ;;  %vm8798_vm7 = vmand %vm8750_vm2, %vm8702_vm15  ;;  %v8893_v21 = vsel %vm14145_vm9, %v8845_v39, %v8331_v7  ;;  %v14156_v60 = vmul.f32 0.0625, %v6064_v62 }
 0x375   : > { %v6207_v26 = vmul.f32 0.1875, %v6159_v51  ;;  %v6303_v3 = vld [vmem:[#allocation2 + $0xda] sm:$0xff]  ;;  %v8894_v40 = vsel %vm8798_vm7, %v8846_v38, %v8342_v41  ;;  %vm8941_vm14 = vcmp.lt.s32.totalorder %v8893_v21, 16  ;;  %v6592_v27 = vmul.f32 0.1875, %v6064_v62  ;;  %v6162_v12 = vld [vmem:[#allocation2 + $0xf1] sm:$0xff] }
 0x376   : > { %v6447_v22 = vld [vmem:[#allocation2 + $0xdb] sm:$0xff]  ;;  %v6351_v31 = vmul.f32 0.1875, %v6303_v3  ;;  %v8077_v24 = vmul.f32 %v13992_v47, %v8022_v6  ;;  %vm8942_vm0 = vcmp.lt.s32.totalorder %v8894_v40, 16  ;;  %v9085_v44 = vsel %vm8941_vm14, %v8076_v30, 0.0  ;;  %v6450_v41 = vld [vmem:[#allocation2 + $0xf3] sm:$0xff]  ;;  %v7612_v40 = vpop.permute.xlu0 %7611 }
 0x377   : > { %v6255_v16 = vadd.f32 %v6207_v26, %v14023_v61  ;;  %v6495_v35 = vmul.f32 0.0625, %v6447_v22  ;;  %v6690_v14 = vmul.f32 0.5625, %v6159_v51  ;;  %v9953_v0 = vpack.c.bf16 %v9085_v44, %v9085_v44  ;;  %v6067_v54 = vld [vmem:[#allocation2 + $0xf8] sm:$0xff] }
 0x378   : > { %v9086_v34 = vsel %vm8942_vm0, %v8077_v24, 0.0  ;;  %v6789_v59 = vmul.f32 0.5625, %v6303_v3  ;;  %v14161_v5 = vadd.f32 %v6592_v27, %v14069_v46  ;;  %v6888_v53 = vmul.f32 0.1875, %v6447_v22  ;;  %v6306_v61 = vld [vmem:[#allocation2 + $0xf2] sm:$0xff] }
 0x379   : > { %v6399_v49 = vadd.f32 %v6351_v31, %v6255_v16  ;;  %v9954_v20 = vpack.c.bf16 %v9086_v34, %v9086_v34  ;;  %v6738_v28 = vadd.f32 %v6690_v14, %v14104_v32  ;;  %9326 = vst.msk [vmem:[%s12159_s26 + $0x54] sm:$0xf] %vm9310_vm4, %v9953_v0  ;;  %v14167_v11 = vadd.f32 %v14078_v33, %v6592_v27  ;;  %v6161_v27 = vld [vmem:[#allocation2 + $0xe9] sm:$0xff] }
 0x37a   : > { %v7041_v7 = vadd.f32 %v14107_v56, %v6690_v14  ;;  %v7266_v2 = vadd.f32 %v14120_v37, %v6207_v26  ;;  %v14175_v32 = vadd.f32 %v14096_v55, %v14156_v60  ;;  %v8363_v50 = vmul.u32 24, %v8362_v23  ;;  %v6065_v26 = vld [vmem:[#allocation2 + $0xe8] sm:$0xff] }
 0x37b   : > { %v6543_v13 = vadd.f32 %v6495_v35, %v6399_v49  ;;  %9327 = vst.msk [vmem:[%s12159_s26 + $0x58] sm:$0xf] %vm9310_vm4, %v9954_v20  ;;  %v6837_v46 = vadd.f32 %v6789_v59, %v6738_v28  ;;  %v6210_v25 = vmul.f32 0.1875, %v6162_v12  ;;  %v14177_v29 = vmul.f32 0.0625, %v6067_v54 }
 0x37c   : > { %v7095_v48 = vadd.f32 %v7041_v7, %v6789_v59  ;;  %v7326_v17 = vadd.f32 %v7266_v2, %v6351_v31  ;;  %v6354_v33 = vmul.f32 0.1875, %v6306_v61  ;;  %v8364_v56 = vsub.s32 %v14115_v52, %v8363_v50  ;;  %v6304_v59 = vld [vmem:[#allocation2 + $0xe2] sm:$0xff] }
 0x37d   : > { %v6936_v8 = vadd.f32 %v6888_v53, %v6837_v46  ;;  %v6258_v37 = vadd.f32 %v6210_v25, %v14137_v57  ;;  %v6498_v39 = vmul.f32 0.0625, %v6450_v41  ;;  %v6642_v51 = vadd.f32 %v14139_v63, %v6543_v13  ;;  %v6448_v2 = vld [vmem:[#allocation2 + $0xe3] sm:$0xff] }
 0x37e   : > { %v7149_v38 = vadd.f32 %v7095_v48, %v6888_v53  ;;  %v7386_v62 = vadd.f32 %v7326_v17, %v6495_v35  ;;  %v6693_v6 = vmul.f32 0.5625, %v6162_v12  ;;  %vm8704_vm10 = vcmp.ne.s32.totalorder %v8364_v56, 0  ;;  %v6160_v35 = vld [vmem:[#allocation2 + $0xe1] sm:$0xff]  ;;  %v6305_v12 = vld [vmem:[#allocation2 + $0xea] sm:$0xff] }
 0x37f   : > { %vm8752_vm11 = vcmp.lt.s32.totalorder %v8364_v56, 0  ;;  %v8848_v55 = vadd.s32 24, %v8364_v56  ;;  %v6402_v30 = vadd.f32 %v6354_v33, %v6258_v37  ;;  %v14187_v52 = vmul.f32 0.1875, %v6067_v54  ;;  %v6449_v48 = vld [vmem:[#allocation2 + $0xeb] sm:$0xff] }
 0x380   : > { %v7441_v3 = vmul.f32 %v13928_v36, %v7386_v62  ;;  %vm14183_vm3 = vmand %vm8752_vm11, %vm8704_vm10  ;;  %v6741_v23 = vadd.f32 %v6693_v6, %v6642_v51  ;;  %v6792_v21 = vmul.f32 0.5625, %v6306_v61  ;;  %v6990_v16 = vadd.f32 %v6936_v8, %v14139_v63  ;;  %v14201_v61 = vpop.permute.xlu1 %7616 }
 0x381   : > { %v8896_v31 = vsel %vm14183_vm3, %v8848_v55, %v8364_v56  ;;  %v14191_v24 = vadd.f32 %v6498_v39, %v6402_v30  ;;  %v7209_v44 = vadd.f32 %v7149_v38, %v14137_v57  ;;  %v6891_v0 = vmul.f32 0.1875, %v6450_v41  ;;  %v10739_v57 = vpop.f32.mrf.mxu1 }
 0x382   : > { %v7777_v14 = vadd.f32 %v7612_v40, %v7441_v3  ;;  %v6840_v34 = vadd.f32 %v6792_v21, %v6741_v23  ;;  %v14195_v49 = vmul.f32 0.0625, %v6065_v26  ;;  %v7044_v20 = vadd.f32 %v6990_v16, %v6693_v6 }
 0x383   : > { %v7269_v28 = vadd.f32 %v7209_v44, %v6210_v25  ;;  %v14198_v53 = vmul.u32.u64.low 2863311531, %v14128_v4  ;;  %v14199_v54 = vmul.u32.u64.high 2863311531, %v14128_v4, %v14198_v53  ;;  %vm14204_vm13 = vcmp.lt.s32.totalorder %v8896_v31, 16 }
 0x384   : > { %v7832_v63 = vadd.f32 %v13964_v42, %v7777_v14  ;;  %v14208_v13 = vmul.f32 0.1875, %v6160_v35  ;;  %v14210_v7 = vmul.f32 0.1875, %v6161_v27  ;;  %v7098_v41 = vadd.f32 %v7044_v20, %v6792_v21  ;;  %v7627_v21 = vpop.permute.xlu1 %7626 }
 0x385   : > { %v7329_v46 = vadd.f32 %v7269_v28, %v6354_v33  ;;  %v14212_v50 = vmul.f32 0.1875, %v6304_v59  ;;  %v14214_v25 = vmul.f32 0.1875, %v6305_v12  ;;  %v14220_v37 = vadd.f32 %v6891_v0, %v6840_v34 }
 0x386   : > { %vm7880_vm12 = vcmp.ge.f32.partialorder %v7832_v63, 0.0  ;;  %v7928_v17 = vmul.f32 0.2, %v7832_v63  ;;  %v6256_v8 = vadd.f32 %v14208_v13, %v14156_v60  ;;  %v6257_v56 = vadd.f32 %v14210_v7, %v14195_v49 }
 0x387   : > { %v7389_v38 = vadd.f32 %v7329_v46, %v6498_v39  ;;  %v8395_v62 = vshrl.u32 %v14199_v54, 4  ;;  %v14223_v51 = vmul.f32 0.0625, %v6448_v2  ;;  %v14227_v30 = vmul.f32 0.0625, %v6449_v48  ;;  %v10797_v46 = vpop.f32.mrf.mxu0 }
 0x388   : > { %v7976_v33 = vsel %vm7880_vm12, %v7832_v63, %v7928_v17  ;;  %v6400_v6 = vadd.f32 %v14212_v50, %v6256_v8  ;;  %v6401_v55 = vadd.f32 %v14214_v25, %v6257_v56  ;;  %v6593_v23 = vmul.f32 0.1875, %v6065_v26 }
 0x389   : > { %v8024_v3 = vmul.f32 1.4142135, %v7976_v33  ;;  %v7444_v60 = vmul.f32 %v13928_v36, %v7389_v38  ;;  %v8396_v22 = vmul.u32 24, %v8395_v62  ;;  %v14230_v40 = vadd.f32 %v7098_v41, %v6891_v0 }
 0x38a   : > { %v14233_v39 = vadd.f32 %v14223_v51, %v6400_v6  ;;  %v14236_v31 = vadd.f32 %v14227_v30, %v6401_v55  ;;  %v6691_v16 = vmul.f32 0.5625, %v6160_v35  ;;  %v6641_v20 = vadd.f32 %v6593_v23, %v14035_v19 }
 0x38b   : > { %v8079_v44 = vmul.f32 %v13992_v47, %v8024_v3  ;;  %v7780_v14 = vadd.f32 %v7627_v21, %v7444_v60  ;;  %v8397_v34 = vsub.s32 %v14128_v4, %v8396_v22  ;;  %v6692_v28 = vmul.f32 0.5625, %v6161_v27  ;;  %v5804_v22 = vpop.f32.mrf.mxu0 }
 0x38c   : > { %v6739_v26 = vadd.f32 %v6691_v16, %v14161_v5  ;;  %v6790_v53 = vmul.f32 0.5625, %v6304_v59  ;;  %v6791_v0 = vmul.f32 0.5625, %v6305_v12  ;;  %v6889_v59 = vmul.f32 0.1875, %v6448_v2  ;;  %v15744_v2 = vld [vmem:[#allocation10_spill] sm:$0xff] }
 0x38d   : > { %v9088_v54 = vsel %vm14204_vm13, %v8079_v44, 0.0  ;;  %v7835_v63 = vadd.f32 %v13964_v42, %v7780_v14  ;;  %vm8707_vm1 = vcmp.ne.s32.totalorder %v8397_v34, 0  ;;  %vm8755_vm6 = vcmp.lt.s32.totalorder %v8397_v34, 0  ;;  %v15742_v44 = vld [vmem:[#allocation11_spill] sm:$0xff] }
 0x38e   : > { %v9956_v35 = vpack.c.bf16 %v9088_v54, %v9088_v54  ;;  %vm14245_vm15 = vmand %vm8755_vm6, %vm8707_vm1  ;;  %v8851_v4 = vadd.s32 24, %v8397_v34  ;;  %v6740_v19 = vadd.f32 %v6692_v28, %v6641_v20  ;;  %v6838_v27 = vadd.f32 %v6790_v53, %v6739_v26 }
 0x38f   : > { %vm7883_vm8 = vcmp.ge.f32.partialorder %v7835_v63, 0.0  ;;  %v7931_v5 = vmul.f32 0.2, %v7835_v63  ;;  %v6989_v12 = vadd.f32 %v14051_v18, %v6593_v23  ;;  %v6890_v56 = vmul.f32 0.1875, %v6449_v48 }
 0x390   : > { %9329 = vst.msk [vmem:[%s12159_s26 + $0x60] sm:$0xf] %vm9310_vm4, %v9956_v35  ;;  %v8899_v17 = vsel %vm14245_vm15, %v8851_v4, %v8397_v34  ;;  %v6839_v8 = vadd.f32 %v6791_v0, %v6740_v19  ;;  %v7042_v38 = vadd.f32 %v14167_v11, %v6691_v16  ;;  %v6937_v33 = vadd.f32 %v6889_v59, %v6838_v27  ;;  %v5327_v16 = vpop.f32.mrf.mxu1  ;;  %v15743_v4 = vld [vmem:[#allocation8_spill] sm:$0xff] }
 0x391   : > { %v7979_v62 = vsel %vm7883_vm8, %v7835_v63, %v7931_v5  ;;  %v7043_v6 = vadd.f32 %v6989_v12, %v6692_v28  ;;  %v7208_v55 = vadd.f32 %v14056_v1, %v14195_v49  ;;  %vm14257_vm2 = vcmp.lt.s32.totalorder %v8899_v17, 16 }
 0x392   : > { %v8027_v3 = vmul.f32 1.4142135, %v7979_v62  ;;  %v7096_v18 = vadd.f32 %v7042_v38, %v6790_v53  ;;  %v7267_v60 = vadd.f32 %v14175_v32, %v14208_v13  ;;  %v14263_v23 = vadd.f32 %v6890_v56, %v6839_v8  ;;  %v10740_v35 = vpop.f32.mrf.mxu1 }
 0x393   : > { %v7097_v48 = vadd.f32 %v7043_v6, %v6791_v0  ;;  %v7268_v11 = vadd.f32 %v7208_v55, %v14210_v7  ;;  %v8130_v21 = vadd.s32 160, %v15654_v45  ;;  %v14270_v14 = vadd.f32 %v10739_v57, %v15742_v44  ;;  %v10798_v0 = vpop.f32.mrf.mxu0 }
 0x394   : > { %v8082_v1 = vmul.f32 %v13992_v47, %v8027_v3  ;;  %v7327_v49 = vadd.f32 %v7267_v60, %v14212_v50  ;;  %v5949_v34 = vadd.f32 %v10797_v46, %v14084_v10  ;;  %v7150_v20 = vadd.f32 %v7096_v18, %v6889_v59  ;;  %v7622_v59 = vpop.permute.xlu0 %7621  ;;  %v5330_v62 = vpop.f32.mrf.mxu1 }
 0x395   : > { %v7328_v32 = vadd.f32 %v7268_v11, %v14214_v25  ;;  %v14275_v13 = vmul.u32.u64.low 2863311531, %v14150_v15  ;;  %v14276_v28 = vmul.u32.u64.high 2863311531, %v14150_v15, %v14275_v13  ;;  %v14285_v54 = vadd.f32 %v7097_v48, %v6890_v56 }
 0x396   : > { %v9091_v7 = vsel %vm14257_vm2, %v8082_v1, 0.0  ;;  %v7387_v26 = vadd.f32 %v7327_v49, %v14223_v51  ;;  %v14281_v53 = vmul.u32.u64.low 2863311531, %v8130_v21  ;;  %v14282_v50 = vmul.u32.u64.high 2863311531, %v8130_v21, %v14281_v53  ;;  %6010 = vst.msk [vmem:[#allocation2 + $0x110] sm:$0xff] %vm5975_vm5, %v5949_v34 }
 0x397   : > { %v9959_v10 = vpack.c.bf16 %v9091_v7, %v9091_v7  ;;  %v7388_v25 = vadd.f32 %v7328_v32, %v14227_v30  ;;  %v5947_v63 = vadd.f32 %v5804_v22, %v14100_v9  ;;  %v14291_v19 = vadd.f32 %v5327_v16, %v15743_v4  ;;  %v15745_v16 = vld [vmem:[#allocation12_spill] sm:$0xff] }
 0x398   : > { %v7442_v41 = vmul.f32 %v13928_v36, %v7387_v26  ;;  %v14295_v51 = vadd.f32 %v14187_v52, %v14233_v39  ;;  %v14298_v27 = vadd.f32 %v6937_v33, %v14187_v52  ;;  %v8373_v30 = vshrl.u32 %v14276_v28, 4 }
 0x399   : > { %9332 = vst.msk [vmem:[%s12159_s26 + $0x6c] sm:$0xf] %vm9310_vm4, %v9959_v10  ;;  %v7443_v46 = vmul.f32 %v13928_v36, %v7388_v25  ;;  %v14306_v9 = vadd.f32 %v7150_v20, %v14177_v29  ;;  %v14309_v5 = vadd.s32 176, %v15654_v45  ;;  %v8384_v52 = vshrl.u32 %v14282_v50, 4  ;;  %v5807_v36 = vpop.f32.mrf.mxu0 }
 0x39a   : > { %6008 = vst.msk [vmem:[#allocation2 + $0x100] sm:$0xff] %vm5975_vm5, %v5947_v63  ;;  %v7778_v39 = vadd.f32 %v14201_v61, %v7442_v41  ;;  %v5950_v12 = vadd.f32 %v10798_v0, %v14123_v43  ;;  %v14315_v57 = vadd.s32 200, %v15654_v45  ;;  %v8374_v8 = vmul.u32 24, %v8373_v30 }
 0x39b   : > { %v7779_v17 = vadd.f32 %v7622_v59, %v7443_v46  ;;  %v14318_v56 = vmul.u32.u64.low 2863311531, %v14309_v5  ;;  %v14319_v38 = vmul.u32.u64.high 2863311531, %v14309_v5, %v14318_v56  ;;  %v8385_v6 = vmul.u32 24, %v8384_v52 }
 0x39c   : > { %v7833_v33 = vadd.f32 %v13964_v42, %v7778_v39  ;;  %6011 = vst.msk [vmem:[#allocation2 + $0x118] sm:$0xff] %vm5975_vm5, %v5950_v12  ;;  %v14324_v61 = vmul.u32.u64.low 2863311531, %v14315_v57  ;;  %v14325_v55 = vmul.u32.u64.high 2863311531, %v14315_v57, %v14324_v61  ;;  %v8375_v3 = vsub.s32 %v14150_v15, %v8374_v8 }
 0x39d   : > { %v7834_v43 = vadd.f32 %v13964_v42, %v7779_v17  ;;  %v14331_v18 = vadd.f32 %v10740_v35, %v15744_v2  ;;  %v5948_v60 = vadd.f32 %v5807_v36, %v14142_v58  ;;  %v8386_v48 = vsub.s32 %v8130_v21, %v8385_v6  ;;  %v6070_v11 = vld [vmem:[#allocation2 + $0x110] sm:$0xff] }
 0x39e   : > { %vm7881_vm9 = vcmp.ge.f32.partialorder %v7833_v33, 0.0  ;;  %v7929_v22 = vmul.f32 0.2, %v7833_v33  ;;  %v14335_v1 = vadd.f32 %v5330_v62, %v15745_v16  ;;  %vm8705_vm14 = vcmp.ne.s32.totalorder %v8375_v3, 0 }
 0x39f   : > { %vm7882_vm7 = vcmp.ge.f32.partialorder %v7834_v43, 0.0  ;;  %v7930_v49 = vmul.f32 0.2, %v7834_v43  ;;  %vm8753_vm0 = vcmp.lt.s32.totalorder %v8375_v3, 0  ;;  %6009 = vst.msk [vmem:[#allocation2 + $0x108] sm:$0xff] %vm5975_vm5, %v5948_v60  ;;  %vm8706_vm10 = vcmp.ne.s32.totalorder %v8386_v48, 0 }
 0x3a0   : > { %v7977_v42 = vsel %vm7881_vm9, %v7833_v33, %v7929_v22  ;;  %vm8754_vm11 = vcmp.lt.s32.totalorder %v8386_v48, 0  ;;  %vm14338_vm3 = vmand %vm8753_vm0, %vm8705_vm14  ;;  %v8849_v58 = vadd.s32 24, %v8375_v3  ;;  %v8850_v32 = vadd.s32 24, %v8386_v48 }
 0x3a1   : > { %v6068_v44 = vld [vmem:[#allocation2 + $0x100] sm:$0xff]  ;;  %v7978_v34 = vsel %vm7882_vm7, %v7834_v43, %v7930_v49  ;;  %v8025_v20 = vmul.f32 1.4142135, %v7977_v42  ;;  %vm8802_vm13 = vmand %vm8754_vm11, %vm8706_vm10  ;;  %v14342_v13 = vmul.f32 0.0625, %v6070_v11  ;;  %v6598_v53 = vmul.f32 0.1875, %v6070_v11 }
 0x3a2   : > { %v6163_v21 = vld [vmem:[#allocation2 + $0xf9] sm:$0xff]  ;;  %v8026_v7 = vmul.f32 1.4142135, %v7978_v34  ;;  %v8897_v26 = vsel %vm14338_vm3, %v8849_v58, %v8375_v3  ;;  %v8898_v25 = vsel %vm8802_vm13, %v8850_v32, %v8386_v48  ;;  %v14347_v63 = vmul.f32 0.0625, %v6068_v44 }
 0x3a3   : > { %v6307_v28 = vld [vmem:[#allocation2 + $0xfa] sm:$0xff]  ;;  %v6211_v50 = vmul.f32 0.1875, %v6163_v21  ;;  %v8080_v10 = vmul.f32 %v13992_v47, %v8025_v20  ;;  %vm8945_vm12 = vcmp.lt.s32.totalorder %v8897_v26, 16  ;;  %vm8946_vm1 = vcmp.lt.s32.totalorder %v8898_v25, 16  ;;  %v6166_v8 = vld [vmem:[#allocation2 + $0x111] sm:$0xff] }
 0x3a4   : > { %v6451_v0 = vld [vmem:[#allocation2 + $0xfb] sm:$0xff]  ;;  %v8081_v35 = vmul.f32 %v13992_v47, %v8026_v7  ;;  %v6355_v4 = vmul.f32 0.1875, %v6307_v28  ;;  %v6596_v59 = vmul.f32 0.1875, %v6068_v44  ;;  %v6694_v39 = vmul.f32 0.5625, %v6163_v21  ;;  %v6310_v6 = vld [vmem:[#allocation2 + $0x112] sm:$0xff] }
 0x3a5   : > { %v6259_v41 = vadd.f32 %v6211_v50, %v14177_v29  ;;  %v9089_v46 = vsel %vm8945_vm12, %v8080_v10, 0.0  ;;  %v6499_v30 = vmul.f32 0.0625, %v6451_v0  ;;  %v6793_v17 = vmul.f32 0.5625, %v6307_v28  ;;  %v6071_v29 = vld [vmem:[#allocation2 + $0x118] sm:$0xff]  ;;  %v14374_v28 = vld [vmem:[%s13549_s23] ss:$0 sm:$0xff] }
 0x3a6   : > { %v9090_v52 = vsel %vm8946_vm1, %v8081_v35, 0.0  ;;  %v9957_v12 = vpack.c.bf16 %v9089_v46, %v9089_v46  ;;  %v14352_v62 = vadd.f32 %v6596_v59, %v14236_v31  ;;  %v6742_v47 = vadd.f32 %v6694_v39, %v14295_v51  ;;  %v6454_v60 = vld [vmem:[#allocation2 + $0x113] sm:$0xff]  ;;  %v6069_v10 = vld [vmem:[#allocation2 + $0x108] sm:$0xff]  ;;  %v7632_v35 = vpop.permute.xlu0 %7631 }
 0x3a7   : > { %v6403_v36 = vadd.f32 %v6355_v4, %v6259_v41  ;;  %v9958_v56 = vpack.c.bf16 %v9090_v52, %v9090_v52  ;;  %v6892_v33 = vmul.f32 0.1875, %v6451_v0  ;;  %v14358_v43 = vadd.f32 %v14263_v23, %v6596_v59  ;;  %v6164_v25 = vld [vmem:[#allocation2 + $0x101] sm:$0xff] }
 0x3a8   : > { %9330 = vst.msk [vmem:[%s12159_s26 + $0x64] sm:$0xf] %vm9310_vm4, %v9957_v12  ;;  %v7045_v3 = vadd.f32 %v14298_v27, %v6694_v39  ;;  %v7270_v2 = vadd.f32 %v14306_v9, %v6211_v50  ;;  %v6841_v31 = vadd.f32 %v6793_v17, %v6742_v47  ;;  %v14366_v51 = vadd.f32 %v14285_v54, %v14347_v63  ;;  %v6165_v39 = vld [vmem:[#allocation2 + $0x109] sm:$0xff] }
 0x3a9   : > { %v6547_v61 = vadd.f32 %v6499_v30, %v6403_v36  ;;  %9331 = vst.msk [vmem:[%s12159_s26 + $0x68] sm:$0xf] %vm9310_vm4, %v9958_v56  ;;  %v8406_v22 = vshrl.u32 %v14319_v38, 4  ;;  %v6214_v48 = vmul.f32 0.1875, %v6166_v8  ;;  %v14369_v23 = vmul.f32 0.0625, %v6071_v29  ;;  %v6308_v36 = vld [vmem:[#allocation2 + $0x102] sm:$0xff] }
 0x3aa   : > { %v7099_v11 = vadd.f32 %v7045_v3, %v6793_v17  ;;  %v7330_v16 = vadd.f32 %v7270_v2, %v6355_v4  ;;  %v6358_v49 = vmul.f32 0.1875, %v6310_v6  ;;  %v6940_v27 = vadd.f32 %v6892_v33, %v6841_v31  ;;  %v14385_v17 = vpop.permute.xlu1 %7636  ;;  %v6452_v31 = vld [vmem:[#allocation2 + $0x103] sm:$0xff] }
 0x3ab   : > { %v8407_v42 = vmul.u32 24, %v8406_v22  ;;  %v6262_v9 = vadd.f32 %v6214_v48, %v14342_v13  ;;  %v6502_v15 = vmul.f32 0.0625, %v6454_v60  ;;  %v6646_v21 = vadd.f32 %v6598_v53, %v6547_v61  ;;  %v6453_v22 = vld [vmem:[#allocation2 + $0x10b] sm:$0xff] }
 0x3ac   : > { %v7153_v58 = vadd.f32 %v7099_v11, %v6892_v33  ;;  %v7390_v44 = vadd.f32 %v7330_v16, %v6499_v30  ;;  %v6697_v34 = vmul.f32 0.5625, %v6166_v8  ;;  %v6796_v38 = vmul.f32 0.5625, %v6310_v6  ;;  %v14390_v8 = vld [vmem:[%s15339_s5] ss:$0 sm:$0xff]  ;;  %v6309_v6 = vld [vmem:[#allocation2 + $0x10a] sm:$0xff] }
 0x3ad   : > { %v8408_v54 = vsub.s32 %v14309_v5, %v8407_v42  ;;  %v6406_v20 = vadd.f32 %v6358_v49, %v6262_v9  ;;  %v6895_v32 = vmul.f32 0.1875, %v6454_v60  ;;  %v6994_v50 = vadd.f32 %v6940_v27, %v6598_v53 }
 0x3ae   : > { %v7445_v7 = vmul.f32 %v14374_v28, %v7390_v44  ;;  %v6745_v26 = vadd.f32 %v6697_v34, %v6646_v21  ;;  %v7213_v0 = vadd.f32 %v7153_v58, %v14342_v13  ;;  %v8439_v12 = vshrl.u32 %v14325_v55, 4 }
 0x3af   : > { %vm8708_vm6 = vcmp.ne.s32.totalorder %v8408_v54, 0  ;;  %vm8756_vm15 = vcmp.lt.s32.totalorder %v8408_v54, 0  ;;  %v8852_v41 = vadd.s32 24, %v8408_v54  ;;  %v14378_v4 = vadd.f32 %v6502_v15, %v6406_v20 }
 0x3b0   : > { %v7781_v5 = vadd.f32 %v7632_v35, %v7445_v7  ;;  %vm8804_vm8 = vmand %vm8756_vm15, %vm8708_vm6  ;;  %v6844_v46 = vadd.f32 %v6796_v38, %v6745_v26  ;;  %v7048_v30 = vadd.f32 %v6994_v50, %v6697_v34  ;;  %v7273_v59 = vadd.f32 %v7213_v0, %v6214_v48  ;;  %v14418_v26 = vld [vmem:[%s13590_s29] ss:$0 sm:$0xff] }
 0x3b1   : > { %v8900_v52 = vsel %vm8804_vm8, %v8852_v41, %v8408_v54  ;;  %v14381_v53 = vmul.f32 0.0625, %v6069_v10  ;;  %v14383_v13 = vmul.f32 0.1875, %v6164_v25  ;;  %v14397_v33 = vmul.f32 0.1875, %v6071_v29  ;;  %v7647_v54 = vpop.permute.xlu1 %7646 }
 0x3b2   : > { %v7836_v56 = vadd.f32 %v14390_v8, %v7781_v5  ;;  %vm14393_vm2 = vcmp.lt.s32.totalorder %v8900_v52, 16  ;;  %v14399_v55 = vadd.f32 %v6895_v32, %v6844_v46  ;;  %v7333_v61 = vadd.f32 %v7273_v59, %v6358_v49 }
 0x3b3   : > { %v8440_v3 = vmul.u32 24, %v8439_v12  ;;  %v14401_v2 = vmul.f32 0.1875, %v6165_v39  ;;  %v6260_v60 = vadd.f32 %v14383_v13, %v14347_v63  ;;  %v7102_v11 = vadd.f32 %v7048_v30, %v6796_v38 }
 0x3b4   : > { %vm7884_vm9 = vcmp.ge.f32.partialorder %v7836_v56, 0.0  ;;  %v7932_v48 = vmul.f32 0.2, %v7836_v56  ;;  %v6356_v16 = vmul.f32 0.1875, %v6308_v36  ;;  %v7393_v27 = vadd.f32 %v7333_v61, %v6502_v15 }
 0x3b5   : > { %v8441_v29 = vsub.s32 %v14315_v57, %v8440_v3  ;;  %v6261_v42 = vadd.f32 %v14401_v2, %v14381_v53  ;;  %v6357_v49 = vmul.f32 0.1875, %v6309_v6  ;;  %v6500_v44 = vmul.f32 0.0625, %v6452_v31 }
 0x3b6   : > { %v7980_v9 = vsel %vm7884_vm9, %v7836_v56, %v7932_v48  ;;  %v6404_v58 = vadd.f32 %v6356_v16, %v6260_v60  ;;  %v14408_v21 = vmul.f32 0.0625, %v6453_v22  ;;  %v7448_v34 = vmul.f32 %v14374_v28, %v7393_v27  ;;  %v10801_v56 = vpop.f32.mrf.mxu0 }
 0x3b7   : > { %v8028_v63 = vmul.f32 1.4142135, %v7980_v9  ;;  %vm8711_vm7 = vcmp.ne.s32.totalorder %v8441_v29, 0  ;;  %vm8759_vm14 = vcmp.lt.s32.totalorder %v8441_v29, 0  ;;  %v8855_v57 = vadd.s32 24, %v8441_v29 }
 0x3b8   : > { %vm14411_vm0 = vmand %vm8759_vm14, %vm8711_vm7  ;;  %v6405_v20 = vadd.f32 %v6357_v49, %v6261_v42  ;;  %v14415_v38 = vadd.f32 %v6500_v44, %v6404_v58  ;;  %v6597_v7 = vmul.f32 0.1875, %v6069_v10  ;;  %v14421_v0 = vadd.f32 %v7102_v11, %v6895_v32  ;;  %v10743_v11 = vpop.f32.mrf.mxu1  ;;  %v5820_v58 = vpop.f32.mrf.mxu0 }
 0x3b9   : > { %v8083_v50 = vmul.f32 %v14418_v26, %v8028_v63  ;;  %v7784_v35 = vadd.f32 %v7647_v54, %v7448_v34  ;;  %v6695_v41 = vmul.f32 0.5625, %v6164_v25  ;;  %v8903_v5 = vsel %vm14411_vm0, %v8855_v57, %v8441_v29 }
 0x3ba   : > { %v14426_v46 = vadd.f32 %v14408_v21, %v6405_v20  ;;  %v6645_v30 = vadd.f32 %v6597_v7, %v14191_v24  ;;  %v6696_v59 = vmul.f32 0.5625, %v6165_v39  ;;  %v6794_v12 = vmul.f32 0.5625, %v6308_v36  ;;  %v15754_v20 = vld [vmem:[#allocation13_spill] sm:$0xff] }
 0x3bb   : > { %v9092_v10 = vsel %vm14393_vm2, %v8083_v50, 0.0  ;;  %v7839_v52 = vadd.f32 %v14390_v8, %v7784_v35  ;;  %v6743_v32 = vadd.f32 %v6695_v41, %v14352_v62  ;;  %vm14433_vm10 = vcmp.lt.s32.totalorder %v8903_v5, 16  ;;  %v10802_v5 = vpop.f32.mrf.mxu0 }
 0x3bc   : > { %v9960_v25 = vpack.c.bf16 %v9092_v10, %v9092_v10  ;;  %v6744_v3 = vadd.f32 %v6696_v59, %v6645_v30  ;;  %v6795_v60 = vmul.f32 0.5625, %v6309_v6  ;;  %v6893_v39 = vmul.f32 0.1875, %v6452_v31 }
 0x3bd   : > { %vm7887_vm11 = vcmp.ge.f32.partialorder %v7839_v52, 0.0  ;;  %v7935_v24 = vmul.f32 0.2, %v7839_v52  ;;  %v6842_v48 = vadd.f32 %v6794_v12, %v6743_v32  ;;  %v6993_v27 = vadd.f32 %v14220_v37, %v6597_v7  ;;  %v15755_v32 = vld [vmem:[#allocation15_spill] sm:$0xff] }
 0x3be   : > { %9333 = vst.msk [vmem:[%s12159_s26 + $0x70] sm:$0xf] %vm9310_vm4, %v9960_v25  ;;  %v6843_v47 = vadd.f32 %v6795_v60, %v6744_v3  ;;  %v7046_v62 = vadd.f32 %v14358_v43, %v6695_v41  ;;  %v7212_v36 = vadd.f32 %v14230_v40, %v14381_v53  ;;  %v6894_v42 = vmul.f32 0.1875, %v6453_v22  ;;  %v5343_v40 = vpop.f32.mrf.mxu1 }
 0x3bf   : > { %v7983_v29 = vsel %vm7887_vm11, %v7839_v52, %v7935_v24  ;;  %v7271_v6 = vadd.f32 %v14366_v51, %v14383_v13  ;;  %v8133_v9 = vadd.s32 184, %v15654_v45  ;;  %v6941_v63 = vadd.f32 %v6893_v39, %v6842_v48  ;;  %v5823_v48 = vpop.f32.mrf.mxu0 }
 0x3c0   : > { %v8031_v31 = vmul.f32 1.4142135, %v7983_v29  ;;  %v7047_v34 = vadd.f32 %v6993_v27, %v6696_v59  ;;  %v7100_v54 = vadd.f32 %v7046_v62, %v6794_v12  ;;  %v14446_v15 = vadd.f32 %v6894_v42, %v6843_v47 }
 0x3c1   : > { %v7272_v37 = vadd.f32 %v7212_v36, %v14401_v2  ;;  %v7331_v43 = vadd.f32 %v7271_v6, %v6356_v16  ;;  %v8134_v57 = vadd.s32 192, %v15654_v45  ;;  %v14452_v51 = vadd.f32 %v10743_v11, %v15754_v20 }
 0x3c2   : > { %v8086_v53 = vmul.f32 %v14418_v26, %v8031_v31  ;;  %v7101_v22 = vadd.f32 %v7047_v34, %v6795_v60  ;;  %v5953_v13 = vadd.f32 %v10801_v56, %v14270_v14  ;;  %v7154_v16 = vadd.f32 %v7100_v54, %v6893_v39 }
 0x3c3   : > { %v7332_v7 = vadd.f32 %v7272_v37, %v6357_v49  ;;  %v7391_v50 = vadd.f32 %v7331_v43, %v6500_v44  ;;  %v14455_v35 = vmul.u32.u64.low 2863311531, %v8133_v9  ;;  %v14456_v41 = vmul.u32.u64.high 2863311531, %v8133_v9, %v14455_v35  ;;  %v10744_v44 = vpop.f32.mrf.mxu1 }
 0x3c4   : > { %v9095_v2 = vsel %vm14433_vm10, %v8086_v53, 0.0  ;;  %v14460_v30 = vmul.u32.u64.low 2863311531, %v8134_v57  ;;  %v14461_v59 = vmul.u32.u64.high 2863311531, %v8134_v57, %v14460_v30  ;;  %6014 = vst.msk [vmem:[#allocation2 + $0x130] sm:$0xff] %vm5975_vm5, %v5953_v13  ;;  %v14464_v52 = vadd.f32 %v7101_v22, %v6894_v42  ;;  %v15757_v53 = vld [vmem:[#allocation14_spill] sm:$0xff] }
 0x3c5   : > { %v9963_v10 = vpack.c.bf16 %v9095_v2, %v9095_v2  ;;  %v7392_v14 = vadd.f32 %v7332_v7, %v14408_v21  ;;  %v7446_v49 = vmul.f32 %v14374_v28, %v7391_v50  ;;  %v14469_v12 = vadd.f32 %v5343_v40, %v15755_v32  ;;  %v5346_v29 = vpop.f32.mrf.mxu1 }
 0x3c6   : > { %v5951_v56 = vadd.f32 %v5820_v58, %v14291_v19  ;;  %v14474_v25 = vadd.f32 %v14397_v33, %v14415_v38  ;;  %v14477_v61 = vadd.f32 %v6941_v63, %v14397_v33  ;;  %v8417_v60 = vshrl.u32 %v14456_v41, 4  ;;  %v7642_v19 = vpop.permute.xlu0 %7641  ;;  %v15756_v38 = vld [vmem:[#allocation17_spill] sm:$0xff] }
 0x3c7   : > { %9336 = vst.msk [vmem:[%s12159_s26 + $0x7c] sm:$0xf] %vm9310_vm4, %v9963_v10  ;;  %v7447_v3 = vmul.f32 %v14374_v28, %v7392_v14  ;;  %v7782_v21 = vadd.f32 %v14385_v17, %v7446_v49  ;;  %v14485_v24 = vadd.s32 208, %v15654_v45  ;;  %v8428_v39 = vshrl.u32 %v14461_v59, 4 }
 0x3c8   : > { %6012 = vst.msk [vmem:[#allocation2 + $0x120] sm:$0xff] %vm5975_vm5, %v5951_v56  ;;  %v14490_v33 = vadd.f32 %v7154_v16, %v14369_v23  ;;  %v14493_v11 = vadd.f32 %v10744_v44, %v15756_v38  ;;  %v5954_v47 = vadd.f32 %v10802_v5, %v14331_v18  ;;  %v8418_v62 = vmul.u32 24, %v8417_v60 }
 0x3c9   : > { %v7783_v17 = vadd.f32 %v7642_v19, %v7447_v3  ;;  %v7837_v27 = vadd.f32 %v14390_v8, %v7782_v21  ;;  %v14498_v36 = vadd.s32 232, %v15654_v45  ;;  %v8429_v42 = vmul.u32 24, %v8428_v39 }
 0x3ca   : > { %v14501_v6 = vmul.u32.u64.low 2863311531, %v14485_v24  ;;  %v14502_v58 = vmul.u32.u64.high 2863311531, %v14485_v24, %v14501_v6  ;;  %6015 = vst.msk [vmem:[#allocation2 + $0x138] sm:$0xff] %vm5975_vm5, %v5954_v47  ;;  %v5952_v31 = vadd.f32 %v5823_v48, %v14335_v1  ;;  %v8419_v34 = vsub.s32 %v8133_v9, %v8418_v62 }
 0x3cb   : > { %v7838_v63 = vadd.f32 %v14390_v8, %v7783_v17  ;;  %vm7885_vm3 = vcmp.ge.f32.partialorder %v7837_v27, 0.0  ;;  %v7933_v18 = vmul.f32 0.2, %v7837_v27  ;;  %v6074_v54 = vld [vmem:[#allocation2 + $0x130] sm:$0xff]  ;;  %v8430_v37 = vsub.s32 %v8134_v57, %v8429_v42 }
 0x3cc   : > { %v14507_v43 = vmul.f32 0.0625, %v6074_v54  ;;  %v14509_v40 = vmul.f32 0.1875, %v6074_v54  ;;  %v14512_v22 = vadd.f32 %v5346_v29, %v15757_v53  ;;  %6013 = vst.msk [vmem:[#allocation2 + $0x128] sm:$0xff] %vm5975_vm5, %v5952_v31  ;;  %vm8709_vm12 = vcmp.ne.s32.totalorder %v8419_v34, 0 }
 0x3cd   : > { %vm7886_vm13 = vcmp.ge.f32.partialorder %v7838_v63, 0.0  ;;  %v7934_v20 = vmul.f32 0.2, %v7838_v63  ;;  %v7981_v13 = vsel %vm7885_vm3, %v7837_v27, %v7933_v18  ;;  %vm8710_vm1 = vcmp.ne.s32.totalorder %v8430_v37, 0 }
 0x3ce   : > { %v8029_v1 = vmul.f32 1.4142135, %v7981_v13  ;;  %vm8757_vm6 = vcmp.lt.s32.totalorder %v8419_v34, 0  ;;  %vm8758_vm15 = vcmp.lt.s32.totalorder %v8430_v37, 0  ;;  %v8853_v7 = vadd.s32 24, %v8419_v34 }
 0x3cf   : > { %v7982_v9 = vsel %vm7886_vm13, %v7838_v63, %v7934_v20  ;;  %vm14515_vm8 = vmand %vm8757_vm6, %vm8709_vm12  ;;  %v8854_v50 = vadd.s32 24, %v8430_v37  ;;  %v6072_v35 = vld [vmem:[#allocation2 + $0x120] sm:$0xff]  ;;  %v14520_v5 = vadd.s32 216, %v15654_v45  ;;  %v8450_v14 = vshrl.u32 %v14502_v58, 4 }
 0x3d0   : > { %v6167_v41 = vld [vmem:[#allocation2 + $0x119] sm:$0xff]  ;;  %v8030_v2 = vmul.f32 1.4142135, %v7982_v9  ;;  %v8084_v16 = vmul.f32 %v14418_v26, %v8029_v1  ;;  %vm8806_vm2 = vmand %vm8758_vm15, %vm8710_vm1  ;;  %v8901_v49 = vsel %vm14515_vm8, %v8853_v7, %v8419_v34  ;;  %v14526_v32 = vmul.f32 0.0625, %v6072_v35 }
 0x3d1   : > { %v6215_v30 = vmul.f32 0.1875, %v6167_v41  ;;  %v6311_v59 = vld [vmem:[#allocation2 + $0x11a] sm:$0xff]  ;;  %v8902_v44 = vsel %vm8806_vm2, %v8854_v50, %v8430_v37  ;;  %vm8949_vm9 = vcmp.lt.s32.totalorder %v8901_v49, 16  ;;  %v6600_v19 = vmul.f32 0.1875, %v6072_v35  ;;  %v6170_v62 = vld [vmem:[#allocation2 + $0x131] sm:$0xff] }
 0x3d2   : > { %v6455_v10 = vld [vmem:[#allocation2 + $0x11b] sm:$0xff]  ;;  %v6359_v56 = vmul.f32 0.1875, %v6311_v59  ;;  %v8085_v3 = vmul.f32 %v14418_v26, %v8030_v2  ;;  %vm8950_vm7 = vcmp.lt.s32.totalorder %v8902_v44, 16  ;;  %v9093_v60 = vsel %vm8949_vm9, %v8084_v16, 0.0  ;;  %v6458_v37 = vld [vmem:[#allocation2 + $0x133] sm:$0xff]  ;;  %v7652_v44 = vpop.permute.xlu0 %7651 }
 0x3d3   : > { %v6263_v21 = vadd.f32 %v6215_v30, %v14369_v23  ;;  %v6503_v48 = vmul.f32 0.0625, %v6455_v10  ;;  %v6698_v39 = vmul.f32 0.5625, %v6167_v41  ;;  %v9961_v47 = vpack.c.bf16 %v9093_v60, %v9093_v60  ;;  %v6075_v31 = vld [vmem:[#allocation2 + $0x138] sm:$0xff] }
 0x3d4   : > { %v9094_v38 = vsel %vm8950_vm7, %v8085_v3, 0.0  ;;  %v6797_v27 = vmul.f32 0.5625, %v6311_v59  ;;  %v14531_v42 = vadd.f32 %v6600_v19, %v14426_v46  ;;  %v6896_v58 = vmul.f32 0.1875, %v6455_v10  ;;  %v6314_v23 = vld [vmem:[#allocation2 + $0x132] sm:$0xff] }
 0x3d5   : > { %v6407_v17 = vadd.f32 %v6359_v56, %v6263_v21  ;;  %v9962_v29 = vpack.c.bf16 %v9094_v38, %v9094_v38  ;;  %v6746_v6 = vadd.f32 %v6698_v39, %v14474_v25  ;;  %9334 = vst.msk [vmem:[%s12159_s26 + $0x74] sm:$0xf] %vm9310_vm4, %v9961_v47  ;;  %v14537_v18 = vadd.f32 %v14446_v15, %v6600_v19  ;;  %v6169_v19 = vld [vmem:[#allocation2 + $0x129] sm:$0xff] }
 0x3d6   : > { %v7049_v34 = vadd.f32 %v14477_v61, %v6698_v39  ;;  %v7274_v54 = vadd.f32 %v14490_v33, %v6215_v30  ;;  %v14545_v25 = vadd.f32 %v14464_v52, %v14526_v32  ;;  %v8451_v53 = vmul.u32 24, %v8450_v14  ;;  %v6073_v30 = vld [vmem:[#allocation2 + $0x128] sm:$0xff] }
 0x3d7   : > { %v6551_v63 = vadd.f32 %v6503_v48, %v6407_v17  ;;  %9335 = vst.msk [vmem:[%s12159_s26 + $0x78] sm:$0xf] %vm9310_vm4, %v9962_v29  ;;  %v6845_v46 = vadd.f32 %v6797_v27, %v6746_v6  ;;  %v6218_v20 = vmul.f32 0.1875, %v6170_v62  ;;  %v14547_v9 = vmul.f32 0.0625, %v6075_v31 }
 0x3d8   : > { %v7103_v13 = vadd.f32 %v7049_v34, %v6797_v27  ;;  %v7334_v1 = vadd.f32 %v7274_v54, %v6359_v56  ;;  %v6362_v15 = vmul.f32 0.1875, %v6314_v23  ;;  %v8452_v61 = vsub.s32 %v14485_v24, %v8451_v53  ;;  %v6312_v27 = vld [vmem:[#allocation2 + $0x122] sm:$0xff] }
 0x3d9   : > { %v6944_v57 = vadd.f32 %v6896_v58, %v6845_v46  ;;  %v6266_v33 = vadd.f32 %v6218_v20, %v14507_v43  ;;  %v6506_v7 = vmul.f32 0.0625, %v6458_v37  ;;  %v6650_v41 = vadd.f32 %v14509_v40, %v6551_v63  ;;  %v6456_v54 = vld [vmem:[#allocation2 + $0x123] sm:$0xff] }
 0x3da   : > { %v7157_v50 = vadd.f32 %v7103_v13, %v6896_v58  ;;  %v7394_v35 = vadd.f32 %v7334_v1, %v6503_v48  ;;  %v6701_v2 = vmul.f32 0.5625, %v6170_v62  ;;  %vm8712_vm14 = vcmp.ne.s32.totalorder %v8452_v61, 0  ;;  %v6168_v48 = vld [vmem:[#allocation2 + $0x121] sm:$0xff]  ;;  %v6313_v62 = vld [vmem:[#allocation2 + $0x12a] sm:$0xff] }
 0x3db   : > { %vm8760_vm0 = vcmp.lt.s32.totalorder %v8452_v61, 0  ;;  %v8856_v52 = vadd.s32 24, %v8452_v61  ;;  %v6410_v16 = vadd.f32 %v6362_v15, %v6266_v33  ;;  %v14557_v24 = vmul.f32 0.1875, %v6075_v31  ;;  %v6457_v13 = vld [vmem:[#allocation2 + $0x12b] sm:$0xff] }
 0x3dc   : > { %v7449_v59 = vmul.f32 %v14374_v28, %v7394_v35  ;;  %vm14553_vm10 = vmand %vm8760_vm0, %vm8712_vm14  ;;  %v6749_v14 = vadd.f32 %v6701_v2, %v6650_v41  ;;  %v6800_v49 = vmul.f32 0.5625, %v6314_v23  ;;  %v6998_v21 = vadd.f32 %v6944_v57, %v14509_v40  ;;  %v14571_v23 = vpop.permute.xlu1 %7656 }
 0x3dd   : > { %v8904_v56 = vsel %vm14553_vm10, %v8856_v52, %v8452_v61  ;;  %v14561_v3 = vadd.f32 %v6506_v7, %v6410_v16  ;;  %v7217_v60 = vadd.f32 %v7157_v50, %v14507_v43  ;;  %v6899_v47 = vmul.f32 0.1875, %v6458_v37  ;;  %v10747_v43 = vpop.f32.mrf.mxu1 }
 0x3de   : > { %v7785_v39 = vadd.f32 %v7652_v44, %v7449_v59  ;;  %v6848_v38 = vadd.f32 %v6800_v49, %v6749_v14  ;;  %v14565_v17 = vmul.f32 0.0625, %v6073_v30  ;;  %v7052_v29 = vadd.f32 %v6998_v21, %v6701_v2 }
 0x3df   : > { %v7277_v6 = vadd.f32 %v7217_v60, %v6218_v20  ;;  %v14568_v58 = vmul.u32.u64.low 2863311531, %v14498_v36  ;;  %v14569_v31 = vmul.u32.u64.high 2863311531, %v14498_v36, %v14568_v58  ;;  %vm14574_vm11 = vcmp.lt.s32.totalorder %v8904_v56, 16 }
 0x3e0   : > { %v7840_v40 = vadd.f32 %v14390_v8, %v7785_v39  ;;  %v14578_v63 = vmul.f32 0.1875, %v6168_v48  ;;  %v14580_v34 = vmul.f32 0.1875, %v6169_v19  ;;  %v7106_v37 = vadd.f32 %v7052_v29, %v6800_v49  ;;  %v7667_v49 = vpop.permute.xlu1 %7666 }
 0x3e1   : > { %v7337_v46 = vadd.f32 %v7277_v6, %v6362_v15  ;;  %v14582_v53 = vmul.f32 0.1875, %v6312_v27  ;;  %v14584_v20 = vmul.f32 0.1875, %v6313_v62  ;;  %v14590_v33 = vadd.f32 %v6899_v47, %v6848_v38 }
 0x3e2   : > { %vm7888_vm3 = vcmp.ge.f32.partialorder %v7840_v40, 0.0  ;;  %v7936_v1 = vmul.f32 0.2, %v7840_v40  ;;  %v6264_v57 = vadd.f32 %v14578_v63, %v14526_v32  ;;  %v6265_v61 = vadd.f32 %v14580_v34, %v14565_v17 }
 0x3e3   : > { %v7397_v50 = vadd.f32 %v7337_v46, %v6506_v7  ;;  %v8483_v35 = vshrl.u32 %v14569_v31, 4  ;;  %v14593_v41 = vmul.f32 0.0625, %v6456_v54  ;;  %v14597_v16 = vmul.f32 0.0625, %v6457_v13  ;;  %v10805_v46 = vpop.f32.mrf.mxu0 }
 0x3e4   : > { %v7984_v15 = vsel %vm7888_vm3, %v7840_v40, %v7936_v1  ;;  %v6408_v2 = vadd.f32 %v14582_v53, %v6264_v57  ;;  %v6409_v52 = vadd.f32 %v14584_v20, %v6265_v61  ;;  %v6601_v14 = vmul.f32 0.1875, %v6073_v30 }
 0x3e5   : > { %v8032_v59 = vmul.f32 1.4142135, %v7984_v15  ;;  %v7452_v32 = vmul.f32 %v14374_v28, %v7397_v50  ;;  %v8484_v10 = vmul.u32 24, %v8483_v35  ;;  %v14600_v44 = vadd.f32 %v7106_v37, %v6899_v47 }
 0x3e6   : > { %v14603_v7 = vadd.f32 %v14593_v41, %v6408_v2  ;;  %v14606_v56 = vadd.f32 %v14597_v16, %v6409_v52  ;;  %v6699_v21 = vmul.f32 0.5625, %v6168_v48  ;;  %v6649_v29 = vadd.f32 %v6601_v14, %v14378_v4 }
 0x3e7   : > { %v8087_v60 = vmul.f32 %v14418_v26, %v8032_v59  ;;  %v7788_v39 = vadd.f32 %v7667_v49, %v7452_v32  ;;  %v8485_v38 = vsub.s32 %v14498_v36, %v8484_v10  ;;  %v6700_v6 = vmul.f32 0.5625, %v6169_v19  ;;  %v5836_v10 = vpop.f32.mrf.mxu0 }
 0x3e8   : > { %v6747_v30 = vadd.f32 %v6699_v21, %v14531_v42  ;;  %v6798_v58 = vmul.f32 0.5625, %v6312_v27  ;;  %v6799_v47 = vmul.f32 0.5625, %v6313_v62  ;;  %v6897_v27 = vmul.f32 0.1875, %v6456_v54 }
 0x3e9   : > { %v9096_v31 = vsel %vm14574_vm11, %v8087_v60, 0.0  ;;  %v7843_v40 = vadd.f32 %v14390_v8, %v7788_v39  ;;  %vm8715_vm13 = vcmp.ne.s32.totalorder %v8485_v38, 0  ;;  %vm8763_vm12 = vcmp.lt.s32.totalorder %v8485_v38, 0  ;;  %v15768_v60 = vld [vmem:[#allocation16_spill] sm:$0xff] }
 0x3ea   : > { %v9964_v48 = vpack.c.bf16 %v9096_v31, %v9096_v31  ;;  %vm14615_vm1 = vmand %vm8763_vm12, %vm8715_vm13  ;;  %v8859_v36 = vadd.s32 24, %v8485_v38  ;;  %v6748_v4 = vadd.f32 %v6700_v6, %v6649_v29  ;;  %v6846_v19 = vadd.f32 %v6798_v58, %v6747_v30 }
 0x3eb   : > { %vm7891_vm6 = vcmp.ge.f32.partialorder %v7843_v40, 0.0  ;;  %v7939_v42 = vmul.f32 0.2, %v7843_v40  ;;  %v6997_v62 = vadd.f32 %v14399_v55, %v6601_v14  ;;  %v6898_v61 = vmul.f32 0.1875, %v6457_v13 }
 0x3ec   : > { %9337 = vst.msk [vmem:[%s12159_s26 + $0x80] sm:$0xf] %vm9310_vm4, %v9964_v48  ;;  %v8907_v1 = vsel %vm14615_vm1, %v8859_v36, %v8485_v38  ;;  %v6847_v57 = vadd.f32 %v6799_v47, %v6748_v4  ;;  %v7050_v50 = vadd.f32 %v14537_v18, %v6699_v21  ;;  %v6945_v15 = vadd.f32 %v6897_v27, %v6846_v19  ;;  %v5359_v21 = vpop.f32.mrf.mxu1  ;;  %v15769_v36 = vld [vmem:[#allocation19_spill] sm:$0xff] }
 0x3ed   : > { %v7987_v35 = vsel %vm7891_vm6, %v7843_v40, %v7939_v42  ;;  %v7051_v2 = vadd.f32 %v6997_v62, %v6700_v6  ;;  %v7216_v52 = vadd.f32 %v14421_v0, %v14565_v17  ;;  %vm14627_vm15 = vcmp.lt.s32.totalorder %v8907_v1, 16 }
 0x3ee   : > { %v8035_v59 = vmul.f32 1.4142135, %v7987_v35  ;;  %v7104_v55 = vadd.f32 %v7050_v50, %v6798_v58  ;;  %v7275_v32 = vadd.f32 %v14545_v25, %v14578_v63  ;;  %v14633_v14 = vadd.f32 %v6898_v61, %v6847_v57  ;;  %v10748_v48 = vpop.f32.mrf.mxu1 }
 0x3ef   : > { %v7105_v13 = vadd.f32 %v7051_v2, %v6799_v47  ;;  %v7276_v18 = vadd.f32 %v7216_v52, %v14580_v34  ;;  %v8138_v49 = vadd.s32 224, %v15654_v45  ;;  %v14640_v39 = vadd.f32 %v10747_v43, %v15768_v60  ;;  %v10806_v47 = vpop.f32.mrf.mxu0 }
 0x3f0   : > { %v8090_v0 = vmul.f32 %v14418_v26, %v8035_v59  ;;  %v7335_v17 = vadd.f32 %v7275_v32, %v14582_v53  ;;  %v5957_v38 = vadd.f32 %v10805_v46, %v14452_v51  ;;  %v7158_v29 = vadd.f32 %v7104_v55, %v6897_v27  ;;  %v7662_v27 = vpop.permute.xlu0 %7661  ;;  %v15770_v55 = vld [vmem:[#allocation21_spill] sm:$0xff] }
 0x3f1   : > { %v7336_v25 = vadd.f32 %v7276_v18, %v14584_v20  ;;  %v14645_v63 = vmul.u32.u64.low 2863311531, %v14520_v5  ;;  %v14646_v6 = vmul.u32.u64.high 2863311531, %v14520_v5, %v14645_v63  ;;  %v14655_v31 = vadd.f32 %v7105_v13, %v6898_v61  ;;  %v5839_v1 = vpop.f32.mrf.mxu0 }
 0x3f2   : > { %v9099_v34 = vsel %vm14627_vm15, %v8090_v0, 0.0  ;;  %v7395_v30 = vadd.f32 %v7335_v17, %v14593_v41  ;;  %v14651_v58 = vmul.u32.u64.low 2863311531, %v8138_v49  ;;  %v14652_v53 = vmul.u32.u64.high 2863311531, %v8138_v49, %v14651_v58  ;;  %6018 = vst.msk [vmem:[#allocation2 + $0x150] sm:$0xff] %vm5975_vm5, %v5957_v38  ;;  %v15771_v0 = vld [vmem:[#allocation23_spill] sm:$0xff] }
 0x3f3   : > { %v9967_v51 = vpack.c.bf16 %v9099_v34, %v9099_v34  ;;  %v7396_v20 = vadd.f32 %v7336_v25, %v14597_v16  ;;  %v5955_v40 = vadd.f32 %v5836_v10, %v14469_v12  ;;  %v14661_v4 = vadd.f32 %v5359_v21, %v15769_v36 }
 0x3f4   : > { %v7450_v37 = vmul.f32 %v14374_v28, %v7395_v30  ;;  %v14665_v41 = vadd.f32 %v14557_v24, %v14603_v7  ;;  %v14668_v19 = vadd.f32 %v6945_v15, %v14557_v24  ;;  %v8461_v16 = vshrl.u32 %v14646_v6, 4  ;;  %v5362_v15 = vpop.f32.mrf.mxu1 }
 0x3f5   : > { %9340 = vst.msk [vmem:[%s12159_s26 + $0x8c] sm:$0xf] %vm9310_vm4, %v9967_v51  ;;  %v7451_v46 = vmul.f32 %v14374_v28, %v7396_v20  ;;  %v14676_v12 = vadd.f32 %v7158_v29, %v14547_v9  ;;  %v14679_v42 = vadd.s32 240, %v15654_v45  ;;  %v8472_v24 = vshrl.u32 %v14652_v53, 4 }
 0x3f6   : > { %6016 = vst.msk [vmem:[#allocation2 + $0x140] sm:$0xff] %vm5975_vm5, %v5955_v40  ;;  %v7786_v7 = vadd.f32 %v14571_v23, %v7450_v37  ;;  %v5958_v62 = vadd.f32 %v10806_v47, %v14493_v11  ;;  %v14685_v43 = vadd.s32 264, %v15654_v45  ;;  %v8462_v61 = vmul.u32 24, %v8461_v16 }
 0x3f7   : > { %v7787_v57 = vadd.f32 %v7662_v27, %v7451_v46  ;;  %v14688_v50 = vmul.u32.u64.low 2863311531, %v14679_v42  ;;  %v14689_v35 = vmul.u32.u64.high 2863311531, %v14679_v42, %v14688_v50  ;;  %v8473_v52 = vmul.u32 24, %v8472_v24 }
 0x3f8   : > { %v7841_v2 = vadd.f32 %v14390_v8, %v7786_v7  ;;  %6019 = vst.msk [vmem:[#allocation2 + $0x158] sm:$0xff] %vm5975_vm5, %v5958_v62  ;;  %v14694_v23 = vmul.u32.u64.low 2863311531, %v14685_v43  ;;  %v14695_v59 = vmul.u32.u64.high 2863311531, %v14685_v43, %v14694_v23  ;;  %v8463_v54 = vsub.s32 %v14520_v5, %v8462_v61 }
 0x3f9   : > { %v7842_v11 = vadd.f32 %v14390_v8, %v7787_v57  ;;  %v14701_v32 = vadd.f32 %v10748_v48, %v15770_v55  ;;  %v5956_v10 = vadd.f32 %v5839_v1, %v14512_v22  ;;  %v8474_v18 = vsub.s32 %v8138_v49, %v8473_v52  ;;  %v6078_v21 = vld [vmem:[#allocation2 + $0x150] sm:$0xff] }
 0x3fa   : > { %vm7889_vm8 = vcmp.ge.f32.partialorder %v7841_v2, 0.0  ;;  %v7937_v13 = vmul.f32 0.2, %v7841_v2  ;;  %v14705_v17 = vadd.f32 %v5362_v15, %v15771_v0  ;;  %vm8713_vm9 = vcmp.ne.s32.totalorder %v8463_v54, 0 }
 0x3fb   : > { %vm7890_vm2 = vcmp.ge.f32.partialorder %v7842_v11, 0.0  ;;  %v7938_v60 = vmul.f32 0.2, %v7842_v11  ;;  %vm8761_vm7 = vcmp.lt.s32.totalorder %v8463_v54, 0  ;;  %6017 = vst.msk [vmem:[#allocation2 + $0x148] sm:$0xff] %vm5975_vm5, %v5956_v10  ;;  %vm8714_vm14 = vcmp.ne.s32.totalorder %v8474_v18, 0 }
 0x3fc   : > { %v7985_v38 = vsel %vm7889_vm8, %v7841_v2, %v7937_v13  ;;  %vm8762_vm0 = vcmp.lt.s32.totalorder %v8474_v18, 0  ;;  %vm14708_vm10 = vmand %vm8761_vm7, %vm8713_vm9  ;;  %v8857_v22 = vadd.s32 24, %v8463_v54  ;;  %v8858_v6 = vadd.s32 24, %v8474_v18 }
 0x3fd   : > { %v6076_v29 = vld [vmem:[#allocation2 + $0x140] sm:$0xff]  ;;  %v7986_v25 = vsel %vm7890_vm2, %v7842_v11, %v7938_v60  ;;  %v8033_v63 = vmul.f32 1.4142135, %v7985_v38  ;;  %vm8810_vm11 = vmand %vm8762_vm0, %vm8714_vm14  ;;  %v6126_v34 = vmul.f32 0.0625, %v6078_v21  ;;  %v6606_v47 = vmul.f32 0.1875, %v6078_v21 }
 0x3fe   : > { %v6171_v49 = vld [vmem:[#allocation2 + $0x139] sm:$0xff]  ;;  %v8034_v58 = vmul.f32 1.4142135, %v7986_v25  ;;  %v8905_v53 = vsel %vm14708_vm10, %v8857_v22, %v8463_v54  ;;  %v8906_v48 = vsel %vm8810_vm11, %v8858_v6, %v8474_v18  ;;  %v14715_v37 = vmul.f32 0.0625, %v6076_v29 }
 0x3ff   : > { %v6315_v30 = vld [vmem:[#allocation2 + $0x13a] sm:$0xff]  ;;  %v6219_v51 = vmul.f32 0.1875, %v6171_v49  ;;  %v8088_v40 = vmul.f32 %v14418_v26, %v8033_v63  ;;  %vm8953_vm3 = vcmp.lt.s32.totalorder %v8905_v53, 16  ;;  %vm8954_vm13 = vcmp.lt.s32.totalorder %v8906_v48, 16  ;;  %v6174_v15 = vld [vmem:[#allocation2 + $0x151] sm:$0xff] }
 0x400   : > { %v6459_v20 = vld [vmem:[#allocation2 + $0x13b] sm:$0xff]  ;;  %v8089_v36 = vmul.f32 %v14418_v26, %v8034_v58  ;;  %v6363_v16 = vmul.f32 0.1875, %v6315_v30  ;;  %v6604_v24 = vmul.f32 0.1875, %v6076_v29  ;;  %v6702_v62 = vmul.f32 0.5625, %v6171_v49  ;;  %v6318_v54 = vld [vmem:[#allocation2 + $0x152] sm:$0xff] }
 0x401   : > { %v6267_v46 = vadd.f32 %v6219_v51, %v14547_v9  ;;  %v9097_v27 = vsel %vm8953_vm3, %v8088_v40, 0.0  ;;  %v6507_v7 = vmul.f32 0.0625, %v6459_v20  ;;  %v6801_v50 = vmul.f32 0.5625, %v6315_v30  ;;  %v6079_v9 = vld [vmem:[#allocation2 + $0x158] sm:$0xff] }
 0x402   : > { %v9098_v1 = vsel %vm8954_vm13, %v8089_v36, 0.0  ;;  %v9965_v57 = vpack.c.bf16 %v9097_v27, %v9097_v27  ;;  %v14720_v52 = vadd.f32 %v6604_v24, %v14606_v56  ;;  %v6750_v23 = vadd.f32 %v6702_v62, %v14665_v41  ;;  %v6462_v21 = vld [vmem:[#allocation2 + $0x153] sm:$0xff]  ;;  %v6077_v36 = vld [vmem:[#allocation2 + $0x148] sm:$0xff] }
 0x403   : > { %v6411_v61 = vadd.f32 %v6363_v16, %v6267_v46  ;;  %v9966_v2 = vpack.c.bf16 %v9098_v1, %v9098_v1  ;;  %v6900_v11 = vmul.f32 0.1875, %v6459_v20  ;;  %v14726_v10 = vadd.f32 %v14633_v14, %v6604_v24  ;;  %v6172_v46 = vld [vmem:[#allocation2 + $0x141] sm:$0xff] }
 0x404   : > { %9338 = vst.msk [vmem:[%s12159_s26 + $0x84] sm:$0xf] %vm9310_vm4, %v9965_v57  ;;  %v7053_v13 = vadd.f32 %v14668_v19, %v6702_v62  ;;  %v7278_v18 = vadd.f32 %v14676_v12, %v6219_v51  ;;  %v6849_v56 = vadd.f32 %v6801_v50, %v6750_v23  ;;  %v14734_v41 = vadd.f32 %v14655_v31, %v14715_v37  ;;  %v6173_v57 = vld [vmem:[#allocation2 + $0x149] sm:$0xff] }
 0x405   : > { %v6555_v55 = vadd.f32 %v6507_v7, %v6411_v61  ;;  %9339 = vst.msk [vmem:[%s12159_s26 + $0x88] sm:$0xf] %vm9310_vm4, %v9966_v2  ;;  %v8494_v0 = vshrl.u32 %v14689_v35, 4  ;;  %v6222_v60 = vmul.f32 0.1875, %v6174_v15  ;;  %v14737_v22 = vmul.f32 0.0625, %v6079_v9  ;;  %v14748_v2 = vpop.permute.xlu1 %7676 }
 0x406   : > { %v7107_v38 = vadd.f32 %v7053_v13, %v6801_v50  ;;  %v7338_v5 = vadd.f32 %v7278_v18, %v6363_v16  ;;  %v6366_v14 = vmul.f32 0.1875, %v6318_v54  ;;  %v6948_v29 = vadd.f32 %v6900_v11, %v6849_v56  ;;  %v7672_v16 = vpop.permute.xlu0 %7671  ;;  %v6317_v13 = vld [vmem:[#allocation2 + $0x14a] sm:$0xff] }
 0x407   : > { %v8495_v19 = vmul.u32 24, %v8494_v0  ;;  %v6270_v49 = vadd.f32 %v6222_v60, %v6126_v34  ;;  %v6510_v12 = vmul.f32 0.0625, %v6462_v21  ;;  %v6654_v6 = vadd.f32 %v6606_v47, %v6555_v55  ;;  %v6460_v0 = vld [vmem:[#allocation2 + $0x143] sm:$0xff] }
 0x408   : > { %v7161_v25 = vadd.f32 %v7107_v38, %v6900_v11  ;;  %v7398_v63 = vadd.f32 %v7338_v5, %v6507_v7  ;;  %v6705_v30 = vmul.f32 0.5625, %v6174_v15  ;;  %v6804_v53 = vmul.f32 0.5625, %v6318_v54 }
 0x409   : > { %v8496_v58 = vsub.s32 %v14679_v42, %v8495_v19  ;;  %v6414_v31 = vadd.f32 %v6366_v14, %v6270_v49  ;;  %v6903_v51 = vmul.f32 0.1875, %v6462_v21  ;;  %v7002_v40 = vadd.f32 %v6948_v29, %v6606_v47  ;;  %v6316_v47 = vld [vmem:[#allocation2 + $0x142] sm:$0xff] }
 0x40a   : > { %v7453_v35 = vmul.f32 %v14374_v28, %v7398_v63  ;;  %v6753_v20 = vadd.f32 %v6705_v30, %v6654_v6  ;;  %v7221_v48 = vadd.f32 %v7161_v25, %v6126_v34  ;;  %v8527_v50 = vshrl.u32 %v14695_v59, 4 }
 0x40b   : > { %vm8716_vm12 = vcmp.ne.s32.totalorder %v8496_v58, 0  ;;  %vm8764_vm1 = vcmp.lt.s32.totalorder %v8496_v58, 0  ;;  %v8860_v27 = vadd.s32 24, %v8496_v58  ;;  %v14741_v24 = vadd.f32 %v6510_v12, %v6414_v31  ;;  %v7687_v31 = vpop.permute.xlu1 %7686 }
 0x40c   : > { %v7789_v7 = vadd.f32 %v7672_v16, %v7453_v35  ;;  %vm8812_vm6 = vmand %vm8764_vm1, %vm8716_vm12  ;;  %v6852_v62 = vadd.f32 %v6804_v53, %v6753_v20  ;;  %v7056_v42 = vadd.f32 %v7002_v40, %v6705_v30  ;;  %v7281_v1 = vadd.f32 %v7221_v48, %v6222_v60  ;;  %v6461_v60 = vld [vmem:[#allocation2 + $0x14b] sm:$0xff] }
 0x40d   : > { %v8908_v61 = vsel %vm8812_vm6, %v8860_v27, %v8496_v58  ;;  %v14744_v15 = vmul.f32 0.0625, %v6077_v36  ;;  %v14746_v34 = vmul.f32 0.1875, %v6172_v46  ;;  %v14755_v54 = vmul.f32 0.1875, %v6079_v9 }
 0x40e   : > { %v7844_v23 = vadd.f32 %v14390_v8, %v7789_v7  ;;  %vm14751_vm15 = vcmp.lt.s32.totalorder %v8908_v61, 16  ;;  %v14757_v55 = vadd.f32 %v6903_v51, %v6852_v62  ;;  %v7341_v18 = vadd.f32 %v7281_v1, %v6366_v14 }
 0x40f   : > { %v8528_v59 = vmul.u32 24, %v8527_v50  ;;  %v14759_v21 = vmul.f32 0.1875, %v6173_v57  ;;  %v6268_v56 = vadd.f32 %v14746_v34, %v14715_v37  ;;  %v7110_v5 = vadd.f32 %v7056_v42, %v6804_v53  ;;  %v10809_v50 = vpop.f32.mrf.mxu0 }
 0x410   : > { %vm7892_vm8 = vcmp.ge.f32.partialorder %v7844_v23, 0.0  ;;  %v7940_v38 = vmul.f32 0.2, %v7844_v23  ;;  %v6364_v29 = vmul.f32 0.1875, %v6316_v47  ;;  %v7401_v19 = vadd.f32 %v7341_v18, %v6510_v12 }
 0x411   : > { %v8529_v9 = vsub.s32 %v14685_v43, %v8528_v59  ;;  %v6269_v49 = vadd.f32 %v14759_v21, %v14744_v15  ;;  %v6365_v25 = vmul.f32 0.1875, %v6317_v13  ;;  %v6508_v6 = vmul.f32 0.0625, %v6460_v0 }
 0x412   : > { %v7988_v14 = vsel %vm7892_vm8, %v7844_v23, %v7940_v38  ;;  %v6412_v63 = vadd.f32 %v6364_v29, %v6268_v56  ;;  %v14766_v30 = vmul.f32 0.0625, %v6461_v60  ;;  %v7456_v37 = vmul.f32 %v14374_v28, %v7401_v19  ;;  %v10751_v38 = vpop.f32.mrf.mxu1 }
 0x413   : > { %v8036_v58 = vmul.f32 1.4142135, %v7988_v14  ;;  %vm8719_vm2 = vcmp.ne.s32.totalorder %v8529_v9, 0  ;;  %vm8767_vm9 = vcmp.lt.s32.totalorder %v8529_v9, 0  ;;  %v8863_v43 = vadd.s32 24, %v8529_v9 }
 0x414   : > { %vm14769_vm7 = vmand %vm8767_vm9, %vm8719_vm2  ;;  %v6413_v12 = vadd.f32 %v6365_v25, %v6269_v49  ;;  %v14773_v35 = vadd.f32 %v6508_v6, %v6412_v63  ;;  %v6605_v20 = vmul.f32 0.1875, %v6077_v36  ;;  %v14776_v48 = vadd.f32 %v7110_v5, %v6903_v51  ;;  %v5852_v49 = vpop.f32.mrf.mxu0 }
 0x415   : > { %v8091_v40 = vmul.f32 %v14418_v26, %v8036_v58  ;;  %v7792_v16 = vadd.f32 %v7687_v31, %v7456_v37  ;;  %v6703_v27 = vmul.f32 0.5625, %v6172_v46  ;;  %v8911_v28 = vsel %vm14769_vm7, %v8863_v43, %v8529_v9 }
 0x416   : > { %v14781_v7 = vadd.f32 %v14766_v30, %v6413_v12  ;;  %v6653_v62 = vadd.f32 %v6605_v20, %v14561_v3  ;;  %v6704_v42 = vmul.f32 0.5625, %v6173_v57  ;;  %v6802_v61 = vmul.f32 0.5625, %v6316_v47 }
 0x417   : > { %v9100_v1 = vsel %vm14751_vm15, %v8091_v40, 0.0  ;;  %v7847_v36 = vadd.f32 %v14390_v8, %v7792_v16  ;;  %v6751_v51 = vadd.f32 %v6703_v27, %v14720_v52  ;;  %vm14788_vm14 = vcmp.lt.s32.totalorder %v8911_v28, 16 }
 0x418   : > { %v9968_v46 = vpack.c.bf16 %v9100_v1, %v9100_v1  ;;  %v6752_v18 = vadd.f32 %v6704_v42, %v6653_v62  ;;  %v6803_v59 = vmul.f32 0.5625, %v6317_v13  ;;  %v6901_v57 = vmul.f32 0.1875, %v6460_v0  ;;  %v15781_v1 = vld [vmem:[#allocation22_spill] sm:$0xff] }
 0x419   : > { %vm7895_vm0 = vcmp.ge.f32.partialorder %v7847_v36, 0.0  ;;  %v7943_v3 = vmul.f32 0.2, %v7847_v36  ;;  %v6850_v56 = vadd.f32 %v6802_v61, %v6751_v51  ;;  %v7001_v8 = vadd.f32 %v14590_v33, %v6605_v20 }
 0x41a   : > { %9341 = vst.msk [vmem:[%s12159_s26 + $0x90] sm:$0xf] %vm9310_vm4, %v9968_v46  ;;  %v6851_v11 = vadd.f32 %v6803_v59, %v6752_v18  ;;  %v7054_v52 = vadd.f32 %v14726_v10, %v6703_v27  ;;  %v7220_v47 = vadd.f32 %v14600_v44, %v14744_v15  ;;  %v6902_v19 = vmul.f32 0.1875, %v6461_v60  ;;  %v5375_v44 = vpop.f32.mrf.mxu1 }
 0x41b   : > { %v7991_v5 = vsel %vm7895_vm0, %v7847_v36, %v7943_v3  ;;  %v7279_v13 = vadd.f32 %v14734_v41, %v14746_v34  ;;  %v8141_v9 = vadd.s32 248, %v15654_v45  ;;  %v6949_v14 = vadd.f32 %v6901_v57, %v6850_v56  ;;  %v15780_v41 = vld [vmem:[#allocation20_spill] sm:$0xff] }
 0x41c   : > { %v8039_v0 = vmul.f32 1.4142135, %v7991_v5  ;;  %v7055_v63 = vadd.f32 %v7001_v8, %v6704_v42  ;;  %v7108_v58 = vadd.f32 %v7054_v52, %v6802_v61  ;;  %v14801_v37 = vadd.f32 %v6902_v19, %v6851_v11  ;;  %v10752_v42 = vpop.f32.mrf.mxu1 }
 0x41d   : > { %v7280_v33 = vadd.f32 %v7220_v47, %v14759_v21  ;;  %v7339_v10 = vadd.f32 %v7279_v13, %v6364_v29  ;;  %v8142_v31 = vadd.s32 256, %v15654_v45  ;;  %v14807_v34 = vadd.f32 %v10751_v38, %v15780_v41  ;;  %v10810_v21 = vpop.f32.mrf.mxu0  ;;  %v14857_v38 = vld [vmem:[%s15339_s5] ss:$0 sm:$0xff] }
 0x41e   : > { %v8094_v15 = vmul.f32 %v14418_v26, %v8039_v0  ;;  %v7109_v60 = vadd.f32 %v7055_v63, %v6803_v59  ;;  %v5961_v53 = vadd.f32 %v10809_v50, %v14640_v39  ;;  %v7162_v16 = vadd.f32 %v7108_v58, %v6901_v57  ;;  %v5378_v47 = vpop.f32.mrf.mxu1 }
 0x41f   : > { %v7340_v43 = vadd.f32 %v7280_v33, %v6365_v25  ;;  %v7399_v12 = vadd.f32 %v7339_v10, %v6508_v6  ;;  %v14810_v20 = vmul.u32.u64.low 2863311531, %v8141_v9  ;;  %v14811_v40 = vmul.u32.u64.high 2863311531, %v8141_v9, %v14810_v20  ;;  %v14823_v25 = vld [vmem:[%s13549_s23] ss:$0 sm:$0xff]  ;;  %v5855_v59 = vpop.f32.mrf.mxu0 }
 0x420   : > { %v9103_v29 = vsel %vm14788_vm14, %v8094_v15, 0.0  ;;  %v14815_v27 = vmul.u32.u64.low 2863311531, %v8142_v31  ;;  %v14816_v28 = vmul.u32.u64.high 2863311531, %v8142_v31, %v14815_v27  ;;  %6022 = vst.msk [vmem:[#allocation2 + $0x170] sm:$0xff] %vm5975_vm5, %v5961_v53  ;;  %v14819_v62 = vadd.f32 %v7109_v60, %v6902_v19 }
 0x421   : > { %v9971_v26 = vpack.c.bf16 %v9103_v29, %v9103_v29  ;;  %v7400_v39 = vadd.f32 %v7340_v43, %v14766_v30  ;;  %v7454_v6 = vmul.f32 %v14823_v25, %v7399_v12  ;;  %v14827_v36 = vadd.f32 %v5375_v44, %v15781_v1  ;;  %v15783_v44 = vld [vmem:[#allocation25_spill] sm:$0xff]  ;;  %v14886_v29 = vld [vmem:[%s13590_s29] ss:$0 sm:$0xff] }
 0x422   : > { %v5959_v51 = vadd.f32 %v5852_v49, %v14661_v4  ;;  %v14832_v61 = vadd.f32 %v14755_v54, %v14773_v35  ;;  %v14835_v50 = vadd.f32 %v6949_v14, %v14755_v54  ;;  %v8505_v23 = vshrl.u32 %v14811_v40, 4  ;;  %v7682_v4 = vpop.permute.xlu0 %7681  ;;  %v15782_v35 = vld [vmem:[#allocation24_spill] sm:$0xff] }
 0x423   : > { %9344 = vst.msk [vmem:[%s12159_s26 + $0x9c] sm:$0xf] %vm9310_vm4, %v9971_v26  ;;  %v7455_v30 = vmul.f32 %v14823_v25, %v7400_v39  ;;  %v7790_v46 = vadd.f32 %v14748_v2, %v7454_v6  ;;  %v14843_v18 = vadd.s32 272, %v15654_v45  ;;  %v8516_v3 = vshrl.u32 %v14816_v28, 4 }
 0x424   : > { %6020 = vst.msk [vmem:[#allocation2 + $0x160] sm:$0xff] %vm5975_vm5, %v5959_v51  ;;  %v14848_v54 = vadd.f32 %v7162_v16, %v14737_v22  ;;  %v14851_v56 = vadd.f32 %v10752_v42, %v15782_v35  ;;  %v5962_v57 = vadd.f32 %v10810_v21, %v14701_v32  ;;  %v8506_v8 = vmul.u32 24, %v8505_v23 }
 0x425   : > { %v7791_v2 = vadd.f32 %v7682_v4, %v7455_v30  ;;  %v7845_v11 = vadd.f32 %v14857_v38, %v7790_v46  ;;  %v14861_v52 = vadd.s32 296, %v15654_v45  ;;  %v8517_v5 = vmul.u32 24, %v8516_v3 }
 0x426   : > { %v14864_v19 = vmul.u32.u64.low 2863311531, %v14843_v18  ;;  %v14865_v13 = vmul.u32.u64.high 2863311531, %v14843_v18, %v14864_v19  ;;  %6023 = vst.msk [vmem:[#allocation2 + $0x178] sm:$0xff] %vm5975_vm5, %v5962_v57  ;;  %v5960_v32 = vadd.f32 %v5855_v59, %v14705_v17  ;;  %v8507_v14 = vsub.s32 %v8141_v9, %v8506_v8 }
 0x427   : > { %v7846_v49 = vadd.f32 %v14857_v38, %v7791_v2  ;;  %vm7893_vm10 = vcmp.ge.f32.partialorder %v7845_v11, 0.0  ;;  %v7941_v0 = vmul.f32 0.2, %v7845_v11  ;;  %v6082_v63 = vld [vmem:[#allocation2 + $0x170] sm:$0xff]  ;;  %v8518_v58 = vsub.s32 %v8142_v31, %v8517_v5 }
 0x428   : > { %v14870_v33 = vmul.f32 0.0625, %v6082_v63  ;;  %v14872_v10 = vmul.f32 0.1875, %v6082_v63  ;;  %v14875_v15 = vadd.f32 %v5378_v47, %v15783_v44  ;;  %6021 = vst.msk [vmem:[#allocation2 + $0x168] sm:$0xff] %vm5975_vm5, %v5960_v32  ;;  %vm8717_vm3 = vcmp.ne.s32.totalorder %v8507_v14, 0 }
 0x429   : > { %vm7894_vm11 = vcmp.ge.f32.partialorder %v7846_v49, 0.0  ;;  %v7942_v60 = vmul.f32 0.2, %v7846_v49  ;;  %v7989_v17 = vsel %vm7893_vm10, %v7845_v11, %v7941_v0  ;;  %vm8718_vm13 = vcmp.ne.s32.totalorder %v8518_v58, 0 }
 0x42a   : > { %v8037_v41 = vmul.f32 1.4142135, %v7989_v17  ;;  %vm8765_vm12 = vcmp.lt.s32.totalorder %v8507_v14, 0  ;;  %vm8766_vm1 = vcmp.lt.s32.totalorder %v8518_v58, 0  ;;  %v8861_v53 = vadd.s32 24, %v8507_v14 }
 0x42b   : > { %v7990_v9 = vsel %vm7894_vm11, %v7846_v49, %v7942_v60  ;;  %vm14878_vm6 = vmand %vm8765_vm12, %vm8717_vm3  ;;  %v8862_v43 = vadd.s32 24, %v8518_v58  ;;  %v6080_v12 = vld [vmem:[#allocation2 + $0x160] sm:$0xff]  ;;  %v14883_v40 = vadd.s32 280, %v15654_v45  ;;  %v8538_v39 = vshrl.u32 %v14865_v13, 4 }
 0x42c   : > { %v6175_v20 = vld [vmem:[#allocation2 + $0x159] sm:$0xff]  ;;  %v8038_v21 = vmul.f32 1.4142135, %v7990_v9  ;;  %v8092_v16 = vmul.f32 %v14886_v29, %v8037_v41  ;;  %vm8814_vm15 = vmand %vm8766_vm1, %vm8718_vm13  ;;  %v8909_v6 = vsel %vm14878_vm6, %v8861_v53, %v8507_v14  ;;  %v14892_v1 = vmul.f32 0.0625, %v6080_v12 }
 0x42d   : > { %v6223_v27 = vmul.f32 0.1875, %v6175_v20  ;;  %v6319_v28 = vld [vmem:[#allocation2 + $0x15a] sm:$0xff]  ;;  %v8910_v42 = vsel %vm8814_vm15, %v8862_v43, %v8518_v58  ;;  %vm8957_vm8 = vcmp.lt.s32.totalorder %v8909_v6, 16  ;;  %v6608_v4 = vmul.f32 0.1875, %v6080_v12  ;;  %v6178_v8 = vld [vmem:[#allocation2 + $0x171] sm:$0xff] }
 0x42e   : > { %v6463_v26 = vld [vmem:[#allocation2 + $0x15b] sm:$0xff]  ;;  %v6367_v51 = vmul.f32 0.1875, %v6319_v28  ;;  %v8093_v30 = vmul.f32 %v14886_v29, %v8038_v21  ;;  %vm8958_vm2 = vcmp.lt.s32.totalorder %v8910_v42, 16  ;;  %v9101_v23 = vsel %vm8957_vm8, %v8092_v16, 0.0  ;;  %v6466_v58 = vld [vmem:[#allocation2 + $0x173] sm:$0xff]  ;;  %v7692_v42 = vpop.permute.xlu0 %7691 }
 0x42f   : > { %v6271_v46 = vadd.f32 %v6223_v27, %v14737_v22  ;;  %v6511_v59 = vmul.f32 0.0625, %v6463_v26  ;;  %v6706_v3 = vmul.f32 0.5625, %v6175_v20  ;;  %v9969_v57 = vpack.c.bf16 %v9101_v23, %v9101_v23  ;;  %v6083_v32 = vld [vmem:[#allocation2 + $0x178] sm:$0xff] }
 0x430   : > { %v9102_v35 = vsel %vm8958_vm2, %v8093_v30, 0.0  ;;  %v6805_v11 = vmul.f32 0.5625, %v6319_v28  ;;  %v14897_v5 = vadd.f32 %v6608_v4, %v14781_v7  ;;  %v6904_v13 = vmul.f32 0.1875, %v6463_v26  ;;  %v6322_v22 = vld [vmem:[#allocation2 + $0x172] sm:$0xff] }
 0x431   : > { %v6415_v2 = vadd.f32 %v6367_v51, %v6271_v46  ;;  %v9970_v47 = vpack.c.bf16 %v9102_v35, %v9102_v35  ;;  %v6754_v19 = vadd.f32 %v6706_v3, %v14832_v61  ;;  %9342 = vst.msk [vmem:[%s12159_s26 + $0x94] sm:$0xf] %vm9310_vm4, %v9969_v57  ;;  %v14903_v0 = vadd.f32 %v14801_v37, %v6608_v4  ;;  %v6177_v4 = vld [vmem:[#allocation2 + $0x169] sm:$0xff] }
 0x432   : > { %v7057_v14 = vadd.f32 %v14835_v50, %v6706_v3  ;;  %v7282_v63 = vadd.f32 %v14848_v54, %v6223_v27  ;;  %v14911_v61 = vadd.f32 %v14819_v62, %v14892_v1  ;;  %v8539_v44 = vmul.u32 24, %v8538_v39  ;;  %v6081_v27 = vld [vmem:[#allocation2 + $0x168] sm:$0xff] }
 0x433   : > { %v6559_v49 = vadd.f32 %v6511_v59, %v6415_v2  ;;  %9343 = vst.msk [vmem:[%s12159_s26 + $0x98] sm:$0xf] %vm9310_vm4, %v9970_v47  ;;  %v6853_v7 = vadd.f32 %v6805_v11, %v6754_v19  ;;  %v6226_v60 = vmul.f32 0.1875, %v6178_v8  ;;  %v14913_v9 = vmul.f32 0.0625, %v6083_v32 }
 0x434   : > { %v7111_v17 = vadd.f32 %v7057_v14, %v6805_v11  ;;  %v7342_v41 = vadd.f32 %v7282_v63, %v6367_v51  ;;  %v6370_v37 = vmul.f32 0.1875, %v6322_v22  ;;  %v8540_v50 = vsub.s32 %v14843_v18, %v8539_v44  ;;  %v6320_v11 = vld [vmem:[#allocation2 + $0x162] sm:$0xff] }
 0x435   : > { %v6952_v31 = vadd.f32 %v6904_v13, %v6853_v7  ;;  %v6274_v54 = vadd.f32 %v6226_v60, %v14870_v33  ;;  %v6514_v53 = vmul.f32 0.0625, %v6466_v58  ;;  %v6658_v20 = vadd.f32 %v14872_v10, %v6559_v49  ;;  %v6464_v63 = vld [vmem:[#allocation2 + $0x163] sm:$0xff] }
 0x436   : > { %v7165_v43 = vadd.f32 %v7111_v17, %v6904_v13  ;;  %v7402_v12 = vadd.f32 %v7342_v41, %v6511_v59  ;;  %v6709_v21 = vmul.f32 0.5625, %v6178_v8  ;;  %vm8720_vm9 = vcmp.ne.s32.totalorder %v8540_v50, 0  ;;  %v6176_v59 = vld [vmem:[#allocation2 + $0x161] sm:$0xff]  ;;  %v6321_v8 = vld [vmem:[#allocation2 + $0x16a] sm:$0xff] }
 0x437   : > { %vm8768_vm7 = vcmp.lt.s32.totalorder %v8540_v50, 0  ;;  %v8864_v62 = vadd.s32 24, %v8540_v50  ;;  %v6418_v16 = vadd.f32 %v6370_v37, %v6274_v54  ;;  %v14923_v18 = vmul.f32 0.1875, %v6083_v32  ;;  %v6465_v17 = vld [vmem:[#allocation2 + $0x16b] sm:$0xff] }
 0x438   : > { %v7457_v28 = vmul.f32 %v14823_v25, %v7402_v12  ;;  %vm14919_vm14 = vmand %vm8768_vm7, %vm8720_vm9  ;;  %v6757_v39 = vadd.f32 %v6709_v21, %v6658_v20  ;;  %v6808_v6 = vmul.f32 0.5625, %v6322_v22  ;;  %v7006_v46 = vadd.f32 %v6952_v31, %v14872_v10  ;;  %v14937_v22 = vpop.permute.xlu1 %7696 }
 0x439   : > { %v8912_v51 = vsel %vm14919_vm14, %v8864_v62, %v8540_v50  ;;  %v14927_v30 = vadd.f32 %v6514_v53, %v6418_v16  ;;  %v7225_v23 = vadd.f32 %v7165_v43, %v14870_v33  ;;  %v6907_v57 = vmul.f32 0.1875, %v6466_v58  ;;  %v10755_v33 = vpop.f32.mrf.mxu1 }
 0x43a   : > { %v7793_v3 = vadd.f32 %v7692_v42, %v7457_v28  ;;  %v6856_v35 = vadd.f32 %v6808_v6, %v6757_v39  ;;  %v14931_v2 = vmul.f32 0.0625, %v6081_v27  ;;  %v7060_v47 = vadd.f32 %v7006_v46, %v6709_v21 }
 0x43b   : > { %v7285_v19 = vadd.f32 %v7225_v23, %v6226_v60  ;;  %v14934_v13 = vmul.u32.u64.low 2863311531, %v14861_v52  ;;  %v14935_v32 = vmul.u32.u64.high 2863311531, %v14861_v52, %v14934_v13  ;;  %vm14940_vm0 = vcmp.lt.s32.totalorder %v8912_v51, 16 }
 0x43c   : > { %v7848_v10 = vadd.f32 %v14857_v38, %v7793_v3  ;;  %v14944_v49 = vmul.f32 0.1875, %v6176_v59  ;;  %v14946_v14 = vmul.f32 0.1875, %v6177_v4  ;;  %v7114_v58 = vadd.f32 %v7060_v47, %v6808_v6  ;;  %v7707_v6 = vpop.permute.xlu1 %7706 }
 0x43d   : > { %v7345_v7 = vadd.f32 %v7285_v19, %v6370_v37  ;;  %v14948_v44 = vmul.f32 0.1875, %v6320_v11  ;;  %v14950_v60 = vmul.f32 0.1875, %v6321_v8  ;;  %v14956_v54 = vadd.f32 %v6907_v57, %v6856_v35 }
 0x43e   : > { %vm7896_vm10 = vcmp.ge.f32.partialorder %v7848_v10, 0.0  ;;  %v7944_v41 = vmul.f32 0.2, %v7848_v10  ;;  %v6272_v31 = vadd.f32 %v14944_v49, %v14892_v1  ;;  %v6273_v50 = vadd.f32 %v14946_v14, %v14931_v2 }
 0x43f   : > { %v7405_v43 = vadd.f32 %v7345_v7, %v6514_v53  ;;  %v8571_v12 = vshrl.u32 %v14935_v32, 4  ;;  %v14959_v20 = vmul.f32 0.0625, %v6464_v63  ;;  %v14963_v16 = vmul.f32 0.0625, %v6465_v17  ;;  %v10813_v7 = vpop.f32.mrf.mxu0 }
 0x440   : > { %v7992_v37 = vsel %vm7896_vm10, %v7848_v10, %v7944_v41  ;;  %v6416_v21 = vadd.f32 %v14948_v44, %v6272_v31  ;;  %v6417_v62 = vadd.f32 %v14950_v60, %v6273_v50  ;;  %v6609_v39 = vmul.f32 0.1875, %v6081_v27 }
 0x441   : > { %v8040_v28 = vmul.f32 1.4142135, %v7992_v37  ;;  %v7460_v1 = vmul.f32 %v14823_v25, %v7405_v43  ;;  %v8572_v26 = vmul.u32 24, %v8571_v12  ;;  %v14966_v42 = vadd.f32 %v7114_v58, %v6907_v57 }
 0x442   : > { %v14969_v53 = vadd.f32 %v14959_v20, %v6416_v21  ;;  %v14972_v51 = vadd.f32 %v14963_v16, %v6417_v62  ;;  %v6707_v46 = vmul.f32 0.5625, %v6176_v59  ;;  %v6657_v47 = vadd.f32 %v6609_v39, %v14741_v24 }
 0x443   : > { %v8095_v23 = vmul.f32 %v14886_v29, %v8040_v28  ;;  %v7796_v3 = vadd.f32 %v7707_v6, %v7460_v1  ;;  %v8573_v35 = vsub.s32 %v14861_v52, %v8572_v26  ;;  %v6708_v19 = vmul.f32 0.5625, %v6177_v4  ;;  %v5868_v26 = vpop.f32.mrf.mxu0 }
 0x444   : > { %v6755_v27 = vadd.f32 %v6707_v46, %v14897_v5  ;;  %v6806_v13 = vmul.f32 0.5625, %v6320_v11  ;;  %v6807_v57 = vmul.f32 0.5625, %v6321_v8  ;;  %v6905_v11 = vmul.f32 0.1875, %v6464_v63 }
 0x445   : > { %v9104_v32 = vsel %vm14940_vm0, %v8095_v23, 0.0  ;;  %v7851_v10 = vadd.f32 %v14857_v38, %v7796_v3  ;;  %vm8723_vm11 = vcmp.ne.s32.totalorder %v8573_v35, 0  ;;  %vm8771_vm3 = vcmp.lt.s32.totalorder %v8573_v35, 0  ;;  %v15794_v23 = vld [vmem:[#allocation27_spill] sm:$0xff] }
 0x446   : > { %v9972_v59 = vpack.c.bf16 %v9104_v32, %v9104_v32  ;;  %vm14981_vm13 = vmand %vm8771_vm3, %vm8723_vm11  ;;  %v8867_v52 = vadd.s32 24, %v8573_v35  ;;  %v6756_v24 = vadd.f32 %v6708_v19, %v6657_v47  ;;  %v6854_v4 = vadd.f32 %v6806_v13, %v6755_v27 }
 0x447   : > { %vm7899_vm12 = vcmp.ge.f32.partialorder %v7851_v10, 0.0  ;;  %v7947_v5 = vmul.f32 0.2, %v7851_v10  ;;  %v7005_v8 = vadd.f32 %v14757_v55, %v6609_v39  ;;  %v6906_v50 = vmul.f32 0.1875, %v6465_v17 }
 0x448   : > { %9345 = vst.msk [vmem:[%s12159_s26 + $0xa0] sm:$0xf] %vm9310_vm4, %v9972_v59  ;;  %v8915_v41 = vsel %vm14981_vm13, %v8867_v52, %v8573_v35  ;;  %v6855_v31 = vadd.f32 %v6807_v57, %v6756_v24  ;;  %v7058_v43 = vadd.f32 %v14903_v0, %v6707_v46  ;;  %v6953_v37 = vadd.f32 %v6905_v11, %v6854_v4  ;;  %v5391_v46 = vpop.f32.mrf.mxu1  ;;  %v15795_v52 = vld [vmem:[#allocation29_spill] sm:$0xff] }
 0x449   : > { %v7995_v12 = vsel %vm7899_vm12, %v7851_v10, %v7947_v5  ;;  %v7059_v21 = vadd.f32 %v7005_v8, %v6708_v19  ;;  %v7224_v62 = vadd.f32 %v14776_v48, %v14931_v2  ;;  %vm14993_vm1 = vcmp.lt.s32.totalorder %v8915_v41, 16 }
 0x44a   : > { %v8043_v28 = vmul.f32 1.4142135, %v7995_v12  ;;  %v7112_v55 = vadd.f32 %v7058_v43, %v6806_v13  ;;  %v7283_v1 = vadd.f32 %v14911_v61, %v14944_v49  ;;  %v14999_v39 = vadd.f32 %v6906_v50, %v6855_v31  ;;  %v10756_v59 = vpop.f32.mrf.mxu1 }
 0x44b   : > { %v7113_v17 = vadd.f32 %v7059_v21, %v6807_v57  ;;  %v7284_v0 = vadd.f32 %v7224_v62, %v14946_v14  ;;  %v8146_v6 = vadd.s32 288, %v15654_v45  ;;  %v15006_v3 = vadd.f32 %v10755_v33, %v15794_v23  ;;  %v10814_v57 = vpop.f32.mrf.mxu0 }
 0x44c   : > { %v8098_v48 = vmul.f32 %v14886_v29, %v8043_v28  ;;  %v7343_v2 = vadd.f32 %v7283_v1, %v14948_v44  ;;  %v5965_v35 = vadd.f32 %v10813_v7, %v14807_v34  ;;  %v7166_v47 = vadd.f32 %v7112_v55, %v6905_v11  ;;  %v7702_v11 = vpop.permute.xlu0 %7701  ;;  %v15796_v55 = vld [vmem:[#allocation26_spill] sm:$0xff] }
 0x44d   : > { %v7344_v61 = vadd.f32 %v7284_v0, %v14950_v60  ;;  %v15011_v49 = vmul.u32.u64.low 2863311531, %v14883_v40  ;;  %v15012_v19 = vmul.u32.u64.high 2863311531, %v14883_v40, %v15011_v49  ;;  %v15021_v32 = vadd.f32 %v7113_v17, %v6906_v50  ;;  %v5871_v41 = vpop.f32.mrf.mxu0 }
 0x44e   : > { %v9107_v14 = vsel %vm14993_vm1, %v8098_v48, 0.0  ;;  %v7403_v27 = vadd.f32 %v7343_v2, %v14959_v20  ;;  %v15017_v13 = vmul.u32.u64.low 2863311531, %v8146_v6  ;;  %v15018_v44 = vmul.u32.u64.high 2863311531, %v8146_v6, %v15017_v13  ;;  %6026 = vst.msk [vmem:[#allocation2 + $0x190] sm:$0xff] %vm5975_vm5, %v5965_v35  ;;  %v15797_v48 = vld [vmem:[#allocation28_spill] sm:$0xff] }
 0x44f   : > { %v9975_v34 = vpack.c.bf16 %v9107_v14, %v9107_v14  ;;  %v7404_v60 = vadd.f32 %v7344_v61, %v14963_v16  ;;  %v5963_v10 = vadd.f32 %v5868_v26, %v14827_v36  ;;  %v15027_v24 = vadd.f32 %v5391_v46, %v15795_v52 }
 0x450   : > { %v7458_v58 = vmul.f32 %v14823_v25, %v7403_v27  ;;  %v15031_v20 = vadd.f32 %v14923_v18, %v14969_v53  ;;  %v15034_v4 = vadd.f32 %v6953_v37, %v14923_v18  ;;  %v8549_v16 = vshrl.u32 %v15012_v19, 4  ;;  %v5394_v37 = vpop.f32.mrf.mxu1 }
 0x451   : > { %9348 = vst.msk [vmem:[%s12159_s26 + $0xac] sm:$0xf] %vm9310_vm4, %v9975_v34  ;;  %v7459_v7 = vmul.f32 %v14823_v25, %v7404_v60  ;;  %v15042_v36 = vadd.f32 %v7166_v47, %v14913_v9  ;;  %v15045_v5 = vadd.s32 304, %v15654_v45  ;;  %v8560_v18 = vshrl.u32 %v15018_v44, 4 }
 0x452   : > { %6024 = vst.msk [vmem:[#allocation2 + $0x180] sm:$0xff] %vm5975_vm5, %v5963_v10  ;;  %v7794_v53 = vadd.f32 %v14937_v22, %v7458_v58  ;;  %v5966_v8 = vadd.f32 %v10814_v57, %v14851_v56  ;;  %v15051_v33 = vadd.s32 328, %v15654_v45  ;;  %v8550_v50 = vmul.u32 24, %v8549_v16 }
 0x453   : > { %v7795_v31 = vadd.f32 %v7702_v11, %v7459_v7  ;;  %v15054_v43 = vmul.u32.u64.low 2863311531, %v15045_v5  ;;  %v15055_v12 = vmul.u32.u64.high 2863311531, %v15045_v5, %v15054_v43  ;;  %v8561_v62 = vmul.u32 24, %v8560_v18 }
 0x454   : > { %v7849_v21 = vadd.f32 %v14857_v38, %v7794_v53  ;;  %6027 = vst.msk [vmem:[#allocation2 + $0x198] sm:$0xff] %vm5975_vm5, %v5966_v8  ;;  %v15060_v22 = vmul.u32.u64.low 2863311531, %v15051_v33  ;;  %v15061_v28 = vmul.u32.u64.high 2863311531, %v15051_v33, %v15060_v22  ;;  %v8551_v63 = vsub.s32 %v14883_v40, %v8550_v50 }
 0x455   : > { %v7850_v56 = vadd.f32 %v14857_v38, %v7795_v31  ;;  %v15067_v1 = vadd.f32 %v10756_v59, %v15796_v55  ;;  %v5964_v26 = vadd.f32 %v5871_v41, %v14875_v15  ;;  %v8562_v0 = vsub.s32 %v8146_v6, %v8561_v62  ;;  %v6566_v46 = vld [vmem:[#allocation2 + $0x190] sm:$0xff] }
 0x456   : > { %vm7897_vm6 = vcmp.ge.f32.partialorder %v7849_v21, 0.0  ;;  %v7945_v17 = vmul.f32 0.2, %v7849_v21  ;;  %v15071_v2 = vadd.f32 %v5394_v37, %v15797_v48  ;;  %vm8721_vm8 = vcmp.ne.s32.totalorder %v8551_v63, 0 }
 0x457   : > { %vm7898_vm15 = vcmp.ge.f32.partialorder %v7850_v56, 0.0  ;;  %v7946_v23 = vmul.f32 0.2, %v7850_v56  ;;  %vm8769_vm2 = vcmp.lt.s32.totalorder %v8551_v63, 0  ;;  %6025 = vst.msk [vmem:[#allocation2 + $0x188] sm:$0xff] %vm5975_vm5, %v5964_v26  ;;  %vm8722_vm9 = vcmp.ne.s32.totalorder %v8562_v0, 0 }
 0x458   : > { %v7993_v35 = vsel %vm7897_vm6, %v7849_v21, %v7945_v17  ;;  %vm8770_vm7 = vcmp.lt.s32.totalorder %v8562_v0, 0  ;;  %vm15074_vm14 = vmand %vm8769_vm2, %vm8721_vm8  ;;  %v8865_v15 = vadd.s32 24, %v8551_v63  ;;  %v8866_v19 = vadd.s32 24, %v8562_v0 }
 0x459   : > { %v6179_v47 = vld [vmem:[#allocation2 + $0x179] sm:$0xff]  ;;  %v7994_v61 = vsel %vm7898_vm15, %v7850_v56, %v7946_v23  ;;  %v8041_v49 = vmul.f32 1.4142135, %v7993_v35  ;;  %vm8818_vm0 = vmand %vm8770_vm7, %vm8722_vm9  ;;  %v6614_v14 = vmul.f32 0.1875, %v6566_v46  ;;  %v7181_v57 = vmul.f32 0.0625, %v6566_v46 }
 0x45a   : > { %v6323_v6 = vld [vmem:[#allocation2 + $0x17a] sm:$0xff]  ;;  %v8042_v13 = vmul.f32 1.4142135, %v7994_v61  ;;  %v8913_v44 = vsel %vm15074_vm14, %v8865_v15, %v8551_v63  ;;  %v6227_v34 = vmul.f32 0.1875, %v6179_v47  ;;  %v8914_v59 = vsel %vm8818_vm0, %v8866_v19, %v8562_v0 }
 0x45b   : > { %v6467_v27 = vld [vmem:[#allocation2 + $0x17b] sm:$0xff]  ;;  %v8096_v10 = vmul.f32 %v14886_v29, %v8041_v49  ;;  %vm8961_vm10 = vcmp.lt.s32.totalorder %v8913_v44, 16  ;;  %v6371_v58 = vmul.f32 0.1875, %v6323_v6  ;;  %vm8962_vm11 = vcmp.lt.s32.totalorder %v8914_v59, 16  ;;  %v6665_v37 = vld [vmem:[#allocation2 + $0x191] sm:$0xff]  ;;  %v7712_v59 = vpop.permute.xlu0 %7711 }
 0x45c   : > { %v6564_v60 = vld [vmem:[#allocation2 + $0x180] sm:$0xff]  ;;  %v8097_v52 = vmul.f32 %v14886_v29, %v8042_v13  ;;  %v6275_v7 = vadd.f32 %v6227_v34, %v14913_v9  ;;  %v6515_v16 = vmul.f32 0.0625, %v6467_v27  ;;  %v6710_v18 = vmul.f32 0.5625, %v6179_v47  ;;  %v6764_v56 = vld [vmem:[#allocation2 + $0x192] sm:$0xff] }
 0x45d   : > { %v9105_v11 = vsel %vm8961_vm10, %v8096_v10, 0.0  ;;  %v6612_v53 = vmul.f32 0.1875, %v6564_v60  ;;  %v6809_v8 = vmul.f32 0.5625, %v6323_v6  ;;  %v6908_v43 = vmul.f32 0.1875, %v6467_v27  ;;  %v6863_v0 = vld [vmem:[#allocation2 + $0x193] sm:$0xff] }
 0x45e   : > { %v9106_v41 = vsel %vm8962_vm11, %v8097_v52, 0.0  ;;  %v9973_v31 = vpack.c.bf16 %v9105_v11, %v9105_v11  ;;  %v6419_v50 = vadd.f32 %v6371_v58, %v6275_v7  ;;  %v6758_v22 = vadd.f32 %v6710_v18, %v15031_v20  ;;  %v6960_v23 = vld [vmem:[#allocation2 + $0x198] sm:$0xff]  ;;  %v15108_v11 = vpop.permute.xlu1 %7716 }
 0x45f   : > { %v9974_v21 = vpack.c.bf16 %v9106_v41, %v9106_v41  ;;  %v15084_v62 = vadd.f32 %v6612_v53, %v14972_v51  ;;  %v7061_v9 = vadd.f32 %v15034_v4, %v6710_v18  ;;  %v15091_v55 = vadd.f32 %v14999_v39, %v6612_v53 }
 0x460   : > { %9346 = vst.msk [vmem:[%s12159_s26 + $0xa4] sm:$0xf] %vm9310_vm4, %v9973_v31  ;;  %v6563_v63 = vadd.f32 %v6515_v16, %v6419_v50  ;;  %v7286_v26 = vadd.f32 %v15042_v36, %v6227_v34  ;;  %v8582_v17 = vshrl.u32 %v15055_v12, 4  ;;  %v6857_v51 = vadd.f32 %v6809_v8, %v6758_v22 }
 0x461   : > { %9347 = vst.msk [vmem:[%s12159_s26 + $0xa8] sm:$0xf] %vm9310_vm4, %v9974_v21  ;;  %v7115_v46 = vadd.f32 %v7061_v9, %v6809_v8  ;;  %v7179_v48 = vmul.f32 0.0625, %v6564_v60  ;;  %v6713_v20 = vmul.f32 0.5625, %v6665_v37  ;;  %v6812_v15 = vmul.f32 0.5625, %v6764_v56  ;;  %v15105_v60 = vld [vmem:[#allocation2 + $0x188] sm:$0xff] }
 0x462   : > { %v7346_v4 = vadd.f32 %v7286_v26, %v6371_v58  ;;  %v8583_v35 = vmul.u32 24, %v8582_v17  ;;  %v6662_v40 = vadd.f32 %v6614_v14, %v6563_v63  ;;  %v6956_v47 = vadd.f32 %v6908_v43, %v6857_v51  ;;  %v6664_v8 = vld [vmem:[#allocation2 + $0x189] sm:$0xff] }
 0x463   : > { %v7169_v6 = vadd.f32 %v7115_v46, %v6908_v43  ;;  %v15098_v39 = vadd.f32 %v7179_v48, %v15021_v32  ;;  %v6911_v36 = vmul.f32 0.1875, %v6863_v0  ;;  %v15101_v19 = vmul.f32 0.1875, %v6960_v23  ;;  %v6763_v63 = vld [vmem:[#allocation2 + $0x18a] sm:$0xff] }
 0x464   : > { %v7406_v61 = vadd.f32 %v7346_v4, %v6515_v16  ;;  %v8584_v12 = vsub.s32 %v15045_v5, %v8583_v35  ;;  %v6761_v49 = vadd.f32 %v6713_v20, %v6662_v40  ;;  %v7010_v27 = vadd.f32 %v6956_v47, %v6614_v14  ;;  %v6663_v16 = vld [vmem:[#allocation2 + $0x181] sm:$0xff]  ;;  %v7727_v40 = vpop.permute.xlu1 %7726 }
 0x465   : > { %v15103_v13 = vmul.f32 0.0625, %v6960_v23  ;;  %v7229_v44 = vadd.f32 %v7181_v57, %v7169_v6  ;;  %v7241_v34 = vmul.f32 0.1875, %v6665_v37  ;;  %v7301_v7 = vmul.f32 0.1875, %v6764_v56  ;;  %v6762_v56 = vld [vmem:[#allocation2 + $0x182] sm:$0xff]  ;;  %v6862_v6 = vld [vmem:[#allocation2 + $0x18b] sm:$0xff] }
 0x466   : > { %v7461_v10 = vmul.f32 %v14823_v25, %v7406_v61  ;;  %vm8724_vm3 = vcmp.ne.s32.totalorder %v8584_v12, 0  ;;  %vm8772_vm13 = vcmp.lt.s32.totalorder %v8584_v12, 0  ;;  %v8868_v32 = vadd.s32 24, %v8584_v12 }
 0x467   : > { %vm8820_vm12 = vmand %vm8772_vm13, %vm8724_vm3  ;;  %v6860_v58 = vadd.f32 %v6812_v15, %v6761_v49  ;;  %v7064_v52 = vadd.f32 %v7010_v27, %v6713_v20  ;;  %v7289_v5 = vadd.f32 %v7241_v34, %v7229_v44  ;;  %v8615_v57 = vshrl.u32 %v15061_v28, 4  ;;  %v6861_v20 = vld [vmem:[#allocation2 + $0x183] sm:$0xff] }
 0x468   : > { %v7797_v14 = vadd.f32 %v7712_v59, %v7461_v10  ;;  %v8916_v53 = vsel %vm8820_vm12, %v8868_v32, %v8584_v12  ;;  %v6613_v18 = vmul.f32 0.1875, %v15105_v60  ;;  %v7361_v43 = vmul.f32 0.0625, %v6863_v0 }
 0x469   : > { %vm15112_vm1 = vcmp.lt.s32.totalorder %v8916_v53, 16  ;;  %v7118_v31 = vadd.f32 %v7064_v52, %v6812_v15  ;;  %v7349_v50 = vadd.f32 %v7301_v7, %v7289_v5  ;;  %v8616_v21 = vmul.u32 24, %v8615_v57  ;;  %v10759_v57 = vpop.f32.mrf.mxu1 }
 0x46a   : > { %v7852_v37 = vadd.f32 %v14857_v38, %v7797_v14  ;;  %v6661_v22 = vadd.f32 %v6613_v18, %v14927_v30  ;;  %v6711_v9 = vmul.f32 0.5625, %v6663_v16  ;;  %v15118_v26 = vadd.f32 %v6911_v36, %v6860_v58  ;;  %v10817_v58 = vpop.f32.mrf.mxu0 }
 0x46b   : > { %v15120_v28 = vadd.f32 %v7118_v31, %v6911_v36  ;;  %v7409_v17 = vadd.f32 %v7361_v43, %v7349_v50  ;;  %v6712_v51 = vmul.f32 0.5625, %v6664_v8  ;;  %v8617_v48 = vsub.s32 %v15051_v33, %v8616_v21 }
 0x46c   : > { %vm7900_vm6 = vcmp.ge.f32.partialorder %v7852_v37, 0.0  ;;  %v7948_v46 = vmul.f32 0.2, %v7852_v37  ;;  %v6759_v0 = vadd.f32 %v6711_v9, %v15084_v62  ;;  %v6810_v30 = vmul.f32 0.5625, %v6762_v56 }
 0x46d   : > { %v7464_v23 = vmul.f32 %v14823_v25, %v7409_v17  ;;  %v6760_v4 = vadd.f32 %v6712_v51, %v6661_v22  ;;  %v6811_v35 = vmul.f32 0.5625, %v6763_v63  ;;  %vm8727_vm15 = vcmp.ne.s32.totalorder %v8617_v48, 0  ;;  %v5884_v17 = vpop.f32.mrf.mxu0 }
 0x46e   : > { %v7996_v15 = vsel %vm7900_vm6, %v7852_v37, %v7948_v46  ;;  %vm8775_vm8 = vcmp.lt.s32.totalorder %v8617_v48, 0  ;;  %v8871_v47 = vadd.s32 24, %v8617_v48  ;;  %v6858_v12 = vadd.f32 %v6810_v30, %v6759_v0 }
 0x46f   : > { %v8044_v36 = vmul.f32 1.4142135, %v7996_v15  ;;  %v7800_v61 = vadd.f32 %v7727_v40, %v7464_v23  ;;  %vm8823_vm2 = vmand %vm8775_vm8, %vm8727_vm15  ;;  %v6909_v49 = vmul.f32 0.1875, %v6861_v20  ;;  %v6859_v27 = vadd.f32 %v6811_v35, %v6760_v4  ;;  %v5407_v4 = vpop.f32.mrf.mxu1 }
 0x470   : > { %v8919_v33 = vsel %vm8823_vm2, %v8871_v47, %v8617_v48  ;;  %v7009_v62 = vadd.f32 %v14956_v54, %v6613_v18  ;;  %v7062_v44 = vadd.f32 %v15091_v55, %v6711_v9  ;;  %v6910_v59 = vmul.f32 0.1875, %v6862_v6 }
 0x471   : > { %v8099_v34 = vmul.f32 %v14886_v29, %v8044_v36  ;;  %v7855_v10 = vadd.f32 %v14857_v38, %v7800_v61  ;;  %vm15129_vm9 = vcmp.lt.s32.totalorder %v8919_v33, 16  ;;  %v6957_v52 = vadd.f32 %v6909_v49, %v6858_v12  ;;  %v15804_v33 = vld [vmem:[#allocation30_spill] sm:$0xff] }
 0x472   : > { %v7063_v5 = vadd.f32 %v7009_v62, %v6712_v51  ;;  %v7116_v7 = vadd.f32 %v7062_v44, %v6810_v30  ;;  %v7180_v14 = vmul.f32 0.0625, %v15105_v60  ;;  %v7239_v53 = vmul.f32 0.1875, %v6663_v16 }
 0x473   : > { %v9108_v54 = vsel %vm15112_vm1, %v8099_v34, 0.0  ;;  %vm7903_vm7 = vcmp.ge.f32.partialorder %v7855_v10, 0.0  ;;  %v7951_v55 = vmul.f32 0.2, %v7855_v10  ;;  %v15136_v31 = vadd.f32 %v6910_v59, %v6859_v27 }
 0x474   : > { %v9976_v18 = vpack.c.bf16 %v9108_v54, %v9108_v54  ;;  %v7117_v50 = vadd.f32 %v7063_v5, %v6811_v35  ;;  %v7228_v43 = vadd.f32 %v7180_v14, %v14966_v42  ;;  %v7240_v21 = vmul.f32 0.1875, %v6664_v8 }
 0x475   : > { %v7999_v37 = vsel %vm7903_vm7, %v7855_v10, %v7951_v55  ;;  %v7287_v22 = vadd.f32 %v7239_v53, %v15098_v39  ;;  %v7299_v9 = vmul.f32 0.1875, %v6762_v56  ;;  %v7170_v41 = vadd.f32 %v7116_v7, %v6909_v49  ;;  %v10760_v49 = vpop.f32.mrf.mxu1 }
 0x476   : > { %9349 = vst.msk [vmem:[%s12159_s26 + $0xb0] sm:$0xf] %vm9310_vm4, %v9976_v18  ;;  %v8047_v60 = vmul.f32 1.4142135, %v7999_v37  ;;  %v15142_v51 = vadd.f32 %v7117_v50, %v6910_v59  ;;  %v7300_v16 = vmul.f32 0.1875, %v6763_v63  ;;  %v7288_v46 = vadd.f32 %v7240_v21, %v7228_v43  ;;  %v10818_v63 = vpop.f32.mrf.mxu0 }
 0x477   : > { %v7347_v48 = vadd.f32 %v7299_v9, %v7287_v22  ;;  %v7359_v0 = vmul.f32 0.0625, %v6861_v20  ;;  %v8149_v23 = vadd.s32 312, %v15654_v45  ;;  %v7360_v8 = vmul.f32 0.0625, %v6862_v6  ;;  %v5410_v54 = vpop.f32.mrf.mxu1 }
 0x478   : > { %v8102_v42 = vmul.f32 %v14886_v29, %v8047_v60  ;;  %v8150_v39 = vadd.s32 320, %v15654_v45  ;;  %v5969_v56 = vadd.f32 %v10817_v58, %v15006_v3  ;;  %v7348_v30 = vadd.f32 %v7300_v16, %v7288_v46  ;;  %v5887_v58 = vpop.f32.mrf.mxu0 }
 0x479   : > { %v7407_v35 = vadd.f32 %v7359_v0, %v7347_v48  ;;  %v15148_v40 = vmul.u32.u64.low 2863311531, %v8149_v23  ;;  %v15149_v15 = vmul.u32.u64.high 2863311531, %v8149_v23, %v15148_v40  ;;  %v5967_v3 = vadd.f32 %v5884_v17, %v15027_v24  ;;  %v15805_v17 = vld [vmem:[#allocation32_spill] sm:$0xff]  ;;  %v15232_v48 = vpop.permute.xlu1 %7736 }
 0x47a   : > { %v9111_v20 = vsel %vm15129_vm9, %v8102_v42, 0.0  ;;  %v15153_v47 = vmul.u32.u64.low 2863311531, %v8150_v39  ;;  %v15154_v36 = vmul.u32.u64.high 2863311531, %v8150_v39, %v15153_v47  ;;  %6030 = vst.msk [vmem:[#allocation2 + $0x1b0] sm:$0xff] %vm5975_vm5, %v5969_v56  ;;  %v7408_v61 = vadd.f32 %v7360_v8, %v7348_v30 }
 0x47b   : > { %v9979_v6 = vpack.c.bf16 %v9111_v20, %v9111_v20  ;;  %v7462_v12 = vmul.f32 %v14823_v25, %v7407_v35  ;;  %v15160_v27 = vadd.f32 %v5407_v4, %v15804_v33  ;;  %v7011_v62 = vadd.f32 %v15101_v19, %v6957_v52  ;;  %6028 = vst.msk [vmem:[#allocation2 + $0x1a0] sm:$0xff] %vm5975_vm5, %v5967_v3  ;;  %v7722_v19 = vpop.permute.xlu0 %7721 }
 0x47c   : > { %v15164_v44 = vadd.f32 %v15103_v13, %v7170_v41  ;;  %v15167_v34 = vadd.s32 336, %v15654_v45  ;;  %v7463_v10 = vmul.f32 %v14823_v25, %v7408_v61  ;;  %v8593_v24 = vshrl.u32 %v15149_v15, 4 }
 0x47d   : > { %9352 = vst.msk [vmem:[%s12159_s26 + $0xbc] sm:$0xf] %vm9310_vm4, %v9979_v6  ;;  %v7798_v32 = vadd.f32 %v15108_v11, %v7462_v12  ;;  %v5970_v59 = vadd.f32 %v10818_v63, %v15067_v1  ;;  %v8604_v13 = vshrl.u32 %v15154_v36, 4  ;;  %v15182_v7 = vadd.s32 360, %v15654_v45 }
 0x47e   : > { %v15178_v52 = vmul.u32.u64.low 2863311531, %v15167_v34  ;;  %v15179_v5 = vmul.u32.u64.high 2863311531, %v15167_v34, %v15178_v52  ;;  %v7799_v25 = vadd.f32 %v7722_v19, %v7463_v10  ;;  %v8594_v14 = vmul.u32 24, %v8593_v24 }
 0x47f   : > { %v7853_v11 = vadd.f32 %v14857_v38, %v7798_v32  ;;  %6031 = vst.msk [vmem:[#allocation2 + $0x1b8] sm:$0xff] %vm5975_vm5, %v5970_v59  ;;  %v8605_v55 = vmul.u32 24, %v8604_v13  ;;  %v15187_v1 = vmul.u32.u64.low 2863311531, %v15182_v7  ;;  %v15188_v53 = vmul.u32.u64.high 2863311531, %v15182_v7, %v15187_v1 }
 0x480   : > { %v5968_v57 = vadd.f32 %v5887_v58, %v15071_v2  ;;  %v7854_v18 = vadd.f32 %v14857_v38, %v7799_v25  ;;  %v8595_v43 = vsub.s32 %v8149_v23, %v8594_v14  ;;  %v8626_v9 = vshrl.u32 %v15179_v5, 4 }
 0x481   : > { %vm7901_vm14 = vcmp.ge.f32.partialorder %v7853_v11, 0.0  ;;  %v7949_v50 = vmul.f32 0.2, %v7853_v11  ;;  %v7176_v37 = vld [vmem:[#allocation2 + $0x1b0] sm:$0xff]  ;;  %v8606_v21 = vsub.s32 %v8150_v39, %v8605_v55  ;;  %v15196_v60 = vadd.f32 %v5410_v54, %v15805_v17 }
 0x482   : > { %v15192_v22 = vmul.f32 0.0625, %v7176_v37  ;;  %6029 = vst.msk [vmem:[#allocation2 + $0x1a8] sm:$0xff] %vm5975_vm5, %v5968_v57  ;;  %vm7902_vm0 = vcmp.ge.f32.partialorder %v7854_v18, 0.0  ;;  %v7950_v41 = vmul.f32 0.2, %v7854_v18  ;;  %vm8725_vm10 = vcmp.ne.s32.totalorder %v8595_v43, 0 }
 0x483   : > { %v7997_v16 = vsel %vm7901_vm14, %v7853_v11, %v7949_v50  ;;  %vm8726_vm11 = vcmp.ne.s32.totalorder %v8606_v21, 0  ;;  %vm8773_vm3 = vcmp.lt.s32.totalorder %v8595_v43, 0  ;;  %vm8774_vm13 = vcmp.lt.s32.totalorder %v8606_v21, 0  ;;  %v6961_v38 = vld [vmem:[#allocation2 + $0x1a0] sm:$0xff] }
 0x484   : > { %v8045_v2 = vmul.f32 1.4142135, %v7997_v16  ;;  %v7998_v46 = vsel %vm7902_vm0, %v7854_v18, %v7950_v41  ;;  %vm15199_vm12 = vmand %vm8773_vm3, %vm8725_vm10  ;;  %v8869_v0 = vadd.s32 24, %v8595_v43  ;;  %v8870_v23 = vadd.s32 24, %v8606_v21  ;;  %v7014_v42 = vld [vmem:[#allocation2 + $0x199] sm:$0xff] }
 0x485   : > { %v6964_v4 = vmul.f32 0.1875, %v6961_v38  ;;  %v7068_v8 = vld [vmem:[#allocation2 + $0x19a] sm:$0xff]  ;;  %v8046_v39 = vmul.f32 1.4142135, %v7998_v46  ;;  %vm8822_vm1 = vmand %vm8774_vm13, %vm8726_vm11  ;;  %v7017_v30 = vmul.f32 0.5625, %v7014_v42  ;;  %v15205_v40 = vadd.s32 344, %v15654_v45 }
 0x486   : > { %v8100_v56 = vmul.f32 %v14886_v29, %v8045_v2  ;;  %v7122_v35 = vld [vmem:[#allocation2 + $0x19b] sm:$0xff]  ;;  %v8917_v15 = vsel %vm15199_vm12, %v8869_v0, %v8595_v43  ;;  %v8918_v63 = vsel %vm8822_vm1, %v8870_v23, %v8606_v21  ;;  %v7071_v47 = vmul.f32 0.5625, %v7068_v8  ;;  %v7236_v10 = vld [vmem:[#allocation2 + $0x1b1] sm:$0xff] }
 0x487   : > { %v7012_v20 = vadd.f32 %v6964_v4, %v15136_v31  ;;  %v8101_v36 = vmul.f32 %v14886_v29, %v8046_v39  ;;  %vm8965_vm6 = vcmp.lt.s32.totalorder %v8917_v15, 16  ;;  %vm8966_vm15 = vcmp.lt.s32.totalorder %v8918_v63, 16  ;;  %v7177_v33 = vld [vmem:[#allocation2 + $0x1b8] sm:$0xff]  ;;  %v15235_v0 = vld [vmem:[%s13549_s23] ss:$0 sm:$0xff]  ;;  %v10821_v39 = vpop.f32.mrf.mxu0 }
 0x488   : > { %v7065_v6 = vadd.f32 %v7017_v30, %v7011_v62  ;;  %v9109_v61 = vsel %vm8965_vm6, %v8100_v56, 0.0  ;;  %v7125_v12 = vmul.f32 0.1875, %v7122_v35  ;;  %v7183_v3 = vmul.f32 0.0625, %v6961_v38  ;;  %v7296_v19 = vld [vmem:[#allocation2 + $0x1b2] sm:$0xff]  ;;  %v7732_v56 = vpop.permute.xlu0 %7731 }
 0x489   : > { %v7242_v49 = vmul.f32 0.1875, %v7014_v42  ;;  %v9110_v32 = vsel %vm8966_vm15, %v8101_v36, 0.0  ;;  %v9977_v24 = vpack.c.bf16 %v9109_v61, %v9109_v61  ;;  %v7302_v58 = vmul.f32 0.1875, %v7068_v8  ;;  %v6962_v5 = vld [vmem:[#allocation2 + $0x1a8] sm:$0xff]  ;;  %v7356_v43 = vld [vmem:[#allocation2 + $0x1b3] sm:$0xff] }
 0x48a   : > { %v7119_v59 = vadd.f32 %v7071_v47, %v7065_v6  ;;  %v9978_v31 = vpack.c.bf16 %v9110_v32, %v9110_v32  ;;  %v7362_v29 = vmul.f32 0.0625, %v7122_v35  ;;  %v8627_v52 = vmul.u32 24, %v8626_v9  ;;  %v7015_v62 = vld [vmem:[#allocation2 + $0x1a1] sm:$0xff]  ;;  %v15212_v25 = vld [vmem:[#allocation2 + $0x1a9] sm:$0xff]  ;;  %v5900_v32 = vpop.f32.mrf.mxu0 }
 0x48b   : > { %v7290_v13 = vadd.f32 %v7242_v49, %v15164_v44  ;;  %9350 = vst.msk [vmem:[%s12159_s26 + $0xb4] sm:$0xf] %vm9310_vm4, %v9977_v24  ;;  %v15217_v14 = vadd.f32 %v7183_v3, %v15142_v51  ;;  %v15219_v54 = vmul.f32 0.0625, %v7177_v33  ;;  %v7245_v55 = vmul.f32 0.1875, %v7236_v10  ;;  %v7069_v9 = vld [vmem:[#allocation2 + $0x1a2] sm:$0xff]  ;;  %v7070_v16 = vld [vmem:[#allocation2 + $0x1aa] sm:$0xff] }
 0x48c   : > { %v7173_v11 = vadd.f32 %v7125_v12, %v7119_v59  ;;  %9351 = vst.msk [vmem:[%s12159_s26 + $0xb8] sm:$0xf] %vm9310_vm4, %v9978_v31  ;;  %v8628_v44 = vsub.s32 %v15167_v34, %v8627_v52  ;;  %v7305_v57 = vmul.f32 0.1875, %v7296_v19  ;;  %v8659_v18 = vshrl.u32 %v15188_v53, 4  ;;  %v7123_v46 = vld [vmem:[#allocation2 + $0x1a3] sm:$0xff]  ;;  %v7124_v63 = vld [vmem:[#allocation2 + $0x1ab] sm:$0xff]  ;;  %v7747_v31 = vpop.permute.xlu1 %7746 }
 0x48d   : > { %v7350_v1 = vadd.f32 %v7302_v58, %v7290_v13  ;;  %v6965_v37 = vmul.f32 0.1875, %v6962_v5  ;;  %v7018_v21 = vmul.f32 0.5625, %v7015_v62  ;;  %v7019_v51 = vmul.f32 0.5625, %v15212_v25  ;;  %v15248_v3 = vld [vmem:[%s15339_s5] ss:$0 sm:$0xff] }
 0x48e   : > { %v7233_v50 = vadd.f32 %v15192_v22, %v7173_v11  ;;  %vm8728_vm8 = vcmp.ne.s32.totalorder %v8628_v44, 0  ;;  %vm8776_vm2 = vcmp.lt.s32.totalorder %v8628_v44, 0  ;;  %v8872_v41 = vadd.s32 24, %v8628_v44 }
 0x48f   : > { %v7410_v17 = vadd.f32 %v7362_v29, %v7350_v1  ;;  %vm15227_vm9 = vmand %vm8776_vm2, %vm8728_vm8  ;;  %v8660_v53 = vmul.u32 24, %v8659_v18  ;;  %v7013_v22 = vadd.f32 %v6965_v37, %v15118_v26  ;;  %v7066_v38 = vadd.f32 %v7018_v21, %v7012_v20 }
 0x490   : > { %v7293_v34 = vadd.f32 %v7245_v55, %v7233_v50  ;;  %v8920_v4 = vsel %vm15227_vm9, %v8872_v41, %v8628_v44  ;;  %v7365_v42 = vmul.f32 0.0625, %v7356_v43  ;;  %v7072_v8 = vmul.f32 0.5625, %v7069_v9  ;;  %v10822_v43 = vpop.f32.mrf.mxu0 }
 0x491   : > { %v7465_v23 = vmul.f32 %v15235_v0, %v7410_v17  ;;  %v8661_v35 = vsub.s32 %v15182_v7, %v8660_v53  ;;  %v7067_v15 = vadd.f32 %v7019_v51, %v7013_v22  ;;  %v7073_v26 = vmul.f32 0.5625, %v7070_v16 }
 0x492   : > { %v7353_v30 = vadd.f32 %v7305_v57, %v7293_v34  ;;  %vm15241_vm7 = vcmp.lt.s32.totalorder %v8920_v4, 16  ;;  %v7120_v36 = vadd.f32 %v7072_v8, %v7066_v38  ;;  %v7126_v6 = vmul.f32 0.1875, %v7123_v46 }
 0x493   : > { %v7801_v20 = vadd.f32 %v7732_v56, %v7465_v23  ;;  %vm8731_vm14 = vcmp.ne.s32.totalorder %v8661_v35, 0  ;;  %vm8779_vm0 = vcmp.lt.s32.totalorder %v8661_v35, 0  ;;  %v8875_v12 = vadd.s32 24, %v8661_v35 }
 0x494   : > { %v7413_v61 = vadd.f32 %v7365_v42, %v7353_v30  ;;  %vm8827_vm10 = vmand %vm8779_vm0, %vm8731_vm14  ;;  %v7121_v49 = vadd.f32 %v7073_v26, %v7067_v15  ;;  %v7127_v33 = vmul.f32 0.1875, %v7124_v63  ;;  %v7174_v10 = vadd.f32 %v7126_v6, %v7120_v36 }
 0x495   : > { %v7856_v7 = vadd.f32 %v15248_v3, %v7801_v20  ;;  %v8923_v59 = vsel %vm8827_vm10, %v8875_v12, %v8661_v35  ;;  %v7184_v58 = vmul.f32 0.0625, %v6962_v5  ;;  %v7243_v19 = vmul.f32 0.1875, %v7015_v62 }
 0x496   : > { %v7468_v24 = vmul.f32 %v15235_v0, %v7413_v61  ;;  %v15252_v29 = vadd.f32 %v7127_v33, %v7121_v49  ;;  %v7244_v52 = vmul.f32 0.1875, %v15212_v25  ;;  %vm15255_vm3 = vcmp.lt.s32.totalorder %v8923_v59, 16 }
 0x497   : > { %vm7904_vm11 = vcmp.ge.f32.partialorder %v7856_v7, 0.0  ;;  %v7952_v13 = vmul.f32 0.2, %v7856_v7  ;;  %v7232_v1 = vadd.f32 %v7184_v58, %v15120_v28  ;;  %v7291_v44 = vadd.f32 %v7243_v19, %v15217_v14  ;;  %v15268_v28 = vld [vmem:[%s13590_s29] ss:$0 sm:$0xff] }
 0x498   : > { %v7804_v11 = vadd.f32 %v7747_v31, %v7468_v24  ;;  %v7303_v57 = vmul.f32 0.1875, %v7069_v9  ;;  %v7304_v62 = vmul.f32 0.1875, %v7070_v16  ;;  %v7363_v18 = vmul.f32 0.0625, %v7123_v46  ;;  %v5903_v46 = vpop.f32.mrf.mxu0 }
 0x499   : > { %v8000_v5 = vsel %vm7904_vm11, %v7856_v7, %v7952_v13  ;;  %v7364_v50 = vmul.f32 0.0625, %v7124_v63  ;;  %v7292_v25 = vadd.f32 %v7244_v52, %v7232_v1  ;;  %v8154_v17 = vadd.s32 352, %v15654_v45  ;;  %v7742_v63 = vpop.permute.xlu0 %7741 }
 0x49a   : > { %v8048_v37 = vmul.f32 1.4142135, %v8000_v5  ;;  %v7859_v21 = vadd.f32 %v15248_v3, %v7804_v11  ;;  %v7351_v51 = vadd.f32 %v7303_v57, %v7291_v44  ;;  %v5971_v38 = vadd.f32 %v5900_v32, %v15160_v27 }
 0x49b   : > { %v15264_v41 = vmul.u32.u64.low 2863311531, %v15205_v40  ;;  %v15265_v2 = vmul.u32.u64.high 2863311531, %v15205_v40, %v15264_v41  ;;  %v7352_v16 = vadd.f32 %v7304_v62, %v7292_v25  ;;  %v7234_v8 = vadd.f32 %v15219_v54, %v7174_v10 }
 0x49c   : > { %v8103_v14 = vmul.f32 %v15268_v28, %v8048_v37  ;;  %vm7907_vm13 = vcmp.ge.f32.partialorder %v7859_v21, 0.0  ;;  %v7955_v9 = vmul.f32 0.2, %v7859_v21  ;;  %v7411_v34 = vadd.f32 %v7363_v18, %v7351_v51  ;;  %6032 = vst.msk [vmem:[#allocation2 + $0x1c0] sm:$0xff] %vm5975_vm5, %v5971_v38 }
 0x49d   : > { %v15271_v53 = vmul.u32.u64.low 2863311531, %v8154_v17  ;;  %v15272_v22 = vmul.u32.u64.high 2863311531, %v8154_v17, %v15271_v53  ;;  %v7412_v42 = vadd.f32 %v7364_v50, %v7352_v16  ;;  %v8637_v35 = vshrl.u32 %v15265_v2, 4 }
 0x49e   : > { %v9112_v23 = vsel %vm15241_vm7, %v8103_v14, 0.0  ;;  %v8003_v4 = vsel %vm7907_vm13, %v7859_v21, %v7955_v9  ;;  %v7466_v30 = vmul.f32 %v15235_v0, %v7411_v34  ;;  %v15283_v27 = vadd.s32 368, %v15654_v45 }
 0x49f   : > { %v9980_v39 = vpack.c.bf16 %v9112_v23, %v9112_v23  ;;  %v8051_v56 = vmul.f32 1.4142135, %v8003_v4  ;;  %v7467_v15 = vmul.f32 %v15235_v0, %v7412_v42  ;;  %v5972_v26 = vadd.f32 %v5903_v46, %v15196_v60 }
 0x4a0   : > { %v7802_v20 = vadd.f32 %v15232_v48, %v7466_v30  ;;  %v8638_v47 = vmul.u32 24, %v8637_v35  ;;  %v8648_v36 = vshrl.u32 %v15272_v22, 4  ;;  %v15297_v60 = vadd.s32 376, %v15654_v45 }
 0x4a1   : > { %9353 = vst.msk [vmem:[%s12159_s26 + $0xc0] sm:$0xf] %vm9310_vm4, %v9980_v39  ;;  %v8106_v54 = vmul.f32 %v15268_v28, %v8051_v56  ;;  %v7803_v6 = vadd.f32 %v7742_v63, %v7467_v15  ;;  %v15292_v61 = vmul.u32.u64.low 2863311531, %v15283_v27  ;;  %v15293_v12 = vmul.u32.u64.high 2863311531, %v15283_v27, %v15292_v61  ;;  %v7752_v63 = vpop.permute.xlu0 %7751 }
 0x4a2   : > { %6033 = vst.msk [vmem:[#allocation2 + $0x1c8] sm:$0xff] %vm5975_vm5, %v5972_v26  ;;  %v7857_v49 = vadd.f32 %v15248_v3, %v7802_v20  ;;  %v8639_v48 = vsub.s32 %v15205_v40, %v8638_v47  ;;  %v8649_v33 = vmul.u32 24, %v8648_v36  ;;  %v7757_v61 = vpop.permute.xlu1 %7756 }
 0x4a3   : > { %v9115_v7 = vsel %vm15255_vm3, %v8106_v54, 0.0  ;;  %v7858_v32 = vadd.f32 %v15248_v3, %v7803_v6  ;;  %v15305_v24 = vmul.u32.u64.low 2863311531, %v15297_v60  ;;  %v15306_v59 = vmul.u32.u64.high 2863311531, %v15297_v60, %v15305_v24  ;;  %v7178_v13 = vld [vmem:[#allocation2 + $0x1c0] sm:$0xff] }
 0x4a4   : > { %v9983_v10 = vpack.c.bf16 %v9115_v7, %v9115_v7  ;;  %vm7905_vm12 = vcmp.ge.f32.partialorder %v7857_v49, 0.0  ;;  %v7953_v58 = vmul.f32 0.2, %v7857_v49  ;;  %v8650_v19 = vsub.s32 %v8154_v17, %v8649_v33  ;;  %v7237_v11 = vld [vmem:[#allocation2 + $0x1b9] sm:$0xff] }
 0x4a5   : > { %vm8729_vm5 = vcmp.ne.s32.totalorder %v8639_v48, 0  ;;  %vm7906_vm1 = vcmp.ge.f32.partialorder %v7858_v32, 0.0  ;;  %v7954_v45 = vmul.f32 0.2, %v7858_v32  ;;  %vm8777_vm6 = vcmp.lt.s32.totalorder %v8639_v48, 0  ;;  %v7297_v5 = vld [vmem:[#allocation2 + $0x1ba] sm:$0xff] }
 0x4a6   : > { %9356 = vst.msk [vmem:[%s12159_s26 + $0xcc] sm:$0xf] %vm9310_vm4, %v9983_v10  ;;  %v8873_v31 = vadd.s32 24, %v8639_v48  ;;  %v8001_v40 = vsel %vm7905_vm12, %v7857_v49, %v7953_v58  ;;  %vm8730_vm15 = vcmp.ne.s32.totalorder %v8650_v19, 0  ;;  %vm8778_vm8 = vcmp.lt.s32.totalorder %v8650_v19, 0  ;;  %vm8825_vm2 = vmand %vm8777_vm6, %vm8729_vm5  ;;  %v7357_v43 = vld [vmem:[#allocation2 + $0x1bb] sm:$0xff] }
 0x4a7   : > { %v8874_v52 = vadd.s32 24, %v8650_v19  ;;  %v8002_v55 = vsel %vm7906_vm1, %v7858_v32, %v7954_v45  ;;  %v8049_v1 = vmul.f32 1.4142135, %v8001_v40  ;;  %vm8826_vm9 = vmand %vm8778_vm8, %vm8730_vm15  ;;  %v7187_v57 = vmul.f32 0.0625, %v7178_v13 }
 0x4a8   : > { %v8921_v44 = vsel %vm8825_vm2, %v8873_v31, %v8639_v48  ;;  %v8050_v62 = vmul.f32 1.4142135, %v8002_v55  ;;  %v7246_v50 = vmul.f32 0.1875, %v7237_v11  ;;  %v7306_v41 = vmul.f32 0.1875, %v7297_v5 }
 0x4a9   : > { %v8922_v18 = vsel %vm8826_vm9, %v8874_v52, %v8650_v19  ;;  %vm8969_vm7 = vcmp.lt.s32.totalorder %v8921_v44, 16  ;;  %v7238_v37 = vld [vmem:[#allocation2 + $0x1c1] sm:$0xff]  ;;  %v8104_v21 = vmul.f32 %v15268_v28, %v8049_v1  ;;  %v7235_v25 = vadd.f32 %v7187_v57, %v15252_v29 }
 0x4aa   : > { %vm8970_vm14 = vcmp.lt.s32.totalorder %v8922_v18, 16  ;;  %v8105_v51 = vmul.f32 %v15268_v28, %v8050_v62  ;;  %v7294_v17 = vadd.f32 %v7246_v50, %v7234_v8  ;;  %v8670_v2 = vshrl.u32 %v15293_v12, 4  ;;  %v7298_v14 = vld [vmem:[#allocation2 + $0x1c2] sm:$0xff] }
 0x4ab   : > { %v9113_v9 = vsel %vm8969_vm7, %v8104_v21, 0.0  ;;  %v7366_v16 = vmul.f32 0.0625, %v7357_v43  ;;  %v7247_v34 = vmul.f32 0.1875, %v7238_v37  ;;  %v7358_v23 = vld [vmem:[#allocation2 + $0x1c3] sm:$0xff]  ;;  %v7307_v29 = vmul.f32 0.1875, %v7298_v14 }
 0x4ac   : > { %v9114_v53 = vsel %vm8970_vm14, %v8105_v51, 0.0  ;;  %v9981_v22 = vpack.c.bf16 %v9113_v9, %v9113_v9  ;;  %v7354_v38 = vadd.f32 %v7306_v41, %v7294_v17  ;;  %v8671_v46 = vmul.u32 24, %v8670_v2 }
 0x4ad   : > { %v9982_v4 = vpack.c.bf16 %v9114_v53, %v9114_v53  ;;  %v7295_v42 = vadd.f32 %v7247_v34, %v7235_v25  ;;  %v8681_v39 = vshrl.u32 %v15306_v59, 4  ;;  %v7367_v35 = vmul.f32 0.0625, %v7358_v23 }
 0x4ae   : > { %9354 = vst.msk [vmem:[%s12159_s26 + $0xc4] sm:$0xf] %vm9310_vm4, %v9981_v22  ;;  %v7414_v8 = vadd.f32 %v7366_v16, %v7354_v38  ;;  %v8672_v56 = vsub.s32 %v15283_v27, %v8671_v46 }
 0x4af   : > { %9355 = vst.msk [vmem:[%s12159_s26 + $0xc8] sm:$0xf] %vm9310_vm4, %v9982_v4  ;;  %v7355_v30 = vadd.f32 %v7307_v29, %v7295_v42  ;;  %v8682_v15 = vmul.u32 24, %v8681_v39 }
 0x4b0   : > { %v7469_v26 = vmul.f32 %v15235_v0, %v7414_v8  ;;  %vm8732_vm0 = vcmp.ne.s32.totalorder %v8672_v56, 0  ;;  %vm8780_vm10 = vcmp.lt.s32.totalorder %v8672_v56, 0  ;;  %v8876_v36 = vadd.s32 24, %v8672_v56 }
 0x4b1   : > { %v7415_v54 = vadd.f32 %v7367_v35, %v7355_v30  ;;  %v8683_v20 = vsub.s32 %v15297_v60, %v8682_v15  ;;  %vm8828_vm11 = vmand %vm8780_vm10, %vm8732_vm0 }
 0x4b2   : > { %v7805_v47 = vadd.f32 %v7752_v63, %v7469_v26  ;;  %v8924_v48 = vsel %vm8828_vm11, %v8876_v36, %v8672_v56 }
 0x4b3   : > { %v7470_v6 = vmul.f32 %v15235_v0, %v7415_v54  ;;  %vm8733_vm3 = vcmp.ne.s32.totalorder %v8683_v20, 0  ;;  %vm8781_vm13 = vcmp.lt.s32.totalorder %v8683_v20, 0  ;;  %v8877_v49 = vadd.s32 24, %v8683_v20 }
 0x4b4   : > { %v7860_v27 = vadd.f32 %v15248_v3, %v7805_v47  ;;  %vm8829_vm5 = vmand %vm8781_vm13, %vm8733_vm3  ;;  %vm8972_vm6 = vcmp.lt.s32.totalorder %v8924_v48, 16 }
 0x4b5   : > { %v7806_v12 = vadd.f32 %v7757_v61, %v7470_v6  ;;  %v8925_v32 = vsel %vm8829_vm5, %v8877_v49, %v8683_v20 }
 0x4b6   : > { %vm7908_vm12 = vcmp.ge.f32.partialorder %v7860_v27, 0.0  ;;  %v7956_v7 = vmul.f32 0.2, %v7860_v27  ;;  %vm8973_vm15 = vcmp.lt.s32.totalorder %v8925_v32, 16 }
 0x4b7   : > { %v7861_v33 = vadd.f32 %v15248_v3, %v7806_v12 }
 0x4b8   : > { %v8004_v60 = vsel %vm7908_vm12, %v7860_v27, %v7956_v7 }
 0x4b9   : > { %v8052_v10 = vmul.f32 1.4142135, %v8004_v60  ;;  %vm7909_vm1 = vcmp.ge.f32.partialorder %v7861_v33, 0.0  ;;  %v7957_v0 = vmul.f32 0.2, %v7861_v33 }
 0x4bb   : > { %v8107_v24 = vmul.f32 %v15268_v28, %v8052_v10  ;;  %v8005_v59 = vsel %vm7909_vm1, %v7861_v33, %v7957_v0 }
 0x4bc   : > { %v8053_v58 = vmul.f32 1.4142135, %v8005_v59 }
 0x4bd   : > { %v9116_v19 = vsel %vm8972_vm6, %v8107_v24, 0.0 }
 0x4be   : > { %v9984_v45 = vpack.c.bf16 %v9116_v19, %v9116_v19  ;;  %v8108_v31 = vmul.f32 %v15268_v28, %v8053_v58 }
 0x4c0   : > { %9357 = vst.msk [vmem:[%s12159_s26 + $0xd0] sm:$0xf] %vm9310_vm4, %v9984_v45  ;;  %v9117_v3 = vsel %vm8973_vm15, %v8108_v31, 0.0 }
 0x4c1   : > { %v9985_v13 = vpack.c.bf16 %v9117_v3, %v9117_v3 }
 0x4c3   : > { %9358 = vst.msk [vmem:[%s12159_s26 + $0xd4] sm:$0xf] %vm9310_vm4, %v9985_v13 }
 0x4c4 PF: > { %s16_s21 = sadd.s32 1, %s11126_s21  }
 0x4c5   : > { %p13_p4 = scmp.ge.s32.totalorder %s16_s21, 4  }
 0x4c7   :  { %15 = sbr.rel (!%p13_p4) target bundleno = 1 (0x1), region = 88 }

</bundles_post_ra>
